<compile_context>
chip_gen: v5e
topology: v5e:2x2
jax: 0.10.0
libtpu: 0.0.40
codegen_flags: <defaults>
</compile_context>

<pallas_src>
import functools

import jax
import jax.numpy as jnp
from jax.experimental import pallas as pl
from jax.experimental.pallas import tpu as pltpu


N_PAD = 128          # lane-dense width of the fused [cls | box | reg | 0...] head matmul
NUM_CLASSES = 8
C_FEAT = 32
TRAIN_SCALES = [(1333, 800), (1066, 640), (800, 480), (666, 400), (533, 320)]


# ----------------------------------------------------------------------------
# Fused kernel: conv3x3 + ReLU -> fused head matmul -> sigmoid/argmax/bbox decode
#               -> packed det store -> fused GAP+linear+tanh scale regressor.
# One grid step == one batch image (parallel across TensorCores).
# ----------------------------------------------------------------------------
def _fused_detector_kernel(x_ref, w3_ref, b3_ref, wh_ref, bh_ref, aux_ref,
                           out_ref, reg_ref, *, H, W, Wp, num_classes, inv_hw):
    HWp = H * Wp
    c_feat = w3_ref.shape[-1]

    # ---- 3x3 conv (pad=1) as 9 accumulated row-shifted bf16 matmuls, f32 accumulator ----
    acc = jnp.zeros((HWp, c_feat), jnp.float32)
    for di in range(3):
        for dj in range(3):
            off = di * Wp + dj                              # static offset
            patch = x_ref[0, off:off + HWp, :]              # (HWp, C) bf16, contiguous rows
            acc = acc + jnp.dot(patch, w3_ref[di * 3 + dj],
                                preferred_element_type=jnp.float32)
    feat = jnp.maximum(acc + b3_ref[...], 0.0)              # (HWp, C_feat) f32, ReLU

    # ---- fused head: [cls | box | reg | zero-pad] in one lane-dense matmul ----
    head = jnp.dot(feat.astype(jnp.bfloat16), wh_ref[...],
                   preferred_element_type=jnp.float32) + bh_ref[...]   # (HWp, N_PAD) f32

    cls_logits = head[:, :num_classes]
    box_raw = head[:, num_classes:num_classes + 4]
    reg_col = head[:, num_classes + 4:num_classes + 5]

    # label straight from logits (argmax invariant under sigmoid, first-index semantics);
    # sigmoid only the selected max logit for the score.
    max_logit = jnp.max(cls_logits, axis=-1, keepdims=True)
    cls_idx = jax.lax.broadcasted_iota(jnp.int32, cls_logits.shape, 1)
    label = jnp.min(jnp.where(cls_logits == max_logit, cls_idx, num_classes),
                    axis=-1, keepdims=True)                 # (HWp, 1) int32
    score = jax.nn.sigmoid(max_logit)                       # (HWp, 1)

    # FCOS-style centers + validity mask (precomputed, batch-invariant aux input)
    ctr = aux_ref[:, 0:2]                                   # (HWp, 2) = [cx, cy]
    valid = aux_ref[:, 2:3]                                 # 1.0 on real cols, 0.0 on junk

    ltrb = jnp.exp(box_raw)                                 # (HWp, 4)
    x1y1 = ctr - ltrb[:, 0:2]
    x2y2 = ctr + ltrb[:, 2:4]

    # single lane-dense packed store: [x1, y1, x2, y2, score, label, 0, 0]
    packed = jnp.concatenate(
        [x1y1, x2y2, score, label.astype(jnp.float32),
         jnp.zeros((HWp, 2), jnp.float32)], axis=-1)        # (HWp, 8)
    out_ref[...] = packed[None]

    # ---- fused scale regressor: tanh(mean_spatial(feat) @ w_r + b_r) ----
    reg_sum = jnp.sum(reg_col * valid, axis=0, keepdims=True)           # (1, 1)
    reg_ref[...] = jnp.tanh(reg_sum * inv_hw)[None]                     # (1, 1, 1)


# ----------------------------------------------------------------------------
# Wrapper: host-side layout glue + pallas_call.
# ----------------------------------------------------------------------------
def detector_forward(kparams, img_nchw, stride=8.0):
    """Returns (dets (B*H*W, 5) f32, labels (B*H*W, 1) i32, regressed_scale (B, 1) f32)."""
    B, C, H, W = img_nchw.shape
    Wp = W + 2
    n_rows = (H + 3) * Wp          # pad H by (1, 2) so every tap's row slice stays in bounds
    HWp = H * Wp
    c_feat = kparams["b3"].shape[-1]
    num_classes = NUM_CLASSES

    # NCHW -> NHWC, pad for the 3x3 conv, flatten spatial with a (W+2)-stride (bf16 halves bytes)
    x_nhwc = jnp.transpose(img_nchw, (0, 2, 3, 1))
    x_pad = jnp.pad(x_nhwc, ((0, 0), (1, 2), (1, 1), (0, 0)))
    x_flat = x_pad.reshape(B, n_rows, C).astype(jnp.bfloat16)

    # batch-invariant aux: [cx, cy, valid] per strided output row
    q = jnp.arange(HWp, dtype=jnp.int32)
    h_idx = q // Wp
    w_idx = q % Wp
    aux = jnp.stack(
        [(w_idx.astype(jnp.float32) + 0.5) * stride,
         (h_idx.astype(jnp.float32) + 0.5) * stride,
         (w_idx < W).astype(jnp.float32)], axis=-1)         # (HWp, 3)

    kernel = functools.partial(
        _fused_detector_kernel, H=H, W=W, Wp=Wp,
        num_classes=num_classes, inv_hw=1.0 / float(H * W))

    packed, reg = pl.pallas_call(
        kernel,
        out_shape=(
            jax.ShapeDtypeStruct((B, HWp, 8), jnp.float32),   # packed dets + label
            jax.ShapeDtypeStruct((B, 1, 1), jnp.float32),     # regressed scale
        ),
        grid=(B,),
        in_specs=[
            pl.BlockSpec((1, n_rows, C), lambda b: (b, 0, 0)),       # padded flat image
            pl.BlockSpec((9, C, c_feat), lambda b: (0, 0, 0)),       # conv taps (bf16)
            pl.BlockSpec((1, c_feat), lambda b: (0, 0)),             # conv bias  (f32)
            pl.BlockSpec((c_feat, N_PAD), lambda b: (0, 0)),         # fused head w (bf16)
            pl.BlockSpec((1, N_PAD), lambda b: (0, 0)),              # fused head b (f32)
            pl.BlockSpec((HWp, 3), lambda b: (0, 0)),                # centers + valid mask
        ],
        out_specs=(
            pl.BlockSpec((1, HWp, 8), lambda b: (b, 0, 0)),
            pl.BlockSpec((1, 1, 1), lambda b: (b, 0, 0)),
        ),
        compiler_params=pltpu.CompilerParams(dimension_semantics=("parallel",)),
    )(x_flat, kparams["w3"], kparams["b3"], kparams["w_head"], kparams["b_head"], aux)

    # crop the (W+2)-stride junk columns, split dets / labels (cheap host glue)
    packed = packed.reshape(B, H, Wp, 8)[:, :, :W, :].reshape(B * H * W, 8)
    dets = packed[:, :5]
    labels = packed[:, 5:6].astype(jnp.int32)
    regressed = reg.reshape(B, 1)
    # TODO(synk): bbox2result's per-class python-list grouping / NMS (dynamic shapes) is
    # left to the host; flat (dets, labels) is returned instead.
    # TODO(synk): for large feature maps add a spatial (H) grid axis with halo handling;
    # one image per block is fine at these shapes.
    return dets, labels, regressed


# ----------------------------------------------------------------------------
# Params: f32 masters + kernel-ready packed/bf16 forms.
# ----------------------------------------------------------------------------
def init_params(key, c_in=4, c_feat=C_FEAT, num_classes=NUM_CLASSES):
    keys = jax.random.split(key, 4)
    s = 0.1
    return {
        "backbone_w": s * jax.random.normal(keys[0], (9, c_in, c_feat), jnp.float32),
        "backbone_b": jnp.zeros((1, c_feat), jnp.float32),
        "cls_w": s * jax.random.normal(keys[1], (c_feat, num_classes), jnp.float32),
        "cls_b": jnp.zeros((1, num_classes), jnp.float32),
        "box_w": s * jax.random.normal(keys[2], (c_feat, 4), jnp.float32),
        "box_b": jnp.zeros((1, 4), jnp.float32),
        "reg_w": s * jax.random.normal(keys[3], (c_feat, 1), jnp.float32),
        "reg_b": jnp.zeros((1, 1), jnp.float32),
    }


def pack_params(p, n_pad=N_PAD):
    c_feat, nc = p["cls_w"].shape
    used = nc + 4 + 1
    w_head = jnp.concatenate(
        [p["cls_w"], p["box_w"], p["reg_w"],
         jnp.zeros((c_feat, n_pad - used), jnp.float32)], axis=1)
    b_head = jnp.concatenate(
        [p["cls_b"], p["box_b"], p["reg_b"],
         jnp.zeros((1, n_pad - used), jnp.float32)], axis=1)
    return {
        "w3": p["backbone_w"].astype(jnp.bfloat16),
        "b3": p["backbone_b"],
        "w_head": w_head.astype(jnp.bfloat16),
        "b_head": b_head,
    }


# ----------------------------------------------------------------------------
# Pure-JAX reference (same bf16-matmul / f32-accumulate math, no Pallas).
# ----------------------------------------------------------------------------
def reference_forward(params, img_nchw, stride=8.0):
    B, C, H, W = img_nchw.shape
    kp = pack_params(params)
    nc = params["cls_w"].shape[1]

    x = jnp.transpose(img_nchw, (0, 2, 3, 1))
    xp = jnp.pad(x, ((0, 0), (1, 1), (1, 1), (0, 0))).astype(jnp.bfloat16)
    acc = jnp.zeros((B, H, W, kp["w3"].shape[-1]), jnp.float32)
    for di in range(3):
        for dj in range(3):
            patch = xp[:, di:di + H, dj:dj + W, :]
            acc = acc + jnp.einsum("bhwc,cf->bhwf", patch, kp["w3"][di * 3 + dj],
                                   preferred_element_type=jnp.float32)
    feat = jnp.maximum(acc + params["backbone_b"].reshape(1, 1, 1, -1), 0.0)
    featf = feat.reshape(B * H * W, -1)

    head = jnp.dot(featf.astype(jnp.bfloat16), kp["w_head"],
                   preferred_element_type=jnp.float32) + kp["b_head"]
    cls_logits = head[:, :nc]
    box_raw = head[:, nc:nc + 4]

    score = jnp.max(jax.nn.sigmoid(cls_logits), axis=-1, keepdims=True)
    label = jnp.argmax(cls_logits, axis=-1).astype(jnp.int32)[:, None]

    ys = (jnp.arange(H, dtype=jnp.float32) + 0.5) * stride
    xs = (jnp.arange(W, dtype=jnp.float32) + 0.5) * stride
    yy, xx = jnp.meshgrid(ys, xs, indexing="ij")
    ctr = jnp.broadcast_to(jnp.stack([xx, yy], -1).reshape(1, H * W, 2),
                           (B, H * W, 2)).reshape(B * H * W, 2)
    ltrb = jnp.exp(box_raw)
    dets = jnp.concatenate([ctr - ltrb[:, 0:2], ctr + ltrb[:, 2:4], score], axis=-1)

    # GAP -> linear -> tanh  (== mean over spatial of the reg head column)
    reg_col = head[:, nc + 4:nc + 5].reshape(B, H * W)
    regressed = jnp.tanh(jnp.mean(reg_col, axis=1, keepdims=True))
    return dets, label, regressed


# ----------------------------------------------------------------------------
# Host-side scale decoding (faithful port of decode_regressed_scale).
# ----------------------------------------------------------------------------
def decode_regressed_scale(regressed_scale, orig_shape):
    orig_scale = list(orig_shape)[2]
    scales = TRAIN_SCALES
    new_scale = (regressed_scale + 1.0) * 0.5 * (
        scales[0][1] * 1.0 / scales[-1][1] - scales[-1][1] * 1.0 / scales[0][1])
    new_scale = (new_scale + scales[-1][1] * 1.0 / scales[0][1]) * orig_scale
    new_scale = int(new_scale)
    new_scale = min(new_scale, scales[0][1])
    new_scale = max(new_scale, scales[-1][1])
    return new_scale


if __name__ == "__main__":
    key = jax.random.PRNGKey(0)
    k_img, k_par = jax.random.split(key)

    B, C, H, W = 2, 4, 16, 16
    img = jax.random.normal(k_img, (B, C, H, W), jnp.float32)    # NCHW like PyTorch
    params = init_params(k_par, c_in=C)
    kparams = pack_params(params)

    dets, labels, regressed = detector_forward(kparams, img)
    jax.block_until_ready((dets, labels, regressed))

    assert dets.shape == (B * H * W, 5) and dets.dtype == jnp.float32
    assert labels.shape == (B * H * W, 1) and labels.dtype == jnp.int32
    assert regressed.shape == (B, 1)

    # correctness vs. pure-JAX reference with matching precision
    ref_dets, ref_labels, ref_reg = reference_forward(params, img)
    assert jnp.allclose(dets, ref_dets, rtol=2e-2, atol=2e-2), \
        float(jnp.max(jnp.abs(dets - ref_dets)))
    assert float(jnp.mean((labels == ref_labels).astype(jnp.float32))) >= 0.95
    assert jnp.allclose(regressed, ref_reg, rtol=2e-2, atol=2e-2)

    new_scale = decode_regressed_scale(float(regressed[0, 0]), img.shape)
    assert TRAIN_SCALES[-1][1] <= new_scale <= TRAIN_SCALES[0][1]

    print("KERNEL_OK")
</pallas_src>

<mosaic_0001>
module attributes {stable_mosaic.version = 11 : i64} {
  func.func @_fused_detector_kernel(%arg0: i32, %arg1: memref<1x342x4xbf16, #tpu.memory_space<vmem>>, %arg2: memref<9x4x32xbf16, #tpu.memory_space<vmem>>, %arg3: memref<1x32xf32, #tpu.memory_space<vmem>>, %arg4: memref<32x128xbf16, #tpu.memory_space<vmem>>, %arg5: memref<1x128xf32, #tpu.memory_space<vmem>>, %arg6: memref<288x3xf32, #tpu.memory_space<vmem>>, %arg7: memref<1x288x8xf32, #tpu.memory_space<vmem>>, %arg8: memref<1x1x1xf32, #tpu.memory_space<vmem>>) attributes {dimension_semantics = [#tpu.dimension_semantics<parallel>], iteration_bounds = array<i64: 2>, scalar_prefetch = 0 : i64, scratch_operands = 0 : i64, tpu.core_type = #tpu.core_type<tc>, window_params = [{transform_indices = @transform_0, window_bounds = array<i64: 1, 342, 4>}, {pipeline_mode = #tpu.pipeline_mode<synchronous>, transform_indices = @transform_1, window_bounds = array<i64: 9, 4, 32>}, {pipeline_mode = #tpu.pipeline_mode<synchronous>, transform_indices = @transform_2, window_bounds = array<i64: 1, 32>}, {pipeline_mode = #tpu.pipeline_mode<synchronous>, transform_indices = @transform_3, window_bounds = array<i64: 32, 128>}, {pipeline_mode = #tpu.pipeline_mode<synchronous>, transform_indices = @transform_4, window_bounds = array<i64: 1, 128>}, {pipeline_mode = #tpu.pipeline_mode<synchronous>, transform_indices = @transform_5, window_bounds = array<i64: 288, 3>}, {transform_indices = @transform_6, window_bounds = array<i64: 1, 288, 8>}, {transform_indices = @transform_7, window_bounds = array<i64: 1, 1, 1>}]} {
    %cst = arith.constant 0.000000e+00 : f32
    %0 = vector.broadcast %cst : f32 to vector<288x32xf32>
    %c0 = arith.constant 0 : index
    %c0_0 = arith.constant 0 : index
    %c0_1 = arith.constant 0 : index
    %1 = vector.load %arg1[%c0, %c0_0, %c0_1] : memref<1x342x4xbf16, #tpu.memory_space<vmem>>, vector<1x288x4xbf16>
    %2 = vector.shape_cast %1 : vector<1x288x4xbf16> to vector<288x4xbf16>
    %c0_2 = arith.constant 0 : index
    %c0_3 = arith.constant 0 : index
    %c0_4 = arith.constant 0 : index
    %3 = vector.load %arg2[%c0_2, %c0_3, %c0_4] : memref<9x4x32xbf16, #tpu.memory_space<vmem>>, vector<1x4x32xbf16>
    %4 = vector.shape_cast %3 : vector<1x4x32xbf16> to vector<4x32xbf16>
    %cst_5 = arith.constant dense<0.000000e+00> : vector<288x32xf32>
    %5 = tpu.matmul %2, %4, %cst_5 {dimension_numbers = #tpu.dot_dimension_numbers<[1], [0], [0], [1], [0, 0, 1, 1], [], []>} : vector<288x4xbf16>, vector<4x32xbf16>, vector<288x32xf32> -> vector<288x32xf32>
    %6 = arith.addf %0, %5 : vector<288x32xf32>
    %c0_6 = arith.constant 0 : index
    %c1 = arith.constant 1 : index
    %c0_7 = arith.constant 0 : index
    %7 = vector.load %arg1[%c0_6, %c1, %c0_7] : memref<1x342x4xbf16, #tpu.memory_space<vmem>>, vector<1x288x4xbf16>
    %8 = vector.shape_cast %7 : vector<1x288x4xbf16> to vector<288x4xbf16>
    %c1_8 = arith.constant 1 : index
    %c0_9 = arith.constant 0 : index
    %c0_10 = arith.constant 0 : index
    %9 = vector.load %arg2[%c1_8, %c0_9, %c0_10] : memref<9x4x32xbf16, #tpu.memory_space<vmem>>, vector<1x4x32xbf16>
    %10 = vector.shape_cast %9 : vector<1x4x32xbf16> to vector<4x32xbf16>
    %cst_11 = arith.constant dense<0.000000e+00> : vector<288x32xf32>
    %11 = tpu.matmul %8, %10, %cst_11 {dimension_numbers = #tpu.dot_dimension_numbers<[1], [0], [0], [1], [0, 0, 1, 1], [], []>} : vector<288x4xbf16>, vector<4x32xbf16>, vector<288x32xf32> -> vector<288x32xf32>
    %12 = arith.addf %6, %11 : vector<288x32xf32>
    %c0_12 = arith.constant 0 : index
    %c2 = arith.constant 2 : index
    %c0_13 = arith.constant 0 : index
    %13 = vector.load %arg1[%c0_12, %c2, %c0_13] : memref<1x342x4xbf16, #tpu.memory_space<vmem>>, vector<1x288x4xbf16>
    %14 = vector.shape_cast %13 : vector<1x288x4xbf16> to vector<288x4xbf16>
    %c2_14 = arith.constant 2 : index
    %c0_15 = arith.constant 0 : index
    %c0_16 = arith.constant 0 : index
    %15 = vector.load %arg2[%c2_14, %c0_15, %c0_16] : memref<9x4x32xbf16, #tpu.memory_space<vmem>>, vector<1x4x32xbf16>
    %16 = vector.shape_cast %15 : vector<1x4x32xbf16> to vector<4x32xbf16>
    %cst_17 = arith.constant dense<0.000000e+00> : vector<288x32xf32>
    %17 = tpu.matmul %14, %16, %cst_17 {dimension_numbers = #tpu.dot_dimension_numbers<[1], [0], [0], [1], [0, 0, 1, 1], [], []>} : vector<288x4xbf16>, vector<4x32xbf16>, vector<288x32xf32> -> vector<288x32xf32>
    %18 = arith.addf %12, %17 : vector<288x32xf32>
    %c0_18 = arith.constant 0 : index
    %c18 = arith.constant 18 : index
    %c0_19 = arith.constant 0 : index
    %19 = vector.load %arg1[%c0_18, %c18, %c0_19] : memref<1x342x4xbf16, #tpu.memory_space<vmem>>, vector<1x288x4xbf16>
    %20 = vector.shape_cast %19 : vector<1x288x4xbf16> to vector<288x4xbf16>
    %c3 = arith.constant 3 : index
    %c0_20 = arith.constant 0 : index
    %c0_21 = arith.constant 0 : index
    %21 = vector.load %arg2[%c3, %c0_20, %c0_21] : memref<9x4x32xbf16, #tpu.memory_space<vmem>>, vector<1x4x32xbf16>
    %22 = vector.shape_cast %21 : vector<1x4x32xbf16> to vector<4x32xbf16>
    %cst_22 = arith.constant dense<0.000000e+00> : vector<288x32xf32>
    %23 = tpu.matmul %20, %22, %cst_22 {dimension_numbers = #tpu.dot_dimension_numbers<[1], [0], [0], [1], [0, 0, 1, 1], [], []>} : vector<288x4xbf16>, vector<4x32xbf16>, vector<288x32xf32> -> vector<288x32xf32>
    %24 = arith.addf %18, %23 : vector<288x32xf32>
    %c0_23 = arith.constant 0 : index
    %c19 = arith.constant 19 : index
    %c0_24 = arith.constant 0 : index
    %25 = vector.load %arg1[%c0_23, %c19, %c0_24] : memref<1x342x4xbf16, #tpu.memory_space<vmem>>, vector<1x288x4xbf16>
    %26 = vector.shape_cast %25 : vector<1x288x4xbf16> to vector<288x4xbf16>
    %c4 = arith.constant 4 : index
    %c0_25 = arith.constant 0 : index
    %c0_26 = arith.constant 0 : index
    %27 = vector.load %arg2[%c4, %c0_25, %c0_26] : memref<9x4x32xbf16, #tpu.memory_space<vmem>>, vector<1x4x32xbf16>
    %28 = vector.shape_cast %27 : vector<1x4x32xbf16> to vector<4x32xbf16>
    %cst_27 = arith.constant dense<0.000000e+00> : vector<288x32xf32>
    %29 = tpu.matmul %26, %28, %cst_27 {dimension_numbers = #tpu.dot_dimension_numbers<[1], [0], [0], [1], [0, 0, 1, 1], [], []>} : vector<288x4xbf16>, vector<4x32xbf16>, vector<288x32xf32> -> vector<288x32xf32>
    %30 = arith.addf %24, %29 : vector<288x32xf32>
    %c0_28 = arith.constant 0 : index
    %c20 = arith.constant 20 : index
    %c0_29 = arith.constant 0 : index
    %31 = vector.load %arg1[%c0_28, %c20, %c0_29] : memref<1x342x4xbf16, #tpu.memory_space<vmem>>, vector<1x288x4xbf16>
    %32 = vector.shape_cast %31 : vector<1x288x4xbf16> to vector<288x4xbf16>
    %c5 = arith.constant 5 : index
    %c0_30 = arith.constant 0 : index
    %c0_31 = arith.constant 0 : index
    %33 = vector.load %arg2[%c5, %c0_30, %c0_31] : memref<9x4x32xbf16, #tpu.memory_space<vmem>>, vector<1x4x32xbf16>
    %34 = vector.shape_cast %33 : vector<1x4x32xbf16> to vector<4x32xbf16>
    %cst_32 = arith.constant dense<0.000000e+00> : vector<288x32xf32>
    %35 = tpu.matmul %32, %34, %cst_32 {dimension_numbers = #tpu.dot_dimension_numbers<[1], [0], [0], [1], [0, 0, 1, 1], [], []>} : vector<288x4xbf16>, vector<4x32xbf16>, vector<288x32xf32> -> vector<288x32xf32>
    %36 = arith.addf %30, %35 : vector<288x32xf32>
    %c0_33 = arith.constant 0 : index
    %c36 = arith.constant 36 : index
    %c0_34 = arith.constant 0 : index
    %37 = vector.load %arg1[%c0_33, %c36, %c0_34] : memref<1x342x4xbf16, #tpu.memory_space<vmem>>, vector<1x288x4xbf16>
    %38 = vector.shape_cast %37 : vector<1x288x4xbf16> to vector<288x4xbf16>
    %c6 = arith.constant 6 : index
    %c0_35 = arith.constant 0 : index
    %c0_36 = arith.constant 0 : index
    %39 = vector.load %arg2[%c6, %c0_35, %c0_36] : memref<9x4x32xbf16, #tpu.memory_space<vmem>>, vector<1x4x32xbf16>
    %40 = vector.shape_cast %39 : vector<1x4x32xbf16> to vector<4x32xbf16>
    %cst_37 = arith.constant dense<0.000000e+00> : vector<288x32xf32>
    %41 = tpu.matmul %38, %40, %cst_37 {dimension_numbers = #tpu.dot_dimension_numbers<[1], [0], [0], [1], [0, 0, 1, 1], [], []>} : vector<288x4xbf16>, vector<4x32xbf16>, vector<288x32xf32> -> vector<288x32xf32>
    %42 = arith.addf %36, %41 : vector<288x32xf32>
    %c0_38 = arith.constant 0 : index
    %c37 = arith.constant 37 : index
    %c0_39 = arith.constant 0 : index
    %43 = vector.load %arg1[%c0_38, %c37, %c0_39] : memref<1x342x4xbf16, #tpu.memory_space<vmem>>, vector<1x288x4xbf16>
    %44 = vector.shape_cast %43 : vector<1x288x4xbf16> to vector<288x4xbf16>
    %c7 = arith.constant 7 : index
    %c0_40 = arith.constant 0 : index
    %c0_41 = arith.constant 0 : index
    %45 = vector.load %arg2[%c7, %c0_40, %c0_41] : memref<9x4x32xbf16, #tpu.memory_space<vmem>>, vector<1x4x32xbf16>
    %46 = vector.shape_cast %45 : vector<1x4x32xbf16> to vector<4x32xbf16>
    %cst_42 = arith.constant dense<0.000000e+00> : vector<288x32xf32>
    %47 = tpu.matmul %44, %46, %cst_42 {dimension_numbers = #tpu.dot_dimension_numbers<[1], [0], [0], [1], [0, 0, 1, 1], [], []>} : vector<288x4xbf16>, vector<4x32xbf16>, vector<288x32xf32> -> vector<288x32xf32>
    %48 = arith.addf %42, %47 : vector<288x32xf32>
    %c0_43 = arith.constant 0 : index
    %c38 = arith.constant 38 : index
    %c0_44 = arith.constant 0 : index
    %49 = vector.load %arg1[%c0_43, %c38, %c0_44] : memref<1x342x4xbf16, #tpu.memory_space<vmem>>, vector<1x288x4xbf16>
    %50 = vector.shape_cast %49 : vector<1x288x4xbf16> to vector<288x4xbf16>
    %c8 = arith.constant 8 : index
    %c0_45 = arith.constant 0 : index
    %c0_46 = arith.constant 0 : index
    %51 = vector.load %arg2[%c8, %c0_45, %c0_46] : memref<9x4x32xbf16, #tpu.memory_space<vmem>>, vector<1x4x32xbf16>
    %52 = vector.shape_cast %51 : vector<1x4x32xbf16> to vector<4x32xbf16>
    %cst_47 = arith.constant dense<0.000000e+00> : vector<288x32xf32>
    %53 = tpu.matmul %50, %52, %cst_47 {dimension_numbers = #tpu.dot_dimension_numbers<[1], [0], [0], [1], [0, 0, 1, 1], [], []>} : vector<288x4xbf16>, vector<4x32xbf16>, vector<288x32xf32> -> vector<288x32xf32>
    %54 = arith.addf %48, %53 : vector<288x32xf32>
    %c0_48 = arith.constant 0 : index
    %c0_49 = arith.constant 0 : index
    %55 = vector.load %arg3[%c0_48, %c0_49] : memref<1x32xf32, #tpu.memory_space<vmem>>, vector<1x32xf32>
    %56 = vector.broadcast %55 : vector<1x32xf32> to vector<288x32xf32>
    %57 = arith.addf %54, %56 : vector<288x32xf32>
    %cst_50 = arith.constant 0.000000e+00 : f32
    %58 = vector.broadcast %cst_50 : f32 to vector<288x32xf32>
    %59 = arith.maximumf %57, %58 : vector<288x32xf32>
    %60 = arith.truncf %59 : vector<288x32xf32> to vector<288x32xbf16>
    %c0_51 = arith.constant 0 : index
    %c0_52 = arith.constant 0 : index
    %61 = vector.load %arg4[%c0_51, %c0_52] : memref<32x128xbf16, #tpu.memory_space<vmem>>, vector<32x128xbf16>
    %cst_53 = arith.constant dense<0.000000e+00> : vector<288x128xf32>
    %62 = tpu.matmul %60, %61, %cst_53 {dimension_numbers = #tpu.dot_dimension_numbers<[1], [0], [0], [1], [0, 0, 1, 1], [], []>} : vector<288x32xbf16>, vector<32x128xbf16>, vector<288x128xf32> -> vector<288x128xf32>
    %c0_54 = arith.constant 0 : index
    %c0_55 = arith.constant 0 : index
    %63 = vector.load %arg5[%c0_54, %c0_55] : memref<1x128xf32, #tpu.memory_space<vmem>>, vector<1x128xf32>
    %64 = vector.broadcast %63 : vector<1x128xf32> to vector<288x128xf32>
    %65 = arith.addf %62, %64 : vector<288x128xf32>
    %66 = vector.extract_strided_slice %65 {offsets = [0, 0], sizes = [288, 8], strides = [1, 1]} : vector<288x128xf32> to vector<288x8xf32>
    %67 = vector.extract_strided_slice %65 {offsets = [0, 8], sizes = [288, 4], strides = [1, 1]} : vector<288x128xf32> to vector<288x4xf32>
    %68 = vector.extract_strided_slice %65 {offsets = [0, 12], sizes = [288, 1], strides = [1, 1]} : vector<288x128xf32> to vector<288x1xf32>
    %cst_56 = arith.constant dense<0xFF800000> : vector<288xf32>
    %69 = vector.multi_reduction <maximumf>, %66, %cst_56 [1] : vector<288x8xf32> to vector<288xf32>
    %70 = vector.shape_cast %69 : vector<288xf32> to vector<288x1xf32>
    %71 = tpu.iota {dimensions = array<i32: 1>} : vector<288x8xi32>
    %72 = vector.broadcast %70 : vector<288x1xf32> to vector<288x8xf32>
    %73 = arith.cmpf oeq, %66, %72 : vector<288x8xf32>
    %c8_i32 = arith.constant 8 : i32
    %74 = vector.broadcast %c8_i32 : i32 to vector<288x8xi32>
    %75 = arith.select %73, %71, %74 : vector<288x8xi1>, vector<288x8xi32>
    %cst_57 = arith.constant dense<2147483647> : vector<288xi32>
    %76 = vector.multi_reduction <minsi>, %75, %cst_57 [1] : vector<288x8xi32> to vector<288xi32>
    %77 = vector.shape_cast %76 : vector<288xi32> to vector<288x1xi32>
    %78 = arith.negf %70 : vector<288x1xf32>
    %79 = math.exp %78 : vector<288x1xf32>
    %cst_58 = arith.constant 1.000000e+00 : f32
    %80 = vector.broadcast %cst_58 : f32 to vector<288x1xf32>
    %81 = arith.addf %80, %79 : vector<288x1xf32>
    %82 = arith.divf %80, %81 : vector<288x1xf32>
    %c0_59 = arith.constant 0 : index
    %c0_60 = arith.constant 0 : index
    %83 = vector.load %arg6[%c0_59, %c0_60] : memref<288x3xf32, #tpu.memory_space<vmem>>, vector<288x2xf32>
    %c0_61 = arith.constant 0 : index
    %c2_62 = arith.constant 2 : index
    %84 = vector.load %arg6[%c0_61, %c2_62] : memref<288x3xf32, #tpu.memory_space<vmem>>, vector<288x1xf32>
    %85 = math.exp %67 : vector<288x4xf32>
    %86 = vector.extract_strided_slice %85 {offsets = [0, 0], sizes = [288, 2], strides = [1, 1]} : vector<288x4xf32> to vector<288x2xf32>
    %87 = arith.subf %83, %86 : vector<288x2xf32>
    %88 = vector.extract_strided_slice %85 {offsets = [0, 2], sizes = [288, 2], strides = [1, 1]} : vector<288x4xf32> to vector<288x2xf32>
    %89 = arith.addf %83, %88 : vector<288x2xf32>
    %90 = arith.sitofp %77 : vector<288x1xi32> to vector<288x1xf32>
    %cst_63 = arith.constant 0.000000e+00 : f32
    %91 = vector.broadcast %cst_63 : f32 to vector<288x2xf32>
    %92 = tpu.concatenate %87, %89, %82, %90, %91 in 1 : vector<288x2xf32>, vector<288x2xf32>, vector<288x1xf32>, vector<288x1xf32>, vector<288x2xf32> -> vector<288x8xf32>
    %93 = vector.shape_cast %92 : vector<288x8xf32> to vector<1x288x8xf32>
    %c0_64 = arith.constant 0 : index
    %c0_65 = arith.constant 0 : index
    %c0_66 = arith.constant 0 : index
    %94 = vector.load %arg7[%c0_64, %c0_65, %c0_66] : memref<1x288x8xf32, #tpu.memory_space<vmem>>, vector<1x288x8xf32>
    tpu.vector_store %arg7[%c0_64, %c0_65, %c0_66], %93 {strides = array<i32>} : memref<1x288x8xf32, #tpu.memory_space<vmem>>, vector<1x288x8xf32>,
    %95 = arith.mulf %68, %84 : vector<288x1xf32>
    %cst_67 = arith.constant dense<0.000000e+00> : vector<1xf32>
    %96 = vector.multi_reduction <add>, %95, %cst_67 [0] : vector<288x1xf32> to vector<1xf32>
    %97 = vector.shape_cast %96 : vector<1xf32> to vector<1x1xf32>
    %cst_68 = arith.constant 3.906250e-03 : f32
    %98 = vector.broadcast %cst_68 : f32 to vector<1x1xf32>
    %99 = arith.mulf %97, %98 : vector<1x1xf32>
    %100 = math.tanh %99 : vector<1x1xf32>
    %101 = vector.shape_cast %100 : vector<1x1xf32> to vector<1x1x1xf32>
    %c0_69 = arith.constant 0 : index
    %c0_70 = arith.constant 0 : index
    %c0_71 = arith.constant 0 : index
    %102 = vector.load %arg8[%c0_69, %c0_70, %c0_71] : memref<1x1x1xf32, #tpu.memory_space<vmem>>, vector<1x1x1xf32>
    tpu.vector_store %arg8[%c0_69, %c0_70, %c0_71], %101 {strides = array<i32>} : memref<1x1x1xf32, #tpu.memory_space<vmem>>, vector<1x1x1xf32>,
    return
  }
  func.func @transform_0(%arg0: i32) -> (i32, i32, i32) {
    %c0_i32 = arith.constant 0 : i32
    %c0_i32_0 = arith.constant 0 : i32
    %c0_i32_1 = arith.constant 0 : i32
    return %arg0, %c0_i32, %c0_i32_0 : i32, i32, i32
  }
  func.func @transform_1(%arg0: i32) -> (i32, i32, i32) {
    %c0_i32 = arith.constant 0 : i32
    %c0_i32_0 = arith.constant 0 : i32
    %c0_i32_1 = arith.constant 0 : i32
    %c0_i32_2 = arith.constant 0 : i32
    return %c0_i32, %c0_i32_0, %c0_i32_1 : i32, i32, i32
  }
  func.func @transform_2(%arg0: i32) -> (i32, i32) {
    %c0_i32 = arith.constant 0 : i32
    %c0_i32_0 = arith.constant 0 : i32
    %c0_i32_1 = arith.constant 0 : i32
    return %c0_i32, %c0_i32_0 : i32, i32
  }
  func.func @transform_3(%arg0: i32) -> (i32, i32) {
    %c0_i32 = arith.constant 0 : i32
    %c0_i32_0 = arith.constant 0 : i32
    %c0_i32_1 = arith.constant 0 : i32
    return %c0_i32, %c0_i32_0 : i32, i32
  }
  func.func @transform_4(%arg0: i32) -> (i32, i32) {
    %c0_i32 = arith.constant 0 : i32
    %c0_i32_0 = arith.constant 0 : i32
    %c0_i32_1 = arith.constant 0 : i32
    return %c0_i32, %c0_i32_0 : i32, i32
  }
  func.func @transform_5(%arg0: i32) -> (i32, i32) {
    %c0_i32 = arith.constant 0 : i32
    %c0_i32_0 = arith.constant 0 : i32
    %c0_i32_1 = arith.constant 0 : i32
    return %c0_i32, %c0_i32_0 : i32, i32
  }
  func.func @transform_6(%arg0: i32) -> (i32, i32, i32) {
    %c0_i32 = arith.constant 0 : i32
    %c0_i32_0 = arith.constant 0 : i32
    %c0_i32_1 = arith.constant 0 : i32
    return %arg0, %c0_i32, %c0_i32_0 : i32, i32, i32
  }
  func.func @transform_7(%arg0: i32) -> (i32, i32, i32) {
    %c0_i32 = arith.constant 0 : i32
    %c0_i32_0 = arith.constant 0 : i32
    %c0_i32_1 = arith.constant 0 : i32
    return %arg0, %c0_i32, %c0_i32_0 : i32, i32, i32
  }
}

</mosaic_0001>

<bundles_post_ra>
// kernel: tpu_custom_call.1
= control target key start
LH: loop header
LB: loop body
LE: loop exit
PB: predicated region body
PF: predicated region fallthrough
CT: control target
= control target key end

     0   :  { %s6704_s24 = smov 0   ;;  %s10080_s0 = inlined_call_operand.vmem [shape: bf16[2,342,4], index: 0, kind: input, shape index: {}]   ;;  %s10081_s1 = inlined_call_operand.vmem [shape: bf16[9,4,32], index: 1, kind: input, shape index: {}]   ;;  %s10082_s2 = inlined_call_operand.vmem [shape: f32[1,32], index: 2, kind: input, shape index: {}]   ;;  %s10083_s3 = inlined_call_operand.vmem [shape: bf16[32,128], index: 3, kind: input, shape index: {}]   ;;  %s10084_s4 = inlined_call_operand.vmem [shape: f32[1,128], index: 4, kind: input, shape index: {}]   ;;  %s10085_s5 = inlined_call_operand.vmem [shape: f32[288,3], index: 5, kind: input, shape index: {}]   ;;  %s10086_s6 = inlined_call_operand.vmem [shape: f32[2,288,8], index: 6, kind: output, shape index: {0}]   ;;  %s10087_s7 = inlined_call_operand.vmem [shape: f32[2,1,1], index: 7, kind: output, shape index: {1}]  }
   0x1 LB: > { %s5851_s25 = sadd.s32 4294967295, %s6657_s24   ;;  %p5855_p0 = scmp.ge.s32.totalorder %s6657_s24, 1  ;;  %s6657_s24 = sphi %s6704_s24, %s18_s24  }
   0x2   : > { %p240_p1 = scmp.lt.s32.totalorder %s6657_s24, 3 }
   0x4   : > { %p241_p2 = pnand %p5855_p0, %p240_p1 }
   0x6   : > { %244 = sbr.rel (%p241_p2) target bundleno = 2632 (0xa48), region = 44 }
   0xb   : > { %v325_v0 = vld [vmem:[%s10081_s1] sm:$0x3]  ;;  %vm626_vm0 = vcmask 1041408   ;;  %p275_p3 = scmp.lt.s32.totalorder %s5851_s25, 1  ;;  %v5858_v2 = vld [vmem:[%s10081_s1 + $0x2] sm:$0x3] }
   0xc   : > { %v766_v1 = vsel %vm626_vm0, %v325_v0, 0  ;;  %v628_v3 = vsel %vm626_vm0, %v5858_v2, 0  ;;  %v5963_v4 = vld [vmem:[%s10081_s1 + $0x4] sm:$0x3]  ;;  %v5982_v5 = vld [vmem:[%s10081_s1 + $0x6] sm:$0x3] }
   0xd   : > { %6357 = vmatpush.bf16.msra.mxu3 %v766_v1  ;;  %s10570_s25 = smov (!%p275_p3, %s5851_s25), 1  ;;  %775 = vmatpush.bf16.msra.mxu1 %v766_v1  ;;  %v966_v6 = vsel %vm626_vm0, %v5963_v4, 0  ;;  %v1327_v7 = vsel %vm626_vm0, %v5982_v5, 0  ;;  %v6069_v8 = vld [vmem:[%s10081_s1 + $0x8] sm:$0x3]  ;;  %vm571_vm1 = vcmask 31744  }
   0xe   : > { %6356 = vmatpush.bf16.msra.mxu2 %v628_v3  ;;  %637 = vmatpush.bf16.msra.mxu0 %v628_v3  ;;  %s6358_s13 = smul.u32 172, %s10570_s25  ;;  %v1696_v9 = vsel %vm626_vm0, %v6069_v8, 0  ;;  %vm422_vm2 = vsmask.f32 7424  ;;  %vm1839_vm3 = vcmask 1045504   ;;  %vm873_vm4 = vcmask 1046528   ;;  %s287_s12 = scalar_lea.vmem %s10087_s7, %s10570_s25 }
   0xf   : > { %vm1470_vm5 = vsmask.f32 6400  ;;  %vm2436_vm6 = vsmask.f32 5376  ;;  %vm2805_vm7 = vcmask 1044480   ;;  %s6659_s10 = smov 10  }
  0x10   : > { %s6738_s16 = scalar_lea.vmem %s10080_s0, %s6358_s13  ;;  %vm3149_vm8 = vcmask 261120   ;;  %vm3303_vm9 = vcmask 64512   ;;  %s6660_s29 = smov 118  }
  0x11   : > { %1336 = vmatpush.bf16.msrb.mxu3 %v1327_v7  ;;  %v6741_v10 = vld [vmem:[%s6738_s16 + $0x48] sm:$0xff]  ;;  %v6744_v11 = vld [vmem:[%s6738_s16 + $0x50] sm:$0xff]  ;;  %v6350_v12 = vld [vmem:[%s6738_s16] sm:$0xff]   ;;  %s6661_s30 = smov 120   ;;  %s6662_s13 = smov 2  }
  0x12   : > { %975 = vmatpush.bf16.msrb.mxu2 %v966_v6  ;;  %1705 = vmatpush.bf16.msrb.mxu0 %v1696_v9  ;;  %v6748_v13 = vld [vmem:[%s6738_s16 + $0x8] sm:$0xff]  ;;  %v424_v14 = vshrl.u32 %v6350_v12, 16  ;;  %v426_v15 = vshll.u32 %v6350_v12, 16  ;;  %v495_v16 = vshll.u32 %v6741_v10, 16  ;;  %v499_v17 = vshrl.u32 %v6741_v10, 16  ;;  %v6765_v28 = vld [vmem:[%s6738_s16 + $0x10] sm:$0xff] }
  0x13   : > { %5945 = vmatmul.msk.bf16.vlgmr.msra.gmra.mxu1 %vm571_vm1, %v6350_v12  ;;  %5954 = vmatmul.msk.bf16.vlgmr.msra.gmra.mxu3 %vm571_vm1, %v6741_v10  ;;  %v503_v18 = vshll.u32 %v6744_v11, 16  ;;  %v431_v20 = vshll.u32 %v6748_v13, 16  ;;  %v6768_v29 = vld [vmem:[%s6738_s16 + $0x58] sm:$0xff]  ;;  %v435_v30 = vshrl.u32 %v6748_v13, 16  ;;  %v439_v31 = vshll.u32 %v6765_v28, 16  ;;  %v6786_v41 = vld [vmem:[%s6738_s16 + $0x60] sm:$0xff] }
  0x14   : > { %v428_v19 = vrot.slane %v426_v15, 1  ;;  %v6757_v21 = vrot.slane %v495_v16, 1  ;;  %v507_v32 = vshrl.u32 %v6744_v11, 16  ;;  %v511_v33 = vshll.u32 %v6768_v29, 16  ;;  %v6783_v40 = vld [vmem:[%s6738_s16 + $0x18] sm:$0xff]  ;;  %v6801_v52 = vld [vmem:[%s6738_s16 + $0x20] sm:$0xff] }
  0x15   : > { %v505_v22 = vrot.slane %v503_v18, 1  ;;  %v433_v24 = vrot.slane %v431_v20, 1  ;;  %v441_v35 = vrot.slane %v439_v31, 1  ;;  %v443_v42 = vshrl.u32 %v6765_v28, 16  ;;  %v6308_v53 = vld [vmem:[%s6738_s16 + $0x68] sm:$0xff]  ;;  %v6309_v1 = vld [vmem:[%s6738_s16 + $0x70] sm:$0xff] }
  0x16   : > { %v429_v23 = vor.u32 %v428_v19, %v424_v14  ;;  %v501_v25 = vor.u32 %v499_v17, %v6757_v21  ;;  %v513_v37 = vrot.slane %v511_v33, 1  ;;  %v447_v43 = vshll.u32 %v6783_v40, 16  ;;  %v6816_v0 = vld [vmem:[%s6738_s16 + $0x28] sm:$0xff]  ;;  %v6829_v15 = vld [vmem:[%s6738_s16 + $0x30] sm:$0xff]  ;;  %v6310_v16 = vld [vmem:[%s6738_s16 + $0x78] sm:$0xff]  ;;  %s6359_s11 = smul.u32 288, %s10570_s25 }
  0x17   : > { %v437_v34 = vor.u32 %v435_v30, %v433_v24  ;;  %v509_v36 = vor.u32 %v507_v32, %v505_v22  ;;  %v515_v44 = vshrl.u32 %v6768_v29, 16  ;;  %v519_v45 = vshll.u32 %v6786_v41, 16  ;;  %v6842_v30 = vld [vmem:[%s6738_s16 + $0x38] sm:$0xff]  ;;  %v6311_v31 = vld [vmem:[%s6738_s16 + $0x80] sm:$0xff]  ;;  %s6663_s8 = smov 116  }
  0x18   : > { %v434_v26 = vsel %vm422_vm2, %v429_v23, %v433_v24  ;;  %v506_v27 = vsel %vm422_vm2, %v501_v25, %v505_v22  ;;  %v445_v46 = vor.u32 %v443_v42, %v441_v35  ;;  %v449_v47 = vrot.slane %v447_v43, 1  ;;  %s8668_s20 = scalar_lea.vmem %s10086_s6, %s6359_s11 }
  0x19   : > { %5927 = vmatmul.msk.bf16.vlgmr.msra.gmra.mxu0 %vm571_vm1, %v434_v26  ;;  %5936 = vmatmul.msk.bf16.vlgmr.msra.gmra.mxu2 %vm571_vm1, %v506_v27  ;;  %v442_v38 = vsel %vm422_vm2, %v437_v34, %v441_v35  ;;  %v514_v39 = vsel %vm422_vm2, %v509_v36, %v513_v37  ;;  %v517_v48 = vor.u32 %v515_v44, %v513_v37  ;;  %v521_v49 = vrot.slane %v519_v45, 1  ;;  %v6855_v44 = vld [vmem:[%s6738_s16 + $0x40] sm:$0xff]  ;;  %v6312_v45 = vld [vmem:[%s6738_s16 + $0x88] sm:$0xff] }
  0x1a   : > { %v450_v50 = vsel %vm422_vm2, %v445_v46, %v449_v47  ;;  %v451_v54 = vshrl.u32 %v6783_v40, 16  ;;  %v455_v55 = vshll.u32 %v6801_v52, 16  ;;  %v523_v56 = vshrl.u32 %v6786_v41, 16 }
  0x1b   : > { %v522_v51 = vsel %vm422_vm2, %v517_v48, %v521_v49  ;;  %v527_v57 = vshll.u32 %v6308_v53, 16  ;;  %v459_v2 = vshrl.u32 %v6801_v52, 16  ;;  %v463_v3 = vshll.u32 %v6816_v0, 16 }
  0x1c   : > { %v453_v58 = vor.u32 %v451_v54, %v449_v47  ;;  %v457_v59 = vrot.slane %v455_v55, 1  ;;  %v525_v60 = vor.u32 %v523_v56, %v521_v49  ;;  %v531_v4 = vshrl.u32 %v6308_v53, 16  ;;  %v326_v55 = vld [vmem:[%s6738_s16 + $0x90] sm:$0x1] }
  0x1d   : > { %v529_v61 = vrot.slane %v527_v57, 1  ;;  %v535_v5 = vshll.u32 %v6309_v1, 16  ;;  %v465_v7 = vrot.slane %v463_v3, 1  ;;  %v467_v17 = vshrl.u32 %v6816_v0, 16 }
  0x1e   : > { %v458_v62 = vsel %vm422_vm2, %v453_v58, %v457_v59  ;;  %v461_v6 = vor.u32 %v459_v2, %v457_v59  ;;  %v471_v18 = vshll.u32 %v6829_v15, 16  ;;  %v539_v19 = vshrl.u32 %v6309_v1, 16  ;;  %v6107_v59 = vld [vmem:[%s10081_s1 + $0xc] sm:$0x3] }
  0x1f   : > { %v530_v63 = vsel %vm422_vm2, %v525_v60, %v529_v61  ;;  %v533_v8 = vor.u32 %v531_v4, %v529_v61  ;;  %v537_v9 = vrot.slane %v535_v5, 1  ;;  %v543_v20 = vshll.u32 %v6310_v16, 16  ;;  %v6194_v60 = vld [vmem:[%s10081_s1 + $0xe] sm:$0x3]  ;;  %v1103_v5 = vld [vmem:[%s6738_s16 + $0x8] sm:$0xe] }
  0x20   : > { %v466_v12 = vsel %vm422_vm2, %v461_v6, %v465_v7  ;;  %v469_v22 = vor.u32 %v467_v17, %v465_v7  ;;  %v473_v23 = vrot.slane %v471_v18, 1  ;;  %v475_v32 = vshrl.u32 %v6829_v15, 16  ;;  %v6088_v6 = vld [vmem:[%s10081_s1 + $0xa] sm:$0x3]  ;;  %v1104_v7 = vld [vmem:[%s6738_s16 + $0xc] sm:$0xf] }
  0x21   : > { %v538_v14 = vsel %vm422_vm2, %v533_v8, %v537_v9  ;;  %v541_v24 = vor.u32 %v539_v19, %v537_v9  ;;  %v545_v25 = vrot.slane %v543_v20, 1  ;;  %v479_v33 = vshll.u32 %v6842_v30, 16  ;;  %v1833_v9 = vld [vmem:[%s6738_s16 + $0x8] sm:$0xc]  ;;  %v6213_v19 = vld [vmem:[%s10081_s1 + $0x10] sm:$0x3] }
  0x22   : > { %v474_v26 = vsel %vm422_vm2, %v469_v22, %v473_v23  ;;  %v547_v34 = vshrl.u32 %v6310_v16, 16  ;;  %v551_v35 = vshll.u32 %v6311_v31, 16  ;;  %v477_v36 = vor.u32 %v475_v32, %v473_v23 }
  0x23   : > { %5946 = vmatmul.msk.bf16.gmra.mxu1 %vm571_vm1, %v6748_v13  ;;  %5955 = vmatmul.msk.bf16.gmra.mxu3 %vm571_vm1, %v6744_v11  ;;  %v546_v27 = vsel %vm422_vm2, %v541_v24, %v545_v25  ;;  %v481_v37 = vrot.slane %v479_v33, 1  ;;  %v483_v46 = vshrl.u32 %v6842_v30, 16  ;;  %v487_v47 = vshll.u32 %v6855_v44, 16 }
  0x24   : > { %v555_v48 = vshrl.u32 %v6311_v31, 16  ;;  %v559_v49 = vshll.u32 %v6312_v45, 16  ;;  %v402_v58 = vunpack.c.l.b16 %v326_v55  ;;  %v491_v2 = vshrl.u32 %v6855_v44, 16 }
  0x25   : > { %v482_v42 = vsel %vm422_vm2, %v477_v36, %v481_v37  ;;  %v1932_v8 = vsel %vm626_vm0, %v6088_v6, 0  ;;  %v1179_v17 = vunpack.c.l.b16 %v1103_v5  ;;  %v1180_v18 = vunpack.c.l.b16 %v1104_v7 }
  0x26   : > { %v561_v54 = vrot.slane %v559_v49, 1  ;;  %v6874_v61 = vpack.c.b16 %v402_v58, %v402_v58  ;;  %1941 = vmatpush.bf16.msrb.mxu1 %v1932_v8  ;;  %v1837_v20 = vunpack.c.l.b16 %v1833_v9  ;;  %v2898_v22 = vsel %vm626_vm0, %v6213_v19, 0 }
  0x27   : > { %2907 = vmatpush.bf16.msra.mxu0 %v2898_v22  ;;  %v1216_v32 = vpack.c.b16 %v1180_v18, %v1179_v17 }
  0x28   : > { %v567_v4 = vshll.u32 %v6874_v61, 16  ;;  %v1838_v33 = vpack.c.b16 %v1180_v18, %v1837_v20 }
  0x29   : > { %5928 = vmatmul.msk.bf16.gmra.mxu0 %vm571_vm1, %v442_v38  ;;  %5937 = vmatmul.msk.bf16.gmra.mxu2 %vm571_vm1, %v514_v39  ;;  %v549_v38 = vor.u32 %v547_v34, %v545_v25  ;;  %v553_v39 = vrot.slane %v551_v35, 1  ;;  %v6313_v34 = vld [vmem:[%s6738_s16 + $0x10] sm:$0xff]  ;;  %v1472_v35 = vshrl.u32 %v1216_v32, 16  ;;  %v1475_v36 = vshll.u32 %v1216_v32, 16 }
  0x2b   : > { %v554_v43 = vsel %vm422_vm2, %v549_v38, %v553_v39  ;;  %v1483_v38 = vshll.u32 %v6313_v34, 16 }
  0x2d   : > { %v1485_v55 = vrot.slane %v1483_v38, 2 }
  0x33   : > { %5947 = vmatmul.msk.bf16.gmra.mxu1 %vm571_vm1, %v6765_v28  ;;  %5956 = vmatmul.msk.bf16.gmra.mxu3 %vm571_vm1, %v6768_v29 }
  0x39   : > { %5929 = vmatmul.msk.bf16.gmra.mxu0 %vm571_vm1, %v450_v50  ;;  %5938 = vmatmul.msk.bf16.gmra.mxu2 %vm571_vm1, %v522_v51  ;;  %v485_v50 = vor.u32 %v483_v46, %v481_v37  ;;  %v489_v51 = vrot.slane %v487_v47, 1  ;;  %v1480_v37 = vshrl.u32 %v6313_v34, 16  ;;  %v6354_v46 = vld [vmem:[%s6738_s16] sm:$0xe] }
  0x3b   : > { %v490_v56 = vsel %vm422_vm2, %v485_v50, %v489_v51 }
  0x43   : > { %5948 = vmatmul.msk.bf16.gmra.mxu1 %vm571_vm1, %v6783_v40  ;;  %5957 = vmatmul.msk.bf16.gmra.mxu3 %vm571_vm1, %v6786_v41 }
  0x49   : > { %5930 = vmatmul.msk.bf16.gmra.mxu0 %vm571_vm1, %v458_v62  ;;  %5939 = vmatmul.msk.bf16.gmra.mxu2 %vm571_vm1, %v530_v63  ;;  %v2293_v62 = vsel %vm626_vm0, %v6107_v59, 0  ;;  %v2662_v63 = vsel %vm626_vm0, %v6194_v60, 0 }
  0x4a   : > { %2302 = vmatpush.bf16.msra.mxu2 %v2293_v62  ;;  %2671 = vmatpush.bf16.msra.mxu3 %v2662_v63 }
  0x53   : > { %5949 = vmatmul.msk.bf16.gmra.mxu1 %vm571_vm1, %v6801_v52  ;;  %5958 = vmatmul.msk.bf16.gmra.mxu3 %vm571_vm1, %v6308_v53  ;;  %v557_v53 = vor.u32 %v555_v48, %v553_v39  ;;  %v1235_v39 = vrot.slane %v1216_v32, 1  ;;  %v1474_v48 = vrot.slane %v1472_v35, 1  ;;  %v877_v35 = vrot.slane %v6765_v28, 1 }
  0x55   : > { %v562_v57 = vsel %vm422_vm2, %v557_v53, %v561_v54  ;;  %v1477_v53 = vrot.slane %v1475_v36, 2 }
  0x57   : > { %v1478_v62 = vor.u32 %v1477_v53, %v1474_v48 }
  0x59   : > { %5931 = vmatmul.msk.bf16.gmra.mxu0 %vm571_vm1, %v466_v12  ;;  %5940 = vmatmul.msk.bf16.gmra.mxu2 %vm571_vm1, %v538_v14  ;;  %v493_v14 = vor.u32 %v491_v2, %v489_v51  ;;  %v875_v2 = vrot.slane %v6748_v13, 1 }
  0x5b   : > { %v498_v25 = vsel %vm422_vm2, %v493_v14, %v6757_v21  ;;  %v1840_v21 = vrot.slane %v1838_v33, 2  ;;  %v6314_v14 = vld [vmem:[%s6738_s16 + $0x18] sm:$0xff] }
  0x5c   : > { %v1492_v13 = vshll.u32 %v6314_v14, 16  ;;  %v1843_v17 = vrot.slane %v6314_v14, 2  ;;  %v1238_v18 = vrot.slane %v6314_v14, 1 }
  0x63   : > { %5950 = vmatmul.msk.bf16.gmra.mxu1 %vm571_vm1, %v6816_v0  ;;  %5959 = vmatmul.msk.bf16.gmra.mxu3 %vm571_vm1, %v6309_v1  ;;  %v563_v1 = vshrl.u32 %v6312_v45, 16 }
  0x65   : > { %v565_v12 = vor.u32 %v563_v1, %v561_v54  ;;  %v1482_v54 = vrot.slane %v1480_v37, 1 }
  0x67   : > { %v1486_v63 = vor.u32 %v1485_v55, %v1482_v54 }
  0x69   : > { %5932 = vmatmul.msk.bf16.gmra.mxu0 %vm571_vm1, %v474_v26  ;;  %5941 = vmatmul.msk.bf16.gmra.mxu2 %vm571_vm1, %v546_v27  ;;  %v1487_v7 = vsel %vm1470_vm5, %v1478_v62, %v1486_v63 }
  0x73   : > { %5951 = vmatmul.msk.bf16.gmra.mxu1 %vm571_vm1, %v6829_v15  ;;  %5960 = vmatmul.msk.bf16.gmra.mxu3 %vm571_vm1, %v6310_v16  ;;  %v569_v16 = vrot.slane %v567_v4, 1 }
  0x75   : > { %v570_v27 = vsel %vm422_vm2, %v565_v12, %v569_v16  ;;  %v1489_v16 = vshrl.u32 %v6314_v14, 16 }
  0x79   : > { %5933 = vmatmul.msk.bf16.gmra.mxu0 %vm571_vm1, %v482_v42  ;;  %5942 = vmatmul.msk.bf16.gmra.mxu2 %vm571_vm1, %v554_v43  ;;  %v1841_v42 = vrot.slane %v6313_v34, 2  ;;  %v1236_v43 = vrot.slane %v6313_v34, 1 }
  0x7b   : > { %v1842_v59 = vsel %vm1839_vm3, %v1840_v21, %v1841_v42  ;;  %v1237_v60 = vsel %vm873_vm4, %v1235_v39, %v1236_v43  ;;  %v1844_v32 = vsel %vm1839_vm3, %v1841_v42, %v1843_v17  ;;  %v1239_v33 = vsel %vm873_vm4, %v1236_v43, %v1238_v18  ;;  %v6315_v43 = vld [vmem:[%s6738_s16 + $0x20] sm:$0xff] }
  0x7c   : > { %v878_v42 = vsel %vm873_vm4, %v875_v2, %v877_v35  ;;  %v1501_v48 = vshll.u32 %v6315_v43, 16  ;;  %v1845_v28 = vrot.slane %v6315_v43, 2 }
  0x7e   : > { %v1846_v62 = vsel %vm1839_vm3, %v1843_v17, %v1845_v28 }
  0x83   : > { %5952 = vmatmul.msk.bf16.gmra.mxu1 %vm571_vm1, %v6842_v30  ;;  %5961 = vmatmul.msk.bf16.gmra.mxu3 %vm571_vm1, %v6311_v31 }
  0x89   : > { %5934 = vmatmul.msk.bf16.gmra.mxu0 %vm571_vm1, %v490_v56  ;;  %5943 = vmatmul.msk.bf16.gmra.mxu2 %vm571_vm1, %v562_v57 }
  0x90   : > { %v777_v3 = vpop.f32.mrf.mxu1 }
  0x93   : > { %5953 = vmatmul.msk.bf16.gmra.mxu1 %vm571_vm1, %v6855_v44  ;;  %5962 = vmatmul.msk.bf16.gmra.mxu3 %vm571_vm1, %v6312_v45  ;;  %v6353_v45 = vld [vmem:[%s6738_s16] sm:$0xf0] }
  0x94   : > { %v6355_v58 = vor.u32 %v6354_v46, %v6353_v45 }
  0x96   : > { %v822_v23 = vpop.f32.mrf.mxu3  ;;  %v639_v24 = vpop.f32.mrf.mxu0  ;;  %v874_v1 = vrot.slane %v6355_v58, 1  ;;  %v1503_v58 = vrot.slane %v1501_v48, 2 }
  0x97   : > { %v6896_v26 = vadd.f32 %v777_v3, %v639_v24  ;;  %v1491_v24 = vrot.slane %v1489_v16, 1 }
  0x98   : > { %v779_v31 = vpop.f32.mrf.mxu1  ;;  %v876_v9 = vsel %vm873_vm4, %v874_v1, %v875_v2  ;;  %v879_v2 = vrot.slane %v6783_v40, 1 }
  0x99   : > { %5935 = vmatmul.msk.bf16.gmra.mxu0 %vm571_vm1, %v498_v25  ;;  %5944 = vmatmul.msk.bf16.gmra.mxu2 %vm571_vm1, %v570_v27  ;;  %v1494_v25 = vrot.slane %v1492_v13, 2  ;;  %v6316_v13 = vld [vmem:[%s6738_s16 + $0x28] sm:$0xff] }
  0x9a   : > { %v880_v14 = vsel %vm873_vm4, %v877_v35, %v879_v2  ;;  %v1507_v17 = vshrl.u32 %v6316_v13, 16  ;;  %v1847_v40 = vrot.slane %v6316_v13, 2 }
  0x9b   : > { %v1495_v34 = vor.u32 %v1494_v25, %v1491_v24 }
  0x9c   : > { %v684_v47 = vpop.f32.mrf.mxu2  ;;  %v1848_v35 = vsel %vm1839_vm3, %v1845_v28, %v1847_v40 }
  0x9d   : > { %v6904_v49 = vadd.f32 %v822_v23, %v684_v47  ;;  %v1496_v21 = vsel %vm1470_vm5, %v1486_v63, %v1495_v34  ;;  %v1498_v47 = vshrl.u32 %v6315_v43, 16 }
  0x9e   : > { %v824_v50 = vpop.f32.mrf.mxu3  ;;  %v641_v51 = vpop.f32.mrf.mxu0 }
  0x9f   : > { %v6906_v56 = vadd.f32 %v779_v31, %v641_v51 }
  0xa0   : > { %v782_v57 = vpop.f32.mrf.mxu1 }
  0xa3   : > { %6089 = vmatmul.msk.bf16.vlgmr.msrb.gmra.mxu1 %vm571_vm1, %v1842_v59  ;;  %6051 = vmatmul.msk.bf16.vlgmr.msrb.gmra.mxu3 %vm571_vm1, %v1237_v60 }
  0xa4   : > { %v686_v3 = vpop.f32.mrf.mxu2 }
  0xa5   : > { %v6913_v4 = vadd.f32 %v824_v50, %v686_v3  ;;  %v1240_v50 = vrot.slane %v6315_v43, 1 }
  0xa6   : > { %v827_v5 = vpop.f32.mrf.mxu3  ;;  %v644_v6 = vpop.f32.mrf.mxu0 }
  0xa7   : > { %v6916_v8 = vadd.f32 %v782_v57, %v644_v6  ;;  %v1500_v57 = vrot.slane %v1498_v47, 1  ;;  %v1241_v63 = vsel %vm873_vm4, %v1238_v18, %v1240_v50  ;;  %v1510_v18 = vshll.u32 %v6316_v13, 16 }
  0xa8   : > { %v784_v12 = vpop.f32.mrf.mxu1 }
  0xa9   : > { %6070 = vmatmul.msk.bf16.vlgmr.msrb.gmra.mxu0 %vm571_vm1, %v1487_v7  ;;  %5964 = vmatmul.msk.bf16.vlgmr.msrb.gmra.mxu2 %vm571_vm1, %v876_v9  ;;  %v1504_v1 = vor.u32 %v1503_v58, %v1500_v57 }
  0xab   : > { %v1505_v9 = vsel %vm1470_vm5, %v1495_v34, %v1504_v1 }
  0xac   : > { %v689_v19 = vpop.f32.mrf.mxu2 }
  0xad   : > { %v6922_v20 = vadd.f32 %v827_v5, %v689_v19  ;;  %v1242_v19 = vrot.slane %v6316_v13, 1 }
  0xae   : > { %v829_v22 = vpop.f32.mrf.mxu3  ;;  %v646_v23 = vpop.f32.mrf.mxu0 }
  0xaf   : > { %v6924_v27 = vadd.f32 %v784_v12, %v646_v23 }
  0xb0   : > { %v787_v31 = vpop.f32.mrf.mxu1 }
  0xb3   : > { %6090 = vmatmul.msk.bf16.gmra.mxu1 %vm571_vm1, %v1844_v32  ;;  %6052 = vmatmul.msk.bf16.gmra.mxu3 %vm571_vm1, %v1239_v33  ;;  %v1512_v32 = vrot.slane %v1510_v18, 2 }
  0xb4   : > { %v691_v36 = vpop.f32.mrf.mxu2 }
  0xb5   : > { %v6931_v37 = vadd.f32 %v829_v22, %v691_v36  ;;  %v1243_v36 = vsel %vm873_vm4, %v1240_v50, %v1242_v19  ;;  %v6317_v50 = vld [vmem:[%s6738_s16 + $0x30] sm:$0xff] }
  0xb6   : > { %v832_v38 = vpop.f32.mrf.mxu3  ;;  %v649_v39 = vpop.f32.mrf.mxu0  ;;  %v1244_v57 = vrot.slane %v6317_v50, 1 }
  0xb7   : > { %v6934_v45 = vadd.f32 %v787_v31, %v649_v39  ;;  %v1509_v31 = vrot.slane %v1507_v17, 1  ;;  %v881_v39 = vrot.slane %v6801_v52, 1  ;;  %v1849_v52 = vrot.slane %v6317_v50, 2 }
  0xb8   : > { %v789_v46 = vpop.f32.mrf.mxu1 }
  0xb9   : > { %6071 = vmatmul.msk.bf16.gmra.mxu0 %vm571_vm1, %v1496_v21  ;;  %5965 = vmatmul.msk.bf16.gmra.mxu2 %vm571_vm1, %v878_v42  ;;  %v882_v28 = vsel %vm873_vm4, %v879_v2, %v881_v39 }
  0xbc   : > { %v694_v51 = vpop.f32.mrf.mxu2 }
  0xbd   : > { %v6940_v53 = vadd.f32 %v832_v38, %v694_v51  ;;  %v1513_v38 = vor.u32 %v1512_v32, %v1509_v31 }
  0xbe   : > { %v834_v54 = vpop.f32.mrf.mxu3  ;;  %v651_v55 = vpop.f32.mrf.mxu0 }
  0xbf   : > { %v6942_v59 = vadd.f32 %v789_v46, %v651_v55  ;;  %v1514_v47 = vsel %vm1470_vm5, %v1504_v1, %v1513_v38  ;;  %v1519_v55 = vshll.u32 %v6317_v50, 16 }
  0xc0   : > { %v792_v60 = vpop.f32.mrf.mxu1 }
  0xc3   : > { %6091 = vmatmul.msk.bf16.gmra.mxu1 %vm571_vm1, %v1846_v62  ;;  %6053 = vmatmul.msk.bf16.gmra.mxu3 %vm571_vm1, %v1241_v63 }
  0xc4   : > { %v696_v3 = vpop.f32.mrf.mxu2 }
  0xc5   : > { %v6949_v5 = vadd.f32 %v834_v54, %v696_v3  ;;  %v1516_v54 = vshrl.u32 %v6317_v50, 16  ;;  %v1521_v3 = vrot.slane %v1519_v55, 2  ;;  %v885_v55 = vrot.slane %v6829_v15, 1 }
  0xc6   : > { %v837_v6 = vpop.f32.mrf.mxu3  ;;  %v654_v7 = vpop.f32.mrf.mxu0 }
  0xc7   : > { %v6952_v12 = vadd.f32 %v792_v60, %v654_v7  ;;  %v1518_v1 = vrot.slane %v1516_v54, 1  ;;  %v1850_v7 = vsel %vm1839_vm3, %v1847_v40, %v1849_v52 }
  0xc8   : > { %v794_v16 = vpop.f32.mrf.mxu1 }
  0xc9   : > { %6072 = vmatmul.msk.bf16.gmra.mxu0 %vm571_vm1, %v1505_v9  ;;  %5966 = vmatmul.msk.bf16.gmra.mxu2 %vm571_vm1, %v880_v14  ;;  %v1245_v9 = vsel %vm873_vm4, %v1242_v19, %v1244_v57  ;;  %v1522_v14 = vor.u32 %v1521_v3, %v1518_v1  ;;  %v6318_v19 = vld [vmem:[%s6738_s16 + $0x38] sm:$0xff] }
  0xca   : > { %v1525_v32 = vshrl.u32 %v6318_v19, 16 }
  0xcc   : > { %v699_v22 = vpop.f32.mrf.mxu2 }
  0xcd   : > { %v6958_v23 = vadd.f32 %v837_v6, %v699_v22 }
  0xce   : > { %v839_v24 = vpop.f32.mrf.mxu3  ;;  %v656_v25 = vpop.f32.mrf.mxu0 }
  0xcf   : > { %v6960_v33 = vadd.f32 %v794_v16, %v656_v25  ;;  %v883_v16 = vrot.slane %v6816_v0, 1  ;;  %v1851_v0 = vrot.slane %v6318_v19, 2 }
  0xd0   : > { %v797_v34 = vpop.f32.mrf.mxu1 }
  0xd1   : > { %v884_v40 = vsel %vm873_vm4, %v881_v39, %v883_v16 }
  0xd3   : > { %6092 = vmatmul.msk.bf16.gmra.mxu1 %vm571_vm1, %v1848_v35  ;;  %6054 = vmatmul.msk.bf16.gmra.mxu3 %vm571_vm1, %v1243_v36  ;;  %v1246_v35 = vrot.slane %v6318_v19, 1 }
  0xd4   : > { %v701_v21 = vpop.f32.mrf.mxu2 }
  0xd5   : > { %v6967_v42 = vadd.f32 %v839_v24, %v701_v21  ;;  %v1523_v24 = vsel %vm1470_vm5, %v1513_v38, %v1522_v14  ;;  %v1527_v38 = vrot.slane %v1525_v32, 1  ;;  %v1247_v50 = vsel %vm873_vm4, %v1244_v57, %v1246_v35  ;;  %v6319_v57 = vld [vmem:[%s6738_s16 + $0x40] sm:$0xff] }
  0xd6   : > { %v842_v46 = vpop.f32.mrf.mxu3  ;;  %v659_v43 = vpop.f32.mrf.mxu0  ;;  %v1853_v15 = vrot.slane %v6319_v57, 2 }
  0xd7   : > { %v6970_v48 = vadd.f32 %v797_v34, %v659_v43  ;;  %v1528_v34 = vshll.u32 %v6318_v19, 16 }
  0xd8   : > { %v799_v51 = vpop.f32.mrf.mxu1 }
  0xd9   : > { %6073 = vmatmul.msk.bf16.gmra.mxu0 %vm571_vm1, %v1514_v47  ;;  %5967 = vmatmul.msk.bf16.gmra.mxu2 %vm571_vm1, %v882_v28  ;;  %v1530_v47 = vrot.slane %v1528_v34, 2  ;;  %v1854_v34 = vsel %vm1839_vm3, %v1851_v0, %v1853_v15 }
  0xdb   : > { %v1531_v54 = vor.u32 %v1530_v47, %v1527_v38 }
  0xdc   : > { %v704_v58 = vpop.f32.mrf.mxu2 }
  0xdd   : > { %v6976_v60 = vadd.f32 %v842_v46, %v704_v58  ;;  %v1532_v3 = vsel %vm1470_vm5, %v1522_v14, %v1531_v54 }
  0xde   : > { %v844_v62 = vpop.f32.mrf.mxu3  ;;  %v661_v63 = vpop.f32.mrf.mxu0 }
  0xdf   : > { %v6978_v6 = vadd.f32 %v799_v51, %v661_v63  ;;  %v1852_v51 = vsel %vm1839_vm3, %v1849_v52, %v1851_v0  ;;  %v886_v52 = vsel %vm873_vm4, %v883_v16, %v885_v55 }
  0xe0   : > { %v802_v2 = vpop.f32.mrf.mxu1 }
  0xe3   : > { %6093 = vmatmul.msk.bf16.gmra.mxu1 %vm571_vm1, %v1850_v7  ;;  %6055 = vmatmul.msk.bf16.gmra.mxu3 %vm571_vm1, %v1245_v9  ;;  %v1534_v9 = vshrl.u32 %v6319_v57, 16 }
  0xe4   : > { %v706_v13 = vpop.f32.mrf.mxu2 }
  0xe5   : > { %v6985_v17 = vadd.f32 %v844_v62, %v706_v13  ;;  %v1537_v13 = vshll.u32 %v6319_v57, 16  ;;  %v1536_v14 = vrot.slane %v1534_v9, 1 }
  0xe6   : > { %v847_v18 = vpop.f32.mrf.mxu3  ;;  %v664_v22 = vpop.f32.mrf.mxu0 }
  0xe7   : > { %v6988_v25 = vadd.f32 %v802_v2, %v664_v22  ;;  %v1539_v19 = vrot.slane %v1537_v13, 2 }
  0xe8   : > { %v804_v31 = vpop.f32.mrf.mxu1 }
  0xe9   : > { %6074 = vmatmul.msk.bf16.gmra.mxu0 %vm571_vm1, %v1523_v24  ;;  %5968 = vmatmul.msk.bf16.gmra.mxu2 %vm571_vm1, %v884_v40 }
  0xec   : > { %v709_v36 = vpop.f32.mrf.mxu2 }
  0xed   : > { %v6994_v21 = vadd.f32 %v847_v18, %v709_v36  ;;  %v1248_v18 = vrot.slane %v6319_v57, 1 }
  0xee   : > { %v849_v46 = vpop.f32.mrf.mxu3  ;;  %v666_v43 = vpop.f32.mrf.mxu0 }
  0xef   : > { %v6996_v28 = vadd.f32 %v804_v31, %v666_v43  ;;  %v1249_v36 = vsel %vm873_vm4, %v1246_v35, %v1248_v18  ;;  %v887_v43 = vrot.slane %v6842_v30, 1  ;;  %v6320_v35 = vld [vmem:[%s6738_s16 + $0x48] sm:$0xff] }
  0xf0   : > { %v807_v39 = vpop.f32.mrf.mxu1  ;;  %v1855_v30 = vrot.slane %v6320_v35, 2 }
  0xf1   : > { %v888_v0 = vsel %vm873_vm4, %v885_v55, %v887_v43 }
  0xf3   : > { %6094 = vmatmul.msk.bf16.gmra.mxu1 %vm571_vm1, %v1852_v51  ;;  %6056 = vmatmul.msk.bf16.gmra.mxu3 %vm571_vm1, %v1247_v50 }
  0xf4   : > { %v711_v58 = vpop.f32.mrf.mxu2 }
  0xf5   : > { %v7003_v62 = vadd.f32 %v849_v46, %v711_v58  ;;  %v1540_v46 = vor.u32 %v1539_v19, %v1536_v14 }
  0xf6   : > { %v852_v63 = vpop.f32.mrf.mxu3  ;;  %v669_v1 = vpop.f32.mrf.mxu0 }
  0xf7   : > { %v7006_v2 = vadd.f32 %v807_v39, %v669_v1  ;;  %v1541_v50 = vsel %vm1470_vm5, %v1531_v54, %v1540_v46  ;;  %v1543_v1 = vshrl.u32 %v6320_v35, 16 }
  0xf8   : > { %v809_v7 = vpop.f32.mrf.mxu1 }
  0xf9   : > { %6075 = vmatmul.msk.bf16.gmra.mxu0 %vm571_vm1, %v1532_v3  ;;  %5969 = vmatmul.msk.bf16.gmra.mxu2 %vm571_vm1, %v886_v52  ;;  %v1546_v3 = vshll.u32 %v6320_v35, 16  ;;  %v1250_v52 = vrot.slane %v6320_v35, 1  ;;  %v1545_v54 = vrot.slane %v1543_v1, 1 }
  0xfb   : > { %v1251_v14 = vsel %vm873_vm4, %v1248_v18, %v1250_v52  ;;  %v6321_v18 = vld [vmem:[%s6738_s16 + $0x50] sm:$0xff] }
  0xfc   : > { %v714_v22 = vpop.f32.mrf.mxu2  ;;  %v1555_v35 = vshll.u32 %v6321_v18, 16  ;;  %v1252_v1 = vrot.slane %v6321_v18, 1 }
  0xfd   : > { %v7012_v24 = vadd.f32 %v852_v63, %v714_v22  ;;  %v1548_v22 = vrot.slane %v1546_v3, 2 }
  0xfe   : > { %v854_v40 = vpop.f32.mrf.mxu3  ;;  %v671_v31 = vpop.f32.mrf.mxu0 }
  0xff   : > { %v7014_v32 = vadd.f32 %v809_v7, %v671_v31  ;;  %v1856_v31 = vsel %vm1839_vm3, %v1853_v15, %v1855_v30  ;;  %v1549_v19 = vor.u32 %v1548_v22, %v1545_v54  ;;  %v1557_v54 = vrot.slane %v1555_v35, 2 }
 0x100   : > { %v812_v16 = vpop.f32.mrf.mxu1 }
 0x103   : > { %6095 = vmatmul.msk.bf16.gmra.mxu1 %vm571_vm1, %v1854_v34  ;;  %6057 = vmatmul.msk.bf16.gmra.mxu3 %vm571_vm1, %v1249_v36 }
 0x104   : > { %v716_v38 = vpop.f32.mrf.mxu2 }
 0x105   : > { %v7021_v47 = vadd.f32 %v854_v40, %v716_v38 }
 0x106   : > { %v857_v39 = vpop.f32.mrf.mxu3  ;;  %v674_v51 = vpop.f32.mrf.mxu0 }
 0x107   : > { %v7024_v58 = vadd.f32 %v812_v16, %v674_v51  ;;  %v889_v16 = vrot.slane %v6855_v44, 1  ;;  %v1550_v51 = vsel %vm1470_vm5, %v1540_v46, %v1549_v19  ;;  %v1857_v44 = vrot.slane %v6321_v18, 2 }
 0x108   : > { %v814_v63 = vpop.f32.mrf.mxu1 }
 0x109   : > { %6076 = vmatmul.msk.bf16.gmra.mxu0 %vm571_vm1, %v1541_v50  ;;  %5970 = vmatmul.msk.bf16.gmra.mxu2 %vm571_vm1, %v888_v0  ;;  %v890_v15 = vsel %vm873_vm4, %v887_v43, %v889_v16 }
 0x10c   : > { %v719_v7 = vpop.f32.mrf.mxu2 }
 0x10d   : > { %v7030_v57 = vadd.f32 %v857_v39, %v719_v7 }
 0x10e   : > { %v859_v9 = vpop.f32.mrf.mxu3  ;;  %v676_v13 = vpop.f32.mrf.mxu0 }
 0x10f   : > { %v7032_v40 = vadd.f32 %v814_v63, %v676_v13  ;;  %v1552_v63 = vshrl.u32 %v6321_v18, 16 }
 0x110   : > { %v817_v55 = vpop.f32.mrf.mxu1 }
 0x111   : > { %v1554_v46 = vrot.slane %v1552_v63, 1  ;;  %v6322_v63 = vld [vmem:[%s6738_s16 + $0x58] sm:$0xff] }
 0x112   : > { %v1561_v35 = vshrl.u32 %v6322_v63, 16 }
 0x113   : > { %6096 = vmatmul.msk.bf16.gmra.mxu1 %vm571_vm1, %v1856_v31  ;;  %6058 = vmatmul.msk.bf16.gmra.mxu3 %vm571_vm1, %v1251_v14  ;;  %v1253_v31 = vsel %vm873_vm4, %v1250_v52, %v1252_v1  ;;  %v6348_v14 = vld [vmem:[%s10083_s3 + $0x8] sm:$0xff] }
 0x114   : > { %v721_v34 = vpop.f32.mrf.mxu2  ;;  %3210 = vmatpush.bf16.msra.mxu1 %v6348_v14 }
 0x115   : > { %v7039_v36 = vadd.f32 %v859_v9, %v721_v34  ;;  %v1558_v34 = vor.u32 %v1557_v54, %v1554_v46 }
 0x116   : > { %v862_v38 = vpop.f32.mrf.mxu3  ;;  %v679_v39 = vpop.f32.mrf.mxu0 }
 0x117   : > { %v7042_v50 = vadd.f32 %v817_v55, %v679_v39  ;;  %v1858_v55 = vsel %vm1839_vm3, %v1855_v30, %v1857_v44  ;;  %v1559_v30 = vsel %vm1470_vm5, %v1549_v19, %v1558_v34 }
 0x118   : > { %v819_v0 = vpop.f32.mrf.mxu1 }
 0x119   : > { %6077 = vmatmul.msk.bf16.gmra.mxu0 %vm571_vm1, %v1550_v51  ;;  %5971 = vmatmul.msk.bf16.gmra.mxu2 %vm571_vm1, %v890_v15 }
 0x11c   : > { %v724_v3 = vpop.f32.mrf.mxu2 }
 0x11d   : > { %v7048_v7 = vadd.f32 %v862_v38, %v724_v3  ;;  %v891_v38 = vrot.slane %v6741_v10, 1  ;;  %v1564_v3 = vshll.u32 %v6322_v63, 16  ;;  %v1254_v10 = vrot.slane %v6322_v63, 1 }
 0x11e   : > { %v864_v9 = vpop.f32.mrf.mxu3  ;;  %v681_v13 = vpop.f32.mrf.mxu0 }
 0x11f   : > { %10175 = vst [vmem:[#allocation2_spill] sm:$0xff] %v7048_v7  ;;  %v7050_v22 = vadd.f32 %v819_v0, %v681_v13  ;;  %v892_v52 = vsel %vm873_vm4, %v889_v16, %v891_v38  ;;  %v1859_v13 = vrot.slane %v6322_v63, 2  ;;  %v1566_v14 = vrot.slane %v1564_v3, 2 }
 0x120   : > { %v1943_v43 = vpop.f32.mrf.mxu1  ;;  %v893_v63 = vrot.slane %v6744_v11, 1 }
 0x121   : > { %v1860_v16 = vsel %vm1839_vm3, %v1857_v44, %v1859_v13 }
 0x123   : > { %6097 = vmatmul.msk.bf16.gmra.mxu1 %vm571_vm1, %v1858_v55  ;;  %6059 = vmatmul.msk.bf16.gmra.mxu3 %vm571_vm1, %v1253_v31  ;;  %v1563_v31 = vrot.slane %v1561_v35, 1 }
 0x124   : > { %v726_v39 = vpop.f32.mrf.mxu2 }
 0x125   : > { %v7060_v51 = vadd.f32 %v864_v9, %v726_v39 }
 0x126   : > { %v1338_v15 = vpop.f32.mrf.mxu3  ;;  %v1707_v0 = vpop.f32.mrf.mxu0 }
 0x127   : > { %10176 = vst [vmem:[#allocation3_spill] sm:$0xff] %v7060_v51 }
 0x128   : > { %v1945_v18 = vpop.f32.mrf.mxu1 }
 0x129   : > { %6078 = vmatmul.msk.bf16.gmra.mxu0 %vm571_vm1, %v1559_v30  ;;  %5972 = vmatmul.msk.bf16.gmra.mxu2 %vm571_vm1, %v892_v52  ;;  %v1255_v30 = vsel %vm873_vm4, %v1252_v1, %v1254_v10  ;;  %v1567_v52 = vor.u32 %v1566_v14, %v1563_v31 }
 0x12b   : > { %v1568_v44 = vsel %vm1470_vm5, %v1558_v34, %v1567_v52 }
 0x12c   : > { %v977_v46 = vpop.f32.mrf.mxu2 }
 0x12d   : > { %v1067_v9 = vadd.f32 %v977_v46, %v6896_v26 }
 0x12e   : > { %v1340_v54 = vpop.f32.mrf.mxu3  ;;  %v1709_v55 = vpop.f32.mrf.mxu0 }
 0x12f   : > { %v1428_v39 = vadd.f32 %v1338_v15, %v1067_v9  ;;  %v894_v15 = vsel %vm873_vm4, %v891_v38, %v893_v63  ;;  %v6323_v9 = vld [vmem:[%s6738_s16 + $0x60] sm:$0xff] }
 0x130   : > { %v1948_v19 = vpop.f32.mrf.mxu1  ;;  %v1570_v11 = vshrl.u32 %v6323_v9, 16 }
 0x131   : > { %v1797_v51 = vadd.f32 %v1707_v0, %v1428_v39 }
 0x132   : > { %v1572_v38 = vrot.slane %v1570_v11, 1 }
 0x133   : > { %6098 = vmatmul.msk.bf16.gmra.mxu1 %vm571_vm1, %v1860_v16  ;;  %6060 = vmatmul.msk.bf16.gmra.mxu3 %vm571_vm1, %v1255_v30  ;;  %v7073_v26 = vadd.f32 %v1943_v43, %v1797_v51  ;;  %v1573_v43 = vshll.u32 %v6323_v9, 16  ;;  %v1861_v51 = vrot.slane %v6323_v9, 2 }
 0x134   : > { %v979_v46 = vpop.f32.mrf.mxu2 }
 0x135   : > { %v1068_v35 = vadd.f32 %v979_v46, %v6906_v56  ;;  %v1256_v56 = vrot.slane %v6323_v9, 1  ;;  %v1575_v46 = vrot.slane %v1573_v43, 2 }
 0x136   : > { %v1343_v3 = vpop.f32.mrf.mxu3  ;;  %v1712_v7 = vpop.f32.mrf.mxu0 }
 0x137   : > { %v1429_v0 = vadd.f32 %v1340_v54, %v1068_v35  ;;  %v1862_v35 = vsel %vm1839_vm3, %v1859_v13, %v1861_v51 }
 0x138   : > { %v1950_v1 = vpop.f32.mrf.mxu1 }
 0x139   : > { %6079 = vmatmul.msk.bf16.gmra.mxu0 %vm571_vm1, %v1568_v44  ;;  %5973 = vmatmul.msk.bf16.gmra.mxu2 %vm571_vm1, %v894_v15  ;;  %v1798_v31 = vadd.f32 %v1709_v55, %v1429_v0  ;;  %v1257_v55 = vsel %vm873_vm4, %v1254_v10, %v1256_v56  ;;  %v1576_v0 = vor.u32 %v1575_v46, %v1572_v38 }
 0x13b   : > { %v7081_v14 = vadd.f32 %v1945_v18, %v1798_v31  ;;  %v895_v18 = vrot.slane %v6768_v29, 1  ;;  %v1577_v13 = vsel %vm1470_vm5, %v1567_v52, %v1576_v0 }
 0x13c   : > { %v982_v16 = vpop.f32.mrf.mxu2 }
 0x13d   : > { %v1069_v39 = vadd.f32 %v982_v16, %v6916_v8  ;;  %v6324_v16 = vld [vmem:[%s6738_s16 + $0x68] sm:$0xff] }
 0x13e   : > { %v1345_v34 = vpop.f32.mrf.mxu3  ;;  %v1714_v30 = vpop.f32.mrf.mxu0  ;;  %v1579_v29 = vshrl.u32 %v6324_v16, 16  ;;  %v1863_v38 = vrot.slane %v6324_v16, 2 }
 0x13f   : > { %v1430_v44 = vadd.f32 %v1343_v3, %v1069_v39  ;;  %v896_v3 = vsel %vm873_vm4, %v893_v63, %v895_v18 }
 0x140   : > { %v1953_v54 = vpop.f32.mrf.mxu1  ;;  %v1581_v63 = vrot.slane %v1579_v29, 1 }
 0x141   : > { %v1799_v15 = vadd.f32 %v1712_v7, %v1430_v44 }
 0x143   : > { %6099 = vmatmul.msk.bf16.gmra.mxu1 %vm571_vm1, %v1862_v35  ;;  %6061 = vmatmul.msk.bf16.gmra.mxu3 %vm571_vm1, %v1257_v55  ;;  %v7089_v8 = vadd.f32 %v1948_v19, %v1799_v15  ;;  %v1582_v19 = vshll.u32 %v6324_v16, 16 }
 0x144   : > { %v984_v9 = vpop.f32.mrf.mxu2 }
 0x145   : > { %v1070_v31 = vadd.f32 %v984_v9, %v6924_v27  ;;  %v1258_v27 = vrot.slane %v6324_v16, 1  ;;  %v1584_v15 = vrot.slane %v1582_v19, 2  ;;  %v1864_v9 = vsel %vm1839_vm3, %v1861_v51, %v1863_v38  ;;  %v6325_v19 = vld [vmem:[%s6738_s16 + $0x70] sm:$0xff] }
 0x146   : > { %v1348_v11 = vpop.f32.mrf.mxu3  ;;  %v1717_v43 = vpop.f32.mrf.mxu0 }
 0x147   : > { %v1431_v7 = vadd.f32 %v1345_v34, %v1070_v31 }
 0x148   : > { %v1955_v10 = vpop.f32.mrf.mxu1 }
 0x149   : > { %6080 = vmatmul.msk.bf16.gmra.mxu0 %vm571_vm1, %v1577_v13  ;;  %5974 = vmatmul.msk.bf16.gmra.mxu2 %vm571_vm1, %v896_v3  ;;  %v1800_v39 = vadd.f32 %v1714_v30, %v1431_v7  ;;  %v1259_v30 = vsel %vm873_vm4, %v1256_v56, %v1258_v27  ;;  %v1585_v3 = vor.u32 %v1584_v15, %v1581_v63 }
 0x14b   : > { %v7097_v46 = vadd.f32 %v1950_v1, %v1800_v39  ;;  %v897_v1 = vrot.slane %v6786_v41, 1  ;;  %v1586_v51 = vsel %vm1470_vm5, %v1576_v0, %v1585_v3  ;;  %v1588_v41 = vshrl.u32 %v6325_v19, 16 }
 0x14c   : > { %v987_v35 = vpop.f32.mrf.mxu2 }
 0x14d   : > { %v1071_v44 = vadd.f32 %v987_v35, %v6934_v45 }
 0x14e   : > { %v1350_v52 = vpop.f32.mrf.mxu3  ;;  %v1719_v55 = vpop.f32.mrf.mxu0 }
 0x14f   : > { %v1432_v31 = vadd.f32 %v1348_v11, %v1071_v44  ;;  %v898_v11 = vsel %vm873_vm4, %v895_v18, %v897_v1  ;;  %v1865_v44 = vrot.slane %v6325_v19, 2 }
 0x150   : > { %v1958_v34 = vpop.f32.mrf.mxu1 }
 0x151   : > { %v1801_v13 = vadd.f32 %v1717_v43, %v1432_v31  ;;  %v1590_v31 = vrot.slane %v1588_v41, 1 }
 0x153   : > { %6100 = vmatmul.msk.bf16.gmra.mxu1 %vm571_vm1, %v1864_v9  ;;  %6062 = vmatmul.msk.bf16.gmra.mxu3 %vm571_vm1, %v1259_v30  ;;  %v7105_v45 = vadd.f32 %v1953_v54, %v1801_v13  ;;  %v1591_v54 = vshll.u32 %v6325_v19, 16  ;;  %v1866_v13 = vsel %vm1839_vm3, %v1863_v38, %v1865_v44 }
 0x154   : > { %v989_v7 = vpop.f32.mrf.mxu2 }
 0x155   : > { %v1072_v16 = vadd.f32 %v989_v7, %v6942_v59  ;;  %v1260_v59 = vrot.slane %v6325_v19, 1 }
 0x156   : > { %v1353_v39 = vpop.f32.mrf.mxu3  ;;  %v1722_v29 = vpop.f32.mrf.mxu0 }
 0x157   : > { %v1433_v43 = vadd.f32 %v1350_v52, %v1072_v16  ;;  %v1593_v52 = vrot.slane %v1591_v54, 2  ;;  %v6326_v54 = vld [vmem:[%s6738_s16 + $0x78] sm:$0xff] }
 0x158   : > { %v1960_v56 = vpop.f32.mrf.mxu1 }
 0x159   : > { %6081 = vmatmul.msk.bf16.gmra.mxu0 %vm571_vm1, %v1586_v51  ;;  %5975 = vmatmul.msk.bf16.gmra.mxu2 %vm571_vm1, %v898_v11  ;;  %v1802_v35 = vadd.f32 %v1719_v55, %v1433_v43  ;;  %v1261_v55 = vsel %vm873_vm4, %v1258_v27, %v1260_v59  ;;  %v1594_v51 = vor.u32 %v1593_v52, %v1590_v31  ;;  %v1867_v31 = vrot.slane %v6326_v54, 2 }
 0x15b   : > { %v7113_v63 = vadd.f32 %v1955_v10, %v1802_v35  ;;  %v6593_v10 = vld [vmem:[%s6738_s16 + $0x68] sm:$0xff]  ;;  %v1595_v38 = vsel %vm1470_vm5, %v1585_v3, %v1594_v51 }
 0x15c   : > { %v992_v15 = vpop.f32.mrf.mxu2  ;;  %v899_v11 = vrot.slane %v6593_v10, 1  ;;  %v1868_v10 = vsel %vm1839_vm3, %v1865_v44, %v1867_v31 }
 0x15d   : > { %v1073_v0 = vadd.f32 %v992_v15, %v6952_v12 }
 0x15e   : > { %v1355_v9 = vpop.f32.mrf.mxu3  ;;  %v1724_v18 = vpop.f32.mrf.mxu0  ;;  %v900_v27 = vsel %vm873_vm4, %v897_v1, %v899_v11 }
 0x15f   : > { %v1434_v7 = vadd.f32 %v1353_v39, %v1073_v0  ;;  %v1597_v0 = vshrl.u32 %v6326_v54, 16 }
 0x160   : > { %v1963_v30 = vpop.f32.mrf.mxu1 }
 0x161   : > { %v1803_v16 = vadd.f32 %v1722_v29, %v1434_v7 }
 0x163   : > { %6101 = vmatmul.msk.bf16.gmra.mxu1 %vm571_vm1, %v1866_v13  ;;  %6063 = vmatmul.msk.bf16.gmra.mxu3 %vm571_vm1, %v1261_v55  ;;  %v7121_v12 = vadd.f32 %v1958_v34, %v1803_v16  ;;  %v1600_v34 = vshll.u32 %v6326_v54, 16  ;;  %v1599_v55 = vrot.slane %v1597_v0, 1 }
 0x164   : > { %v994_v43 = vpop.f32.mrf.mxu2 }
 0x165   : > { %v1074_v19 = vadd.f32 %v994_v43, %v6960_v33  ;;  %v1262_v33 = vrot.slane %v6326_v54, 1 }
 0x166   : > { %v1358_v35 = vpop.f32.mrf.mxu3  ;;  %v1727_v41 = vpop.f32.mrf.mxu0 }
 0x167   : > { %v1435_v29 = vadd.f32 %v1355_v9, %v1074_v19  ;;  %v1602_v9 = vrot.slane %v1600_v34, 2  ;;  %v6327_v34 = vld [vmem:[%s6738_s16 + $0x80] sm:$0xff] }
 0x168   : > { %v1965_v39 = vpop.f32.mrf.mxu1 }
 0x169   : > { %6082 = vmatmul.msk.bf16.gmra.mxu0 %vm571_vm1, %v1595_v38  ;;  %5976 = vmatmul.msk.bf16.gmra.mxu2 %vm571_vm1, %v900_v27  ;;  %v1804_v15 = vadd.f32 %v1724_v18, %v1435_v29  ;;  %v1263_v18 = vsel %vm873_vm4, %v1260_v59, %v1262_v33  ;;  %v1603_v38 = vor.u32 %v1602_v9, %v1599_v55  ;;  %v1869_v55 = vrot.slane %v6327_v34, 2 }
 0x16b   : > { %v7129_v52 = vadd.f32 %v1960_v56, %v1804_v15  ;;  %v6594_v56 = vld [vmem:[%s6738_s16 + $0x70] sm:$0xff]  ;;  %v1604_v44 = vsel %vm1470_vm5, %v1594_v51, %v1603_v38 }
 0x16c   : > { %v997_v13 = vpop.f32.mrf.mxu2  ;;  %v901_v27 = vrot.slane %v6594_v56, 1  ;;  %v1870_v56 = vsel %vm1839_vm3, %v1867_v31, %v1869_v55 }
 0x16d   : > { %v1075_v3 = vadd.f32 %v997_v13, %v6970_v48 }
 0x16e   : > { %v1360_v7 = vpop.f32.mrf.mxu3  ;;  %v1729_v1 = vpop.f32.mrf.mxu0  ;;  %v902_v59 = vsel %vm873_vm4, %v899_v11, %v901_v27 }
 0x16f   : > { %v1436_v43 = vadd.f32 %v1358_v35, %v1075_v3  ;;  %v1606_v3 = vshrl.u32 %v6327_v34, 16 }
 0x170   : > { %v1968_v16 = vpop.f32.mrf.mxu1 }
 0x171   : > { %v1805_v19 = vadd.f32 %v1727_v41, %v1436_v43 }
 0x173   : > { %6102 = vmatmul.msk.bf16.gmra.mxu1 %vm571_vm1, %v1868_v10  ;;  %6064 = vmatmul.msk.bf16.gmra.mxu3 %vm571_vm1, %v1263_v18  ;;  %v7137_v48 = vadd.f32 %v1963_v30, %v1805_v19  ;;  %v1609_v30 = vshll.u32 %v6327_v34, 16  ;;  %v1608_v18 = vrot.slane %v1606_v3, 1 }
 0x174   : > { %v999_v29 = vpop.f32.mrf.mxu2 }
 0x175   : > { %v1076_v54 = vadd.f32 %v999_v29, %v6978_v6  ;;  %v1264_v6 = vrot.slane %v6327_v34, 1 }
 0x176   : > { %v1363_v15 = vpop.f32.mrf.mxu3  ;;  %v1732_v0 = vpop.f32.mrf.mxu0 }
 0x177   : > { %v1437_v41 = vadd.f32 %v1360_v7, %v1076_v54  ;;  %v1611_v7 = vrot.slane %v1609_v30, 2  ;;  %v6328_v30 = vld [vmem:[%s6738_s16 + $0x88] sm:$0xff] }
 0x178   : > { %v1970_v35 = vpop.f32.mrf.mxu1 }
 0x179   : > { %6083 = vmatmul.msk.bf16.gmra.mxu0 %vm571_vm1, %v1604_v44  ;;  %5977 = vmatmul.msk.bf16.gmra.mxu2 %vm571_vm1, %v902_v59  ;;  %v1806_v13 = vadd.f32 %v1729_v1, %v1437_v41  ;;  %v1265_v1 = vsel %vm873_vm4, %v1262_v33, %v1264_v6  ;;  %v1612_v44 = vor.u32 %v1611_v7, %v1608_v18  ;;  %v1871_v18 = vrot.slane %v6328_v30, 2 }
 0x17b   : > { %v7145_v9 = vadd.f32 %v1965_v39, %v1806_v13  ;;  %v6595_v39 = vld [vmem:[%s6738_s16 + $0x78] sm:$0xff]  ;;  %v1613_v31 = vsel %vm1470_vm5, %v1603_v38, %v1612_v44 }
 0x17c   : > { %v1002_v10 = vpop.f32.mrf.mxu2  ;;  %v903_v59 = vrot.slane %v6595_v39, 1  ;;  %v1872_v39 = vsel %vm1839_vm3, %v1869_v55, %v1871_v18 }
 0x17d   : > { %v1077_v51 = vadd.f32 %v1002_v10, %v6988_v25 }
 0x17e   : > { %v1365_v43 = vpop.f32.mrf.mxu3  ;;  %v1734_v11 = vpop.f32.mrf.mxu0  ;;  %v904_v33 = vsel %vm873_vm4, %v901_v27, %v903_v59 }
 0x17f   : > { %v1438_v29 = vadd.f32 %v1363_v15, %v1077_v51  ;;  %v1618_v51 = vshll.u32 %v6328_v30, 16 }
 0x180   : > { %v1973_v19 = vpop.f32.mrf.mxu1 }
 0x181   : > { %v1807_v54 = vadd.f32 %v1732_v0, %v1438_v29 }
 0x183   : > { %6103 = vmatmul.msk.bf16.gmra.mxu1 %vm571_vm1, %v1870_v56  ;;  %6065 = vmatmul.msk.bf16.gmra.mxu3 %vm571_vm1, %v1265_v1  ;;  %v7153_v25 = vadd.f32 %v1968_v16, %v1807_v54  ;;  %v1615_v16 = vshrl.u32 %v6328_v30, 16 }
 0x184   : > { %v1004_v41 = vpop.f32.mrf.mxu2 }
 0x185   : > { %v1078_v34 = vadd.f32 %v1004_v41, %v6996_v28  ;;  %v1266_v28 = vrot.slane %v6328_v30, 1  ;;  %v1617_v1 = vrot.slane %v1615_v16, 1 }
 0x186   : > { %v1368_v13 = vpop.f32.mrf.mxu3  ;;  %v1737_v3 = vpop.f32.mrf.mxu0 }
 0x187   : > { %v1439_v0 = vadd.f32 %v1365_v43, %v1078_v34  ;;  %v1620_v43 = vrot.slane %v1618_v51, 2  ;;  %v6329_v51 = vld [vmem:[%s6738_s16 + $0x90] sm:$0xff] }
 0x188   : > { %v7158_v15 = vpop.f32.mrf.mxu1 }
 0x189   : > { %6084 = vmatmul.msk.bf16.gmra.mxu0 %vm571_vm1, %v1613_v31  ;;  %5978 = vmatmul.msk.bf16.gmra.mxu2 %vm571_vm1, %v904_v33  ;;  %v1808_v10 = vadd.f32 %v1734_v11, %v1439_v0  ;;  %v1267_v11 = vsel %vm873_vm4, %v1264_v6, %v1266_v28  ;;  %v1621_v31 = vor.u32 %v1620_v43, %v1617_v1  ;;  %v1268_v1 = vrot.slane %v6329_v51, 1 }
 0x18b   : > { %v7163_v7 = vadd.f32 %v1970_v35, %v1808_v10  ;;  %v6596_v35 = vld [vmem:[%s6738_s16 + $0x80] sm:$0xff]  ;;  %v1622_v55 = vsel %vm1470_vm5, %v1612_v44, %v1621_v31 }
 0x18c   : > { %v1007_v56 = vpop.f32.mrf.mxu2  ;;  %v905_v33 = vrot.slane %v6596_v35, 1  ;;  %v1464_v35 = vld [vmem:[%s6738_s16 + $0x98] sm:$0x3] }
 0x18d   : > { %v1079_v38 = vadd.f32 %v1007_v56, %v7006_v2  ;;  %v1624_v56 = vshrl.u32 %v6329_v51, 16 }
 0x18e   : > { %v1370_v27 = vpop.f32.mrf.mxu3  ;;  %v1739_v29 = vpop.f32.mrf.mxu0  ;;  %v906_v6 = vsel %vm873_vm4, %v903_v59, %v905_v33 }
 0x18f   : > { %v1440_v41 = vadd.f32 %v1368_v13, %v1079_v38  ;;  %v1873_v38 = vrot.slane %v6329_v51, 2 }
 0x190   : > { %v1978_v54 = vpop.f32.mrf.mxu1 }
 0x191   : > { %v1809_v34 = vadd.f32 %v1737_v3, %v1440_v41 }
 0x193   : > { %6104 = vmatmul.msk.bf16.gmra.mxu1 %vm571_vm1, %v1872_v39  ;;  %6066 = vmatmul.msk.bf16.gmra.mxu3 %vm571_vm1, %v1267_v11  ;;  %v7171_v2 = vadd.f32 %v1973_v19, %v1809_v34  ;;  %v1874_v34 = vsel %vm1839_vm3, %v1871_v18, %v1873_v38 }
 0x194   : > { %v1009_v0 = vpop.f32.mrf.mxu2 }
 0x195   : > { %v1080_v30 = vadd.f32 %v1009_v0, %v7014_v32  ;;  %v1627_v32 = vshll.u32 %v6329_v51, 16 }
 0x196   : > { %v1373_v10 = vpop.f32.mrf.mxu3  ;;  %v1742_v16 = vpop.f32.mrf.mxu0 }
 0x197   : > { %v1441_v3 = vadd.f32 %v1370_v27, %v1080_v30  ;;  %v1626_v27 = vrot.slane %v1624_v56, 1  ;;  %v1629_v41 = vrot.slane %v1627_v32, 2  ;;  %v1139_v30 = vld [vmem:[%s6738_s16 + $0x98] sm:$0x1] }
 0x198   : > { %v7176_v13 = vpop.f32.mrf.mxu1  ;;  %v1215_v32 = vunpack.c.l.b16 %v1139_v30 }
 0x199   : > { %10177 = vst [vmem:[#allocation4_spill] sm:$0xff] %v7176_v13  ;;  %6085 = vmatmul.msk.bf16.gmra.mxu0 %vm571_vm1, %v1622_v55  ;;  %5979 = vmatmul.msk.bf16.gmra.mxu2 %vm571_vm1, %v906_v6  ;;  %v7181_v19 = vadd.f32 %v1739_v29, %v1441_v3  ;;  %v1269_v29 = vsel %vm873_vm4, %v1266_v28, %v1268_v1  ;;  %v1468_v3 = vunpack.c.l.b16 %v1464_v35 }
 0x19a   : > { %v1630_v6 = vor.u32 %v1629_v41, %v1626_v27  ;;  %v1234_v35 = vpack.c.b16 %v1215_v32, %v1215_v32 }
 0x19c   : > { %v1012_v43 = vpop.f32.mrf.mxu2 }
 0x19d   : > { %v1081_v44 = vadd.f32 %v1012_v43, %v7024_v58  ;;  %v6597_v58 = vld [vmem:[%s6738_s16 + $0x88] sm:$0xff] }
 0x19e   : > { %v1375_v59 = vpop.f32.mrf.mxu3  ;;  %v1744_v39 = vpop.f32.mrf.mxu0  ;;  %v907_v51 = vrot.slane %v6597_v58, 1  ;;  %v1270_v58 = vrot.slane %v1234_v35, 1 }
 0x19f   : > { %v1442_v0 = vadd.f32 %v1373_v10, %v1081_v44  ;;  %v1469_v44 = vpack.c.b16 %v1468_v3, %v1468_v3 }
 0x1a0   : > { %v1983_v11 = vpop.f32.mrf.mxu1  ;;  %v908_v27 = vsel %vm873_vm4, %v905_v33, %v907_v51 }
 0x1a1   : > { %v1811_v55 = vadd.f32 %v1742_v16, %v1442_v0  ;;  %v1631_v16 = vsel %vm1470_vm5, %v1621_v31, %v1630_v6  ;;  %v2069_v0 = vld [vmem:[%s6738_s16 + $0x10] sm:$0xc]  ;;  %v1636_v30 = vshll.u32 %v1469_v44, 16  ;;  %v1875_v3 = vrot.slane %v1469_v44, 2 }
 0x1a3   : > { %6105 = vmatmul.msk.bf16.gmra.mxu1 %vm571_vm1, %v1874_v34  ;;  %6067 = vmatmul.msk.bf16.gmra.mxu3 %vm571_vm1, %v1269_v29  ;;  %v7191_v56 = vadd.f32 %v1978_v54, %v1811_v55  ;;  %v2070_v29 = vld [vmem:[%s6738_s16 + $0x14] sm:$0xf]  ;;  %v2145_v55 = vunpack.c.l.b16 %v2069_v0  ;;  %v909_v0 = vrot.slane %v6874_v61, 1 }
 0x1a4   : > { %v1014_v18 = vpop.f32.mrf.mxu2  ;;  %v2146_v31 = vunpack.c.l.b16 %v2070_v29 }
 0x1a5   : > { %v1082_v10 = vadd.f32 %v1014_v18, %v7032_v40  ;;  %v1633_v40 = vshrl.u32 %v1469_v44, 16  ;;  %v6347_v44 = vld [vmem:[%s10083_s3] sm:$0xff]  ;;  %v910_v61 = vsel %vm873_vm4, %v907_v51, %v909_v0 }
 0x1a6   : > { %v1378_v43 = vpop.f32.mrf.mxu3  ;;  %v1747_v28 = vpop.f32.mrf.mxu0  ;;  %3211 = vmatpush.bf16.msra.mxu1 %v6347_v44 }
 0x1a7   : > { %v1443_v34 = vadd.f32 %v1375_v59, %v1082_v10  ;;  %v1635_v10 = vrot.slane %v1633_v40, 1 }
 0x1a8   : > { %v7196_v41 = vpop.f32.mrf.mxu1 }
 0x1a9   : > { %10178 = vst [vmem:[#allocation5_spill] sm:$0xff] %v7196_v41  ;;  %6086 = vmatmul.msk.bf16.gmra.mxu0 %vm571_vm1, %v1631_v16  ;;  %5980 = vmatmul.msk.bf16.gmra.mxu2 %vm571_vm1, %v908_v27  ;;  %v7202_v54 = vadd.f32 %v1744_v39, %v1443_v34  ;;  %v1638_v41 = vrot.slane %v1636_v30, 2  ;;  %v7205_v16 = vpack.c.b16 %v2146_v31, %v2145_v55 }
 0x1aa   : > { %v1876_v39 = vsel %vm1839_vm3, %v1873_v38, %v1875_v3  ;;  %v1271_v34 = vsel %vm873_vm4, %v1268_v1, %v1270_v58 }
 0x1ab   : > { %10179 = vst [vmem:[#allocation6_spill] sm:$0xff] %v7202_v54  ;;  %v7210_v54 = vld [vmem:[%s6738_s16 + $0x18] sm:$0xff]  ;;  %v2438_v38 = vshrl.u32 %v7205_v16, 16  ;;  %v2441_v1 = vshll.u32 %v7205_v16, 16 }
 0x1ac   : > { %v1017_v33 = vpop.f32.mrf.mxu2  ;;  %v2446_v29 = vshrl.u32 %v7210_v54, 16  ;;  %v2449_v40 = vshll.u32 %v7210_v54, 16 }
 0x1ad   : > { %v1083_v18 = vadd.f32 %v1017_v33, %v7042_v50  ;;  %v1639_v50 = vor.u32 %v1638_v41, %v1635_v10  ;;  %v2440_v58 = vrot.slane %v2438_v38, 2  ;;  %v2443_v10 = vrot.slane %v2441_v1, 3 }
 0x1ae   : > { %v1380_v59 = vpop.f32.mrf.mxu3  ;;  %v1749_v32 = vpop.f32.mrf.mxu0 }
 0x1af   : > { %v1444_v27 = vadd.f32 %v1378_v43, %v1083_v18  ;;  %v1640_v3 = vsel %vm1470_vm5, %v1630_v6, %v1639_v50  ;;  %v2444_v44 = vor.u32 %v2443_v10, %v2440_v58 }
 0x1b0   : > { %v1988_v13 = vpop.f32.mrf.mxu1 }
 0x1b1   : > { %v1813_v35 = vadd.f32 %v1747_v28, %v1444_v27  ;;  %v2451_v27 = vrot.slane %v2449_v40, 3  ;;  %v7237_v40 = vld [vmem:[%s6738_s16 + $0x20] sm:$0xff] }
 0x1b3   : > { %6106 = vmatmul.msk.bf16.gmra.mxu1 %vm571_vm1, %v1876_v39  ;;  %6068 = vmatmul.msk.bf16.gmra.mxu3 %vm571_vm1, %v1271_v34  ;;  %v7219_v43 = vadd.f32 %v1983_v11, %v1813_v35  ;;  %v2799_v11 = vld [vmem:[%s6738_s16 + $0x10] sm:$0x8]  ;;  %v2448_v39 = vrot.slane %v2446_v29, 2 }
 0x1b4   : > { %v1019_v28 = vpop.f32.mrf.mxu2  ;;  %v2803_v34 = vunpack.c.l.b16 %v2799_v11 }
 0x1b5   : > { %v1084_v41 = vadd.f32 %v1019_v28, %v7050_v22  ;;  %v2452_v6 = vor.u32 %v2451_v27, %v2448_v39 }
 0x1b6   : > { %v1383_v30 = vpop.f32.mrf.mxu3  ;;  %v1752_v55 = vpop.f32.mrf.mxu0 }
 0x1b7   : > { %v1445_v18 = vadd.f32 %v1380_v59, %v1084_v41  ;;  %v2804_v59 = vpack.c.b16 %v2146_v31, %v2803_v34  ;;  %v2453_v29 = vsel %vm2436_vm6, %v2444_v44, %v2452_v6  ;;  %v2455_v31 = vshrl.u32 %v7237_v40, 16 }
 0x1b8   : > { %v7227_v33 = vpop.f32.mrf.mxu1 }
 0x1b9   : > { %6087 = vmatmul.msk.bf16.gmra.mxu0 %vm571_vm1, %v1640_v3  ;;  %5981 = vmatmul.msk.bf16.gmra.mxu2 %vm571_vm1, %v910_v61  ;;  %v7232_v22 = vadd.f32 %v1749_v32, %v1445_v18  ;;  %v2806_v41 = vrot.slane %v2804_v59, 3  ;;  %v2807_v32 = vrot.slane %v7210_v54, 3  ;;  %v2201_v3 = vrot.slane %v7205_v16, 2 }
 0x1ba   : > { %v2202_v61 = vrot.slane %v7210_v54, 2  ;;  %v2457_v27 = vrot.slane %v2455_v31, 2 }
 0x1bb   : > { %v2808_v10 = vsel %vm2805_vm7, %v2806_v41, %v2807_v32  ;;  %v7259_v41 = vld [vmem:[%s6738_s16 + $0x28] sm:$0xff] }
 0x1bc   : > { %v1022_v35 = vpop.f32.mrf.mxu2  ;;  %v2203_v39 = vsel %vm1839_vm3, %v2201_v3, %v2202_v61  ;;  %v2809_v3 = vrot.slane %v7237_v40, 3 }
 0x1bd   : > { %v1085_v51 = vadd.f32 %v1022_v35, %v6904_v49 }
 0x1be   : > { %v1385_v50 = vpop.f32.mrf.mxu3  ;;  %v1754_v0 = vpop.f32.mrf.mxu0 }
 0x1bf   : > { %v1446_v1 = vadd.f32 %v1383_v30, %v1085_v51  ;;  %v2458_v30 = vshll.u32 %v7237_v40, 16 }
 0x1c0   : > { %v1993_v38 = vpop.f32.mrf.mxu1 }
 0x1c1   : > { %v1815_v28 = vadd.f32 %v1752_v55, %v1446_v1 }
 0x1c3   : > { %6195 = vmatmul.msk.bf16.vlgmr.msra.gmra.mxu3 %vm571_vm1, %v2453_v29  ;;  %v7243_v49 = vadd.f32 %v1988_v13, %v1815_v28  ;;  %v2460_v13 = vrot.slane %v2458_v30, 3  ;;  %v2464_v30 = vshrl.u32 %v7259_v41, 16 }
 0x1c4   : > { %v1024_v58 = vpop.f32.mrf.mxu2 }
 0x1c5   : > { %v1086_v11 = vadd.f32 %v1024_v58, %v6913_v4  ;;  %v2461_v44 = vor.u32 %v2460_v13, %v2457_v27 }
 0x1c6   : > { %v1388_v55 = vpop.f32.mrf.mxu3  ;;  %v1757_v18 = vpop.f32.mrf.mxu0 }
 0x1c7   : > { %v1447_v54 = vadd.f32 %v1385_v50, %v1086_v11  ;;  %v2462_v28 = vsel %vm2436_vm6, %v2452_v6, %v2461_v44 }
 0x1c8   : > { %v7250_v16 = vpop.f32.mrf.mxu1 }
 0x1c9   : > { %6214 = vmatmul.msk.bf16.vlgmr.msra.gmra.mxu0 %vm571_vm1, %v2808_v10  ;;  %6176 = vmatmul.msk.bf16.vlgmr.msra.gmra.mxu2 %vm571_vm1, %v2203_v39  ;;  %v7254_v34 = vadd.f32 %v1754_v0, %v1447_v54  ;;  %v2204_v0 = vrot.slane %v7237_v40, 2  ;;  %v2810_v10 = vsel %vm2805_vm7, %v2807_v32, %v2809_v3  ;;  %v2466_v40 = vrot.slane %v2464_v30, 2 }
 0x1ca   : > { %v2811_v30 = vrot.slane %v7259_v41, 3 }
 0x1cc   : > { %v1027_v4 = vpop.f32.mrf.mxu2 }
 0x1cd   : > { %v1087_v35 = vadd.f32 %v1027_v4, %v6922_v20  ;;  %v2467_v20 = vshll.u32 %v7259_v41, 16 }
 0x1ce   : > { %v1390_v51 = vpop.f32.mrf.mxu3  ;;  %v1759_v59 = vpop.f32.mrf.mxu0 }
 0x1cf   : > { %v1448_v29 = vadd.f32 %v1388_v55, %v1087_v35 }
 0x1d0   : > { %v1998_v1 = vpop.f32.mrf.mxu1 }
 0x1d1   : > { %v1817_v50 = vadd.f32 %v1757_v18, %v1448_v29  ;;  %v2205_v18 = vsel %vm1839_vm3, %v2202_v61, %v2204_v0 }
 0x1d3   : > { %6196 = vmatmul.msk.bf16.gmra.mxu3 %vm571_vm1, %v2462_v28  ;;  %v7264_v31 = vadd.f32 %v1993_v38, %v1817_v50  ;;  %v2469_v38 = vrot.slane %v2467_v20, 3  ;;  %v7280_v50 = vld [vmem:[%s6738_s16 + $0x30] sm:$0xff]  ;;  %v2206_v20 = vrot.slane %v7259_v41, 2 }
 0x1d4   : > { %v1029_v58 = vpop.f32.mrf.mxu2 }
 0x1d5   : > { %v1088_v11 = vadd.f32 %v1029_v58, %v6931_v37  ;;  %v2470_v13 = vor.u32 %v2469_v38, %v2466_v40  ;;  %v2473_v58 = vshrl.u32 %v7280_v50, 16 }
 0x1d6   : > { %v1393_v55 = vpop.f32.mrf.mxu3  ;;  %v1762_v6 = vpop.f32.mrf.mxu0 }
 0x1d7   : > { %v1449_v54 = vadd.f32 %v1390_v51, %v1088_v11  ;;  %v2471_v28 = vsel %vm2436_vm6, %v2461_v44, %v2470_v13  ;;  %v2475_v40 = vrot.slane %v2473_v58, 2 }
 0x1d8   : > { %v7271_v39 = vpop.f32.mrf.mxu1 }
 0x1d9   : > { %6215 = vmatmul.msk.bf16.gmra.mxu0 %vm571_vm1, %v2810_v10  ;;  %6177 = vmatmul.msk.bf16.gmra.mxu2 %vm571_vm1, %v2205_v18  ;;  %v7275_v27 = vadd.f32 %v1759_v59, %v1449_v54  ;;  %v2812_v18 = vsel %vm2805_vm7, %v2809_v3, %v2811_v30 }
 0x1dc   : > { %v1032_v37 = vpop.f32.mrf.mxu2 }
 0x1dd   : > { %v1089_v4 = vadd.f32 %v1032_v37, %v6940_v53  ;;  %v2476_v53 = vshll.u32 %v7280_v50, 16 }
 0x1de   : > { %v1395_v35 = vpop.f32.mrf.mxu3  ;;  %v1764_v32 = vpop.f32.mrf.mxu0 }
 0x1df   : > { %v1450_v61 = vadd.f32 %v1393_v55, %v1089_v4 }
 0x1e0   : > { %v2003_v29 = vpop.f32.mrf.mxu1 }
 0x1e1   : > { %v1819_v51 = vadd.f32 %v1762_v6, %v1450_v61  ;;  %v2207_v6 = vsel %vm1839_vm3, %v2204_v0, %v2206_v20 }
 0x1e3   : > { %6197 = vmatmul.msk.bf16.gmra.mxu3 %vm571_vm1, %v2471_v28  ;;  %v7285_v59 = vadd.f32 %v1998_v1, %v1819_v51  ;;  %v2478_v1 = vrot.slane %v2476_v53, 3  ;;  %v7301_v51 = vld [vmem:[%s6738_s16 + $0x38] sm:$0xff]  ;;  %v2813_v53 = vrot.slane %v7280_v50, 3 }
 0x1e4   : > { %v1034_v11 = vpop.f32.mrf.mxu2 }
 0x1e5   : > { %v1090_v55 = vadd.f32 %v1034_v11, %v6949_v5  ;;  %v2479_v37 = vor.u32 %v2478_v1, %v2475_v40  ;;  %v2208_v11 = vrot.slane %v7280_v50, 2 }
 0x1e6   : > { %v1398_v10 = vpop.f32.mrf.mxu3  ;;  %v1767_v44 = vpop.f32.mrf.mxu0 }
 0x1e7   : > { %v1451_v41 = vadd.f32 %v1395_v35, %v1090_v55  ;;  %v2480_v0 = vsel %vm2436_vm6, %v2470_v13, %v2479_v37  ;;  %v2482_v55 = vshrl.u32 %v7301_v51, 16 }
 0x1e8   : > { %v7292_v54 = vpop.f32.mrf.mxu1 }
 0x1e9   : > { %6216 = vmatmul.msk.bf16.gmra.mxu0 %vm571_vm1, %v2812_v18  ;;  %6178 = vmatmul.msk.bf16.gmra.mxu2 %vm571_vm1, %v2207_v6  ;;  %v7296_v38 = vadd.f32 %v1764_v32, %v1451_v41  ;;  %v2814_v41 = vsel %vm2805_vm7, %v2811_v30, %v2813_v53  ;;  %v2484_v50 = vrot.slane %v2482_v55, 2 }
 0x1ec   : > { %v1037_v5 = vpop.f32.mrf.mxu2 }
 0x1ed   : > { %v1091_v4 = vadd.f32 %v1037_v5, %v6958_v23  ;;  %v2485_v23 = vshll.u32 %v7301_v51, 16 }
 0x1ee   : > { %v1400_v61 = vpop.f32.mrf.mxu3  ;;  %v1769_v3 = vpop.f32.mrf.mxu0 }
 0x1ef   : > { %v1452_v28 = vadd.f32 %v1398_v10, %v1091_v4  ;;  %v2487_v1 = vrot.slane %v2485_v23, 3  ;;  %v2815_v23 = vrot.slane %v7301_v51, 3 }
 0x1f0   : > { %v2008_v35 = vpop.f32.mrf.mxu1 }
 0x1f1   : > { %v1821_v58 = vadd.f32 %v1767_v44, %v1452_v28  ;;  %v2209_v44 = vsel %vm1839_vm3, %v2206_v20, %v2208_v11  ;;  %v2488_v4 = vor.u32 %v2487_v1, %v2484_v50 }
 0x1f3   : > { %6198 = vmatmul.msk.bf16.gmra.mxu3 %vm571_vm1, %v2480_v0  ;;  %v7306_v32 = vadd.f32 %v2003_v29, %v1821_v58  ;;  %v2489_v20 = vsel %vm2436_vm6, %v2479_v37, %v2488_v4 }
 0x1f4   : > { %v1039_v18 = vpop.f32.mrf.mxu2 }
 0x1f5   : > { %v1092_v10 = vadd.f32 %v1039_v18, %v6967_v42  ;;  %v2210_v18 = vrot.slane %v7301_v51, 2 }
 0x1f6   : > { %v1403_v13 = vpop.f32.mrf.mxu3  ;;  %v1772_v6 = vpop.f32.mrf.mxu0 }
 0x1f7   : > { %v1453_v40 = vadd.f32 %v1400_v61, %v1092_v10  ;;  %v7322_v61 = vld [vmem:[%s6738_s16 + $0x40] sm:$0xff]  ;;  %v2211_v50 = vsel %vm1839_vm3, %v2208_v11, %v2210_v18 }
 0x1f8   : > { %v7317_v5 = vpop.f32.mrf.mxu1  ;;  %v2491_v10 = vshrl.u32 %v7322_v61, 16 }
 0x1f9   : > { %6217 = vmatmul.msk.bf16.gmra.mxu0 %vm571_vm1, %v2814_v41  ;;  %6179 = vmatmul.msk.bf16.gmra.mxu2 %vm571_vm1, %v2209_v44  ;;  %v7315_v29 = vadd.f32 %v1769_v3, %v1453_v40 }
 0x1fa   : > { %v2493_v1 = vrot.slane %v2491_v10, 2 }
 0x1fc   : > { %v1042_v42 = vpop.f32.mrf.mxu2 }
 0x1fd   : > { %v1093_v28 = vadd.f32 %v1042_v42, %v6976_v60  ;;  %v2494_v60 = vshll.u32 %v7322_v61, 16 }
 0x1fe   : > { %v1405_v0 = vpop.f32.mrf.mxu3  ;;  %v1774_v30 = vpop.f32.mrf.mxu0 }
 0x1ff   : > { %v1454_v58 = vadd.f32 %v1403_v13, %v1093_v28  ;;  %v2496_v42 = vrot.slane %v2494_v60, 3  ;;  %v2817_v60 = vrot.slane %v7322_v61, 3 }
 0x200   : > { %v2013_v44 = vpop.f32.mrf.mxu1 }
 0x201   : > { %v1823_v55 = vadd.f32 %v1772_v6, %v1454_v58  ;;  %v2816_v6 = vsel %vm2805_vm7, %v2813_v53, %v2815_v23  ;;  %v2497_v28 = vor.u32 %v2496_v42, %v2493_v1  ;;  %v2818_v1 = vsel %vm2805_vm7, %v2815_v23, %v2817_v60 }
 0x203   : > { %6199 = vmatmul.msk.bf16.gmra.mxu3 %vm571_vm1, %v2489_v20  ;;  %v7327_v3 = vadd.f32 %v2008_v35, %v1823_v55  ;;  %v2498_v11 = vsel %vm2436_vm6, %v2488_v4, %v2497_v28 }
 0x204   : > { %v1044_v41 = vpop.f32.mrf.mxu2 }
 0x205   : > { %v1094_v13 = vadd.f32 %v1044_v41, %v6985_v17 }
 0x206   : > { %v1408_v37 = vpop.f32.mrf.mxu3  ;;  %v1777_v40 = vpop.f32.mrf.mxu0 }
 0x207   : > { %v1455_v51 = vadd.f32 %v1405_v0, %v1094_v13  ;;  %v7343_v0 = vld [vmem:[%s6738_s16 + $0x48] sm:$0xff]  ;;  %v2212_v13 = vrot.slane %v7322_v61, 2 }
 0x208   : > { %v7339_v41 = vpop.f32.mrf.mxu1 }
 0x209   : > { %6218 = vmatmul.msk.bf16.gmra.mxu0 %vm571_vm1, %v2816_v6  ;;  %6180 = vmatmul.msk.bf16.gmra.mxu2 %vm571_vm1, %v2211_v50  ;;  %v7336_v35 = vadd.f32 %v1774_v30, %v1455_v51  ;;  %10180 = vst [vmem:[#allocation7_spill] sm:$0xff] %v7339_v41  ;;  %v2503_v6 = vshll.u32 %v7343_v0, 16 }
 0x20c   : > { %v1047_v58 = vpop.f32.mrf.mxu2 }
 0x20d   : > { %v1095_v17 = vadd.f32 %v1047_v58, %v6994_v21  ;;  %v2500_v21 = vshrl.u32 %v7343_v0, 16  ;;  %v2505_v58 = vrot.slane %v2503_v6, 3  ;;  %v2214_v6 = vrot.slane %v7343_v0, 2 }
 0x20e   : > { %v1410_v20 = vpop.f32.mrf.mxu3  ;;  %v1779_v55 = vpop.f32.mrf.mxu0 }
 0x20f   : > { %v1456_v53 = vadd.f32 %v1408_v37, %v1095_v17  ;;  %v2502_v61 = vrot.slane %v2500_v21, 2  ;;  %v2819_v21 = vrot.slane %v7343_v0, 3  ;;  %v2215_v0 = vsel %vm1839_vm3, %v2212_v13, %v2214_v6 }
 0x210   : > { %v2018_v17 = vpop.f32.mrf.mxu1 }
 0x211   : > { %v1825_v10 = vadd.f32 %v1777_v40, %v1456_v53  ;;  %v2213_v40 = vsel %vm1839_vm3, %v2210_v18, %v2212_v13  ;;  %v2506_v53 = vor.u32 %v2505_v58, %v2502_v61  ;;  %v7362_v18 = vld [vmem:[%s6738_s16 + $0x50] sm:$0xff]  ;;  %v7383_v13 = vld [vmem:[%s6738_s16 + $0x58] sm:$0xff] }
 0x213   : > { %6200 = vmatmul.msk.bf16.gmra.mxu3 %vm571_vm1, %v2498_v11  ;;  %v7348_v30 = vadd.f32 %v2013_v44, %v1825_v10  ;;  %v2507_v41 = vsel %vm2436_vm6, %v2497_v28, %v2506_v53 }
 0x214   : > { %v1049_v50 = vpop.f32.mrf.mxu2 }
 0x215   : > { %v1096_v37 = vadd.f32 %v1049_v50, %v7003_v62 }
 0x216   : > { %v1413_v51 = vpop.f32.mrf.mxu3  ;;  %v1782_v4 = vpop.f32.mrf.mxu0 }
 0x217   : > { %v1457_v42 = vadd.f32 %v1410_v20, %v1096_v37 }
 0x218   : > { %v7366_v37 = vpop.f32.mrf.mxu1 }
 0x219   : > { %6219 = vmatmul.msk.bf16.gmra.mxu0 %vm571_vm1, %v2818_v1  ;;  %6181 = vmatmul.msk.bf16.gmra.mxu2 %vm571_vm1, %v2213_v40  ;;  %v7357_v44 = vadd.f32 %v1779_v55, %v1457_v42  ;;  %10181 = vst [vmem:[#allocation8_spill] sm:$0xff] %v7366_v37  ;;  %v2512_v1 = vshll.u32 %v7362_v18, 16 }
 0x21c   : > { %v1052_v11 = vpop.f32.mrf.mxu2 }
 0x21d   : > { %v1097_v62 = vadd.f32 %v1052_v11, %v7012_v24  ;;  %v2509_v24 = vshrl.u32 %v7362_v18, 16  ;;  %v2514_v11 = vrot.slane %v2512_v1, 3  ;;  %v2216_v1 = vrot.slane %v7362_v18, 2 }
 0x21e   : > { %v1415_v10 = vpop.f32.mrf.mxu3  ;;  %v1784_v50 = vpop.f32.mrf.mxu0 }
 0x21f   : > { %v1458_v23 = vadd.f32 %v1413_v51, %v1097_v62  ;;  %v2511_v58 = vrot.slane %v2509_v24, 2  ;;  %v2821_v24 = vrot.slane %v7362_v18, 3 }
 0x221   : > { %v1827_v20 = vadd.f32 %v1782_v4, %v1458_v23  ;;  %v2820_v4 = vsel %vm2805_vm7, %v2817_v60, %v2819_v21  ;;  %v2023_v23 = vpop.f32.mrf.mxu1 }
 0x223   : > { %6201 = vmatmul.msk.bf16.gmra.mxu3 %vm571_vm1, %v2507_v41  ;;  %v7369_v55 = vadd.f32 %v2018_v17, %v1827_v20  ;;  %v2515_v17 = vor.u32 %v2514_v11, %v2511_v58 }
 0x224   : > { %v1054_v51 = vpop.f32.mrf.mxu2 }
 0x225   : > { %v1098_v28 = vadd.f32 %v1054_v51, %v7021_v47  ;;  %v2516_v37 = vsel %vm2436_vm6, %v2506_v53, %v2515_v17 }
 0x226   : > { %v1418_v40 = vpop.f32.mrf.mxu3  ;;  %v1787_v42 = vpop.f32.mrf.mxu0 }
 0x227   : > { %v1459_v61 = vadd.f32 %v1415_v10, %v1098_v28  ;;  %v2518_v28 = vshrl.u32 %v7383_v13, 16 }
 0x229   : > { %6220 = vmatmul.msk.bf16.gmra.mxu0 %vm571_vm1, %v2820_v4  ;;  %6182 = vmatmul.msk.bf16.gmra.mxu2 %vm571_vm1, %v2215_v0  ;;  %v7378_v41 = vadd.f32 %v1784_v50, %v1459_v61  ;;  %v2822_v61 = vsel %vm2805_vm7, %v2819_v21, %v2821_v24  ;;  %v7395_v58 = vpop.f32.mrf.mxu1 }
 0x22c   : > { %v1057_v62 = vpop.f32.mrf.mxu2 }
 0x22d   : > { %v1099_v47 = vadd.f32 %v1057_v62, %v7030_v57  ;;  %v2521_v57 = vshll.u32 %v7383_v13, 16 }
 0x22e   : > { %v1420_v20 = vpop.f32.mrf.mxu3  ;;  %v1789_v51 = vpop.f32.mrf.mxu0 }
 0x22f   : > { %v1460_v60 = vadd.f32 %v1418_v40, %v1099_v47  ;;  %v2523_v11 = vrot.slane %v2521_v57, 3  ;;  %v10183_v47 = vld [vmem:[#allocation2_spill] sm:$0xff]  ;;  %v2823_v57 = vrot.slane %v7383_v13, 3 }
 0x231   : > { %v1829_v10 = vadd.f32 %v1787_v42, %v1460_v60  ;;  %v2217_v42 = vsel %vm1839_vm3, %v2214_v6, %v2216_v1 }
 0x233   : > { %6202 = vmatmul.msk.bf16.gmra.mxu3 %vm571_vm1, %v2516_v37  ;;  %v7388_v50 = vadd.f32 %v2023_v23, %v1829_v10  ;;  %v2520_v37 = vrot.slane %v2518_v28, 2  ;;  %v2028_v28 = vpop.f32.mrf.mxu1 }
 0x234   : > { %v1059_v4 = vpop.f32.mrf.mxu2 }
 0x235   : > { %10182 = vst [vmem:[#allocation9_spill] sm:$0xff] %v7388_v50  ;;  %v1100_v40 = vadd.f32 %v1059_v4, %v7039_v36  ;;  %v2524_v23 = vor.u32 %v2523_v11, %v2520_v37  ;;  %v7404_v50 = vld [vmem:[%s6738_s16 + $0x60] sm:$0xff] }
 0x236   : > { %v1423_v0 = vpop.f32.mrf.mxu3  ;;  %v1792_v53 = vpop.f32.mrf.mxu0 }
 0x237   : > { %v1461_v18 = vadd.f32 %v1420_v20, %v1100_v40  ;;  %v2525_v6 = vsel %vm2436_vm6, %v2515_v17, %v2524_v23  ;;  %v4712_v20 = vld [vmem:[%s10085_s5 + $0x10] sm:$0xff]  ;;  %v2218_v40 = vrot.slane %v7383_v13, 2  ;;  %v2527_v17 = vshrl.u32 %v7404_v50, 16 }
 0x238   : > { %5545 = vrot.lane.b32.xlu0 %v4712_v20, %s6659_s10 }
 0x239   : > { %6221 = vmatmul.msk.bf16.gmra.mxu0 %vm571_vm1, %v2822_v61  ;;  %6183 = vmatmul.msk.bf16.gmra.mxu2 %vm571_vm1, %v2217_v42  ;;  %v7399_v62 = vadd.f32 %v1789_v51, %v1461_v18  ;;  %v2530_v61 = vshll.u32 %v7404_v50, 16  ;;  %v10184_v18 = vld [vmem:[#allocation3_spill] sm:$0xff]  ;;  %v2529_v13 = vrot.slane %v2527_v17, 2 }
 0x23c   : > { %v1062_v36 = vpop.f32.mrf.mxu2 }
 0x23d   : > { %v1101_v60 = vadd.f32 %v1062_v36, %v10183_v47  ;;  %v2824_v47 = vsel %vm2805_vm7, %v2821_v24, %v2823_v57 }
 0x23e   : > { %v1425_v10 = vpop.f32.mrf.mxu3  ;;  %v1794_v21 = vpop.f32.mrf.mxu0 }
 0x23f   : > { %v1462_v4 = vadd.f32 %v1423_v0, %v1101_v60 }
 0x241   : > { %v1831_v51 = vadd.f32 %v1792_v53, %v1462_v4  ;;  %v2219_v53 = vsel %vm1839_vm3, %v2216_v1, %v2218_v40  ;;  %v2532_v4 = vrot.slane %v2530_v61, 3  ;;  %v7431_v61 = vld [vmem:[%s6738_s16 + $0x68] sm:$0xff] }
 0x243   : > { %6203 = vmatmul.msk.bf16.gmra.mxu3 %vm571_vm1, %v2525_v6  ;;  %v7413_v0 = vadd.f32 %v2028_v28, %v1831_v51  ;;  %v4715_v6 = vld [vmem:[%s10085_s5 + $0x28] sm:$0xff]  ;;  %v2533_v28 = vor.u32 %v2532_v4, %v2529_v13  ;;  %v7449_v13 = vld [vmem:[%s10082_s2] ss:$0 sm:$0xff] }
 0x244   : > { %v1064_v42 = vpop.f32.mrf.mxu2  ;;  %5551 = vrot.lane.b32.xlu0 %v4715_v6, %s6659_s10 }
 0x245   : > { %v1102_v37 = vadd.f32 %v1064_v42, %v10184_v18  ;;  %v2534_v17 = vsel %vm2436_vm6, %v2524_v23, %v2533_v28  ;;  %v4718_v42 = vld [vmem:[%s10085_s5 + $0x40] sm:$0xff]  ;;  %v4711_v18 = vld [vmem:[%s10085_s5 + $0x8] sm:$0xff]  ;;  %v2536_v23 = vshrl.u32 %v7431_v61, 16 }
 0x246   : > { %v2673_v11 = vpop.f32.mrf.mxu3  ;;  %v2909_v36 = vpop.f32.mrf.mxu0  ;;  %5543 = vrot.lane.b32.xlu1 %v4711_v18, %s6659_s10  ;;  %v4714_v18 = vld [vmem:[%s10085_s5 + $0x20] sm:$0xff] }
 0x247   : > { %v1463_v60 = vadd.f32 %v1425_v10, %v1102_v37  ;;  %v2220_v37 = vrot.slane %v7404_v50, 2 }
 0x249   : > { %6222 = vmatmul.msk.bf16.gmra.mxu0 %vm571_vm1, %v2824_v47  ;;  %6184 = vmatmul.msk.bf16.gmra.mxu2 %vm571_vm1, %v2219_v53  ;;  %v7426_v20 = vadd.f32 %v1794_v21, %v1463_v60  ;;  %v2539_v47 = vshll.u32 %v7431_v61, 16 }
 0x24b   : > { %10185 = vst [vmem:[#allocation2_spill] sm:$0xff] %v7426_v20 }
 0x24c   : > { %v2304_v24 = vpop.f32.mrf.mxu2  ;;  %5557 = vrot.lane.b32.xlu0 %v4718_v42, %s6659_s10  ;;  %v2541_v42 = vrot.slane %v2539_v47, 3 }
 0x24d   : > { %v2394_v51 = vadd.f32 %v2304_v24, %v7073_v26  ;;  %v2825_v26 = vrot.slane %v7404_v50, 3  ;;  %v2221_v50 = vsel %vm1839_vm3, %v2218_v40, %v2220_v37 }
 0x24e   : > { %v2675_v1 = vpop.f32.mrf.mxu3  ;;  %v2911_v10 = vpop.f32.mrf.mxu0  ;;  %5549 = vrot.lane.b32.xlu1 %v4714_v18, %s6659_s10 }
 0x24f   : > { %v2763_v21 = vadd.f32 %v2673_v11, %v2394_v51  ;;  %v2826_v24 = vsel %vm2805_vm7, %v2823_v57, %v2825_v26 }
 0x251   : > { %v2999_v60 = vadd.f32 %v2909_v36, %v2763_v21  ;;  %v4721_v36 = vld [vmem:[%s10085_s5 + $0x58] sm:$0xff] }
 0x253   : > { %6204 = vmatmul.msk.bf16.gmra.mxu3 %vm571_vm1, %v2534_v17  ;;  %v2538_v17 = vrot.slane %v2536_v23, 2 }
 0x254   : > { %v2306_v53 = vpop.f32.mrf.mxu2  ;;  %5563 = vrot.lane.b32.xlu0 %v4721_v36, %s6659_s10 }
 0x255   : > { %v2395_v4 = vadd.f32 %v2306_v53, %v7081_v14  ;;  %v3039_v14 = vadd.f32 %v7449_v13, %v2999_v60  ;;  %v7469_v60 = vld [vmem:[%s6738_s16 + $0x70] sm:$0xff] }
 0x256   : > { %v2678_v11 = vpop.f32.mrf.mxu3  ;;  %v2914_v6 = vpop.f32.mrf.mxu0 }
 0x257   : > { %v2764_v51 = vadd.f32 %v2675_v1, %v2395_v4  ;;  %v2542_v1 = vor.u32 %v2541_v42, %v2538_v17  ;;  %v3075_v23 = vmax.f32 %v3039_v14, 0.0  ;;  %v2545_v17 = vshrl.u32 %v7469_v60, 16 }
 0x258   : > { %v2548_v42 = vshll.u32 %v7469_v60, 16 }
 0x259   : > { %6223 = vmatmul.msk.bf16.gmra.mxu0 %vm571_vm1, %v2826_v24  ;;  %v3000_v57 = vadd.f32 %v2911_v10, %v2764_v51  ;;  %6185 = vmatmul.msk.bf16.gmra.mxu2 %vm571_vm1, %v2221_v50  ;;  %v2543_v20 = vsel %vm2436_vm6, %v2533_v28, %v2542_v1  ;;  %v4724_v10 = vld [vmem:[%s10085_s5 + $0x70] sm:$0xff]  ;;  %v4717_v50 = vld [vmem:[%s10085_s5 + $0x38] sm:$0xff]  ;;  %v2222_v28 = vrot.slane %v7431_v61, 2 }
 0x25a   : > { %5555 = vrot.lane.b32.xlu1 %v4717_v50, %s6659_s10 }
 0x25b   : > { %v3040_v40 = vadd.f32 %v7449_v13, %v3000_v57 }
 0x25c   : > { %v2309_v21 = vpop.f32.mrf.mxu2  ;;  %5569 = vrot.lane.b32.xlu0 %v4724_v10, %s6659_s10 }
 0x25d   : > { %v3076_v47 = vmax.f32 %v3040_v40, 0.0  ;;  %v2396_v53 = vadd.f32 %v2309_v21, %v7089_v8  ;;  %v2827_v8 = vrot.slane %v7431_v61, 3  ;;  %v2223_v61 = vsel %vm1839_vm3, %v2220_v37, %v2222_v28 }
 0x25e   : > { %v2680_v4 = vpop.f32.mrf.mxu3  ;;  %v2916_v24 = vpop.f32.mrf.mxu0 }
 0x25f   : > { %v3111_v36 = vpack.c.bf16 %v3076_v47, %v3075_v23  ;;  %v2765_v51 = vadd.f32 %v2678_v11, %v2396_v53  ;;  %v2828_v21 = vsel %vm2805_vm7, %v2825_v26, %v2827_v8  ;;  %v4710_v23 = vld [vmem:[%s10085_s5] sm:$0xff]  ;;  %v2547_v47 = vrot.slane %v2545_v17, 2 }
 0x260   : > { %5541 = vrot.lane.b32.xlu2 %v4710_v23, %s6659_s10  ;;  %v2550_v53 = vrot.slane %v2548_v42, 3  ;;  %v7507_v23 = vld [vmem:[%s6738_s16 + $0x78] sm:$0xff] }
 0x261   : > { %6240 = vmatmul.msk.bf16.vlgmr.msra.gmra.mxu1 %vm3149_vm8, %v3111_v36  ;;  %v3001_v14 = vadd.f32 %v2914_v6, %v2765_v51  ;;  %v4727_v6 = vld [vmem:[%s10085_s5 + $0x88] sm:$0xff] }
 0x262   : > { %v2551_v36 = vor.u32 %v2550_v53, %v2547_v47  ;;  %v2557_v47 = vshll.u32 %v7507_v23, 16 }
 0x263   : > { %6205 = vmatmul.msk.bf16.gmra.mxu3 %vm571_vm1, %v2543_v20  ;;  %v3041_v26 = vadd.f32 %v7449_v13, %v3001_v14  ;;  %v4723_v14 = vld [vmem:[%s10085_s5 + $0x68] sm:$0xff] }
 0x264   : > { %v2311_v18 = vpop.f32.mrf.mxu2  ;;  %5575 = vrot.lane.b32.xlu0 %v4727_v6, %s6659_s10 }
 0x265   : > { %v2397_v57 = vadd.f32 %v2311_v18, %v7097_v46  ;;  %v4720_v46 = vld [vmem:[%s10085_s5 + $0x50] sm:$0xff]  ;;  %v3077_v50 = vmax.f32 %v3041_v26, 0.0 }
 0x266   : > { %v2683_v40 = vpop.f32.mrf.mxu3  ;;  %v2919_v11 = vpop.f32.mrf.mxu0  ;;  %5561 = vrot.lane.b32.xlu1 %v4720_v46, %s6659_s10 }
 0x267   : > { %v2766_v20 = vadd.f32 %v2680_v4, %v2397_v57 }
 0x269   : > { %6224 = vmatmul.msk.bf16.gmra.mxu0 %vm571_vm1, %v2828_v21  ;;  %v3002_v37 = vadd.f32 %v2916_v24, %v2766_v20  ;;  %6186 = vmatmul.msk.bf16.gmra.mxu2 %vm571_vm1, %v2223_v61  ;;  %v2552_v21 = vsel %vm2436_vm6, %v2542_v1, %v2551_v36  ;;  %v4730_v24 = vld [vmem:[%s10085_s5 + $0xa0] sm:$0xff]  ;;  %v2224_v1 = vrot.slane %v7469_v60, 2  ;;  %v2554_v20 = vshrl.u32 %v7507_v23, 16 }
 0x26b   : > { %v3042_v4 = vadd.f32 %v7449_v13, %v3002_v37 }
 0x26c   : > { %v2314_v10 = vpop.f32.mrf.mxu2  ;;  %5581 = vrot.lane.b32.xlu0 %v4730_v24, %s6659_s10 }
 0x26d   : > { %v3078_v51 = vmax.f32 %v3042_v4, 0.0  ;;  %v2398_v17 = vadd.f32 %v2314_v10, %v7105_v45  ;;  %v2829_v45 = vrot.slane %v7469_v60, 3  ;;  %v2225_v4 = vsel %vm1839_vm3, %v2222_v28, %v2224_v1  ;;  %v4733_v60 = vld [vmem:[%s10085_s5 + $0xb8] sm:$0xff] }
 0x26e   : > { %v2685_v42 = vpop.f32.mrf.mxu3  ;;  %v2921_v18 = vpop.f32.mrf.mxu0  ;;  %5567 = vrot.lane.b32.xlu1 %v4723_v14, %s6659_s10  ;;  %v4713_v28 = vld [vmem:[%s10085_s5 + $0x18] sm:$0xff] }
 0x26f   : > { %v3112_v57 = vpack.c.bf16 %v3078_v51, %v3077_v50  ;;  %v2767_v61 = vadd.f32 %v2683_v40, %v2398_v17  ;;  %v2830_v37 = vsel %vm2805_vm7, %v2827_v8, %v2829_v45  ;;  %v2556_v50 = vrot.slane %v2554_v20, 2  ;;  %v4726_v17 = vld [vmem:[%s10085_s5 + $0x80] sm:$0xff]  ;;  %5547 = vrot.lane.b32.xlu2 %v4713_v28, %s6659_s10 }
 0x270   : > { %v2559_v51 = vrot.slane %v2557_v47, 3 }
 0x271   : > { %6241 = vmatmul.msk.bf16.gmra.mxu1 %vm3149_vm8, %v3112_v57  ;;  %v3003_v6 = vadd.f32 %v2919_v11, %v2767_v61 }
 0x273   : > { %6206 = vmatmul.msk.bf16.gmra.mxu3 %vm571_vm1, %v2552_v21 }
 0x274   : > { %v2316_v53 = vpop.f32.mrf.mxu2  ;;  %5587 = vrot.lane.b32.xlu0 %v4733_v60, %s6659_s10 }
 0x275   : > { %v2399_v46 = vadd.f32 %v2316_v53, %v7113_v63  ;;  %v3043_v63 = vadd.f32 %v7449_v13, %v3003_v6  ;;  %v7545_v53 = vld [vmem:[%s6738_s16 + $0x80] sm:$0xff]  ;;  %v4736_v6 = vld [vmem:[%s10085_s5 + $0xd0] sm:$0xff] }
 0x276   : > { %v2688_v26 = vpop.f32.mrf.mxu3  ;;  %v2924_v40 = vpop.f32.mrf.mxu0  ;;  %5573 = vrot.lane.b32.xlu1 %v4726_v17, %s6659_s10 }
 0x277   : > { %v2768_v10 = vadd.f32 %v2685_v42, %v2399_v46  ;;  %v2560_v42 = vor.u32 %v2559_v51, %v2556_v50  ;;  %v3079_v21 = vmax.f32 %v3043_v63, 0.0  ;;  %v4729_v46 = vld [vmem:[%s10085_s5 + $0x98] sm:$0xff] }
 0x279   : > { %6225 = vmatmul.msk.bf16.gmra.mxu0 %vm571_vm1, %v2830_v37  ;;  %v3004_v8 = vadd.f32 %v2921_v18, %v2768_v10  ;;  %6187 = vmatmul.msk.bf16.gmra.mxu2 %vm571_vm1, %v2225_v4  ;;  %v2561_v47 = vsel %vm2436_vm6, %v2551_v36, %v2560_v42  ;;  %v4716_v36 = vld [vmem:[%s10085_s5 + $0x30] sm:$0xff]  ;;  %v2226_v4 = vrot.slane %v7507_v23, 2  ;;  %v2563_v10 = vshrl.u32 %v7545_v53, 16 }
 0x27a   : > { %5553 = vrot.lane.b32.xlu2 %v4716_v36, %s6659_s10 }
 0x27b   : > { %v3044_v11 = vadd.f32 %v7449_v13, %v3004_v8  ;;  %v2227_v28 = vsel %vm1839_vm3, %v2224_v1, %v2226_v4  ;;  %v4719_v1 = vld [vmem:[%s10085_s5 + $0x48] sm:$0xff] }
 0x27c   : > { %v2319_v57 = vpop.f32.mrf.mxu2  ;;  %5593 = vrot.lane.b32.xlu0 %v4736_v6, %s6659_s10 }
 0x27d   : > { %v3080_v24 = vmax.f32 %v3044_v11, 0.0  ;;  %v2400_v14 = vadd.f32 %v2319_v57, %v7121_v12  ;;  %v2831_v12 = vrot.slane %v7507_v23, 3  ;;  %v2565_v23 = vrot.slane %v2563_v10, 2  ;;  %v7587_v10 = vld [vmem:[%s6738_s16 + $0x88] sm:$0xff] }
 0x27e   : > { %v2690_v61 = vpop.f32.mrf.mxu3  ;;  %v2926_v18 = vpop.f32.mrf.mxu0  ;;  %5579 = vrot.lane.b32.xlu1 %v4729_v46, %s6659_s10 }
 0x27f   : > { %v3113_v20 = vpack.c.bf16 %v3080_v24, %v3079_v21  ;;  %v2769_v37 = vadd.f32 %v2688_v26, %v2400_v14  ;;  %v2566_v26 = vshll.u32 %v7545_v53, 16  ;;  %v2832_v8 = vsel %vm2805_vm7, %v2829_v45, %v2831_v12  ;;  %v4739_v21 = vld [vmem:[%s10085_s5 + $0xe8] sm:$0xff]  ;;  %v4732_v24 = vld [vmem:[%s10085_s5 + $0xb0] sm:$0xff] }
 0x281   : > { %6242 = vmatmul.msk.bf16.gmra.mxu1 %vm3149_vm8, %v3113_v20  ;;  %v3005_v51 = vadd.f32 %v2924_v40, %v2769_v37  ;;  %v2568_v57 = vrot.slane %v2566_v26, 3  ;;  %v4742_v26 = vld [vmem:[%s10085_s5 + $0x100] sm:$0xff] }
 0x282   : > { %5559 = vrot.lane.b32.xlu2 %v4719_v1, %s6659_s10 }
 0x283   : > { %6207 = vmatmul.msk.bf16.gmra.mxu3 %vm571_vm1, %v2561_v47  ;;  %v2569_v14 = vor.u32 %v2568_v57, %v2565_v23 }
 0x284   : > { %v2321_v50 = vpop.f32.mrf.mxu2  ;;  %5599 = vrot.lane.b32.xlu0 %v4739_v21, %s6659_s10 }
 0x285   : > { %v2401_v60 = vadd.f32 %v2321_v50, %v7129_v52  ;;  %v3045_v52 = vadd.f32 %v7449_v13, %v3005_v51  ;;  %v2570_v36 = vsel %vm2436_vm6, %v2560_v42, %v2569_v14  ;;  %v4735_v50 = vld [vmem:[%s10085_s5 + $0xc8] sm:$0xff]  ;;  %v4722_v42 = vld [vmem:[%s10085_s5 + $0x60] sm:$0xff] }
 0x286   : > { %v2693_v17 = vpop.f32.mrf.mxu3  ;;  %v2929_v63 = vpop.f32.mrf.mxu0  ;;  %5585 = vrot.lane.b32.xlu1 %v4732_v24, %s6659_s10 }
 0x287   : > { %v2770_v11 = vadd.f32 %v2690_v61, %v2401_v60  ;;  %v3081_v20 = vmax.f32 %v3045_v52, 0.0  ;;  %v2228_v60 = vrot.slane %v7545_v53, 2 }
 0x289   : > { %6226 = vmatmul.msk.bf16.gmra.mxu0 %vm571_vm1, %v2832_v8  ;;  %v3006_v45 = vadd.f32 %v2926_v18, %v2770_v11  ;;  %6188 = vmatmul.msk.bf16.gmra.mxu2 %vm571_vm1, %v2227_v28  ;;  %v2572_v8 = vshrl.u32 %v7587_v10, 16  ;;  %v2229_v52 = vsel %vm1839_vm3, %v2226_v4, %v2228_v60  ;;  %v4725_v4 = vld [vmem:[%s10085_s5 + $0x78] sm:$0xff] }
 0x28a   : > { %5565 = vrot.lane.b32.xlu2 %v4722_v42, %s6659_s10  ;;  %v4741_v42 = vld [vmem:[%s10085_s5 + $0xf8] sm:$0xff] }
 0x28b   : > { %v3046_v40 = vadd.f32 %v7449_v13, %v3006_v45 }
 0x28c   : > { %v2324_v61 = vpop.f32.mrf.mxu2  ;;  %5605 = vrot.lane.b32.xlu0 %v4742_v26, %s6659_s10 }
 0x28d   : > { %v3082_v47 = vmax.f32 %v3046_v40, 0.0  ;;  %v2402_v6 = vadd.f32 %v2324_v61, %v7137_v48  ;;  %v2833_v48 = vrot.slane %v7545_v53, 3  ;;  %v2574_v53 = vrot.slane %v2572_v8, 2  ;;  %v4745_v40 = vld [vmem:[%s10085_s5 + $0x118] sm:$0xff]  ;;  %v4738_v61 = vld [vmem:[%s10085_s5 + $0xe0] sm:$0xff] }
 0x28e   : > { %v2695_v46 = vpop.f32.mrf.mxu3  ;;  %v2931_v18 = vpop.f32.mrf.mxu0  ;;  %5591 = vrot.lane.b32.xlu1 %v4735_v50, %s6659_s10 }
 0x28f   : > { %v3114_v37 = vpack.c.bf16 %v3082_v47, %v3081_v20  ;;  %v2771_v51 = vadd.f32 %v2693_v17, %v2402_v6  ;;  %v2575_v17 = vshll.u32 %v7587_v10, 16  ;;  %v2834_v24 = vsel %vm2805_vm7, %v2831_v12, %v2833_v48 }
 0x291   : > { %6243 = vmatmul.msk.bf16.gmra.mxu1 %vm3149_vm8, %v3114_v37  ;;  %v3007_v11 = vadd.f32 %v2929_v63, %v2771_v51  ;;  %v2577_v1 = vrot.slane %v2575_v17, 3  ;;  %v7629_v51 = vld [vmem:[%s6738_s16 + $0x90] sm:$0xff]  ;;  %v2835_v17 = vrot.slane %v7587_v10, 3 }
 0x292   : > { %5571 = vrot.lane.b32.xlu2 %v4725_v4, %s6659_s10 }
 0x293   : > { %6208 = vmatmul.msk.bf16.gmra.mxu3 %vm571_vm1, %v2570_v36  ;;  %v2578_v20 = vor.u32 %v2577_v1, %v2574_v53  ;;  %v2836_v53 = vsel %vm2805_vm7, %v2833_v48, %v2835_v17 }
 0x294   : > { %v2326_v28 = vpop.f32.mrf.mxu2  ;;  %5611 = vrot.lane.b32.xlu0 %v4745_v40, %s6659_s10 }
 0x295   : > { %v2403_v23 = vadd.f32 %v2326_v28, %v7145_v9  ;;  %v3047_v9 = vadd.f32 %v7449_v13, %v3007_v11  ;;  %v2579_v50 = vsel %vm2436_vm6, %v2569_v14, %v2578_v20  ;;  %v2230_v28 = vrot.slane %v7587_v10, 2 }
 0x296   : > { %v2698_v57 = vpop.f32.mrf.mxu3  ;;  %v2934_v21 = vpop.f32.mrf.mxu0  ;;  %5597 = vrot.lane.b32.xlu1 %v4738_v61, %s6659_s10  ;;  %v2581_v14 = vshrl.u32 %v7629_v51, 16  ;;  %v2584_v11 = vshll.u32 %v7629_v51, 16 }
 0x297   : > { %v2772_v45 = vadd.f32 %v2695_v46, %v2403_v23  ;;  %v3083_v6 = vmax.f32 %v3047_v9, 0.0  ;;  %v2231_v1 = vsel %vm1839_vm3, %v2228_v60, %v2230_v28  ;;  %v4744_v9 = vld [vmem:[%s10085_s5 + $0x110] sm:$0xff] }
 0x298   : > { %v2583_v10 = vrot.slane %v2581_v14, 2  ;;  %v2586_v61 = vrot.slane %v2584_v11, 3 }
 0x299   : > { %6227 = vmatmul.msk.bf16.gmra.mxu0 %vm571_vm1, %v2834_v24  ;;  %v3008_v12 = vadd.f32 %v2931_v18, %v2772_v45  ;;  %6189 = vmatmul.msk.bf16.gmra.mxu2 %vm571_vm1, %v2229_v52 }
 0x29a   : > { %v2587_v60 = vor.u32 %v2586_v61, %v2583_v10  ;;  %v2430_v61 = vld [vmem:[%s6738_s16 + $0xa0] sm:$0x7] }
 0x29b   : > { %v3048_v63 = vadd.f32 %v7449_v13, %v3008_v12 }
 0x29c   : > { %v2329_v47 = vpop.f32.mrf.mxu2 }
 0x29d   : > { %v3084_v46 = vmax.f32 %v3048_v63, 0.0  ;;  %v2404_v37 = vadd.f32 %v2329_v47, %v7153_v25  ;;  %v4728_v25 = vld [vmem:[%s10085_s5 + $0x90] sm:$0xff] }
 0x29e   : > { %v2700_v36 = vpop.f32.mrf.mxu3  ;;  %v2936_v18 = vpop.f32.mrf.mxu0  ;;  %5603 = vrot.lane.b32.xlu1 %v4741_v42, %s6659_s10  ;;  %5577 = vrot.lane.b32.xlu2 %v4728_v25, %s6659_s10  ;;  %v2837_v42 = vrot.slane %v7629_v51, 3  ;;  %v2232_v25 = vrot.slane %v7629_v51, 2 }
 0x29f   : > { %v3115_v26 = vpack.c.bf16 %v3084_v46, %v3083_v6  ;;  %v2773_v8 = vadd.f32 %v2698_v57, %v2404_v37 }
 0x2a0   : > { %v2233_v51 = vsel %vm1839_vm3, %v2230_v28, %v2232_v25 }
 0x2a1   : > { %6244 = vmatmul.msk.bf16.gmra.mxu1 %vm3149_vm8, %v3115_v26  ;;  %v3009_v57 = vadd.f32 %v2934_v21, %v2773_v8  ;;  %v7663_v26 = vld [vmem:[%s6738_s16 + $0x98] sm:$0xff]  ;;  %v4734_v8 = vld [vmem:[%s10085_s5 + $0xc0] sm:$0xff] }
 0x2a2   : > { %v2593_v14 = vshll.u32 %v7663_v26, 16 }
 0x2a3   : > { %6209 = vmatmul.msk.bf16.gmra.mxu3 %vm571_vm1, %v2579_v50  ;;  %v3049_v12 = vadd.f32 %v7449_v13, %v3009_v57 }
 0x2a4   : > { %v2331_v23 = vpop.f32.mrf.mxu2  ;;  %v2595_v10 = vrot.slane %v2593_v14, 3 }
 0x2a5   : > { %v2405_v24 = vadd.f32 %v2331_v23, %v7163_v7  ;;  %v4731_v7 = vld [vmem:[%s10085_s5 + $0xa8] sm:$0xff]  ;;  %v3085_v63 = vmax.f32 %v3049_v12, 0.0 }
 0x2a6   : > { %v2703_v52 = vpop.f32.mrf.mxu3  ;;  %v2939_v45 = vpop.f32.mrf.mxu0  ;;  %5609 = vrot.lane.b32.xlu1 %v4744_v9, %s6659_s10  ;;  %5583 = vrot.lane.b32.xlu2 %v4731_v7, %s6659_s10  ;;  %v2434_v9 = vunpack.c.l.b16 %v2430_v61 }
 0x2a7   : > { %v2774_v40 = vadd.f32 %v2700_v36, %v2405_v24 }
 0x2a9   : > { %6228 = vmatmul.msk.bf16.gmra.mxu0 %vm571_vm1, %v2836_v53  ;;  %v3010_v21 = vadd.f32 %v2936_v18, %v2774_v40  ;;  %6190 = vmatmul.msk.bf16.gmra.mxu2 %vm571_vm1, %v2231_v1  ;;  %v2588_v18 = vsel %vm2436_vm6, %v2578_v20, %v2587_v60  ;;  %v2590_v20 = vshrl.u32 %v7663_v26, 16  ;;  %v2838_v53 = vsel %vm2805_vm7, %v2835_v17, %v2837_v42 }
 0x2ab   : > { %v3050_v48 = vadd.f32 %v7449_v13, %v3010_v21  ;;  %v2592_v40 = vrot.slane %v2590_v20, 2 }
 0x2ac   : > { %v2334_v4 = vpop.f32.mrf.mxu2 }
 0x2ad   : > { %v3086_v47 = vmax.f32 %v3050_v48, 0.0  ;;  %v2406_v6 = vadd.f32 %v2334_v4, %v7171_v2  ;;  %v2046_v2 = vadd.f32 %v7158_v15, %v7181_v19  ;;  %v2596_v28 = vor.u32 %v2595_v10, %v2592_v40 }
 0x2ae   : > { %v2705_v46 = vpop.f32.mrf.mxu3  ;;  %v2941_v37 = vpop.f32.mrf.mxu0  ;;  %5589 = vrot.lane.b32.xlu2 %v4734_v8, %s6659_s10  ;;  %v10187_v8 = vld [vmem:[#allocation4_spill] sm:$0xff] }
 0x2af   : > { %v3116_v36 = vpack.c.bf16 %v3086_v47, %v3085_v63  ;;  %v2775_v50 = vadd.f32 %v2703_v52, %v2406_v6  ;;  %v2597_v6 = vsel %vm2436_vm6, %v2587_v60, %v2596_v28 }
 0x2b1   : > { %6245 = vmatmul.msk.bf16.gmra.mxu1 %vm3149_vm8, %v3116_v36  ;;  %v3011_v23 = vadd.f32 %v2939_v45, %v2775_v50  ;;  %v4737_v45 = vld [vmem:[%s10085_s5 + $0xd8] sm:$0xff]  ;;  %v2839_v36 = vrot.slane %v7663_v26, 3  ;;  %v2234_v50 = vrot.slane %v7663_v26, 2  ;;  %v2105_v26 = vld [vmem:[%s6738_s16 + $0xa0] sm:$0x3] }
 0x2b3   : > { %6210 = vmatmul.msk.bf16.gmra.mxu3 %vm571_vm1, %v2588_v18  ;;  %v3051_v15 = vadd.f32 %v7449_v13, %v3011_v23  ;;  %v4740_v18 = vld [vmem:[%s10085_s5 + $0xf0] sm:$0xff] }
 0x2b4   : > { %v2336_v11 = vpop.f32.mrf.mxu2 }
 0x2b5   : > { %v2407_v57 = vadd.f32 %v2336_v11, %v2046_v2  ;;  %v3087_v21 = vmax.f32 %v3051_v15, 0.0 }
 0x2b6   : > { %v2708_v24 = vpop.f32.mrf.mxu3  ;;  %v2944_v52 = vpop.f32.mrf.mxu0  ;;  %5595 = vrot.lane.b32.xlu2 %v4737_v45, %s6659_s10 }
 0x2b7   : > { %v2776_v1 = vadd.f32 %v2705_v46, %v2407_v57  ;;  %v2435_v46 = vpack.c.b16 %v2434_v9, %v2434_v9 }
 0x2b9   : > { %6229 = vmatmul.msk.bf16.gmra.mxu0 %vm571_vm1, %v2838_v53  ;;  %v3012_v19 = vadd.f32 %v2941_v37, %v2776_v1  ;;  %6191 = vmatmul.msk.bf16.gmra.mxu2 %vm571_vm1, %v2233_v51  ;;  %v2599_v2 = vshrl.u32 %v2435_v46, 16  ;;  %v2602_v20 = vshll.u32 %v2435_v46, 16  ;;  %v2840_v53 = vsel %vm2805_vm7, %v2837_v42, %v2839_v36 }
 0x2ba   : > { %v2235_v51 = vsel %vm1839_vm3, %v2232_v25, %v2234_v50 }
 0x2bb   : > { %v3052_v17 = vadd.f32 %v7449_v13, %v3012_v19  ;;  %v2601_v40 = vrot.slane %v2599_v2, 2  ;;  %v2604_v10 = vrot.slane %v2602_v20, 3  ;;  %v2181_v19 = vunpack.c.l.b16 %v2105_v26 }
 0x2bc   : > { %v2339_v12 = vpop.f32.mrf.mxu2 }
 0x2bd   : > { %v3088_v7 = vmax.f32 %v3052_v17, 0.0  ;;  %v2408_v48 = vadd.f32 %v2339_v12, %v7191_v56  ;;  %v10186_v56 = vld [vmem:[#allocation6_spill] sm:$0xff]  ;;  %v2605_v25 = vor.u32 %v2604_v10, %v2601_v40 }
 0x2be   : > { %v2710_v4 = vpop.f32.mrf.mxu3  ;;  %v2946_v63 = vpop.f32.mrf.mxu0  ;;  %5601 = vrot.lane.b32.xlu2 %v4740_v18, %s6659_s10  ;;  %v2048_v60 = vadd.f32 %v10187_v8, %v10186_v56  ;;  %v10188_v18 = vld [vmem:[#allocation5_spill] sm:$0xff] }
 0x2bf   : > { %v3117_v47 = vpack.c.bf16 %v3088_v7, %v3087_v21  ;;  %v2777_v37 = vadd.f32 %v2708_v24, %v2408_v48  ;;  %v2200_v48 = vpack.c.b16 %v2181_v19, %v2181_v19  ;;  %v2050_v56 = vadd.f32 %v10188_v18, %v7232_v22 }
 0x2c0   : > { %v2052_v19 = vadd.f32 %v7227_v33, %v7254_v34 }
 0x2c1   : > { %6246 = vmatmul.msk.bf16.gmra.mxu1 %vm3149_vm8, %v3117_v47  ;;  %v3013_v11 = vadd.f32 %v2944_v52, %v2777_v37  ;;  %v4743_v52 = vld [vmem:[%s10085_s5 + $0x108] sm:$0xff]  ;;  %v2236_v37 = vrot.slane %v2200_v48, 2 }
 0x2c3   : > { %6211 = vmatmul.msk.bf16.gmra.mxu3 %vm571_vm1, %v2597_v6  ;;  %v3053_v61 = vadd.f32 %v7449_v13, %v3013_v11  ;;  %v2841_v6 = vrot.slane %v2435_v46, 3  ;;  %v7718_v11 = vpop.f32.mrf.mxu1 }
 0x2c4   : > { %v2341_v14 = vpop.f32.mrf.mxu2 }
 0x2c5   : > { %v2409_v23 = vadd.f32 %v2341_v14, %v2048_v60  ;;  %v3089_v17 = vmax.f32 %v3053_v61, 0.0  ;;  %v2842_v14 = vsel %vm2805_vm7, %v2839_v36, %v2841_v6 }
 0x2c6   : > { %v2713_v57 = vpop.f32.mrf.mxu3  ;;  %v2949_v24 = vpop.f32.mrf.mxu0  ;;  %5607 = vrot.lane.b32.xlu2 %v4743_v52, %s6659_s10 }
 0x2c7   : > { %v2778_v1 = vadd.f32 %v2710_v4, %v2409_v23 }
 0x2c9   : > { %6230 = vmatmul.msk.bf16.gmra.mxu0 %vm571_vm1, %v2840_v53  ;;  %v3014_v15 = vadd.f32 %v2946_v63, %v2778_v1  ;;  %6192 = vmatmul.msk.bf16.gmra.mxu2 %vm571_vm1, %v2235_v51  ;;  %v2606_v63 = vsel %vm2436_vm6, %v2596_v28, %v2605_v25  ;;  %v2237_v28 = vsel %vm1839_vm3, %v2234_v50, %v2236_v37 }
 0x2cb   : > { %v3054_v42 = vadd.f32 %v7449_v13, %v3014_v15 }
 0x2cc   : > { %v2344_v45 = vpop.f32.mrf.mxu2 }
 0x2cd   : > { %v3090_v9 = vmax.f32 %v3054_v42, 0.0  ;;  %v2410_v12 = vadd.f32 %v2344_v45, %v7219_v43 }
 0x2ce   : > { %v2715_v21 = vpop.f32.mrf.mxu3  ;;  %v2951_v7 = vpop.f32.mrf.mxu0 }
 0x2cf   : > { %v3118_v4 = vpack.c.bf16 %v3090_v9, %v3089_v17  ;;  %v2779_v47 = vadd.f32 %v2713_v57, %v2410_v12 }
 0x2d1   : > { %6247 = vmatmul.msk.bf16.gmra.mxu1 %vm3149_vm8, %v3118_v4  ;;  %v3015_v60 = vadd.f32 %v2949_v24, %v2779_v47  ;;  %v7728_v24 = vld [vmem:[%s10084_s4] ss:$0 sm:$0xff] }
 0x2d3   : > { %6212 = vmatmul.msk.bf16.gmra.mxu3 %vm571_vm1, %v2606_v63  ;;  %v3055_v46 = vadd.f32 %v7449_v13, %v3015_v60 }
 0x2d4   : > { %v2346_v8 = vpop.f32.mrf.mxu2 }
 0x2d5   : > { %v2411_v2 = vadd.f32 %v2346_v8, %v2050_v56  ;;  %v3091_v53 = vmax.f32 %v3055_v46, 0.0 }
 0x2d6   : > { %v2718_v43 = vpop.f32.mrf.mxu3  ;;  %v2954_v20 = vpop.f32.mrf.mxu0 }
 0x2d7   : > { %v2780_v23 = vadd.f32 %v2715_v21, %v2411_v2 }
 0x2d9   : > { %6231 = vmatmul.msk.bf16.gmra.mxu0 %vm571_vm1, %v2842_v14  ;;  %v3016_v57 = vadd.f32 %v2951_v7, %v2780_v23  ;;  %6193 = vmatmul.msk.bf16.gmra.mxu2 %vm571_vm1, %v2237_v28 }
 0x2db   : > { %v3056_v22 = vadd.f32 %v7449_v13, %v3016_v57 }
 0x2dc   : > { %v2349_v36 = vpop.f32.mrf.mxu2 }
 0x2dd   : > { %v3092_v51 = vmax.f32 %v3056_v22, 0.0  ;;  %v2412_v50 = vadd.f32 %v2349_v36, %v7243_v49 }
 0x2de   : > { %v2720_v1 = vpop.f32.mrf.mxu3  ;;  %v2956_v26 = vpop.f32.mrf.mxu0 }
 0x2df   : > { %v3213_v40 = vpop.f32.mrf.mxu1  ;;  %v3119_v10 = vpack.c.bf16 %v3092_v51, %v3091_v53  ;;  %v2781_v15 = vadd.f32 %v2718_v43, %v2412_v50 }
 0x2e0   : > { %v7732_v61 = vadd.f32 %v7728_v24, %v3213_v40 }
 0x2e1   : > { %6248 = vmatmul.msk.bf16.gmra.mxu1 %vm3149_vm8, %v3119_v10  ;;  %v3017_v49 = vadd.f32 %v2954_v20, %v2781_v15 }
 0x2e2   : > { %10189 = vst [vmem:[#allocation3_spill] sm:$0xff] %v7732_v61  ;;  %v3304_v52 = vsel %vm3303_vm9, %v7732_v61, -inf  ;;  %v4746_v23 = vmul.f32 1.442695, %v7732_v61 }
 0x2e3   : > { %3305 = vmax.xlane.f32.xlu0 %v3304_v52  ;;  %v3057_v7 = vadd.f32 %v7449_v13, %v3017_v49 }
 0x2e4   : > { %v2351_v42 = vpop.f32.mrf.mxu2 }
 0x2e5   : > { %v2413_v25 = vadd.f32 %v2351_v42, %v2052_v19  ;;  %v3093_v47 = vmax.f32 %v3057_v7, 0.0 }
 0x2e6   : > { %v2723_v45 = vpop.f32.mrf.mxu3  ;;  %v2959_v17 = vpop.f32.mrf.mxu0 }
 0x2e7   : > { %v3215_v9 = vpop.f32.mrf.mxu1  ;;  %v2782_v12 = vadd.f32 %v2720_v1, %v2413_v25 }
 0x2e8   : > { %v7740_v21 = vadd.f32 %v7728_v24, %v3215_v9  ;;  %v2056_v9 = vadd.f32 %v7271_v39, %v7296_v38 }
 0x2e9   : > { %v3018_v4 = vadd.f32 %v2956_v26, %v2782_v12 }
 0x2ea   : > { %10190 = vst [vmem:[#allocation6_spill] sm:$0xff] %v7740_v21  ;;  %v4748_v48 = vmul.f32 1.442695, %v7740_v21  ;;  %v3307_v63 = vsel %vm3303_vm9, %v7740_v21, -inf }
 0x2eb   : > { %3308 = vmax.xlane.f32.xlu0 %v3307_v63  ;;  %v3058_v33 = vadd.f32 %v7449_v13, %v3018_v4 }
 0x2ec   : > { %6375 = vpow2.f32 %v4748_v48  ;;  %v2354_v34 = vpop.f32.mrf.mxu2 }
 0x2ed   : > { %v3094_v6 = vmax.f32 %v3058_v33, 0.0  ;;  %v2414_v37 = vadd.f32 %v2354_v34, %v7264_v31  ;;  %v2054_v31 = vadd.f32 %v7250_v16, %v7275_v27 }
 0x2ee   : > { %v2725_v18 = vpop.f32.mrf.mxu3  ;;  %v2961_v56 = vpop.f32.mrf.mxu0 }
 0x2ef   : > { %v3218_v8 = vpop.f32.mrf.mxu1  ;;  %v3120_v60 = vpack.c.bf16 %v3094_v6, %v3093_v47  ;;  %v2783_v20 = vadd.f32 %v2723_v45, %v2414_v37 }
 0x2f0   : > { %v7749_v2 = vadd.f32 %v7728_v24, %v3218_v8 }
 0x2f1   : > { %6249 = vmatmul.msk.bf16.gmra.mxu1 %vm3149_vm8, %v3120_v60  ;;  %v3019_v57 = vadd.f32 %v2959_v17, %v2783_v20 }
 0x2f2   : > { %10191 = vst [vmem:[#allocation4_spill] sm:$0xff] %v7749_v2  ;;  %v6376_v43 = vpop.eup %6375  ;;  %v4750_v14 = vmul.f32 1.442695, %v7749_v2  ;;  %v3310_v28 = vsel %vm3303_vm9, %v7749_v2, -inf }
 0x2f3   : > { %5000 = vrot.lane.b32.xlu2 %v6376_v43, %s6660_s29  ;;  %3311 = vmax.xlane.f32.xlu1 %v3310_v28  ;;  %v3059_v1 = vadd.f32 %v7449_v13, %v3019_v57  ;;  %v2058_v28 = vadd.f32 %v7292_v54, %v7315_v29 }
 0x2f4   : > { %6377 = vpow2.f32 %v4750_v14  ;;  %v2356_v46 = vpop.f32.mrf.mxu2 }
 0x2f5   : > { %v2415_v22 = vadd.f32 %v2356_v46, %v2054_v31  ;;  %6379 = vpow2.f32 %v4746_v23  ;;  %v3095_v15 = vmax.f32 %v3059_v1, 0.0 }
 0x2f6   : > { %v2728_v36 = vpop.f32.mrf.mxu3  ;;  %v2964_v53 = vpop.f32.mrf.mxu0 }
 0x2f7   : > { %v2784_v51 = vadd.f32 %v2725_v18, %v2415_v22  ;;  %v3220_v27 = vpop.f32.mrf.mxu1 }
 0x2f8   : > { %v7768_v25 = vadd.f32 %v7728_v24, %v3220_v27 }
 0x2f9   : > { %v3020_v26 = vadd.f32 %v2961_v56, %v2784_v51 }
 0x2fa   : > { %v7759_v50 = vpop.eup %6377  ;;  %10192 = vst [vmem:[#allocation5_spill] sm:$0xff] %v7768_v25  ;;  %v4752_v12 = vmul.f32 1.442695, %v7768_v25 }
 0x2fb   : > { %4858 = vrot.lane.b32.xlu2 %v7759_v50, %s6661_s30  ;;  %v3060_v16 = vadd.f32 %v7449_v13, %v3020_v26  ;;  %v6380_v10 = vpop.eup %6379 }
 0x2fc   : > { %v2359_v40 = vpop.f32.mrf.mxu2  ;;  %6381 = vpow2.f32 %v4752_v12 }
 0x2fd   : > { %v3096_v52 = vmax.f32 %v3060_v16, 0.0  ;;  %v2416_v19 = vadd.f32 %v2359_v40, %v7285_v59 }
 0x2fe   : > { %v2730_v42 = vpop.f32.mrf.mxu3  ;;  %v2966_v49 = vpop.f32.mrf.mxu0 }
 0x2ff   : > { %4854 = vrot.lane.b32.xlu0 %v6380_v10, %s6661_s30  ;;  %v3121_v45 = vpack.c.bf16 %v3096_v52, %v3095_v15  ;;  %v2785_v17 = vadd.f32 %v2728_v36, %v2416_v19  ;;  %v2060_v19 = vadd.f32 %v7317_v5, %v7336_v35 }
 0x301   : > { %6250 = vmatmul.msk.bf16.gmra.mxu1 %vm3149_vm8, %v3121_v45  ;;  %v3021_v48 = vadd.f32 %v2964_v53, %v2785_v17 }
 0x302   : > { %v6382_v39 = vpop.eup %6381 }
 0x303   : > { %v3061_v34 = vadd.f32 %v7449_v13, %v3021_v48 }
 0x304   : > { %v2361_v7 = vpop.f32.mrf.mxu2 }
 0x305   : > { %v2417_v4 = vadd.f32 %v2361_v7, %v2056_v9  ;;  %v3097_v38 = vmax.f32 %v3061_v34, 0.0 }
 0x306   : > { %v2733_v59 = vpop.f32.mrf.mxu3  ;;  %v2969_v63 = vpop.f32.mrf.mxu0 }
 0x307   : > { %4998 = vrot.lane.b32.xlu0 %v6380_v10, %s6660_s29  ;;  %v2786_v33 = vadd.f32 %v2730_v42, %v2417_v4 }
 0x309   : > { %v3022_v47 = vadd.f32 %v2966_v49, %v2786_v33 }
 0x30b   : > { %v3062_v6 = vadd.f32 %v7449_v13, %v3022_v47 }
 0x30c   : > { %4856 = vrot.lane.b32.xlu1 %v6376_v43, %s6661_s30  ;;  %v2364_v37 = vpop.f32.mrf.mxu2 }
 0x30d   : > { %v3098_v18 = vmax.f32 %v3062_v6, 0.0  ;;  %v2418_v56 = vadd.f32 %v2364_v37, %v7306_v32  ;;  %v3223_v32 = vpop.f32.mrf.mxu1 }
 0x30e   : > { %v2735_v8 = vpop.f32.mrf.mxu3  ;;  %v2971_v60 = vpop.f32.mrf.mxu0  ;;  %v7788_v40 = vadd.f32 %v7728_v24, %v3223_v32 }
 0x30f   : > { %4860 = vrot.lane.b32.xlu0 %v6382_v39, %s6661_s30  ;;  %v3122_v20 = vpack.c.bf16 %v3098_v18, %v3097_v38  ;;  %v2787_v14 = vadd.f32 %v2733_v59, %v2418_v56  ;;  %v10195_v38 = vld [vmem:[#allocation7_spill] sm:$0xff] }
 0x310   : > { %10193 = vst [vmem:[#allocation10_spill] sm:$0xff] %v7788_v40  ;;  %v3316_v52 = vsel %vm3303_vm9, %v7788_v40, -inf  ;;  %v2062_v18 = vadd.f32 %v10195_v38, %v7357_v44 }
 0x311   : > { %6251 = vmatmul.msk.bf16.gmra.mxu1 %vm3149_vm8, %v3122_v20  ;;  %v3023_v23 = vadd.f32 %v2969_v63, %v2787_v14 }
 0x313   : > { %v3063_v36 = vadd.f32 %v7449_v13, %v3023_v23 }
 0x314   : > { %v2366_v31 = vpop.f32.mrf.mxu2 }
 0x315   : > { %v2419_v43 = vadd.f32 %v2366_v31, %v2058_v28  ;;  %v3099_v26 = vmax.f32 %v3063_v36, 0.0  ;;  %v3225_v42 = vpop.f32.mrf.mxu1 }
 0x316   : > { %v2738_v46 = vpop.f32.mrf.mxu3  ;;  %v2974_v57 = vpop.f32.mrf.mxu0  ;;  %v7796_v12 = vadd.f32 %v7728_v24, %v3225_v42 }
 0x317   : > { %5004 = vrot.lane.b32.xlu0 %v6382_v39, %s6660_s29  ;;  %v2788_v22 = vadd.f32 %v2735_v8, %v2419_v43  ;;  %v3313_v8 = vsel %vm3303_vm9, %v7768_v25, -inf }
 0x318   : > { %10194 = vst [vmem:[#allocation11_spill] sm:$0xff] %v7796_v12  ;;  %v3319_v59 = vsel %vm3303_vm9, %v7796_v12, -inf }
 0x319   : > { %v3024_v53 = vadd.f32 %v2971_v60, %v2788_v22 }
 0x31b   : > { %v3064_v51 = vadd.f32 %v7449_v13, %v3024_v53 }
 0x31c   : > { %v2369_v1 = vpop.f32.mrf.mxu2 }
 0x31d   : > { %v3100_v16 = vmax.f32 %v3064_v51, 0.0  ;;  %v2420_v27 = vadd.f32 %v2369_v1, %v7327_v3  ;;  %v3228_v23 = vpop.f32.mrf.mxu1 }
 0x31e   : > { %v2740_v54 = vpop.f32.mrf.mxu3  ;;  %v2976_v29 = vpop.f32.mrf.mxu0 }
 0x31f   : > { %v3123_v10 = vpack.c.bf16 %v3100_v16, %v3099_v26  ;;  %v2789_v15 = vadd.f32 %v2738_v46, %v2420_v27 }
 0x321   : > { %6252 = vmatmul.msk.bf16.gmra.mxu1 %vm3149_vm8, %v3123_v10  ;;  %v3025_v45 = vadd.f32 %v2974_v57, %v2789_v15  ;;  %v7811_v57 = vadd.f32 %v7728_v24, %v3228_v23 }
 0x323   : > { %v3065_v48 = vadd.f32 %v7449_v13, %v3025_v45  ;;  %10196 = vst [vmem:[#allocation7_spill] sm:$0xff] %v7811_v57  ;;  %v3322_v16 = vsel %vm3303_vm9, %v7811_v57, -inf }
 0x324   : > { %3317 = vmax.xlane.f32.xlu2 %v3316_v52  ;;  %v2371_v49 = vpop.f32.mrf.mxu2 }
 0x325   : > { %v2421_v3 = vadd.f32 %v2371_v49, %v2060_v19  ;;  %v3101_v35 = vmax.f32 %v3065_v48, 0.0  ;;  %v4758_v49 = vmul.f32 1.442695, %v7811_v57  ;;  %v7822_v45 = vpop.f32.mrf.mxu1 }
 0x326   : > { %v2743_v17 = vpop.f32.mrf.mxu3  ;;  %v2979_v9 = vpop.f32.mrf.mxu0 }
 0x327   : > { %v2790_v7 = vadd.f32 %v2740_v54, %v2421_v3  ;;  %v6598_v3 = vld [vmem:[%s10082_s2] ss:$0 sm:$0xff] }
 0x329   : > { %v3026_v4 = vadd.f32 %v2976_v29, %v2790_v7  ;;  %v10197_v29 = vld [vmem:[#allocation8_spill] sm:$0xff] }
 0x32b   : > { %v3066_v63 = vadd.f32 %v7449_v13, %v3026_v4 }
 0x32c   : > { %3320 = vmax.xlane.f32.xlu2 %v3319_v59  ;;  %v2374_v5 = vpop.f32.mrf.mxu2 }
 0x32d   : > { %v3102_v33 = vmax.f32 %v3066_v63, 0.0  ;;  %v2422_v34 = vadd.f32 %v2374_v5, %v7348_v30  ;;  %v4754_v30 = vmul.f32 1.442695, %v7788_v40  ;;  %v10198_v63 = vld [vmem:[#allocation9_spill] sm:$0xff] }
 0x32e   : > { %v2745_v47 = vpop.f32.mrf.mxu3  ;;  %v2981_v6 = vpop.f32.mrf.mxu0 }
 0x32f   : > { %v3124_v37 = vpack.c.bf16 %v3102_v33, %v3101_v35  ;;  %v2791_v39 = vadd.f32 %v2743_v17, %v2422_v34  ;;  %6383 = vpow2.f32 %v4754_v30 }
 0x330   : > { %6385 = vpow2.f32 %v4758_v49 }
 0x331   : > { %6253 = vmatmul.msk.bf16.gmra.mxu1 %vm3149_vm8, %v3124_v37  ;;  %v3027_v60 = vadd.f32 %v2979_v9, %v2791_v39  ;;  %v2066_v37 = vadd.f32 %v7395_v58, %v7399_v62  ;;  %v3233_v39 = vpop.f32.mrf.mxu1 }
 0x333   : > { %v3067_v43 = vadd.f32 %v7449_v13, %v3027_v60 }
 0x334   : > { %v2376_v56 = vpop.f32.mrf.mxu2 }
 0x335   : > { %v2423_v20 = vadd.f32 %v2376_v56, %v2062_v18  ;;  %v3103_v32 = vmax.f32 %v3067_v43, 0.0  ;;  %v6384_v54 = vpop.eup %6383 }
 0x336   : > { %3314 = vmax.xlane.f32.xlu1 %v3313_v8  ;;  %v2748_v14 = vpop.f32.mrf.mxu3  ;;  %v2984_v28 = vpop.f32.mrf.mxu0 }
 0x337   : > { %v2792_v31 = vadd.f32 %v2745_v47, %v2423_v20 }
 0x339   : > { %v3028_v46 = vadd.f32 %v2981_v6, %v2792_v31  ;;  %v6386_v6 = vpop.eup %6385  ;;  %v3235_v23 = vpop.f32.mrf.mxu1 }
 0x33a   : > { %v7855_v49 = vadd.f32 %v7728_v24, %v3235_v23 }
 0x33b   : > { %v3068_v44 = vadd.f32 %v7449_v13, %v3028_v46  ;;  %v2064_v13 = vadd.f32 %v10197_v29, %v7378_v41  ;;  %v4756_v41 = vmul.f32 1.442695, %v7796_v12 }
 0x33c   : > { %v2379_v22 = vpop.f32.mrf.mxu2 }
 0x33d   : > { %v3104_v36 = vmax.f32 %v3068_v44, 0.0  ;;  %v2424_v53 = vadd.f32 %v2379_v22, %v7369_v55  ;;  %6387 = vpow2.f32 %v4756_v41  ;;  %v10199_v22 = vld [vmem:[#allocation2_spill] sm:$0xff]  ;;  %v7863_v41 = vpop.permute.xlu0 %5545 }
 0x33e   : > { %v2750_v51 = vpop.f32.mrf.mxu3  ;;  %v2986_v1 = vpop.f32.mrf.mxu0  ;;  %10202 = vst [vmem:[#allocation2_spill] sm:$0xff] %v7855_v49 }
 0x33f   : > { %v3125_v26 = vpack.c.bf16 %v3104_v36, %v3103_v32  ;;  %v2793_v27 = vadd.f32 %v2748_v14, %v2424_v53  ;;  %v2068_v32 = vadd.f32 %v7718_v11, %v10199_v22  ;;  %10203 = vst [vmem:[#allocation12_spill] sm:$0xff] %v7863_v41 }
 0x341   : > { %3323 = vmax.xlane.f32.xlu0 %v3322_v16  ;;  %6254 = vmatmul.msk.bf16.gmra.mxu1 %vm3149_vm8, %v3125_v26  ;;  %v3029_v15 = vadd.f32 %v2984_v28, %v2793_v27  ;;  %v3238_v16 = vpop.f32.mrf.mxu1 }
 0x343   : > { %v3069_v17 = vadd.f32 %v6598_v3, %v3029_v15  ;;  %v6388_v18 = vpop.eup %6387  ;;  %v7844_v15 = vadd.f32 %v7728_v24, %v3233_v39 }
 0x344   : > { %4862 = vrot.lane.b32.xlu2 %v6384_v54, %s6661_s30  ;;  %v2381_v10 = vpop.f32.mrf.mxu2 }
 0x345   : > { %v2425_v52 = vadd.f32 %v2381_v10, %v2064_v13  ;;  %v3105_v4 = vmax.f32 %v3069_v17, 0.0  ;;  %10200 = vst [vmem:[#allocation8_spill] sm:$0xff] %v7844_v15  ;;  %v3328_v11 = vsel %vm3303_vm9, %v7844_v15, -inf }
 0x346   : > { %v2753_v55 = vpop.f32.mrf.mxu3  ;;  %v2989_v42 = vpop.f32.mrf.mxu0 }
 0x347   : > { %v2794_v19 = vadd.f32 %v2750_v51, %v2425_v52 }
 0x349   : > { %v3030_v9 = vadd.f32 %v2986_v1, %v2794_v19  ;;  %v7851_v19 = vadd.f32 %v7728_v24, %v7822_v45  ;;  %v4764_v45 = vmul.f32 1.442695, %v7855_v49 }
 0x34b   : > { %v3070_v7 = vadd.f32 %v6598_v3, %v3030_v9  ;;  %10201 = vst [vmem:[#allocation9_spill] sm:$0xff] %v7851_v19  ;;  %v3325_v17 = vsel %vm3303_vm9, %v7851_v19, -inf }
 0x34c   : > { %5006 = vrot.lane.b32.xlu2 %v6384_v54, %s6660_s29  ;;  %v2384_v48 = vpop.f32.mrf.mxu2 }
 0x34d   : > { %v3106_v59 = vmax.f32 %v3070_v7, 0.0  ;;  %v2426_v5 = vadd.f32 %v2384_v48, %v10198_v63  ;;  %v4762_v7 = vmul.f32 1.442695, %v7844_v15 }
 0x34e   : > { %v2755_v33 = vpop.f32.mrf.mxu3  ;;  %v2991_v47 = vpop.f32.mrf.mxu0 }
 0x34f   : > { %5002 = vrot.lane.b32.xlu1 %v7759_v50, %s6660_s29  ;;  %v3126_v35 = vpack.c.bf16 %v3106_v59, %v3105_v4  ;;  %v2795_v34 = vadd.f32 %v2753_v55, %v2426_v5  ;;  %v3240_v55 = vpop.f32.mrf.mxu1  ;;  %v7867_v4 = vpop.permute.xlu0 %5551 }
 0x350   : > { %10204 = vst [vmem:[#allocation13_spill] sm:$0xff] %v7867_v4 }
 0x351   : > { %6255 = vmatmul.msk.bf16.gmra.mxu1 %vm3149_vm8, %v3126_v35  ;;  %v3031_v56 = vadd.f32 %v2989_v42, %v2795_v34  ;;  %v4760_v42 = vmul.f32 1.442695, %v7851_v19 }
 0x353   : > { %v3071_v60 = vadd.f32 %v6598_v3, %v3031_v56  ;;  %6389 = vpow2.f32 %v4760_v42 }
 0x354   : > { %v2386_v38 = vpop.f32.mrf.mxu2  ;;  %6391 = vpow2.f32 %v4764_v45 }
 0x355   : > { %4866 = vrot.lane.b32.xlu0 %v6386_v6, %s6661_s30  ;;  %v2427_v8 = vadd.f32 %v2386_v38, %v2066_v37  ;;  %v3107_v58 = vmax.f32 %v3071_v60, 0.0  ;;  %6393 = vpow2.f32 %v4762_v7  ;;  %v7887_v37 = vadd.f32 %v7728_v24, %v3238_v16 }
 0x356   : > { %v2758_v14 = vpop.f32.mrf.mxu3  ;;  %v2994_v30 = vpop.f32.mrf.mxu0 }
 0x357   : > { %4864 = vrot.lane.b32.xlu1 %v6388_v18, %s6661_s30  ;;  %v2796_v50 = vadd.f32 %v2755_v33, %v2427_v8  ;;  %v7872_v63 = vpop.permute.xlu0 %5557  ;;  %v7880_v33 = vadd.f32 %v7728_v24, %v3240_v55  ;;  %10210 = vst [vmem:[#allocation19_spill] sm:$0xff] %v7887_v37  ;;  %v4766_v38 = vmul.f32 1.442695, %v7887_v37  ;;  %v3334_v8 = vsel %vm3303_vm9, %v7887_v37, -inf }
 0x358   : > { %10205 = vst [vmem:[#allocation14_spill] sm:$0xff] %v7872_v63 }
 0x359   : > { %v3032_v20 = vadd.f32 %v2991_v47, %v2796_v50  ;;  %v6390_v9 = vpop.eup %6389  ;;  %10208 = vst [vmem:[#allocation17_spill] sm:$0xff] %v7880_v33  ;;  %v3337_v34 = vsel %vm3303_vm9, %v7880_v33, -inf  ;;  %6395 = vpow2.f32 %v4766_v38  ;;  %v4768_v23 = vmul.f32 1.442695, %v7880_v33 }
 0x35a   : > { %v6392_v48 = vpop.eup %6391 }
 0x35b   : > { %v3072_v28 = vadd.f32 %v6598_v3, %v3032_v20  ;;  %v6394_v59 = vpop.eup %6393 }
 0x35c   : > { %v2389_v31 = vpop.f32.mrf.mxu2 }
 0x35d   : > { %5010 = vrot.lane.b32.xlu0 %v6386_v6, %s6660_s29  ;;  %v3108_v62 = vmax.f32 %v3072_v28, 0.0  ;;  %v2428_v43 = vadd.f32 %v2389_v31, %v7413_v0  ;;  %v3243_v6 = vpop.f32.mrf.mxu1 }
 0x35e   : > { %v2760_v53 = vpop.f32.mrf.mxu3  ;;  %v2996_v26 = vpop.f32.mrf.mxu0  ;;  %v7890_v39 = vadd.f32 %v7728_v24, %v3243_v6 }
 0x35f   : > { %5008 = vrot.lane.b32.xlu1 %v6388_v18, %s6660_s29  ;;  %v3127_v46 = vpack.c.bf16 %v3108_v62, %v3107_v58  ;;  %v2797_v44 = vadd.f32 %v2758_v14, %v2428_v43  ;;  %v7875_v5 = vpop.permute.xlu0 %5563  ;;  %v6396_v50 = vpop.eup %6395 }
 0x360   : > { %10206 = vst [vmem:[#allocation15_spill] sm:$0xff] %v7875_v5  ;;  %v3340_v18 = vsel %vm3303_vm9, %v7890_v39, -inf  ;;  %v4770_v60 = vmul.f32 1.442695, %v7890_v39  ;;  %v7903_v14 = vpop.permute.xlu1 %5543 }
 0x361   : > { %6256 = vmatmul.msk.bf16.gmra.mxu1 %vm3149_vm8, %v3127_v46  ;;  %v3033_v51 = vadd.f32 %v2994_v30, %v2797_v44  ;;  %10211 = vst [vmem:[#allocation20_spill] sm:$0xff] %v7890_v39  ;;  %v7917_v46 = vpop.permute.xlu2 %5541 }
 0x362   : > { %10214 = vst [vmem:[#allocation23_spill] sm:$0xff] %v7903_v14  ;;  %6397 = vpow2.f32 %v4770_v60 }
 0x363   : > { %v3073_v54 = vadd.f32 %v6598_v3, %v3033_v51  ;;  %6399 = vpow2.f32 %v4768_v23  ;;  %10219 = vst [vmem:[#allocation28_spill] sm:$0xff] %v7917_v46 }
 0x364   : > { %v2391_v36 = vpop.f32.mrf.mxu2 }
 0x365   : > { %v2429_v1 = vadd.f32 %v2391_v36, %v2068_v32  ;;  %v3109_v0 = vmax.f32 %v3073_v54, 0.0  ;;  %v3245_v36 = vpop.f32.mrf.mxu1  ;;  %v3412_v54 = vlaneseq }
 0x366   : > { %v7953_v42 = vadd.f32 %v7728_v24, %v3245_v36 }
 0x367   : > { %v2798_v27 = vadd.f32 %v2760_v53, %v2429_v1  ;;  %v7877_v35 = vpop.permute.xlu0 %5569 }
 0x368   : > { %10207 = vst [vmem:[#allocation16_spill] sm:$0xff] %v7877_v35  ;;  %v6398_v28 = vpop.eup %6397  ;;  %v7909_v30 = vpop.permute.xlu1 %5549  ;;  %v4772_v7 = vmul.f32 1.442695, %v7953_v42 }
 0x369   : > { %v3034_v29 = vadd.f32 %v2996_v26, %v2798_v27  ;;  %10216 = vst [vmem:[#allocation25_spill] sm:$0xff] %v7909_v30  ;;  %v6400_v43 = vpop.eup %6399  ;;  %v7920_v44 = vpop.permute.xlu2 %5547 }
 0x36a   : > { %10220 = vst [vmem:[#allocation29_spill] sm:$0xff] %v7920_v44  ;;  %6401 = vpow2.f32 %v4772_v7 }
 0x36b   : > { %v3074_v13 = vadd.f32 %v6598_v3, %v3034_v29  ;;  %v3331_v3 = vsel %vm3303_vm9, %v7855_v49, -inf  ;;  %10230 = vst [vmem:[#allocation39_spill] sm:$0xff] %v7953_v42 }
 0x36d   : > { %v3110_v10 = vmax.f32 %v3074_v13, 0.0  ;;  %v3248_v26 = vpop.f32.mrf.mxu1 }
 0x36e   : > { %v7934_v16 = vadd.f32 %v7728_v24, %v3248_v26  ;;  %v6599_v26 = vld [vmem:[%s10085_s5] sm:$0xff] }
 0x36f   : > { %v3128_v52 = vpack.c.bf16 %v3110_v10, %v3109_v0  ;;  %v7884_v47 = vpop.permute.xlu0 %5575 }
 0x370   : > { %10209 = vst [vmem:[#allocation18_spill] sm:$0xff] %v7884_v47  ;;  %v7913_v58 = vpop.permute.xlu1 %5555  ;;  %v3346_v27 = vsel %vm3303_vm9, %v7934_v16, -inf  ;;  %v4774_v36 = vmul.f32 1.442695, %v7934_v16 }
 0x371   : > { %6257 = vmatmul.msk.bf16.gmra.mxu1 %vm3149_vm8, %v3128_v52  ;;  %10217 = vst [vmem:[#allocation26_spill] sm:$0xff] %v7913_v58  ;;  %v7927_v53 = vpop.permute.xlu2 %5553  ;;  %v7944_v52 = vand.u32 127, %v3412_v54 }
 0x372   : > { %10223 = vst [vmem:[#allocation32_spill] sm:$0xff] %v7927_v53 }
 0x373   : > { %10226 = vst [vmem:[#allocation35_spill] sm:$0xff] %v7934_v16 }
 0x375   : > { %3329 = vmax.xlane.f32.xlu2 %v3328_v11  ;;  %v3250_v10 = vpop.f32.mrf.mxu1 }
 0x376   : > { %v7949_v55 = vadd.f32 %v7728_v24, %v3250_v10 }
 0x377   : > { %v7895_v56 = vpop.permute.xlu0 %5581 }
 0x378   : > { %10212 = vst [vmem:[#allocation21_spill] sm:$0xff] %v7895_v56  ;;  %v7922_v22 = vpop.permute.xlu1 %5561 }
 0x379   : > { %10221 = vst [vmem:[#allocation30_spill] sm:$0xff] %v7922_v22  ;;  %v7938_v29 = vpop.permute.xlu2 %5559 }
 0x37a   : > { %10227 = vst [vmem:[#allocation36_spill] sm:$0xff] %v7938_v29 }
 0x37b   : > { %10229 = vst [vmem:[#allocation38_spill] sm:$0xff] %v7949_v55 }
 0x37f   : > { %v7901_v20 = vpop.permute.xlu0 %5587 }
 0x380   : > { %10213 = vst [vmem:[#allocation22_spill] sm:$0xff] %v7901_v20  ;;  %v7929_v51 = vpop.permute.xlu1 %5567 }
 0x381   : > { %10224 = vst [vmem:[#allocation33_spill] sm:$0xff] %v7929_v51 }
 0x387   : > { %3332 = vmax.xlane.f32.xlu0 %v3331_v3  ;;  %v7906_v31 = vpop.permute.xlu0 %5593  ;;  %v3349_v3 = vsel %vm3303_vm9, %v7949_v55, -inf }
 0x388   : > { %10215 = vst [vmem:[#allocation24_spill] sm:$0xff] %v7906_v31  ;;  %v7940_v13 = vpop.permute.xlu1 %5573 }
 0x389   : > { %3326 = vmax.xlane.f32.xlu1 %v3325_v17  ;;  %10228 = vst [vmem:[#allocation37_spill] sm:$0xff] %v7940_v13 }
 0x38d   : > { %4868 = vrot.lane.b32.xlu2 %v6390_v9, %s6661_s30 }
 0x38f   : > { %v7915_v62 = vpop.permute.xlu0 %5599 }
 0x390   : > { %10218 = vst [vmem:[#allocation27_spill] sm:$0xff] %v7915_v62  ;;  %v7962_v45 = vpop.permute.xlu1 %5579 }
 0x391   : > { %10232 = vst [vmem:[#allocation41_spill] sm:$0xff] %v7962_v45 }
 0x395   : > { %5012 = vrot.lane.b32.xlu2 %v6390_v9, %s6660_s29  ;;  %v7960_v9 = vpop.permute.xlu2 %5565 }
 0x396   : > { %10231 = vst [vmem:[#allocation40_spill] sm:$0xff] %v7960_v9 }
 0x397   : > { %v7924_v32 = vpop.permute.xlu0 %5605 }
 0x398   : > { %10222 = vst [vmem:[#allocation31_spill] sm:$0xff] %v7924_v32  ;;  %v7973_v38 = vpop.permute.xlu1 %5585 }
 0x399   : > { %10234 = vst [vmem:[#allocation43_spill] sm:$0xff] %v7973_v38 }
 0x39b   : > { %4872 = vrot.lane.b32.xlu0 %v6392_v48, %s6661_s30 }
 0x39d   : > { %v7971_v6 = vpop.permute.xlu2 %5571 }
 0x39e   : > { %10233 = vst [vmem:[#allocation42_spill] sm:$0xff] %v7971_v6 }
 0x39f   : > { %v7931_v1 = vpop.permute.xlu0 %5611 }
 0x3a0   : > { %10225 = vst [vmem:[#allocation34_spill] sm:$0xff] %v7931_v1 }
 0x3a2   : > { %4870 = vrot.lane.b32.xlu1 %v6394_v59, %s6661_s30 }
 0x3a3   : > { %5016 = vrot.lane.b32.xlu0 %v6392_v48, %s6660_s29 }
 0x3a5   : > { %v7980_v60 = vpop.permute.xlu2 %5577 }
 0x3a6   : > { %10235 = vst [vmem:[#allocation44_spill] sm:$0xff] %v7980_v60  ;;  %v6602_v60 = vld [vmem:[%s10085_s5 + $0x10] sm:$0xff] }
 0x3a7   : > { %v7942_v0 = vpop.xlane.xlu0 %3305 }
 0x3a8   : > { %vm3414_vm10 = vcmp.eq.f32.partialorder %v7732_v61, %v7942_v0 }
 0x3a9   : > { %v3450_v11 = vsel %vm3414_vm10, %v7944_v52, 8 }
 0x3aa   : > { %5014 = vrot.lane.b32.xlu1 %v6394_v59, %s6660_s29  ;;  %v7958_v17 = vsel %vm3303_vm9, %v3450_v11, 2147483647 }
 0x3ab   : > { %v3488_v48 = vshra.s32 %v7958_v17, 16 }
 0x3ad   : > { %v7991_v54 = vpop.permute.xlu2 %5583 }
 0x3ae   : > { %10237 = vst [vmem:[#allocation46_spill] sm:$0xff] %v7991_v54 }
 0x3af   : > { %v7966_v59 = vpop.xlane.xlu0 %3308 }
 0x3b0   : > { %vm3415_vm11 = vcmp.eq.f32.partialorder %v7740_v21, %v7966_v59  ;;  %v8181_v21 = vld [vmem:[%s10085_s5 + $0x20] sm:$0xff] }
 0x3b1   : > { %10270 = vst [vmem:[#allocation79_spill] sm:$0xff] %v8181_v21 }
 0x3b5   : > { %v7997_v7 = vpop.permute.xlu2 %5589 }
 0x3b6   : > { %10239 = vst [vmem:[#allocation48_spill] sm:$0xff] %v7997_v7 }
 0x3be   : > { %3338 = vmax.xlane.f32.xlu2 %v3337_v34  ;;  %v7968_v34 = vcvt.s32.f32 %v3488_v48 }
 0x3cd   : > { %3341 = vmax.xlane.f32.xlu0 %v3340_v18  ;;  %v6402_v18 = vpop.eup %6401 }
 0x3d4   : > { %3335 = vmax.xlane.f32.xlu1 %v3334_v8  ;;  %v3343_v8 = vsel %vm3303_vm9, %v7953_v42, -inf }
 0x3d6   : > { %4874 = vrot.lane.b32.xlu2 %v6396_v50, %s6661_s30 }
 0x3de   : > { %5018 = vrot.lane.b32.xlu2 %v6396_v50, %s6660_s29  ;;  %v7978_v50 = vpop.permute.xlu0 %4854 }
 0x3e1   : > { %4878 = vrot.lane.b32.xlu0 %v6398_v28, %s6661_s30 }
 0x3e6   : > { %v4999_v23 = vpop.permute.xlu0 %4998 }
 0x3e9   : > { %5022 = vrot.lane.b32.xlu0 %v6398_v28, %s6660_s29  ;;  %v7982_v28 = vpop.permute.xlu1 %5591 }
 0x3ea   : > { %10236 = vst [vmem:[#allocation45_spill] sm:$0xff] %v7982_v28 }
 0x3ed   : > { %4876 = vrot.lane.b32.xlu1 %v6400_v43, %s6661_s30 }
 0x3f1   : > { %v7993_v10 = vpop.permute.xlu1 %5597 }
 0x3f2   : > { %10238 = vst [vmem:[#allocation47_spill] sm:$0xff] %v7993_v10 }
 0x3f5   : > { %5020 = vrot.lane.b32.xlu1 %v6400_v43, %s6660_s29  ;;  %v4776_v43 = vmul.f32 1.442695, %v7949_v55 }
 0x3f7   : > { %6403 = vpow2.f32 %v4776_v43 }
 0x3f8   : > { %6405 = vpow2.f32 %v4774_v36 }
 0x3f9   : > { %v7999_v48 = vpop.permute.xlu1 %5603 }
 0x3fa   : > { %10240 = vst [vmem:[#allocation49_spill] sm:$0xff] %v7999_v48 }
 0x3fd   : > { %v6404_v11 = vpop.eup %6403 }
 0x407   : > { %3347 = vmax.xlane.f32.xlu2 %v3346_v27  ;;  %v5106_v27 = vadd.f32 %v6599_v26, %v4999_v23  ;;  %v8008_v23 = vpop.permute.xlu1 %5609  ;;  %v3253_v26 = vpop.f32.mrf.mxu1 }
 0x408   : > { %10242 = vst [vmem:[#allocation51_spill] sm:$0xff] %v8008_v23 }
 0x40f   : > { %v3255_v1 = vpop.f32.mrf.mxu1 }
 0x410   : > { %v8071_v56 = vadd.f32 %v7728_v24, %v3255_v1 }
 0x412   : > { %10252 = vst [vmem:[#allocation61_spill] sm:$0xff] %v8071_v56 }
 0x413   : > { %3350 = vmax.xlane.f32.xlu0 %v3349_v3  ;;  %v6406_v3 = vpop.eup %6405 }
 0x41b   : > { %3491 = vmin.xlane.f32.xlu0 %v7968_v34 }
 0x41f   : > { %3344 = vmax.xlane.f32.xlu1 %v3343_v8  ;;  %4880 = vrot.lane.b32.xlu2 %v6402_v18, %s6661_s30  ;;  %v8006_v8 = vpop.permute.xlu2 %5595 }
 0x420   : > { %10241 = vst [vmem:[#allocation50_spill] sm:$0xff] %v8006_v8 }
 0x427   : > { %5024 = vrot.lane.b32.xlu2 %v6402_v18, %s6660_s29  ;;  %v3451_v18 = vsel %vm3415_vm11, %v7944_v52, 8 }
 0x428   : > { %v8011_v43 = vsel %vm3303_vm9, %v3451_v18, 2147483647  ;;  %v3258_v18 = vpop.f32.mrf.mxu1 }
 0x429   : > { %v3503_v36 = vshra.s32 %v8011_v43, 16 }
 0x42f   : > { %5214 = vrot.lane.b32.xlu0 %v5106_v27, %s6662_s13  ;;  %v8014_v27 = vcvt.s32.f32 %v3503_v36  ;;  %v8032_v36 = vadd.f32 %v7728_v24, %v3258_v18 }
 0x431   : > { %10247 = vst [vmem:[#allocation56_spill] sm:$0xff] %v8032_v36  ;;  %v3358_v18 = vsel %vm3303_vm9, %v8032_v36, -inf  ;;  %v4782_v54 = vmul.f32 1.442695, %v8032_v36 }
 0x433   : > { %6407 = vpow2.f32 %v4782_v54  ;;  %v3355_v54 = vsel %vm3303_vm9, %v8071_v56, -inf }
 0x437   : > { %4884 = vrot.lane.b32.xlu0 %v6404_v11, %s6661_s30 }
 0x438   : > { %4882 = vrot.lane.b32.xlu1 %v6406_v3, %s6661_s30 }
 0x439   : > { %v6408_v13 = vpop.eup %6407 }
 0x43f   : > { %5028 = vrot.lane.b32.xlu0 %v6404_v11, %s6660_s29  ;;  %v8016_v11 = vpop.permute.xlu2 %5601 }
 0x440   : > { %5026 = vrot.lane.b32.xlu1 %v6406_v3, %s6660_s29  ;;  %10243 = vst [vmem:[#allocation52_spill] sm:$0xff] %v8016_v11  ;;  %v8018_v3 = vpop.xlane.xlu1 %3311  ;;  %v8035_v11 = vadd.f32 %v7728_v24, %v3253_v26 }
 0x441   : > { %10244 = vst [vmem:[#allocation53_spill] sm:$0xff] %v8018_v3  ;;  %vm3416_vm13 = vcmp.eq.f32.partialorder %v7749_v2, %v8018_v3 }
 0x442   : > { %10248 = vst [vmem:[#allocation57_spill] sm:$0xff] %v8035_v11  ;;  %v3452_v31 = vsel %vm3416_vm13, %v7944_v52, 8  ;;  %v3352_v26 = vsel %vm3303_vm9, %v8035_v11, -inf }
 0x443   : > { %v8054_v7 = vsel %vm3303_vm9, %v3452_v31, 2147483647  ;;  %v6601_v31 = vld [vmem:[%s10085_s5 + $0x18] sm:$0xff] }
 0x444   : > { %10249 = vst [vmem:[#allocation58_spill] sm:$0xff] %v8054_v7  ;;  %v3518_v20 = vshra.s32 %v8054_v7, 16 }
 0x447   : > { %v8023_v48 = vpop.permute.xlu2 %5607 }
 0x448   : > { %v8021_v32 = vpop.permute.xlu1 %4856  ;;  %10245 = vst [vmem:[#allocation54_spill] sm:$0xff] %v8023_v48  ;;  %v8041_v48 = vld [vmem:[%s10085_s5 + $0x8] sm:$0xff] }
 0x44f   : > { %v5001_v62 = vpop.permute.xlu2 %5000 }
 0x450   : > { %3506 = vmin.xlane.f32.xlu2 %v8014_v27  ;;  %v8025_v23 = vpop.xlane.xlu1 %3314  ;;  %v5107_v8 = vadd.f32 %v8041_v48, %v5001_v62 }
 0x451   : > { %10246 = vst [vmem:[#allocation55_spill] sm:$0xff] %v8025_v23  ;;  %vm3417_vm12 = vcmp.eq.f32.partialorder %v7768_v25, %v8025_v23 }
 0x452   : > { %v3453_v10 = vsel %vm3417_vm12, %v7944_v52, 8 }
 0x453   : > { %v8049_v28 = vsel %vm3303_vm9, %v3453_v10, 2147483647  ;;  %v8064_v10 = vpop.permute.xlu0 %4860 }
 0x454   : > { %v3533_v62 = vshra.s32 %v8049_v28, 16  ;;  %10251 = vst [vmem:[#allocation60_spill] sm:$0xff] %v8064_v10 }
 0x456   : > { %v8058_v38 = vcvt.s32.f32 %v3533_v62  ;;  %v4780_v62 = vmul.f32 1.442695, %v8071_v56 }
 0x458   : > { %6409 = vpow2.f32 %v4780_v62  ;;  %v8092_v62 = vpop.permute.xlu2 %4858 }
 0x459   : > { %10256 = vst [vmem:[#allocation65_spill] sm:$0xff] %v8092_v62 }
 0x460   : > { %v8097_v35 = vpop.xlane.xlu2 %3317 }
 0x461   : > { %vm3418_vm0 = vcmp.eq.f32.partialorder %v7788_v40, %v8097_v35 }
 0x468   : > { %5216 = vrot.lane.b32.xlu2 %v5107_v8, %s6662_s13  ;;  %v8060_v8 = vcvt.s32.f32 %v3518_v20  ;;  %v5003_v20 = vpop.permute.xlu1 %5002  ;;  %v8107_v51 = vpop.xlane.xlu2 %3320 }
 0x469   : > { %3359 = vmax.xlane.f32.xlu0 %v3358_v18  ;;  %v5005_v18 = vpop.permute.xlu0 %5004  ;;  %v5108_v47 = vadd.f32 %v6602_v60, %v5003_v20  ;;  %10259 = vst [vmem:[#allocation68_spill] sm:$0xff] %v8107_v51  ;;  %vm3419_vm15 = vcmp.eq.f32.partialorder %v7796_v12, %v8107_v51  ;;  %v3454_v12 = vsel %vm3418_vm0, %v7944_v52, 8 }
 0x46a   : > { %3353 = vmax.xlane.f32.xlu1 %v3352_v26  ;;  %10250 = vst [vmem:[#allocation59_spill] sm:$0xff] %v8060_v8  ;;  %v5109_v26 = vadd.f32 %v6601_v31, %v5005_v18  ;;  %v6410_v18 = vpop.eup %6409  ;;  %v3455_v63 = vsel %vm3419_vm15, %v7944_v52, 8 }
 0x470   : > { %v8149_v30 = vpop.permute.xlu1 %4864  ;;  %v8165_v61 = vpop.permute.xlu2 %4862 }
 0x471   : > { %3536 = vmin.xlane.f32.xlu0 %v8058_v38  ;;  %v8075_v45 = vpop.xlane.xlu0 %3323  ;;  %10266 = vst [vmem:[#allocation75_spill] sm:$0xff] %v8149_v30 }
 0x472   : > { %3521 = vmin.xlane.f32.xlu1 %v8060_v8  ;;  %10253 = vst [vmem:[#allocation62_spill] sm:$0xff] %v8075_v45  ;;  %vm3420_vm14 = vcmp.eq.f32.partialorder %v7811_v57, %v8075_v45  ;;  %v8129_v57 = vsel %vm3303_vm9, %v3455_v63, 2147483647  ;;  %v8144_v63 = vsel %vm3303_vm9, %v3454_v12, 2147483647 }
 0x473   : > { %v3456_v9 = vsel %vm3420_vm14, %v7944_v52, 8  ;;  %10263 = vst [vmem:[#allocation72_spill] sm:$0xff] %v8129_v57 }
 0x474   : > { %v8117_v22 = vsel %vm3303_vm9, %v3456_v9, 2147483647  ;;  %v3563_v9 = vshra.s32 %v8129_v57, 16  ;;  %10268 = vst [vmem:[#allocation77_spill] sm:$0xff] %v8165_v61 }
 0x478   : > { %v5009_v2 = vpop.permute.xlu1 %5008  ;;  %v5007_v14 = vpop.permute.xlu2 %5006 }
 0x479   : > { %v8082_v1 = vpop.permute.xlu0 %4866 }
 0x47a   : > { %10254 = vst [vmem:[#allocation63_spill] sm:$0xff] %v8082_v1 }
 0x481   : > { %v5011_v31 = vpop.permute.xlu0 %5010 }
 0x485   : > { %5220 = vrot.lane.b32.xlu0 %v5109_v26, %s6662_s13  ;;  %v3260_v26 = vpop.f32.mrf.mxu1 }
 0x486   : > { %v8120_v29 = vadd.f32 %v7728_v24, %v3260_v26  ;;  %v8137_v26 = vcvt.s32.f32 %v3563_v9  ;;  %v6603_v9 = vld [vmem:[%s10085_s5 + $0x30] sm:$0xff] }
 0x487   : > { %v5112_v25 = vadd.f32 %v6603_v9, %v5011_v31  ;;  %v6604_v31 = vld [vmem:[%s10085_s5 + $0x28] sm:$0xff] }
 0x488   : > { %10261 = vst [vmem:[#allocation70_spill] sm:$0xff] %v8120_v29  ;;  %v3361_v53 = vsel %vm3303_vm9, %v8120_v29, -inf  ;;  %v5111_v9 = vadd.f32 %v6604_v31, %v5009_v2  ;;  %v5110_v2 = vadd.f32 %v8181_v21, %v5007_v14  ;;  %v4784_v1 = vmul.f32 1.442695, %v8120_v29 }
 0x489   : > { %v8090_v60 = vpop.xlane.xlu0 %3332  ;;  %10264 = vst [vmem:[#allocation73_spill] sm:$0xff] %v8137_v26 }
 0x48a   : > { %10255 = vst [vmem:[#allocation64_spill] sm:$0xff] %v8090_v60  ;;  %vm3423_vm2 = vcmp.eq.f32.partialorder %v7855_v49, %v8090_v60 }
 0x48b   : > { %5218 = vrot.lane.b32.xlu1 %v5108_v47, %s6662_s13  ;;  %v4778_v47 = vmul.f32 1.442695, %v8035_v11 }
 0x48d   : > { %4890 = vrot.lane.b32.xlu0 %v6408_v13, %s6661_s30  ;;  %6411 = vpow2.f32 %v4778_v47  ;;  %v3263_v6 = vpop.f32.mrf.mxu1 }
 0x48e   : > { %v8160_v12 = vadd.f32 %v7728_v24, %v3263_v6 }
 0x490   : > { %10267 = vst [vmem:[#allocation76_spill] sm:$0xff] %v8160_v12 }
 0x491   : > { %3356 = vmax.xlane.f32.xlu2 %v3355_v54  ;;  %v8095_v54 = vpop.permute.xlu0 %4872 }
 0x492   : > { %10257 = vst [vmem:[#allocation66_spill] sm:$0xff] %v8095_v54 }
 0x493   : > { %4888 = vrot.lane.b32.xlu1 %v6410_v18, %s6661_s30  ;;  %v6412_v20 = vpop.eup %6411 }
 0x495   : > { %5034 = vrot.lane.b32.xlu0 %v6408_v13, %s6660_s29 }
 0x499   : > { %v8100_v13 = vpop.permute.xlu0 %5016 }
 0x49b   : > { %5032 = vrot.lane.b32.xlu1 %v6410_v18, %s6660_s29  ;;  %v3265_v18 = vpop.f32.mrf.mxu1 }
 0x49c   : > { %v8105_v47 = vadd.f32 %v7728_v24, %v3265_v18  ;;  %v3578_v18 = vshra.s32 %v8117_v22, 16 }
 0x49e   : > { %10258 = vst [vmem:[#allocation67_spill] sm:$0xff] %v8105_v47  ;;  %v8131_v4 = vcvt.s32.f32 %v3578_v18  ;;  %v4788_v44 = vmul.f32 1.442695, %v8105_v47 }
 0x4a0   : > { %6413 = vpow2.f32 %v4788_v44  ;;  %v8174_v44 = vpop.xlane.xlu1 %3326 }
 0x4a1   : > { %v8110_v5 = vpop.xlane.xlu0 %3341  ;;  %10269 = vst [vmem:[#allocation78_spill] sm:$0xff] %v8174_v44  ;;  %vm3421_vm5 = vcmp.eq.f32.partialorder %v7851_v19, %v8174_v44 }
 0x4a2   : > { %10260 = vst [vmem:[#allocation69_spill] sm:$0xff] %v8110_v5  ;;  %vm3426_vm6 = vcmp.eq.f32.partialorder %v7890_v39, %v8110_v5 }
 0x4a6   : > { %v6414_v46 = vpop.eup %6413 }
 0x4a8   : > { %v8184_v31 = vpop.permute.xlu1 %4870 }
 0x4a9   : > { %4886 = vrot.lane.b32.xlu2 %v6412_v20, %s6661_s30  ;;  %v8124_v58 = vpop.permute.xlu0 %4878  ;;  %10271 = vst [vmem:[#allocation80_spill] sm:$0xff] %v8184_v31 }
 0x4aa   : > { %10262 = vst [vmem:[#allocation71_spill] sm:$0xff] %v8124_v58 }
 0x4b1   : > { %5030 = vrot.lane.b32.xlu2 %v6412_v20, %s6660_s29  ;;  %v3367_v20 = vsel %vm3303_vm9, %v8105_v47, -inf }
 0x4bf   : > { %3368 = vmax.xlane.f32.xlu0 %v3367_v20  ;;  %v8140_v20 = vpop.permute.xlu0 %5022 }
 0x4c5   : > { %3362 = vmax.xlane.f32.xlu1 %v3361_v53  ;;  %v3548_v53 = vshra.s32 %v8144_v63, 16 }
 0x4c7   : > { %3581 = vmin.xlane.f32.xlu0 %v8131_v4  ;;  %v8147_v18 = vpop.xlane.xlu0 %3350  ;;  %v8152_v40 = vcvt.s32.f32 %v3548_v53  ;;  %v4786_v53 = vmul.f32 1.442695, %v8160_v12 }
 0x4c8   : > { %10265 = vst [vmem:[#allocation74_spill] sm:$0xff] %v8147_v18  ;;  %vm3429_vm11 = vcmp.eq.f32.partialorder %v7949_v55, %v8147_v18 }
 0x4c9   : > { %6415 = vpow2.f32 %v4786_v53 }
 0x4ca   : > { %6417 = vpow2.f32 %v4784_v1  ;;  %v3577_v1 = vand.u32 65535, %v8117_v22 }
 0x4cd   : > { %3566 = vmin.xlane.f32.xlu1 %v8137_v26 }
 0x4cf   : > { %v8162_v41 = vpop.xlane.xlu0 %3491  ;;  %v6416_v6 = vpop.eup %6415 }
 0x4da   : > { %3551 = vmin.xlane.f32.xlu2 %v8152_v40 }
 0x4db   : > { %5226 = vrot.lane.b32.xlu0 %v5112_v25, %s6662_s13  ;;  %v8172_v25 = vpop.permute.xlu0 %5214 }
 0x4e3   : > { %4896 = vrot.lane.b32.xlu0 %v6414_v46, %s6661_s30  ;;  %v8186_v53 = vpop.permute.xlu0 %4884 }
 0x4e4   : > { %10272 = vst [vmem:[#allocation81_spill] sm:$0xff] %v8186_v53 }
 0x4e6   : > { %5224 = vrot.lane.b32.xlu1 %v5111_v9, %s6662_s13  ;;  %v5015_v9 = vpop.permute.xlu1 %5014 }
 0x4eb   : > { %5040 = vrot.lane.b32.xlu0 %v6414_v46, %s6660_s29  ;;  %v3268_v46 = vpop.f32.mrf.mxu1  ;;  %v8190_v30 = vpop.permute.xlu0 %5028 }
 0x4ee   : > { %4894 = vrot.lane.b32.xlu1 %v6416_v6, %s6661_s30  ;;  %v8192_v26 = vpop.xlane.xlu1 %3335 }
 0x4ef   : > { %10273 = vst [vmem:[#allocation82_spill] sm:$0xff] %v8192_v26  ;;  %vm3424_vm13 = vcmp.eq.f32.partialorder %v7887_v37, %v8192_v26 }
 0x4f2   : > { %5222 = vrot.lane.b32.xlu2 %v5110_v2, %s6662_s13 }
 0x4f3   : > { %v3270_v51 = vpop.f32.mrf.mxu1  ;;  %v8194_v57 = vpop.xlane.xlu0 %3359 }
 0x4f4   : > { %10274 = vst [vmem:[#allocation83_spill] sm:$0xff] %v8194_v57 }
 0x4f6   : > { %5038 = vrot.lane.b32.xlu1 %v6416_v6, %s6660_s29  ;;  %v8196_v58 = vpop.permute.xlu1 %4876  ;;  %v3459_v6 = vsel %vm3423_vm2, %v7944_v52, 8  ;;  %vm3432_vm2 = vcmp.eq.f32.partialorder %v8032_v36, %v8194_v57 }
 0x4f7   : > { %10275 = vst [vmem:[#allocation84_spill] sm:$0xff] %v8196_v58  ;;  %v8209_v62 = vsel %vm3303_vm9, %v3459_v6, 2147483647  ;;  %v8213_v58 = vpop.xlane.xlu2 %3329 }
 0x4f8   : > { %10277 = vst [vmem:[#allocation86_spill] sm:$0xff] %v8213_v58  ;;  %v3623_v49 = vshra.s32 %v8209_v62, 16  ;;  %vm3422_vm3 = vcmp.eq.f32.partialorder %v7844_v15, %v8213_v58 }
 0x4f9   : > { %v3458_v60 = vsel %vm3422_vm3, %v7944_v52, 8  ;;  %vm3493_vm3 = vcmp.eq.f32.partialorder %v7968_v34, %v8162_v41 }
 0x4fa   : > { %v8239_v58 = vsel %vm3303_vm9, %v3458_v60, 2147483647  ;;  %v6607_v60 = vld [vmem:[%s10085_s5 + $0x48] sm:$0xff] }
 0x4fb   : > { %v3273_v14 = vpop.f32.mrf.mxu1  ;;  %v8200_v31 = vpop.xlane.xlu0 %3536 }
 0x4fc   : > { %v8203_v2 = vadd.f32 %v7728_v24, %v3273_v14  ;;  %v3364_v24 = vsel %vm3303_vm9, %v8160_v12, -inf  ;;  %v8225_v14 = vld [vmem:[%s10084_s4] ss:$0 sm:$0xff] }
 0x4fd   : > { %v8228_v6 = vadd.f32 %v8225_v14, %v3268_v46  ;;  %v3608_v46 = vshra.s32 %v8239_v58, 16  ;;  %v8268_v11 = vadd.f32 %v8225_v14, %v3270_v51 }
 0x4fe   : > { %10276 = vst [vmem:[#allocation85_spill] sm:$0xff] %v8203_v2  ;;  %v3376_v53 = vsel %vm3303_vm9, %v8203_v2, -inf  ;;  %v8211_v3 = vpop.permute.xlu1 %5020 }
 0x4ff   : > { %10279 = vst [vmem:[#allocation88_spill] sm:$0xff] %v8228_v6  ;;  %v3370_v15 = vsel %vm3303_vm9, %v8228_v6, -inf  ;;  %v4792_v22 = vmul.f32 1.442695, %v8268_v11 }
 0x500   : > { %10284 = vst [vmem:[#allocation93_spill] sm:$0xff] %v8268_v11 }
 0x503   : > { %v8215_v54 = vpop.permute.xlu0 %5220 }
 0x504   : > { %10278 = vst [vmem:[#allocation87_spill] sm:$0xff] %v8215_v54  ;;  %v4794_v54 = vmul.f32 1.442695, %v8203_v2 }
 0x506   : > { %v8233_v8 = vpop.xlane.xlu1 %3344  ;;  %6419 = vpow2.f32 %v4794_v54 }
 0x507   : > { %10280 = vst [vmem:[#allocation89_spill] sm:$0xff] %v8233_v8  ;;  %6421 = vpow2.f32 %v4792_v22 }
 0x50b   : > { %v8241_v7 = vpop.permute.xlu0 %4890 }
 0x50c   : > { %10281 = vst [vmem:[#allocation90_spill] sm:$0xff] %v8241_v7 }
 0x513   : > { %v8250_v45 = vpop.permute.xlu0 %5034 }
 0x515   : > { %3377 = vmax.xlane.f32.xlu0 %v3376_v53  ;;  %v8230_v53 = vcvt.s32.f32 %v3623_v49  ;;  %v8246_v49 = vcvt.s32.f32 %v3608_v46  ;;  %v6418_v46 = vpop.eup %6417 }
 0x516   : > { %v6420_v10 = vpop.eup %6419 }
 0x517   : > { %v6422_v51 = vpop.eup %6421 }
 0x51b   : > { %3365 = vmax.xlane.f32.xlu2 %v3364_v24  ;;  %v8244_v24 = vpop.permute.xlu1 %4882 }
 0x51c   : > { %10282 = vst [vmem:[#allocation91_spill] sm:$0xff] %v8244_v24 }
 0x51d   : > { %3626 = vmin.xlane.f32.xlu0 %v8230_v53 }
 0x520   : > { %3371 = vmax.xlane.f32.xlu1 %v3370_v15  ;;  %v5115_v15 = vadd.f32 %v6607_v60, %v8100_v13  ;;  %v3579_v60 = vcvt.s32.f32 %v3577_v1 }
 0x523   : > { %v8257_v7 = vpop.permute.xlu1 %5026 }
 0x528   : > { %3611 = vmin.xlane.f32.xlu1 %v8246_v49 }
 0x52b   : > { %v8264_v29 = vpop.xlane.xlu1 %3353 }
 0x52c   : > { %10283 = vst [vmem:[#allocation92_spill] sm:$0xff] %v8264_v29 }
 0x531   : > { %5232 = vrot.lane.b32.xlu0 %v5115_v15, %s6662_s13  ;;  %v6608_v15 = vld [vmem:[%s10085_s5 + $0x40] sm:$0xff] }
 0x532   : > { %v8260_v24 = vpop.xlane.xlu0 %3368  ;;  %v5114_v29 = vadd.f32 %v6608_v15, %v5015_v9  ;;  %v3457_v9 = vsel %vm3421_vm5, %v7944_v52, 8  ;;  %v8300_v15 = vpop.permute.xlu2 %4868 }
 0x533   : > { %4892 = vrot.lane.b32.xlu2 %v6418_v46, %s6661_s30  ;;  %v8281_v21 = vpop.xlane.xlu1 %3521  ;;  %10290 = vst [vmem:[#allocation99_spill] sm:$0xff] %v8300_v15 }
 0x534   : > { %10287 = vst [vmem:[#allocation96_spill] sm:$0xff] %v8281_v21 }
 0x539   : > { %4902 = vrot.lane.b32.xlu0 %v6420_v10, %s6661_s30 }
 0x53a   : > { %v8270_v13 = vpop.xlane.xlu0 %3581  ;;  %v5013_v21 = vpop.permute.xlu2 %5012 }
 0x53b   : > { %10285 = vst [vmem:[#allocation94_spill] sm:$0xff] %v8270_v13  ;;  %vm3583_vm4 = vcmp.eq.f32.partialorder %v8131_v4, %v8270_v13  ;;  %5036 = vrot.lane.b32.xlu2 %v6418_v46, %s6660_s29  ;;  %v8285_v4 = vpop.permute.xlu1 %5218  ;;  %v3275_v46 = vpop.f32.mrf.mxu1 }
 0x53c   : > { %v8275_v54 = vsel %vm3583_vm4, %v3579_v60, inf  ;;  %10288 = vst [vmem:[#allocation97_spill] sm:$0xff] %v8285_v4  ;;  %v8331_v44 = vadd.f32 %v8225_v14, %v3275_v46 }
 0x53d   : > { %10286 = vst [vmem:[#allocation95_spill] sm:$0xff] %v8275_v54 }
 0x53e   : > { %10296 = vst [vmem:[#allocation105_spill] sm:$0xff] %v8331_v44  ;;  %v3379_v54 = vsel %vm3303_vm9, %v8331_v44, -inf }
 0x541   : > { %5046 = vrot.lane.b32.xlu0 %v6420_v10, %s6660_s29  ;;  %5230 = vrot.lane.b32.xlu1 %v5114_v29, %s6662_s13  ;;  %v8295_v10 = vsel %vm3303_vm9, %v3457_v9, 2147483647  ;;  %v3462_v9 = vsel %vm3426_vm6, %v7944_v52, 8 }
 0x542   : > { %v3593_v22 = vshra.s32 %v8295_v10, 16 }
 0x543   : > { %v8289_v1 = vpop.permute.xlu1 %4888  ;;  %v3278_v60 = vpop.f32.mrf.mxu1 }
 0x544   : > { %10289 = vst [vmem:[#allocation98_spill] sm:$0xff] %v8289_v1  ;;  %v8302_v4 = vcvt.s32.f32 %v3593_v22  ;;  %v8316_v22 = vsel %vm3303_vm9, %v3462_v9, 2147483647 }
 0x545   : > { %v3668_v39 = vshra.s32 %v8316_v22, 16 }
 0x549   : > { %4900 = vrot.lane.b32.xlu1 %v6422_v51, %s6661_s30 }
 0x54b   : > { %v8297_v29 = vpop.permute.xlu1 %5032 }
 0x54d   : > { %v8318_v15 = vpop.permute.xlu0 %5226 }
 0x54e   : > { %10293 = vst [vmem:[#allocation102_spill] sm:$0xff] %v8318_v15 }
 0x551   : > { %5044 = vrot.lane.b32.xlu1 %v6422_v51, %s6660_s29  ;;  %v3280_v51 = vpop.f32.mrf.mxu1 }
 0x552   : > { %v8310_v19 = vadd.f32 %v8225_v14, %v3280_v51  ;;  %v8325_v51 = vcvt.s32.f32 %v3668_v39 }
 0x553   : > { %v8307_v1 = vpop.xlane.xlu1 %3362 }
 0x554   : > { %10291 = vst [vmem:[#allocation100_spill] sm:$0xff] %v8307_v1  ;;  %v3385_v13 = vsel %vm3303_vm9, %v8310_v19, -inf  ;;  %v8323_v1 = vpop.xlane.xlu2 %3338 }
 0x555   : > { %10292 = vst [vmem:[#allocation101_spill] sm:$0xff] %v8310_v19  ;;  %vm3425_vm7 = vcmp.eq.f32.partialorder %v7880_v33, %v8323_v1  ;;  %v8333_v9 = vpop.permute.xlu0 %4896 }
 0x556   : > { %10295 = vst [vmem:[#allocation104_spill] sm:$0xff] %v8323_v1  ;;  %v3461_v15 = vsel %vm3425_vm7, %v7944_v52, 8  ;;  %vm3427_vm7 = vcmp.eq.f32.partialorder %v7953_v42, %v8233_v8 }
 0x557   : > { %10297 = vst [vmem:[#allocation106_spill] sm:$0xff] %v8333_v9  ;;  %v8347_v33 = vsel %vm3303_vm9, %v3461_v15, 2147483647  ;;  %v6610_v15 = vld [vmem:[%s10085_s5 + $0x60] sm:$0xff] }
 0x558   : > { %v3653_v46 = vshra.s32 %v8347_v33, 16 }
 0x55a   : > { %v8355_v9 = vcvt.s32.f32 %v3653_v46  ;;  %v3622_v46 = vand.u32 65535, %v8209_v62 }
 0x55b   : > { %v8321_v5 = vpop.xlane.xlu1 %3566 }
 0x55c   : > { %10294 = vst [vmem:[#allocation103_spill] sm:$0xff] %v8321_v5  ;;  %v8341_v5 = vld [vmem:[%s10085_s5 + $0x38] sm:$0xff] }
 0x55d   : > { %10299 = vst [vmem:[#allocation108_spill] sm:$0xff] %v8341_v5  ;;  %v5113_v39 = vadd.f32 %v8341_v5, %v5013_v21  ;;  %v8351_v1 = vpop.permute.xlu0 %5040  ;;  %v4800_v21 = vmul.f32 1.442695, %v8310_v19  ;;  %v3624_v19 = vcvt.s32.f32 %v3622_v46 }
 0x55f   : > { %6423 = vpow2.f32 %v4800_v21  ;;  %v8379_v21 = vadd.f32 %v8225_v14, %v3278_v60 }
 0x561   : > { %10304 = vst [vmem:[#allocation113_spill] sm:$0xff] %v8379_v21  ;;  %v4798_v62 = vmul.f32 1.442695, %v8379_v21 }
 0x563   : > { %6425 = vpow2.f32 %v4798_v62 }
 0x564   : > { %3596 = vmin.xlane.f32.xlu2 %v8302_v4 }
 0x56b   : > { %3386 = vmax.xlane.f32.xlu0 %v3385_v13  ;;  %v8335_v13 = vpop.permute.xlu1 %5224 }
 0x56c   : > { %10298 = vst [vmem:[#allocation107_spill] sm:$0xff] %v8335_v13 }
 0x573   : > { %3671 = vmin.xlane.f32.xlu0 %v8325_v51  ;;  %v8353_v13 = vpop.permute.xlu1 %4894 }
 0x574   : > { %10300 = vst [vmem:[#allocation109_spill] sm:$0xff] %v8353_v13  ;;  %v6424_v13 = vpop.eup %6423 }
 0x575   : > { %v6426_v60 = vpop.eup %6425 }
 0x57b   : > { %3380 = vmax.xlane.f32.xlu1 %v3379_v54  ;;  %v5118_v54 = vadd.f32 %v6610_v15, %v8140_v20  ;;  %v8366_v5 = vpop.permute.xlu1 %5038  ;;  %v3607_v15 = vand.u32 65535, %v8239_v58 }
 0x57c   : > { %5228 = vrot.lane.b32.xlu2 %v5113_v39, %s6662_s13 }
 0x583   : > { %3656 = vmin.xlane.f32.xlu1 %v8355_v9 }
 0x587   : > { %5238 = vrot.lane.b32.xlu0 %v5118_v54, %s6662_s13  ;;  %v6611_v54 = vld [vmem:[%s10085_s5 + $0x58] sm:$0xff] }
 0x588   : > { %v8364_v39 = vpop.xlane.xlu0 %3377  ;;  %v5117_v46 = vadd.f32 %v6611_v54, %v8211_v3  ;;  %v8400_v54 = vpop.permute.xlu2 %4874 }
 0x589   : > { %10307 = vst [vmem:[#allocation116_spill] sm:$0xff] %v8400_v54 }
 0x58f   : > { %4908 = vrot.lane.b32.xlu0 %v6424_v13, %s6661_s30 }
 0x590   : > { %v8370_v61 = vpop.xlane.xlu0 %3626  ;;  %v5019_v55 = vpop.permute.xlu2 %5018 }
 0x591   : > { %10301 = vst [vmem:[#allocation110_spill] sm:$0xff] %v8370_v61  ;;  %vm3628_vm8 = vcmp.eq.f32.partialorder %v8230_v53, %v8370_v61 }
 0x592   : > { %v8374_v23 = vsel %vm3628_vm8, %v3624_v19, inf  ;;  %v3609_v19 = vcvt.s32.f32 %v3607_v15  ;;  %v4790_v15 = vmul.f32 1.442695, %v8228_v6  ;;  %vm3435_vm8 = vcmp.eq.f32.partialorder %v8105_v47, %v8260_v24 }
 0x593   : > { %10302 = vst [vmem:[#allocation111_spill] sm:$0xff] %v8374_v23  ;;  %v8376_v20 = vpop.xlane.xlu1 %3371  ;;  %v3471_v42 = vsel %vm3435_vm8, %v7944_v52, 8 }
 0x594   : > { %10303 = vst [vmem:[#allocation112_spill] sm:$0xff] %v8376_v20  ;;  %v3283_v20 = vpop.f32.mrf.mxu1  ;;  %6427 = vpow2.f32 %v4790_v15 }
 0x597   : > { %5052 = vrot.lane.b32.xlu0 %v6424_v13, %s6660_s29  ;;  %v3373_v13 = vsel %vm3303_vm9, %v8268_v11, -inf }
 0x59a   : > { %v6428_v62 = vpop.eup %6427 }
 0x59b   : > { %v8388_v53 = vpop.xlane.xlu1 %3611 }
 0x59c   : > { %10305 = vst [vmem:[#allocation114_spill] sm:$0xff] %v8388_v53  ;;  %vm3613_vm10 = vcmp.eq.f32.partialorder %v8246_v49, %v8388_v53  ;;  %5236 = vrot.lane.b32.xlu1 %v5117_v46, %s6662_s13  ;;  %v3285_v3 = vpop.f32.mrf.mxu1 }
 0x59d   : > { %v8393_v58 = vsel %vm3613_vm10, %v3609_v19, inf  ;;  %v3465_v19 = vsel %vm3429_vm11, %v7944_v52, 8 }
 0x59e   : > { %10306 = vst [vmem:[#allocation115_spill] sm:$0xff] %v8393_v58  ;;  %v8421_v58 = vpop.xlane.xlu2 %3347 }
 0x59f   : > { %10310 = vst [vmem:[#allocation119_spill] sm:$0xff] %v8421_v58  ;;  %vm3428_vm12 = vcmp.eq.f32.partialorder %v7934_v16, %v8421_v58 }
 0x5a0   : > { %v3464_v6 = vsel %vm3428_vm12, %v7944_v52, 8 }
 0x5a3   : > { %v8414_v15 = vpop.permute.xlu0 %5232 }
 0x5a4   : > { %4906 = vrot.lane.b32.xlu1 %v6426_v60, %s6661_s30  ;;  %v3288_v49 = vpop.f32.mrf.mxu1  ;;  %10309 = vst [vmem:[#allocation118_spill] sm:$0xff] %v8414_v15 }
 0x5a5   : > { %3374 = vmax.xlane.f32.xlu2 %v3373_v13  ;;  %v8405_v46 = vadd.f32 %v8225_v14, %v3288_v49  ;;  %v8412_v13 = vsel %vm3303_vm9, %v3465_v19, 2147483647  ;;  %v8428_v19 = vadd.f32 %v8225_v14, %v3283_v20  ;;  %v6612_v20 = vld [vmem:[%s10085_s5 + $0x78] sm:$0xff] }
 0x5a6   : > { %v3713_v53 = vshra.s32 %v8412_v13, 16  ;;  %v5121_v58 = vadd.f32 %v6612_v20, %v8190_v30 }
 0x5a7   : > { %10308 = vst [vmem:[#allocation117_spill] sm:$0xff] %v8405_v46  ;;  %v4806_v16 = vmul.f32 1.442695, %v8405_v46 }
 0x5a8   : > { %v8418_v49 = vcvt.s32.f32 %v3713_v53  ;;  %10312 = vst [vmem:[#allocation121_spill] sm:$0xff] %v8428_v19  ;;  %v3388_v53 = vsel %vm3303_vm9, %v8428_v19, -inf }
 0x5a9   : > { %6429 = vpow2.f32 %v4806_v16 }
 0x5ab   : > { %v8423_v18 = vpop.permute.xlu0 %4902 }
 0x5ac   : > { %5050 = vrot.lane.b32.xlu1 %v6426_v60, %s6660_s29  ;;  %v3394_v60 = vsel %vm3303_vm9, %v8405_v46, -inf  ;;  %10311 = vst [vmem:[#allocation120_spill] sm:$0xff] %v8423_v18  ;;  %v3460_v18 = vsel %vm3424_vm13, %v7944_v52, 8 }
 0x5af   : > { %v6430_v23 = vpop.eup %6429 }
 0x5b3   : > { %v8438_v15 = vpop.permute.xlu0 %5046 }
 0x5bd   : > { %4898 = vrot.lane.b32.xlu2 %v6428_v62, %s6661_s30 }
 0x5c1   : > { %3395 = vmax.xlane.f32.xlu0 %v3394_v60  ;;  %v8430_v60 = vpop.permute.xlu1 %5230 }
 0x5c2   : > { %10313 = vst [vmem:[#allocation122_spill] sm:$0xff] %v8430_v60 }
 0x5c5   : > { %5042 = vrot.lane.b32.xlu2 %v6428_v62, %s6660_s29  ;;  %v8436_v62 = vsel %vm3303_vm9, %v3464_v6, 2147483647 }
 0x5c6   : > { %v3698_v61 = vshra.s32 %v8436_v62, 16 }
 0x5c8   : > { %v8448_v54 = vcvt.s32.f32 %v3698_v61  ;;  %v8460_v61 = vsel %vm3303_vm9, %v3460_v18, 2147483647 }
 0x5c9   : > { %3716 = vmin.xlane.f32.xlu0 %v8418_v49  ;;  %v8446_v60 = vpop.permute.xlu1 %4900  ;;  %v3638_v20 = vshra.s32 %v8460_v61, 16 }
 0x5ca   : > { %10314 = vst [vmem:[#allocation123_spill] sm:$0xff] %v8446_v60  ;;  %v8478_v60 = vadd.f32 %v8225_v14, %v3285_v3 }
 0x5cc   : > { %10318 = vst [vmem:[#allocation127_spill] sm:$0xff] %v8478_v60  ;;  %v4804_v26 = vmul.f32 1.442695, %v8478_v60 }
 0x5ce   : > { %6431 = vpow2.f32 %v4804_v26 }
 0x5d1   : > { %v8462_v30 = vpop.permute.xlu1 %5044 }
 0x5d6   : > { %3389 = vmax.xlane.f32.xlu1 %v3388_v53  ;;  %v3667_v53 = vand.u32 65535, %v8316_v22  ;;  %v8471_v22 = vcvt.s32.f32 %v3638_v20 }
 0x5dd   : > { %5244 = vrot.lane.b32.xlu0 %v5121_v58, %s6662_s13  ;;  %v3669_v58 = vcvt.s32.f32 %v3667_v53  ;;  %v3652_v53 = vand.u32 65535, %v8347_v33  ;;  %v6432_v33 = vpop.eup %6431 }
 0x5de   : > { %v8451_v6 = vpop.xlane.xlu0 %3386  ;;  %3701 = vmin.xlane.f32.xlu1 %v8448_v54 }
 0x5e5   : > { %4914 = vrot.lane.b32.xlu0 %v6430_v23, %s6661_s30 }
 0x5e6   : > { %v8464_v16 = vpop.xlane.xlu0 %3671 }
 0x5e7   : > { %10315 = vst [vmem:[#allocation124_spill] sm:$0xff] %v8464_v16  ;;  %vm3673_vm14 = vcmp.eq.f32.partialorder %v8325_v51, %v8464_v16  ;;  %v6613_v51 = vld [vmem:[%s10085_s5 + $0x70] sm:$0xff]  ;;  %v3290_v16 = vpop.f32.mrf.mxu1 }
 0x5e8   : > { %v8469_v37 = vsel %vm3673_vm14, %v3669_v58, inf  ;;  %v5120_v58 = vadd.f32 %v6613_v51, %v8257_v7  ;;  %v6614_v7 = vld [vmem:[%s10085_s5 + $0x50] sm:$0xff]  ;;  %vm5322_vm14 = vcmask 15360  }
 0x5e9   : > { %10316 = vst [vmem:[#allocation125_spill] sm:$0xff] %v8469_v37  ;;  %v5116_v51 = vadd.f32 %v6614_v7, %v5019_v55  ;;  %v3468_v7 = vsel %vm3432_vm2, %v7944_v52, 8  ;;  %vm5432_vm2 = vcmask 48128  }
 0x5ed   : > { %5058 = vrot.lane.b32.xlu0 %v6430_v23, %s6660_s29  ;;  %v3654_v23 = vcvt.s32.f32 %v3652_v53  ;;  %v3502_v53 = vand.u32 65535, %v8011_v43 }
 0x5ee   : > { %3641 = vmin.xlane.f32.xlu2 %v8471_v22  ;;  %v8475_v18 = vpop.xlane.xlu1 %3380 }
 0x5ef   : > { %10317 = vst [vmem:[#allocation126_spill] sm:$0xff] %v8475_v18  ;;  %v8493_v18 = vpop.permute.xlu2 %4880  ;;  %v8503_v26 = vpop.f32.mrf.mxu1 }
 0x5f0   : > { %10321 = vst [vmem:[#allocation130_spill] sm:$0xff] %v8493_v18 }
 0x5f6   : > { %v8486_v20 = vpop.xlane.xlu1 %3656 }
 0x5f7   : > { %10319 = vst [vmem:[#allocation128_spill] sm:$0xff] %v8486_v20  ;;  %vm3658_vm15 = vcmp.eq.f32.partialorder %v8355_v9, %v8486_v20  ;;  %5242 = vrot.lane.b32.xlu1 %v5120_v58, %s6662_s13  ;;  %v8501_v9 = vpop.permute.xlu2 %5024 }
 0x5f8   : > { %v8491_v3 = vsel %vm3658_vm15, %v3654_v23, inf  ;;  %v3504_v23 = vcvt.s32.f32 %v3502_v53 }
 0x5f9   : > { %10320 = vst [vmem:[#allocation129_spill] sm:$0xff] %v8491_v3  ;;  %v3295_v3 = vpop.f32.mrf.mxu1  ;;  %v8512_v55 = vpop.permute.xlu0 %5238 }
 0x5fa   : > { %10322 = vst [vmem:[#allocation131_spill] sm:$0xff] %v8512_v55 }
 0x5ff   : > { %4912 = vrot.lane.b32.xlu1 %v6432_v33, %s6661_s30  ;;  %v8506_v58 = vpop.xlane.xlu2 %3506 }
 0x600   : > { %vm3508_vm0 = vcmp.eq.f32.partialorder %v8014_v27, %v8506_v58 }
 0x601   : > { %v3509_v20 = vsel %vm3508_vm0, %v3504_v23, inf  ;;  %vm5395_vm0 = vcmask 39936  }
 0x606   : > { %5234 = vrot.lane.b32.xlu2 %v5116_v51, %s6662_s13  ;;  %v8521_v51 = vsel %vm3303_vm9, %v3468_v7, 2147483647  ;;  %v3382_v7 = vsel %vm3303_vm9, %v8379_v21, -inf }
 0x607   : > { %5056 = vrot.lane.b32.xlu1 %v6432_v33, %s6660_s29  ;;  %v8515_v33 = vadd.f32 %v8225_v14, %v3295_v3  ;;  %v3758_v27 = vshra.s32 %v8521_v51, 16  ;;  %v8528_v23 = vpop.permute.xlu2 %5216  ;;  %v3487_v3 = vand.u32 65535, %v7958_v17  ;;  %v8545_v17 = vadd.f32 %v8225_v14, %v3290_v16  ;;  %v6615_v16 = vld [vmem:[%s10085_s5 + $0x90] sm:$0xff] }
 0x609   : > { %10323 = vst [vmem:[#allocation132_spill] sm:$0xff] %v8515_v33  ;;  %v3403_v43 = vsel %vm3303_vm9, %v8515_v33, -inf  ;;  %v8526_v53 = vcvt.s32.f32 %v3758_v27  ;;  %v4812_v37 = vmul.f32 1.442695, %v8515_v33 }
 0x60a   : > { %10327 = vst [vmem:[#allocation136_spill] sm:$0xff] %v8545_v17 }
 0x60b   : > { %6433 = vpow2.f32 %v4812_v37 }
 0x60e   : > { %v8534_v57 = vpop.permute.xlu1 %5236 }
 0x60f   : > { %10325 = vst [vmem:[#allocation134_spill] sm:$0xff] %v8534_v57  ;;  %v8540_v55 = vpop.xlane.xlu2 %3356 }
 0x610   : > { %10326 = vst [vmem:[#allocation135_spill] sm:$0xff] %v8540_v55  ;;  %vm3431_vm4 = vcmp.eq.f32.partialorder %v8071_v56, %v8540_v55  ;;  %v4796_v56 = vmul.f32 1.442695, %v8331_v44 }
 0x611   : > { %v3467_v57 = vsel %vm3431_vm4, %v7944_v52, 8 }
 0x612   : > { %6435 = vpow2.f32 %v4796_v56 }
 0x616   : > { %v8550_v34 = vpop.permute.xlu1 %4906 }
 0x617   : > { %3510 = vmin.xlane.f32.xlu0 %v3509_v20  ;;  %v8524_v20 = vpop.permute.xlu0 %4908  ;;  %10328 = vst [vmem:[#allocation137_spill] sm:$0xff] %v8550_v34 }
 0x618   : > { %10324 = vst [vmem:[#allocation133_spill] sm:$0xff] %v8524_v20 }
 0x61f   : > { %3404 = vmax.xlane.f32.xlu0 %v3403_v43  ;;  %v8532_v36 = vpop.permute.xlu0 %5052  ;;  %v3489_v43 = vcvt.s32.f32 %v3487_v3  ;;  %v3397_v3 = vsel %vm3303_vm9, %v8545_v17, -inf }
 0x621   : > { %v3494_v27 = vsel %vm3493_vm3, %v3489_v43, inf  ;;  %v3712_v43 = vand.u32 65535, %v8412_v13  ;;  %vm3538_vm3 = vcmp.eq.f32.partialorder %v8058_v38, %v8200_v31 }
 0x627   : > { %3761 = vmin.xlane.f32.xlu0 %v8526_v53 }
 0x62f   : > { %3383 = vmax.xlane.f32.xlu2 %v3382_v7  ;;  %v8556_v7 = vsel %vm3303_vm9, %v3467_v57, 2147483647  ;;  %v3714_v57 = vcvt.s32.f32 %v3712_v43  ;;  %v8590_v43 = vadd.f32 %v8225_v14, %v8503_v26 }
 0x630   : > { %v3743_v55 = vshra.s32 %v8556_v7, 16 }
 0x631   : > { %3495 = vmin.xlane.f32.xlu1 %v3494_v27  ;;  %v5124_v27 = vadd.f32 %v6615_v16, %v8250_v45  ;;  %v8574_v45 = vpop.permute.xlu1 %5050  ;;  %10333 = vst [vmem:[#allocation142_spill] sm:$0xff] %v8590_v43 }
 0x632   : > { %v8572_v20 = vcvt.s32.f32 %v3743_v55 }
 0x634   : > { %v8547_v18 = vpop.xlane.xlu0 %3395 }
 0x639   : > { %3398 = vmax.xlane.f32.xlu1 %v3397_v3  ;;  %v6434_v3 = vpop.eup %6433 }
 0x63a   : > { %v6436_v16 = vpop.eup %6435 }
 0x63b   : > { %5250 = vrot.lane.b32.xlu0 %v5124_v27, %s6662_s13 }
 0x63c   : > { %v8566_v34 = vpop.xlane.xlu0 %3716 }
 0x63d   : > { %10329 = vst [vmem:[#allocation138_spill] sm:$0xff] %v8566_v34  ;;  %vm3718_vm5 = vcmp.eq.f32.partialorder %v8418_v49, %v8566_v34  ;;  %v3697_v49 = vand.u32 65535, %v8436_v62  ;;  %v6616_v62 = vld [vmem:[%s10085_s5 + $0x88] sm:$0xff] }
 0x63e   : > { %v8570_v13 = vsel %vm3718_vm5, %v3714_v57, inf  ;;  %v4810_v57 = vmul.f32 1.442695, %v8590_v43 }
 0x63f   : > { %10330 = vst [vmem:[#allocation139_spill] sm:$0xff] %v8570_v13  ;;  %v3699_v56 = vcvt.s32.f32 %v3697_v49  ;;  %v6259_v49 = vmul.f32 -1.442695, %v7966_v59 }
 0x640   : > { %6437 = vpow2.f32 %v4810_v57  ;;  %v3547_v57 = vand.u32 65535, %v8144_v63  ;;  %v8625_v63 = vsel %vm3303_vm9, %v3471_v42, 2147483647 }
 0x641   : > { %3746 = vmin.xlane.f32.xlu1 %v8572_v20  ;;  %6439 = vpow2.f32 %v6259_v49 }
 0x643   : > { %4920 = vrot.lane.b32.xlu0 %v6434_v3, %s6661_s30 }
 0x647   : > { %4904 = vrot.lane.b32.xlu2 %v6436_v16, %s6661_s30 }
 0x649   : > { %v8579_v37 = vpop.xlane.xlu1 %3389 }
 0x64a   : > { %10331 = vst [vmem:[#allocation140_spill] sm:$0xff] %v8579_v37 }
 0x64b   : > { %5064 = vrot.lane.b32.xlu0 %v6434_v3, %s6660_s29  ;;  %v5123_v3 = vadd.f32 %v6616_v62, %v8297_v29  ;;  %v3463_v29 = vsel %vm3427_vm7, %v7944_v52, 8 }
 0x64c   : > { %v8618_v49 = vsel %vm3303_vm9, %v3463_v29, 2147483647 }
 0x64f   : > { %5048 = vrot.lane.b32.xlu2 %v6436_v16, %s6660_s29  ;;  %v8600_v16 = vpop.permute.xlu2 %4886  ;;  %v8615_v59 = vpop.permute.xlu0 %5244 }
 0x650   : > { %10335 = vst [vmem:[#allocation144_spill] sm:$0xff] %v8600_v16 }
 0x651   : > { %v8584_v55 = vpop.xlane.xlu1 %3701  ;;  %10336 = vst [vmem:[#allocation145_spill] sm:$0xff] %v8615_v59  ;;  %v3513_v59 = vcvt.f32.s32 %v8506_v58 }
 0x652   : > { %10332 = vst [vmem:[#allocation141_spill] sm:$0xff] %v8584_v55  ;;  %vm3703_vm6 = vcmp.eq.f32.partialorder %v8448_v54, %v8584_v55  ;;  %v6438_v54 = vpop.eup %6437  ;;  %v3683_v55 = vshra.s32 %v8618_v49, 16 }
 0x653   : > { %v8592_v27 = vsel %vm3703_vm6, %v3699_v56, inf  ;;  %v6440_v56 = vpop.eup %6439 }
 0x654   : > { %10334 = vst [vmem:[#allocation143_spill] sm:$0xff] %v8592_v27  ;;  %v8627_v27 = vcvt.s32.f32 %v3683_v55 }
 0x657   : > { %v8604_v26 = vpop.permute.xlu2 %5030  ;;  %v8630_v29 = vpop.permute.xlu0 %4914 }
 0x658   : > { %10337 = vst [vmem:[#allocation146_spill] sm:$0xff] %v8630_v29 }
 0x65a   : > { %5248 = vrot.lane.b32.xlu1 %v5123_v3, %s6662_s13  ;;  %v4135_v3 = vadd.f32 1.0, %v6440_v56  ;;  %v3803_v56 = vshra.s32 %v8625_v63, 16 }
 0x65c   : > { %6441 = vrcp.f32 %v4135_v3  ;;  %vm4190_vm12 = vweird.f32 %v4135_v3  ;;  %v4194_v29 = vand.u32 2147483647, %v4135_v3 }
 0x65e   : > { %vm4195_vm15 = vcmp.eq.f32.partialorder %v4194_v29, 8.507059e+37 }
 0x65f   : > { %v8613_v62 = vpop.xlane.xlu2 %3551 }
 0x660   : > { %vm3553_vm10 = vcmp.eq.f32.partialorder %v8152_v40, %v8613_v62  ;;  %v6258_v40 = vmul.f32 -1.442695, %v7942_v0  ;;  %v4196_v0 = vand.u32 2147483648, %v4135_v3 }
 0x662   : > { %4918 = vrot.lane.b32.xlu1 %v6438_v54, %s6661_s30  ;;  %v6442_v37 = vpop.eup %6441  ;;  %6443 = vpow2.f32 %v6258_v40 }
 0x663   : > { %v4186_v44 = vmul.f32 %v6442_v37, %v4135_v3  ;;  %vm4191_vm11 = vweird.f32 %v6442_v37  ;;  %v6617_v3 = vld [vmem:[%s10085_s5 + $0x68] sm:$0xff] }
 0x664   : > { %vm4192_vm13 = vmor %vm4190_vm12, %vm4191_vm11  ;;  %vm3438_vm11 = vcmp.eq.f32.partialorder %v8203_v2, %v8364_v39 }
 0x665   : > { %v4187_v42 = vsub.f32 1.0, %v4186_v44  ;;  %v4963_v44 = vsub.f32 %v8041_v48, %v8021_v32  ;;  %v5119_v32 = vadd.f32 %v6617_v3, %v8501_v9 }
 0x668   : > { %v6444_v55 = vpop.eup %6443 }
 0x669   : > { %v8640_v34 = vadd.f32 1.0, %v6444_v55  ;;  %v8642_v13 = vpop.permute.xlu1 %5242  ;;  %v4197_v55 = vor.u32 1.1754944e-38, %v4196_v0 }
 0x66a   : > { %5062 = vrot.lane.b32.xlu1 %v6438_v54, %s6660_s29  ;;  %v3549_v54 = vcvt.s32.f32 %v3547_v57  ;;  %v8634_v57 = vcvt.s32.f32 %v3803_v56  ;;  %10338 = vst [vmem:[#allocation147_spill] sm:$0xff] %v8642_v13  ;;  %v8644_v56 = vpop.permute.xlu2 %5222  ;;  %v5324_v13 = vsel %vm5322_vm14, %v4963_v44, %v8528_v23  ;;  %v3757_v44 = vand.u32 65535, %v8521_v51 }
 0x66b   : > { %6445 = vrcp.f32 %v8640_v34  ;;  %vm4175_vm7 = vweird.f32 %v8640_v34 }
 0x66c   : > { %v3554_v47 = vsel %vm3553_vm10, %v3549_v54, inf  ;;  %v8637_v54 = vpop.permute.xlu0 %5058  ;;  %v3759_v3 = vcvt.s32.f32 %v3757_v44  ;;  %v6619_v44 = vld [vmem:[%s10085_s5] sm:$0xff] }
 0x672   : > { %v8673_v9 = vpop.xlane.xlu2 %3365 }
 0x673   : > { %10339 = vst [vmem:[#allocation148_spill] sm:$0xff] %v8673_v9  ;;  %vm3434_vm4 = vcmp.eq.f32.partialorder %v8160_v12, %v8673_v9 }
 0x675   : > { %3555 = vmin.xlane.f32.xlu0 %v3554_v47  ;;  %v4188_v47 = vmul.f32 %v6442_v37, %v4187_v42  ;;  %v3514_v42 = vshll.u32 %v3513_v59, 16 }
 0x677   : > { %v4189_v16 = vadd.f32 %v6442_v37, %v4188_v47  ;;  %v3532_v47 = vand.u32 65535, %v8049_v28 }
 0x678   : > { %3686 = vmin.xlane.f32.xlu2 %v8627_v27 }
 0x679   : > { %v4193_v58 = vsel %vm4192_vm13, %v6442_v37, %v4189_v16  ;;  %v8660_v37 = vld [vmem:[%s10085_s5 + $0xa8] sm:$0xff] }
 0x67a   : > { %v4198_v48 = vsel %vm4195_vm15, %v4197_v55, %v4193_v58  ;;  %v5127_v28 = vadd.f32 %v8660_v37, %v8351_v1  ;;  %v3534_v1 = vcvt.s32.f32 %v3532_v47  ;;  %v3470_v58 = vsel %vm3434_vm4, %v7944_v52, 8 }
 0x67c   : > { %v3539_v0 = vsel %vm3538_vm3, %v3534_v1, inf }
 0x67d   : > { %3806 = vmin.xlane.f32.xlu0 %v8634_v57 }
 0x68a   : > { %v3511_v40 = vpop.xlane.xlu0 %3510 }
 0x68b   : > { %v3512_v8 = vcvt.f32.s32 %v3511_v40  ;;  %v3298_v40 = vpop.f32.mrf.mxu1 }
 0x68d   : > { %v3515_v33 = vadd.s32 %v3514_v42, %v3512_v8  ;;  %v5360_v8 = vsel %vm571_vm1, %v5324_v13, %v4198_v48  ;;  %v8677_v13 = vpop.permute.xlu1 %4912  ;;  %v8689_v42 = vadd.f32 %v8225_v14, %v3298_v40  ;;  %v8699_v48 = vsel %vm3303_vm9, %v3470_v58, 2147483647 }
 0x68e   : > { %v4179_v40 = vand.u32 2147483647, %v8640_v34 }
 0x68f   : > { %v5143_v23 = vcvt.s32.f32 %v3515_v33  ;;  %v6446_v33 = vpop.eup %6445 }
 0x690   : > { %5240 = vrot.lane.b32.xlu2 %v5119_v32, %s6662_s13  ;;  %v4171_v38 = vmul.f32 %v6446_v33, %v8640_v34  ;;  %v3406_v32 = vsel %vm3303_vm9, %v8689_v42, -inf  ;;  %vm4176_vm6 = vweird.f32 %v6446_v33  ;;  %vm4180_vm10 = vcmp.eq.f32.partialorder %v4179_v40, 8.507059e+37 }
 0x691   : > { %v5397_v16 = vsel %vm5395_vm0, %v5360_v8, %v5143_v23  ;;  %5256 = vrot.lane.b32.xlu0 %v5127_v28, %s6662_s13  ;;  %v3788_v8 = vshra.s32 %v8699_v48, 16  ;;  %vm4177_vm8 = vmor %vm4175_vm7, %vm4176_vm6 }
 0x692   : > { %v5434_v59 = vsel %vm5432_vm2, %v5397_v16, 0.0  ;;  %v8680_v29 = vpop.xlane.xlu0 %3404  ;;  %v4172_v47 = vsub.f32 1.0, %v4171_v38  ;;  %v3498_v16 = vcvt.f32.s32 %v8162_v41  ;;  %v4962_v41 = vsub.f32 %v6619_v44, %v7978_v50 }
 0x693   : > { %5470 = vst.msk [vmem:[%s8668_s20 + $0x8] sm:$0xff] %vm3303_vm9, %v5434_v59  ;;  %v8707_v59 = vpop.permute.xlu2 %4892 }
 0x694   : > { %3540 = vmin.xlane.f32.xlu1 %v3539_v0  ;;  %v4173_v23 = vmul.f32 %v6446_v33, %v4172_v47  ;;  %v4181_v0 = vand.u32 2147483648, %v8640_v34  ;;  %v3499_v58 = vshll.u32 %v3498_v16, 16 }
 0x695   : > { %v8701_v28 = vpop.permute.xlu1 %5056 }
 0x696   : > { %v4174_v1 = vadd.f32 %v6446_v33, %v4173_v23  ;;  %v5323_v23 = vsel %vm5322_vm14, %v4962_v41, %v8172_v25  ;;  %v3592_v25 = vand.u32 65535, %v8295_v10  ;;  %v3391_v10 = vsel %vm3303_vm9, %v8478_v60, -inf }
 0x69a   : > { %v8692_v55 = vpop.xlane.xlu0 %3761 }
 0x69b   : > { %10340 = vst [vmem:[#allocation149_spill] sm:$0xff] %v8692_v55  ;;  %vm3763_vm5 = vcmp.eq.f32.partialorder %v8526_v53, %v8692_v55  ;;  %v8709_v53 = vcvt.s32.f32 %v3788_v8 }
 0x69c   : > { %3407 = vmax.xlane.f32.xlu1 %v3406_v32  ;;  %v8703_v51 = vsel %vm3763_vm5, %v3759_v3, inf  ;;  %v4178_v3 = vsel %vm4177_vm8, %v6446_v33, %v4174_v1  ;;  %v4182_v32 = vor.u32 1.1754944e-38, %v4181_v0  ;;  %v3742_v33 = vand.u32 65535, %v8556_v7  ;;  %v3300_v1 = vpop.f32.mrf.mxu1 }
 0x69d   : > { %10341 = vst [vmem:[#allocation150_spill] sm:$0xff] %v8703_v51  ;;  %v8723_v51 = vpop.permute.xlu2 %5036  ;;  %v3474_v7 = vsel %vm3438_vm11, %v7944_v52, 8 }
 0x69e   : > { %v4183_v34 = vsel %vm4180_vm10, %v4182_v32, %v4178_v3  ;;  %v8752_v41 = vsel %vm3303_vm9, %v3474_v7, 2147483647  ;;  %v6279_v7 = vmul.f32 -1.442695, %v8260_v24  ;;  %v3558_v24 = vcvt.f32.s32 %v8613_v62 }
 0x69f   : > { %v5359_v12 = vsel %vm571_vm1, %v5323_v23, %v4183_v34  ;;  %v4802_v23 = vmul.f32 1.442695, %v8428_v19  ;;  %v3802_v19 = vand.u32 65535, %v8625_v63 }
 0x6a4   : > { %3791 = vmin.xlane.f32.xlu1 %v8709_v53  ;;  %v3496_v38 = vpop.xlane.xlu1 %3495 }
 0x6a5   : > { %v3497_v47 = vcvt.f32.s32 %v3496_v38  ;;  %v8734_v0 = vpop.xlane.xlu2 %3596  ;;  %v3594_v38 = vcvt.s32.f32 %v3592_v25 }
 0x6a6   : > { %vm3598_vm13 = vcmp.eq.f32.partialorder %v8302_v4, %v8734_v0  ;;  %v3848_v4 = vshra.s32 %v8752_v41, 16 }
 0x6a7   : > { %v3500_v8 = vadd.s32 %v3499_v58, %v3497_v47  ;;  %v6262_v47 = vmul.f32 -1.442695, %v8097_v35  ;;  %v8776_v35 = vld [vmem:[%s10085_s5 + $0xc0] sm:$0xff] }
 0x6a8   : > { %v8764_v3 = vcvt.s32.f32 %v3848_v4 }
 0x6a9   : > { %v5142_v9 = vcvt.s32.f32 %v3500_v8 }
 0x6ab   : > { %v5396_v55 = vsel %vm5395_vm0, %v5359_v12, %v5142_v9  ;;  %v3744_v12 = vcvt.s32.f32 %v3742_v33  ;;  %v8741_v9 = vadd.f32 %v8225_v14, %v3300_v1  ;;  %v8757_v14 = vld [vmem:[%s10085_s5 + $0xa0] sm:$0xff]  ;;  %v5130_v33 = vadd.f32 %v8776_v35, %v8438_v15 }
 0x6ac   : > { %v5433_v50 = vsel %vm5432_vm2, %v5396_v55, 0.0  ;;  %v8726_v16 = vpop.xlane.xlu1 %3398  ;;  %v5126_v58 = vadd.f32 %v8757_v14, %v8366_v5 }
 0x6ad   : > { %10342 = vst [vmem:[#allocation151_spill] sm:$0xff] %v8726_v16  ;;  %v4816_v44 = vmul.f32 1.442695, %v8741_v9  ;;  %v8769_v5 = vpop.permute.xlu0 %5250  ;;  %v8780_v1 = vpop.permute.xlu2 %5228 }
 0x6ae   : > { %5469 = vst.msk [vmem:[%s8668_s20] sm:$0xff] %vm3303_vm9, %v5433_v50 }
 0x6af   : > { %6447 = vpow2.f32 %v4816_v44  ;;  %10345 = vst [vmem:[#allocation154_spill] sm:$0xff] %v8769_v5 }
 0x6b0   : > { %6449 = vpow2.f32 %v6262_v47 }
 0x6b1   : > { %6451 = vpow2.f32 %v4802_v23 }
 0x6b4   : > { %v8736_v40 = vpop.xlane.xlu1 %3746 }
 0x6b5   : > { %10343 = vst [vmem:[#allocation152_spill] sm:$0xff] %v8736_v40  ;;  %vm3748_vm12 = vcmp.eq.f32.partialorder %v8572_v20, %v8736_v40  ;;  %v3599_v20 = vsel %vm3598_vm13, %v3594_v38, inf  ;;  %v6448_v32 = vpop.eup %6447  ;;  %v8782_v25 = vpop.permute.xlu0 %4920  ;;  %v10346_v38 = vld [vmem:[#allocation55_spill] sm:$0xff] }
 0x6b6   : > { %v8743_v55 = vsel %vm3748_vm12, %v3744_v12, inf  ;;  %v6450_v8 = vpop.eup %6449  ;;  %v6261_v44 = vmul.f32 -1.442695, %v10346_v38  ;;  %v10348_v38 = vld [vmem:[#allocation77_spill] sm:$0xff]  ;;  %v10349_v40 = vld [vmem:[#allocation79_spill] sm:$0xff] }
 0x6b7   : > { %10344 = vst [vmem:[#allocation153_spill] sm:$0xff] %v8743_v55  ;;  %v4138_v34 = vadd.f32 1.0, %v6450_v8  ;;  %v6452_v50 = vpop.eup %6451  ;;  %v4966_v2 = vsub.f32 %v10349_v40, %v10348_v38 }
 0x6b9   : > { %3392 = vmax.xlane.f32.xlu2 %v3391_v10  ;;  %6453 = vrcp.f32 %v4138_v34  ;;  %v4241_v8 = vand.u32 2147483648, %v4138_v34  ;;  %vm4235_vm3 = vweird.f32 %v4138_v34 }
 0x6ba   : > { %6455 = vpow2.f32 %v6279_v7 }
 0x6bb   : > { %3600 = vmin.xlane.f32.xlu0 %v3599_v20  ;;  %6457 = vpow2.f32 %v6261_v44  ;;  %v3559_v44 = vshll.u32 %v3558_v24, 16  ;;  %v4242_v62 = vor.u32 1.1754944e-38, %v4241_v8 }
 0x6bd   : > { %5254 = vrot.lane.b32.xlu1 %v5126_v58, %s6662_s13  ;;  %v8788_v58 = vpop.xlane.xlu2 %3374  ;;  %v8790_v4 = vpop.permute.xlu0 %5064 }
 0x6be   : > { %vm3437_vm6 = vcmp.eq.f32.partialorder %v8268_v11, %v8788_v58 }
 0x6bf   : > { %v6454_v12 = vpop.eup %6453 }
 0x6c0   : > { %v4231_v10 = vmul.f32 %v6454_v12, %v4138_v34  ;;  %v6456_v15 = vpop.eup %6455  ;;  %vm4236_vm15 = vweird.f32 %v6454_v12 }
 0x6c1   : > { %vm4237_vm4 = vmor %vm4235_vm3, %vm4236_vm15 }
 0x6c2   : > { %v4232_v20 = vsub.f32 1.0, %v4231_v10 }
 0x6c3   : > { %3851 = vmin.xlane.f32.xlu0 %v8764_v3 }
 0x6c4   : > { %v4233_v47 = vmul.f32 %v6454_v12, %v4232_v20 }
 0x6c5   : > { %4924 = vrot.lane.b32.xlu1 %v6448_v32, %s6661_s30  ;;  %v8796_v7 = vpop.permute.xlu2 %4898 }
 0x6c6   : > { %v4234_v23 = vadd.f32 %v6454_v12, %v4233_v47  ;;  %10347 = vst [vmem:[#allocation55_spill] sm:$0xff] %v8796_v7  ;;  %v5327_v47 = vsel %vm5322_vm14, %v4966_v2, %v8644_v56 }
 0x6cc   : > { %v8804_v16 = vpop.permute.xlu1 %5248 }
 0x6cd   : > { %5068 = vrot.lane.b32.xlu1 %v6448_v32, %s6660_s29  ;;  %v8792_v32 = vadd.f32 1.0, %v6456_v15  ;;  %v4238_v15 = vsel %vm4237_vm4, %v6454_v12, %v4234_v23  ;;  %10350 = vst [vmem:[#allocation77_spill] sm:$0xff] %v8804_v16  ;;  %v3804_v23 = vcvt.s32.f32 %v3802_v19  ;;  %v8820_v63 = vpop.permute.xlu2 %5042 }
 0x6cf   : > { %6459 = vrcp.f32 %v8792_v32  ;;  %v4496_v16 = vand.u32 2147483648, %v8792_v32  ;;  %vm4490_vm13 = vweird.f32 %v8792_v32 }
 0x6d1   : > { %4910 = vrot.lane.b32.xlu2 %v6452_v50, %s6661_s30 }
 0x6d4   : > { %v8829_v38 = vpop.permute.xlu1 %4918 }
 0x6d7   : > { %5262 = vrot.lane.b32.xlu0 %v5130_v33, %s6662_s13  ;;  %v4239_v33 = vand.u32 2147483647, %v4138_v34 }
 0x6d9   : > { %5054 = vrot.lane.b32.xlu2 %v6452_v50, %s6660_s29  ;;  %v6458_v50 = vpop.eup %6457  ;;  %vm4240_vm5 = vcmp.eq.f32.partialorder %v4239_v33, 8.507059e+37  ;;  %v10354_v33 = vld [vmem:[#allocation57_spill] sm:$0xff] }
 0x6da   : > { %v8800_v55 = vadd.f32 1.0, %v6458_v50  ;;  %v4243_v7 = vsel %vm4240_vm5, %v4242_v62, %v4238_v15  ;;  %v6460_v40 = vpop.eup %6459 }
 0x6db   : > { %v5363_v24 = vsel %vm571_vm1, %v5327_v47, %v4243_v7  ;;  %v4486_v8 = vmul.f32 %v6460_v40, %v8792_v32  ;;  %v3473_v7 = vsel %vm3437_vm6, %v7944_v52, 8  ;;  %vm4491_vm11 = vweird.f32 %v6460_v40 }
 0x6dc   : > { %6461 = vrcp.f32 %v8800_v55  ;;  %vm4492_vm15 = vmor %vm4490_vm13, %vm4491_vm11  ;;  %vm4220_vm5 = vweird.f32 %v8800_v55 }
 0x6dd   : > { %v4487_v19 = vsub.f32 1.0, %v4486_v8 }
 0x6e8   : > { %v3556_v10 = vpop.xlane.xlu0 %3555 }
 0x6e9   : > { %v3557_v20 = vcvt.f32.s32 %v3556_v10  ;;  %v8827_v10 = vpop.eup %6461 }
 0x6ea   : > { %v4216_v15 = vmul.f32 %v8827_v10, %v8800_v55  ;;  %vm4221_vm4 = vweird.f32 %v8827_v10 }
 0x6eb   : > { %v3560_v34 = vadd.s32 %v3559_v44, %v3557_v20  ;;  %v8833_v20 = vsel %vm3303_vm9, %v3473_v7, 2147483647  ;;  %vm4222_vm6 = vmor %vm4220_vm5, %vm4221_vm4  ;;  %vm3444_vm4 = vcmp.eq.f32.partialorder %v8405_v46, %v8547_v18 }
 0x6ec   : > { %v3833_v62 = vshra.s32 %v8833_v20, 16 }
 0x6ed   : > { %v5146_v5 = vcvt.s32.f32 %v3560_v34  ;;  %v4488_v34 = vmul.f32 %v6460_v40, %v4487_v19 }
 0x6ef   : > { %v5400_v12 = vsel %vm5395_vm0, %v5363_v24, %v5146_v5  ;;  %v10353_v5 = vld [vmem:[#allocation92_spill] sm:$0xff]  ;;  %v10357_v24 = vld [vmem:[#allocation101_spill] sm:$0xff] }
 0x6f0   : > { %v5437_v2 = vsel %vm5432_vm2, %v5400_v12, 0.0  ;;  %v8813_v56 = vpop.xlane.xlu0 %3806  ;;  %vm3430_vm8 = vcmp.eq.f32.partialorder %v10354_v33, %v10353_v5  ;;  %10355 = vst [vmem:[#allocation92_spill] sm:$0xff] %v8829_v38  ;;  %vm3441_vm10 = vcmp.eq.f32.partialorder %v10357_v24, %v8451_v6  ;;  %v3637_v12 = vand.u32 65535, %v8460_v61  ;;  %v8854_v24 = vpop.permute.xlu1 %5062 }
 0x6f1   : > { %10351 = vst [vmem:[#allocation79_spill] sm:$0xff] %v8813_v56  ;;  %vm3808_vm7 = vcmp.eq.f32.partialorder %v8634_v57, %v8813_v56  ;;  %v3466_v44 = vsel %vm3430_vm8, %v7944_v52, 8  ;;  %v10356_v57 = vld [vmem:[#allocation95_spill] sm:$0xff]  ;;  %v3477_v7 = vsel %vm3441_vm10, %v7944_v52, 8  ;;  %v4494_v61 = vand.u32 2147483647, %v8792_v32 }
 0x6f2   : > { %5473 = vst.msk [vmem:[%s8668_s20 + $0x20] sm:$0xff] %vm3303_vm9, %v5437_v2  ;;  %v8822_v50 = vsel %vm3808_vm7, %v3804_v23, inf  ;;  %v8840_v47 = vsel %vm3303_vm9, %v3466_v44, 2147483647  ;;  %v8845_v2 = vpop.xlane.xlu2 %3641  ;;  %v4217_v23 = vsub.f32 1.0, %v4216_v15  ;;  %v4489_v44 = vadd.f32 %v6460_v40, %v4488_v34  ;;  %v10358_v34 = vld [vmem:[#allocation106_spill] sm:$0xff] }
 0x6f3   : > { %10352 = vst [vmem:[#allocation155_spill] sm:$0xff] %v8822_v50  ;;  %v3728_v8 = vshra.s32 %v8840_v47, 16  ;;  %vm3643_vm12 = vcmp.eq.f32.partialorder %v8471_v22, %v8845_v2  ;;  %v3639_v19 = vcvt.s32.f32 %v3637_v12  ;;  %v8860_v15 = vsel %vm3303_vm9, %v3477_v7, 2147483647 }
 0x6f4   : > { %v4218_v22 = vmul.f32 %v8827_v10, %v4217_v23  ;;  %v4983_v12 = vsub.f32 %v8660_v37, %v10358_v34  ;;  %v4497_v56 = vor.u32 1.1754944e-38, %v4496_v16  ;;  %vm4495_vm3 = vcmp.eq.f32.partialorder %v4494_v61, 8.507059e+37  ;;  %v10360_v37 = vld [vmem:[#allocation78_spill] sm:$0xff] }
 0x6f5   : > { %v3644_v11 = vsel %vm3643_vm12, %v3639_v19, inf  ;;  %v8862_v33 = vcvt.s32.f32 %v3728_v8  ;;  %v3893_v32 = vshra.s32 %v8860_v15, 16  ;;  %v3543_v7 = vcvt.f32.s32 %v8200_v31 }
 0x6f6   : > { %v4219_v50 = vadd.f32 %v8827_v10, %v4218_v22  ;;  %v4226_v16 = vand.u32 2147483648, %v8800_v55  ;;  %v4224_v23 = vand.u32 2147483647, %v8800_v55  ;;  %v10362_v55 = vld [vmem:[#allocation87_spill] sm:$0xff] }
 0x6f7   : > { %3585 = vmin.xlane.f32.xlu1 %v10356_v57  ;;  %v8851_v57 = vcvt.s32.f32 %v3833_v62  ;;  %v4493_v62 = vsel %vm4492_vm15, %v6460_v40, %v4489_v44  ;;  %v6265_v40 = vmul.f32 -1.442695, %v10360_v37  ;;  %v8880_v31 = vcvt.s32.f32 %v3893_v32 }
 0x6f8   : > { %v4498_v19 = vsel %vm4495_vm3, %v4497_v56, %v4493_v62  ;;  %v6622_v56 = vld [vmem:[%s10085_s5 + $0x18] sm:$0xff]  ;;  %v3544_v22 = vshll.u32 %v3543_v7, 16  ;;  %v4223_v34 = vsel %vm4222_vm6, %v8827_v10, %v4219_v50  ;;  %vm4225_vm7 = vcmp.eq.f32.partialorder %v4224_v23, 8.507059e+37 }
 0x6f9   : > { %6463 = vpow2.f32 %v6265_v40  ;;  %v3787_v40 = vand.u32 65535, %v8699_v48 }
 0x6ff   : > { %3836 = vmin.xlane.f32.xlu1 %v8851_v57  ;;  %v6464_v50 = vpop.eup %6463 }
 0x700   : > { %v4141_v10 = vadd.f32 1.0, %v6464_v50  ;;  %v10366_v50 = vld [vmem:[#allocation109_spill] sm:$0xff] }
 0x701   : > { %3645 = vmin.xlane.f32.xlu0 %v3644_v11 }
 0x702   : > { %3731 = vmin.xlane.f32.xlu2 %v8862_v33  ;;  %6465 = vrcp.f32 %v4141_v10  ;;  %vm4280_vm11 = vweird.f32 %v4141_v10 }
 0x703   : > { %v5257_v38 = vpop.permute.xlu0 %5256 }
 0x704   : > { %v5344_v8 = vsel %vm5322_vm14, %v4983_v12, %v5257_v38  ;;  %v10361_v38 = vld [vmem:[#allocation60_spill] sm:$0xff]  ;;  %v4227_v12 = vor.u32 1.1754944e-38, %v4226_v16  ;;  %v8901_v16 = vld [vmem:[%s10085_s5 + $0xb8] sm:$0xff] }
 0x705   : > { %v8874_v11 = vsel %vm571_vm1, %v5344_v8, %v4498_v19  ;;  %v4965_v61 = vsub.f32 %v6622_v56, %v10361_v38  ;;  %v5129_v23 = vadd.f32 %v8901_v16, %v8462_v30  ;;  %v3789_v38 = vcvt.s32.f32 %v3787_v40  ;;  %v8923_v30 = vld [vmem:[%s10085_s5 + $0xd8] sm:$0xff] }
 0x706   : > { %10359 = vst [vmem:[#allocation95_spill] sm:$0xff] %v8874_v11  ;;  %v4228_v8 = vsel %vm4225_vm7, %v4227_v12, %v4223_v34  ;;  %v8927_v34 = vpop.permute.xlu2 %5234  ;;  %v6282_v12 = vmul.f32 -1.442695, %v8364_v39  ;;  %v4982_v40 = vsub.f32 %v8757_v14, %v10366_v50  ;;  %v4284_v39 = vand.u32 2147483647, %v4141_v10 }
 0x707   : > { %v3541_v44 = vpop.xlane.xlu1 %3540  ;;  %v5326_v32 = vsel %vm5322_vm14, %v4965_v61, %v10362_v55  ;;  %v8910_v61 = vld [vmem:[%s10085_s5 + $0x80] sm:$0xff] }
 0x708   : > { %v3542_v62 = vcvt.f32.s32 %v3541_v44  ;;  %v5362_v11 = vsel %vm571_vm1, %v5326_v32, %v4228_v8  ;;  %v5122_v48 = vadd.f32 %v8910_v61, %v8604_v26  ;;  %v6466_v26 = vpop.eup %6465  ;;  %6467 = vpow2.f32 %v6282_v12 }
 0x709   : > { %3896 = vmin.xlane.f32.xlu0 %v8880_v31  ;;  %vm4281_vm10 = vweird.f32 %v6466_v26  ;;  %vm4285_vm13 = vcmp.eq.f32.partialorder %v4284_v39, 8.507059e+37 }
 0x70a   : > { %v3545_v19 = vadd.s32 %v3544_v22, %v3542_v62  ;;  %v5133_v62 = vadd.f32 %v8923_v30, %v8532_v36  ;;  %v4286_v36 = vand.u32 2147483648, %v4141_v10  ;;  %vm4282_vm12 = vmor %vm4280_vm11, %vm4281_vm10 }
 0x70c   : > { %v5145_v37 = vcvt.s32.f32 %v3545_v19  ;;  %v4287_v14 = vor.u32 1.1754944e-38, %v4286_v36 }
 0x70e   : > { %v5399_v7 = vsel %vm5395_vm0, %v5362_v11, %v5145_v37  ;;  %v8931_v32 = vpop.xlane.xlu2 %3383  ;;  %v6468_v19 = vpop.eup %6467 }
 0x70f   : > { %v5436_v56 = vsel %vm5432_vm2, %v5399_v7, 0.0  ;;  %v8893_v44 = vpop.xlane.xlu1 %3407  ;;  %v8933_v37 = vadd.f32 1.0, %v6468_v19  ;;  %v3603_v7 = vcvt.f32.s32 %v8734_v0  ;;  %vm3440_vm3 = vcmp.eq.f32.partialorder %v8379_v21, %v8931_v32 }
 0x710   : > { %10363 = vst [vmem:[#allocation106_spill] sm:$0xff] %v8893_v44  ;;  %v3847_v44 = vand.u32 65535, %v8752_v41 }
 0x711   : > { %5472 = vst.msk [vmem:[%s8668_s20 + $0x18] sm:$0xff] %vm3303_vm9, %v5436_v56  ;;  %6469 = vrcp.f32 %v8933_v37  ;;  %vm4535_vm7 = vweird.f32 %v8933_v37 }
 0x717   : > { %v8905_v11 = vpop.xlane.xlu1 %3791 }
 0x718   : > { %10364 = vst [vmem:[#allocation78_spill] sm:$0xff] %v8905_v11  ;;  %vm3793_vm8 = vcmp.eq.f32.partialorder %v8709_v53, %v8905_v11  ;;  %5260 = vrot.lane.b32.xlu1 %v5129_v23, %s6662_s13  ;;  %v4276_v53 = vmul.f32 %v6466_v26, %v4141_v10  ;;  %v8939_v23 = vpop.permute.xlu2 %4904 }
 0x719   : > { %v8917_v22 = vsel %vm3793_vm8, %v3789_v38, inf  ;;  %10367 = vst [vmem:[#allocation87_spill] sm:$0xff] %v8939_v23  ;;  %v10381_v23 = vld [vmem:[#allocation102_spill] sm:$0xff] }
 0x71a   : > { %10365 = vst [vmem:[#allocation60_spill] sm:$0xff] %v8917_v22  ;;  %5246 = vrot.lane.b32.xlu2 %v5122_v48, %s6662_s13  ;;  %v4277_v55 = vsub.f32 1.0, %v4276_v53  ;;  %v10368_v48 = vld [vmem:[#allocation99_spill] sm:$0xff]  ;;  %v3604_v53 = vshll.u32 %v3603_v7, 16 }
 0x71c   : > { %v4278_v8 = vmul.f32 %v6466_v26, %v4277_v55 }
 0x71d   : > { %5268 = vrot.lane.b32.xlu0 %v5133_v62, %s6662_s13  ;;  %v10369_v62 = vld [vmem:[#allocation108_spill] sm:$0xff] }
 0x71e   : > { %v4279_v56 = vadd.f32 %v6466_v26, %v4278_v8  ;;  %v4969_v12 = vsub.f32 %v10369_v62, %v10368_v48  ;;  %v6470_v48 = vpop.eup %6469  ;;  %v3682_v62 = vand.u32 65535, %v8618_v49 }
 0x71f   : > { %v4531_v36 = vmul.f32 %v6470_v48, %v8933_v37  ;;  %vm4536_vm6 = vweird.f32 %v6470_v48 }
 0x720   : > { %v4283_v19 = vsel %vm4282_vm12, %v6466_v26, %v4279_v56  ;;  %v5330_v50 = vsel %vm5322_vm14, %v4969_v12, %v8780_v1  ;;  %v3849_v1 = vcvt.s32.f32 %v3847_v44  ;;  %v10372_v44 = vld [vmem:[#allocation62_spill] sm:$0xff]  ;;  %v3684_v49 = vcvt.s32.f32 %v3682_v62  ;;  %vm4537_vm8 = vmor %vm4535_vm7, %vm4536_vm6 }
 0x721   : > { %v4288_v11 = vsel %vm4285_vm13, %v4287_v14, %v4283_v19  ;;  %v3480_v19 = vsel %vm3444_vm4, %v7944_v52, 8 }
 0x722   : > { %v5366_v7 = vsel %vm571_vm1, %v5330_v50, %v4288_v11  ;;  %v4532_v11 = vsub.f32 1.0, %v4531_v36  ;;  %v4541_v50 = vand.u32 2147483648, %v8933_v37  ;;  %v10374_v36 = vld [vmem:[#allocation120_spill] sm:$0xff] }
 0x724   : > { %v4533_v39 = vmul.f32 %v6470_v48, %v4532_v11  ;;  %v4542_v11 = vor.u32 1.1754944e-38, %v4541_v50 }
 0x726   : > { %v4534_v14 = vadd.f32 %v6470_v48, %v4533_v39 }
 0x72e   : > { %v3601_v38 = vpop.xlane.xlu0 %3600 }
 0x72f   : > { %v3602_v55 = vcvt.f32.s32 %v3601_v38  ;;  %v5255_v0 = vpop.permute.xlu1 %5254 }
 0x730   : > { %v8944_v8 = vsel %vm5322_vm14, %v4982_v40, %v5255_v0  ;;  %v8959_v40 = vpop.permute.xlu2 %5048  ;;  %v3400_v0 = vsel %vm3303_vm9, %v8590_v43, -inf }
 0x731   : > { %10370 = vst [vmem:[#allocation109_spill] sm:$0xff] %v8944_v8  ;;  %v3605_v10 = vadd.s32 %v3604_v53, %v3602_v55  ;;  %v6264_v53 = vmul.f32 -1.442695, %v10372_v44  ;;  %v10373_v55 = vld [vmem:[#allocation111_spill] sm:$0xff] }
 0x733   : > { %v5149_v22 = vcvt.s32.f32 %v3605_v10  ;;  %6471 = vpow2.f32 %v6264_v53 }
 0x735   : > { %v5403_v38 = vsel %vm5395_vm0, %v5366_v7, %v5149_v22  ;;  %v3476_v22 = vsel %vm3440_vm3, %v7944_v52, 8  ;;  %v4539_v7 = vand.u32 2147483647, %v8933_v37 }
 0x736   : > { %v5440_v26 = vsel %vm5432_vm2, %v5403_v38, 0.0  ;;  %v8952_v56 = vpop.xlane.xlu0 %3851  ;;  %v8986_v38 = vsel %vm3303_vm9, %v3480_v19, 2147483647 }
 0x737   : > { %10371 = vst [vmem:[#allocation99_spill] sm:$0xff] %v8952_v56  ;;  %vm3853_vm15 = vcmp.eq.f32.partialorder %v8764_v3, %v8952_v56  ;;  %v8972_v3 = vsel %vm3303_vm9, %v3476_v22, 2147483647  ;;  %vm4540_vm10 = vcmp.eq.f32.partialorder %v4539_v7, 8.507059e+37  ;;  %v3938_v62 = vshra.s32 %v8986_v38, 16  ;;  %v9003_v50 = vpop.permute.xlu1 %4924 }
 0x738   : > { %5476 = vst.msk [vmem:[%s8668_s20 + $0x38] sm:$0xff] %vm3303_vm9, %v5440_v26  ;;  %v8961_v41 = vsel %vm3853_vm15, %v3849_v1, inf  ;;  %v8969_v12 = vpop.xlane.xlu2 %3686  ;;  %v3878_v10 = vshra.s32 %v8972_v3, 16  ;;  %v4986_v1 = vsub.f32 %v8776_v35, %v10374_v36  ;;  %v6281_v36 = vmul.f32 -1.442695, %v8788_v58 }
 0x739   : > { %vm3688_vm5 = vcmp.eq.f32.partialorder %v8627_v27, %v8969_v12  ;;  %v4538_v27 = vsel %vm4537_vm8, %v6470_v48, %v4534_v14  ;;  %v10376_v48 = vld [vmem:[#allocation82_spill] sm:$0xff]  ;;  %v8999_v19 = vcvt.s32.f32 %v3938_v62  ;;  %v4808_v14 = vmul.f32 1.442695, %v8545_v17  ;;  %10377 = vst [vmem:[#allocation62_spill] sm:$0xff] %v9003_v50  ;;  %v9020_v62 = vld [vmem:[%s10085_s5 + $0xd0] sm:$0xff] }
 0x73a   : > { %v3689_v26 = vsel %vm3688_vm5, %v3684_v49, inf  ;;  %v8990_v22 = vcvt.s32.f32 %v3878_v10  ;;  %v4543_v44 = vsel %vm4540_vm10, %v4542_v11, %v4538_v27  ;;  %v9013_v11 = vld [vmem:[%s10085_s5 + $0xf0] sm:$0xff]  ;;  %v3832_v56 = vand.u32 65535, %v8833_v20 }
 0x73f   : > { %v9026_v58 = vpop.permute.xlu1 %5068 }
 0x740   : > { %10378 = vst [vmem:[#allocation111_spill] sm:$0xff] %v9026_v58 }
 0x742   : > { %3630 = vmin.xlane.f32.xlu1 %v10373_v55  ;;  %v6472_v55 = vpop.eup %6471 }
 0x743   : > { %3401 = vmax.xlane.f32.xlu2 %v3400_v0  ;;  %v6268_v0 = vmul.f32 -1.442695, %v10376_v48  ;;  %v4140_v35 = vadd.f32 1.0, %v6472_v55  ;;  %v6285_v48 = vmul.f32 -1.442695, %v8451_v6 }
 0x745   : > { %6473 = vpow2.f32 %v6268_v0  ;;  %vm4265_vm12 = vweird.f32 %v4140_v35  ;;  %v4269_v8 = vand.u32 2147483647, %v4140_v35 }
 0x746   : > { %6475 = vrcp.f32 %v4140_v35 }
 0x747   : > { %3690 = vmin.xlane.f32.xlu0 %v3689_v26  ;;  %6477 = vpow2.f32 %v4808_v14  ;;  %v10379_v14 = vld [vmem:[#allocation94_spill] sm:$0xff]  ;;  %vm4270_vm15 = vcmp.eq.f32.partialorder %v4269_v8, 8.507059e+37 }
 0x749   : > { %v5263_v39 = vpop.permute.xlu0 %5262 }
 0x74a   : > { %v5347_v37 = vsel %vm5322_vm14, %v4986_v1, %v5263_v39  ;;  %3881 = vmin.xlane.f32.xlu1 %v8990_v22  ;;  %v5136_v39 = vadd.f32 %v9013_v11, %v8637_v54 }
 0x74b   : > { %v8996_v53 = vsel %vm571_vm1, %v5347_v37, %v4543_v44  ;;  %v6474_v49 = vpop.eup %6473  ;;  %v5132_v44 = vadd.f32 %v9020_v62, %v8574_v45  ;;  %v9024_v37 = vpop.permute.xlu2 %5240  ;;  %v3588_v45 = vcvt.f32.s32 %v10379_v14 }
 0x74c   : > { %10375 = vst [vmem:[#allocation108_spill] sm:$0xff] %v8996_v53  ;;  %v6476_v10 = vpop.eup %6475  ;;  %v9005_v7 = vadd.f32 1.0, %v6474_v49 }
 0x74d   : > { %v6478_v26 = vpop.eup %6477  ;;  %v4261_v27 = vmul.f32 %v6476_v10, %v4140_v35  ;;  %vm4266_vm11 = vweird.f32 %v6476_v10  ;;  %v3589_v21 = vshll.u32 %v3588_v45, 16 }
 0x74e   : > { %6479 = vrcp.f32 %v9005_v7  ;;  %vm4267_vm13 = vmor %vm4265_vm12, %vm4266_vm11  ;;  %v4331_v20 = vand.u32 2147483648, %v9005_v7  ;;  %vm4325_vm5 = vweird.f32 %v9005_v7 }
 0x74f   : > { %3941 = vmin.xlane.f32.xlu0 %v8999_v19  ;;  %v4262_v1 = vsub.f32 1.0, %v4261_v27  ;;  %6481 = vpow2.f32 %v6281_v36  ;;  %v4271_v36 = vand.u32 2147483648, %v4140_v35 }
 0x750   : > { %6483 = vpow2.f32 %v6285_v48 }
 0x751   : > { %v4263_v54 = vmul.f32 %v6476_v10, %v4262_v1  ;;  %v10380_v1 = vld [vmem:[#allocation63_spill] sm:$0xff]  ;;  %v4272_v17 = vor.u32 1.1754944e-38, %v4271_v36 }
 0x753   : > { %v4264_v27 = vadd.f32 %v6476_v10, %v4263_v54  ;;  %v9037_v46 = vpop.xlane.xlu2 %3392 }
 0x754   : > { %v9028_v55 = vpop.eup %6479 }
 0x755   : > { %v4321_v0 = vmul.f32 %v9028_v55, %v9005_v7  ;;  %v6482_v49 = vpop.eup %6481  ;;  %v4268_v54 = vsel %vm4267_vm13, %v6476_v10, %v4264_v27  ;;  %v3648_v10 = vcvt.f32.s32 %v8845_v2  ;;  %vm4326_vm3 = vweird.f32 %v9028_v55 }
 0x756   : > { %v9043_v14 = vadd.f32 1.0, %v6482_v49  ;;  %v6484_v50 = vpop.eup %6483  ;;  %v4273_v58 = vsel %vm4270_vm15, %v4272_v17, %v4268_v54  ;;  %v3834_v17 = vcvt.s32.f32 %v3832_v56  ;;  %v4329_v2 = vand.u32 2147483647, %v9005_v7  ;;  %v6629_v56 = vld [vmem:[%s10085_s5 + $0x50] sm:$0xff]  ;;  %vm4327_vm6 = vmor %vm4325_vm5, %vm4326_vm3 }
 0x757   : > { %v4322_v6 = vsub.f32 1.0, %v4321_v0  ;;  %v4332_v7 = vor.u32 1.1754944e-38, %v4331_v20  ;;  %vm3443_vm3 = vcmp.eq.f32.partialorder %v8478_v60, %v9037_v46 }
 0x758   : > { %6485 = vrcp.f32 %v9043_v14  ;;  %vm4330_vm7 = vcmp.eq.f32.partialorder %v4329_v2, 8.507059e+37  ;;  %vm4520_vm15 = vweird.f32 %v9043_v14 }
 0x759   : > { %v4323_v53 = vmul.f32 %v9028_v55, %v4322_v6  ;;  %v10384_v6 = vld [vmem:[#allocation116_spill] sm:$0xff] }
 0x75b   : > { %4916 = vrot.lane.b32.xlu2 %v6478_v26, %s6661_s30 }
 0x75e   : > { %v6486_v36 = vpop.eup %6485 }
 0x75f   : > { %vm4521_vm11 = vweird.f32 %v6486_v36 }
 0x763   : > { %5274 = vrot.lane.b32.xlu0 %v5136_v39, %s6662_s13  ;;  %5060 = vrot.lane.b32.xlu2 %v6478_v26, %s6660_s29  ;;  %v6628_v26 = vld [vmem:[%s10085_s5 + $0x30] sm:$0xff] }
 0x764   : > { %5266 = vrot.lane.b32.xlu1 %v5132_v44, %s6662_s13  ;;  %v4968_v44 = vsub.f32 %v6628_v26, %v10380_v1  ;;  %v4972_v26 = vsub.f32 %v6629_v56, %v10384_v6  ;;  %v3649_v1 = vshll.u32 %v3648_v10, 16  ;;  %v10385_v6 = vld [vmem:[#allocation58_spill] sm:$0xff] }
 0x766   : > { %v5329_v35 = vsel %vm5322_vm14, %v4968_v44, %v10381_v23 }
 0x767   : > { %v5365_v49 = vsel %vm571_vm1, %v5329_v35, %v4273_v58  ;;  %v4516_v35 = vmul.f32 %v6486_v36, %v9043_v14 }
 0x76a   : > { %v3586_v39 = vpop.xlane.xlu1 %3585 }
 0x76b   : > { %v3587_v48 = vcvt.f32.s32 %v3586_v39  ;;  %v9051_v39 = vadd.f32 1.0, %v6484_v50 }
 0x76d   : > { %v3590_v0 = vadd.s32 %v3589_v21, %v3587_v48  ;;  %v4324_v21 = vadd.f32 %v9028_v55, %v4323_v53  ;;  %6487 = vrcp.f32 %v9051_v39  ;;  %v9068_v53 = vpop.permute.xlu2 %4910  ;;  %v5333_v48 = vsel %vm5322_vm14, %v4972_v26, %v8927_v34 }
 0x76e   : > { %v3517_v26 = vand.u32 65535, %v10385_v6 }
 0x76f   : > { %v5148_v45 = vcvt.s32.f32 %v3590_v0  ;;  %v4328_v44 = vsel %vm4327_vm6, %v9028_v55, %v4324_v21  ;;  %v3892_v0 = vand.u32 65535, %v8860_v15 }
 0x771   : > { %v5402_v27 = vsel %vm5395_vm0, %v5365_v49, %v5148_v45  ;;  %v4333_v45 = vsel %vm4330_vm7, %v4332_v7, %v4328_v44  ;;  %v3894_v34 = vcvt.s32.f32 %v3892_v0  ;;  %v10387_v44 = vld [vmem:[#allocation70_spill] sm:$0xff]  ;;  %v10390_v0 = vld [vmem:[#allocation132_spill] sm:$0xff] }
 0x772   : > { %v5439_v23 = vsel %vm5432_vm2, %v5402_v27, 0.0  ;;  %v9058_v8 = vpop.xlane.xlu1 %3836  ;;  %v5369_v27 = vsel %vm571_vm1, %v5333_v48, %v4333_v45  ;;  %v4526_v48 = vand.u32 2147483648, %v9043_v14  ;;  %vm3447_vm13 = vcmp.eq.f32.partialorder %v10390_v0, %v8680_v29 }
 0x773   : > { %10382 = vst [vmem:[#allocation120_spill] sm:$0xff] %v9058_v8  ;;  %vm3838_vm4 = vcmp.eq.f32.partialorder %v8851_v57, %v9058_v8  ;;  %v9083_v10 = vpop.eup %6487 }
 0x774   : > { %5475 = vst.msk [vmem:[%s8668_s20 + $0x30] sm:$0xff] %vm3303_vm9, %v5439_v23  ;;  %v3646_v50 = vpop.xlane.xlu0 %3645  ;;  %v9070_v58 = vsel %vm3838_vm4, %v3834_v17, inf  ;;  %v4517_v17 = vsub.f32 1.0, %v4516_v35  ;;  %v4576_v20 = vmul.f32 %v9083_v10, %v9051_v39  ;;  %v10389_v35 = vld [vmem:[#allocation59_spill] sm:$0xff]  ;;  %vm9117_vm4 = vmor %vm4520_vm15, %vm4521_vm11  ;;  %vm4581_vm5 = vweird.f32 %v9083_v10 }
 0x775   : > { %10383 = vst [vmem:[#allocation82_spill] sm:$0xff] %v9070_v58  ;;  %v3647_v57 = vcvt.f32.s32 %v3646_v50  ;;  %v9096_v15 = vpop.permute.xlu2 %5054 }
 0x776   : > { %v4518_v50 = vmul.f32 %v6486_v36, %v4517_v17  ;;  %v4577_v56 = vsub.f32 1.0, %v4576_v20  ;;  %v10393_v17 = vld [vmem:[#allocation123_spill] sm:$0xff] }
 0x777   : > { %v3650_v54 = vadd.s32 %v3649_v1, %v3647_v57  ;;  %v3727_v1 = vand.u32 65535, %v8840_v47  ;;  %v10386_v57 = vld [vmem:[#allocation100_spill] sm:$0xff]  ;;  %v4524_v47 = vand.u32 2147483647, %v9043_v14  ;;  %v3483_v14 = vsel %vm3447_vm13, %v7944_v52, 8 }
 0x778   : > { %vm3433_vm10 = vcmp.eq.f32.partialorder %v10387_v44, %v10386_v57  ;;  %v4519_v7 = vadd.f32 %v6486_v36, %v4518_v50  ;;  %v10405_v44 = vld [vmem:[#allocation118_spill] sm:$0xff] }
 0x779   : > { %v5152_v49 = vcvt.s32.f32 %v3650_v54  ;;  %v10388_v54 = vld [vmem:[#allocation96_spill] sm:$0xff]  ;;  %vm4525_vm7 = vcmp.eq.f32.partialorder %v4524_v47, 8.507059e+37 }
 0x77a   : > { %vm3523_vm12 = vcmp.eq.f32.partialorder %v10389_v35, %v10388_v54  ;;  %v4523_v20 = vsel %vm9117_vm4, %v6486_v36, %v4519_v7 }
 0x77b   : > { %v5406_v23 = vsel %vm5395_vm0, %v5369_v27, %v5152_v49  ;;  %v3519_v49 = vcvt.s32.f32 %v3517_v26  ;;  %v3469_v27 = vsel %vm3433_vm10, %v7944_v52, 8  ;;  %v3479_v26 = vsel %vm3443_vm3, %v7944_v52, 8 }
 0x77c   : > { %v5443_v55 = vsel %vm5432_vm2, %v5406_v23, 0.0  ;;  %v9088_v21 = vpop.xlane.xlu0 %3896  ;;  %v9133_v35 = vsel %vm3303_vm9, %v3469_v27, 2147483647  ;;  %v10394_v23 = vld [vmem:[#allocation64_spill] sm:$0xff] }
 0x77d   : > { %5479 = vst.msk [vmem:[%s8668_s20 + $0x50] sm:$0xff] %vm3303_vm9, %v5443_v55  ;;  %vm3898_vm8 = vcmp.eq.f32.partialorder %v8880_v31, %v9088_v21  ;;  %v4578_v31 = vmul.f32 %v9083_v10, %v4577_v56  ;;  %v9110_v45 = vpop.xlane.xlu2 %3731  ;;  %v3729_v55 = vcvt.s32.f32 %v3727_v1  ;;  %v3524_v50 = vsel %vm3523_vm12, %v3519_v49, inf }
 0x77e   : > { %v9098_v2 = vsel %vm3898_vm8, %v3894_v34, inf  ;;  %v4985_v34 = vsub.f32 %v8901_v16, %v10393_v17  ;;  %vm3733_vm6 = vcmp.eq.f32.partialorder %v8862_v33, %v9110_v45  ;;  %v4527_v56 = vor.u32 1.1754944e-38, %v4526_v48 }
 0x77f   : > { %v4579_v6 = vadd.f32 %v9083_v10, %v4578_v31  ;;  %v4586_v16 = vand.u32 2147483648, %v9051_v39  ;;  %vm4580_vm8 = vweird.f32 %v9051_v39  ;;  %v4584_v49 = vand.u32 2147483647, %v9051_v39 }
 0x780   : > { %v4528_v36 = vsel %vm4525_vm7, %v4527_v56, %v4523_v20  ;;  %v6267_v48 = vmul.f32 -1.442695, %v10394_v23  ;;  %v9140_v31 = vsel %vm3303_vm9, %v3483_v14, 2147483647  ;;  %v3734_v27 = vsel %vm3733_vm6, %v3729_v55, inf  ;;  %vm4582_vm10 = vmor %vm4580_vm8, %vm4581_vm5  ;;  %v10397_v14 = vld [vmem:[#allocation125_spill] sm:$0xff] }
 0x781   : > { %v9151_v17 = vsel %vm3303_vm9, %v3479_v26, 2147483647  ;;  %v4583_v39 = vsel %vm4582_vm10, %v9083_v10, %v4579_v6  ;;  %v4587_v56 = vor.u32 1.1754944e-38, %v4586_v16  ;;  %vm4585_vm11 = vcmp.eq.f32.partialorder %v4584_v49, 8.507059e+37  ;;  %v10398_v6 = vld [vmem:[#allocation89_spill] sm:$0xff] }
 0x782   : > { %v3983_v55 = vshra.s32 %v9140_v31, 16  ;;  %6489 = vpow2.f32 %v6267_v48 }
 0x784   : > { %v9167_v16 = vcvt.s32.f32 %v3983_v55  ;;  %v9191_v55 = vld [vmem:[%s10085_s5 + $0x98] sm:$0xff] }
 0x788   : > { %v6490_v23 = vpop.eup %6489 }
 0x789   : > { %v4143_v48 = vadd.f32 1.0, %v6490_v23  ;;  %v10399_v23 = vld [vmem:[#allocation110_spill] sm:$0xff] }
 0x78a   : > { %v5261_v1 = vpop.permute.xlu1 %5260 }
 0x78b   : > { %v5346_v7 = vsel %vm5322_vm14, %v4985_v34, %v5261_v1  ;;  %v10396_v34 = vld [vmem:[#allocation133_spill] sm:$0xff]  ;;  %v4588_v1 = vsel %vm4585_vm11, %v4587_v56, %v4583_v39  ;;  %vm4310_vm13 = vweird.f32 %v4143_v48 }
 0x78c   : > { %v9143_v47 = vsel %vm571_vm1, %v5346_v7, %v4528_v36  ;;  %3525 = vmin.xlane.f32.xlu2 %v3524_v50  ;;  %v4989_v20 = vsub.f32 %v8923_v30, %v10396_v34  ;;  %v3773_v50 = vshra.s32 %v9133_v35, 16  ;;  %v3923_v36 = vshra.s32 %v9151_v17, 16 }
 0x78d   : > { %10395 = vst [vmem:[#allocation94_spill] sm:$0xff] %v9143_v47  ;;  %3735 = vmin.xlane.f32.xlu0 %v3734_v27  ;;  %v6271_v30 = vmul.f32 -1.442695, %v10398_v6 }
 0x78e   : > { %3675 = vmin.xlane.f32.xlu1 %v10397_v14  ;;  %v9165_v7 = vcvt.s32.f32 %v3773_v50  ;;  %v9170_v49 = vcvt.s32.f32 %v3923_v36  ;;  %v9180_v14 = vld [vmem:[%s10085_s5 + $0x108] sm:$0xff]  ;;  %v6284_v36 = vmul.f32 -1.442695, %v8931_v32  ;;  %v4314_v32 = vand.u32 2147483647, %v4143_v48 }
 0x78f   : > { %v5269_v33 = vpop.permute.xlu0 %5268  ;;  %6491 = vpow2.f32 %v6271_v30  ;;  %v5139_v56 = vadd.f32 %v9180_v14, %v8790_v4 }
 0x790   : > { %v5350_v26 = vsel %vm5322_vm14, %v4989_v20, %v5269_v33  ;;  %6493 = vrcp.f32 %v4143_v48  ;;  %v6288_v33 = vmul.f32 -1.442695, %v8547_v18  ;;  %v9202_v18 = vld [vmem:[%s10085_s5 + $0xe8] sm:$0xff]  ;;  %vm9217_vm3 = vcmp.eq.f32.partialorder %v4314_v32, 8.507059e+37 }
 0x791   : > { %v9162_v10 = vsel %vm571_vm1, %v5350_v26, %v4588_v1  ;;  %v5125_v1 = vadd.f32 %v9191_v55, %v8723_v51  ;;  %v5135_v6 = vadd.f32 %v9202_v18, %v8701_v28  ;;  %v6633_v28 = vld [vmem:[%s10085_s5 + $0x48] sm:$0xff] }
 0x794   : > { %3776 = vmin.xlane.f32.xlu2 %v9165_v7 }
 0x795   : > { %3986 = vmin.xlane.f32.xlu0 %v9167_v16  ;;  %v6492_v27 = vpop.eup %6491 }
 0x796   : > { %3926 = vmin.xlane.f32.xlu1 %v9170_v49  ;;  %v9174_v39 = vadd.f32 1.0, %v6492_v27  ;;  %v6494_v34 = vpop.eup %6493  ;;  %v3633_v27 = vcvt.f32.s32 %v10399_v23 }
 0x797   : > { %v4306_v20 = vmul.f32 %v6494_v34, %v4143_v48  ;;  %vm4311_vm12 = vweird.f32 %v6494_v34 }
 0x798   : > { %6495 = vrcp.f32 %v9174_v39  ;;  %vm9213_vm15 = vmor %vm4310_vm13, %vm4311_vm12  ;;  %v3634_v23 = vshll.u32 %v3633_v27, 16  ;;  %vm4370_vm5 = vweird.f32 %v9174_v39 }
 0x799   : > { %v4307_v26 = vsub.f32 1.0, %v4306_v20  ;;  %6497 = vpow2.f32 %v6288_v33  ;;  %v4316_v33 = vand.u32 2147483648, %v4143_v48 }
 0x79a   : > { %6499 = vpow2.f32 %v6284_v36 }
 0x79b   : > { %v4308_v30 = vmul.f32 %v6494_v34, %v4307_v26  ;;  %v10400_v26 = vld [vmem:[#allocation66_spill] sm:$0xff]  ;;  %v4317_v0 = vor.u32 1.1754944e-38, %v4316_v33 }
 0x79c   : > { %v4971_v36 = vsub.f32 %v6633_v28, %v10400_v26  ;;  %v3693_v28 = vcvt.f32.s32 %v8969_v12  ;;  %v4376_v26 = vand.u32 2147483648, %v9174_v39  ;;  %v3877_v12 = vand.u32 65535, %v8972_v3 }
 0x79d   : > { %v4309_v20 = vadd.f32 %v6494_v34, %v4308_v30 }
 0x79e   : > { %v9184_v50 = vpop.eup %6495  ;;  %v5332_v32 = vsel %vm5322_vm14, %v4971_v36, %v10405_v44  ;;  %v4374_v44 = vand.u32 2147483647, %v9174_v39  ;;  %v3694_v36 = vshll.u32 %v3693_v28, 16 }
 0x79f   : > { %v4366_v4 = vmul.f32 %v9184_v50, %v9174_v39  ;;  %v4313_v48 = vsel %vm9213_vm15, %v6494_v34, %v4309_v20  ;;  %vm4371_vm4 = vweird.f32 %v9184_v50  ;;  %v6634_v34 = vld [vmem:[%s10085_s5 + $0x68] sm:$0xff]  ;;  %v10406_v20 = vld [vmem:[#allocation130_spill] sm:$0xff] }
 0x7a0   : > { %v4318_v33 = vsel %vm9217_vm3, %v4317_v0, %v4313_v48  ;;  %vm4372_vm6 = vmor %vm4370_vm5, %vm4371_vm4  ;;  %vm4375_vm7 = vcmp.eq.f32.partialorder %v4374_v44, 8.507059e+37 }
 0x7a1   : > { %v4367_v51 = vsub.f32 1.0, %v4366_v4  ;;  %v4377_v4 = vor.u32 1.1754944e-38, %v4376_v26 }
 0x7a3   : > { %v4368_v47 = vmul.f32 %v9184_v50, %v4367_v51 }
 0x7a5   : > { %v4369_v58 = vadd.f32 %v9184_v50, %v4368_v47 }
 0x7a7   : > { %v4373_v0 = vsel %vm4372_vm6, %v9184_v50, %v4369_v58  ;;  %v3937_v58 = vand.u32 65535, %v8986_v38 }
 0x7a8   : > { %v4378_v50 = vsel %vm4375_vm7, %v4377_v4, %v4373_v0  ;;  %v10409_v0 = vld [vmem:[#allocation53_spill] sm:$0xff] }
 0x7a9   : > { %5280 = vrot.lane.b32.xlu0 %v5139_v56, %s6662_s13  ;;  %v6498_v56 = vpop.eup %6497  ;;  %v6260_v4 = vmul.f32 -1.442695, %v10409_v0  ;;  %v6274_v0 = vmul.f32 -1.442695, %v10353_v5 }
 0x7aa   : > { %v9223_v51 = vadd.f32 1.0, %v6498_v56  ;;  %v4975_v56 = vsub.f32 %v6634_v34, %v10406_v20 }
 0x7ac   : > { %5252 = vrot.lane.b32.xlu2 %v5125_v1, %s6662_s13  ;;  %v6500_v1 = vpop.eup %6499  ;;  %6501 = vrcp.f32 %v9223_v51  ;;  %vm4625_vm13 = vweird.f32 %v9223_v51 }
 0x7ad   : > { %v9225_v60 = vadd.f32 1.0, %v6500_v1  ;;  %v5368_v1 = vsel %vm571_vm1, %v5332_v32, %v4318_v33 }
 0x7af   : > { %5272 = vrot.lane.b32.xlu1 %v5135_v6, %s6662_s13  ;;  %6503 = vrcp.f32 %v9225_v60  ;;  %vm4565_vm4 = vweird.f32 %v9225_v60 }
 0x7b0   : > { %6505 = vpow2.f32 %v6260_v4 }
 0x7b5   : > { %v3631_v30 = vpop.xlane.xlu1 %3630 }
 0x7b6   : > { %v3632_v8 = vcvt.f32.s32 %v3631_v30  ;;  %v5336_v30 = vsel %vm5322_vm14, %v4975_v56, %v9024_v37  ;;  %v6502_v37 = vpop.eup %6501 }
 0x7b7   : > { %v5372_v32 = vsel %vm571_vm1, %v5336_v30, %v4378_v50  ;;  %v6504_v34 = vpop.eup %6503  ;;  %v4621_v44 = vmul.f32 %v6502_v37, %v9223_v51  ;;  %vm4626_vm11 = vweird.f32 %v6502_v37  ;;  %v4571_v50 = vand.u32 2147483648, %v9225_v60 }
 0x7b8   : > { %v3635_v27 = vadd.s32 %v3634_v23, %v3632_v8  ;;  %v4561_v38 = vmul.f32 %v6504_v34, %v9225_v60  ;;  %vm4566_vm12 = vweird.f32 %v6504_v34  ;;  %vm9284_vm3 = vmor %vm4625_vm13, %vm4626_vm11 }
 0x7b9   : > { %vm9294_vm5 = vmor %vm4565_vm4, %vm4566_vm12 }
 0x7ba   : > { %v5151_v47 = vcvt.s32.f32 %v3635_v27  ;;  %v3691_v8 = vpop.xlane.xlu0 %3690  ;;  %v3879_v27 = vcvt.s32.f32 %v3877_v12  ;;  %v3939_v12 = vcvt.s32.f32 %v3937_v58  ;;  %v4629_v58 = vand.u32 2147483647, %v9223_v51 }
 0x7bb   : > { %v3692_v6 = vcvt.f32.s32 %v3691_v8  ;;  %v4622_v8 = vsub.f32 1.0, %v4621_v44 }
 0x7bc   : > { %v5405_v3 = vsel %vm5395_vm0, %v5368_v1, %v5151_v47  ;;  %v9272_v47 = vpop.permute.xlu2 %5246  ;;  %v4562_v1 = vsub.f32 1.0, %v4561_v38  ;;  %vm4630_vm6 = vcmp.eq.f32.partialorder %v4629_v58, 8.507059e+37  ;;  %v10418_v58 = vld [vmem:[#allocation139_spill] sm:$0xff] }
 0x7bd   : > { %v5442_v39 = vsel %vm5432_vm2, %v5405_v3, 0.0  ;;  %v3695_v23 = vadd.s32 %v3694_v36, %v3692_v6  ;;  %v9250_v48 = vpop.xlane.xlu1 %3881  ;;  %v4623_v36 = vmul.f32 %v6502_v37, %v4622_v8 }
 0x7be   : > { %10407 = vst [vmem:[#allocation63_spill] sm:$0xff] %v9250_v48  ;;  %vm3883_vm8 = vcmp.eq.f32.partialorder %v8990_v22, %v9250_v48  ;;  %v4563_v6 = vmul.f32 %v6504_v34, %v4562_v1 }
 0x7bf   : > { %5478 = vst.msk [vmem:[%s8668_s20 + $0x48] sm:$0xff] %vm3303_vm9, %v5442_v39  ;;  %v5155_v28 = vcvt.s32.f32 %v3695_v23  ;;  %v9257_v26 = vsel %vm3883_vm8, %v3879_v27, inf  ;;  %v4624_v30 = vadd.f32 %v6502_v37, %v4623_v36  ;;  %v10410_v39 = vld [vmem:[#allocation69_spill] sm:$0xff] }
 0x7c0   : > { %10408 = vst [vmem:[#allocation102_spill] sm:$0xff] %v9257_v26  ;;  %v6270_v23 = vmul.f32 -1.442695, %v10410_v39  ;;  %v4564_v27 = vadd.f32 %v6504_v34, %v4563_v6  ;;  %v4572_v6 = vor.u32 1.1754944e-38, %v4571_v50 }
 0x7c1   : > { %v5409_v20 = vsel %vm5395_vm0, %v5372_v32, %v5155_v28  ;;  %v4569_v32 = vand.u32 2147483647, %v9225_v60  ;;  %v10416_v60 = vld [vmem:[#allocation137_spill] sm:$0xff] }
 0x7c2   : > { %v5446_v56 = vsel %vm5432_vm2, %v5409_v20, 0.0  ;;  %v9262_v33 = vpop.xlane.xlu0 %3941  ;;  %v4628_v20 = vsel %vm9284_vm3, %v6502_v37, %v4624_v30  ;;  %6507 = vpow2.f32 %v6270_v23  ;;  %v4568_v8 = vsel %vm9294_vm5, %v6504_v34, %v4564_v27  ;;  %v6506_v27 = vpop.eup %6505 }
 0x7c3   : > { %5482 = vst.msk [vmem:[%s8668_s20 + $0x68] sm:$0xff] %vm3303_vm9, %v5446_v56  ;;  %vm3943_vm10 = vcmp.eq.f32.partialorder %v8999_v19, %v9262_v33  ;;  %v4631_v19 = vand.u32 2147483648, %v9223_v51  ;;  %v3409_v51 = vsel %vm3303_vm9, %v8741_v9, -inf  ;;  %v4988_v1 = vsub.f32 %v9020_v62, %v10416_v60 }
 0x7c4   : > { %v9270_v22 = vsel %vm3943_vm10, %v3939_v12, inf  ;;  %v9275_v3 = vpop.xlane.xlu2 %3401  ;;  %v10415_v12 = vld [vmem:[#allocation146_spill] sm:$0xff]  ;;  %vm4570_vm7 = vcmp.eq.f32.partialorder %v4569_v32, 8.507059e+37  ;;  %6509 = vpow2.f32 %v6274_v0  ;;  %v4136_v28 = vadd.f32 1.0, %v6506_v27 }
 0x7c5   : > { %vm3446_vm15 = vcmp.eq.f32.partialorder %v8590_v43, %v9275_v3  ;;  %v4992_v44 = vsub.f32 %v9013_v11, %v10415_v12  ;;  %v4632_v38 = vor.u32 1.1754944e-38, %v4631_v19  ;;  %v4573_v34 = vsel %vm4570_vm7, %v4572_v6, %v4568_v8 }
 0x7c6   : > { %v3482_v37 = vsel %vm3446_vm15, %v7944_v52, 8  ;;  %6511 = vrcp.f32 %v4136_v28  ;;  %v4814_v56 = vmul.f32 1.442695, %v8689_v42  ;;  %v6291_v0 = vmul.f32 -1.442695, %v8680_v29  ;;  %v9341_v29 = vld [vmem:[%s10085_s5 + $0x100] sm:$0xff] }
 0x7c7   : > { %v4633_v4 = vsel %vm4630_vm6, %v4632_v38, %v4628_v20  ;;  %v9312_v62 = vsel %vm3303_vm9, %v3482_v37, 2147483647  ;;  %v6287_v27 = vmul.f32 -1.442695, %v9037_v46  ;;  %vm4205_vm11 = vweird.f32 %v4136_v28 }
 0x7c8   : > { %v6508_v5 = vpop.eup %6507  ;;  %v3968_v50 = vshra.s32 %v9312_v62, 16 }
 0x7c9   : > { %v4146_v32 = vadd.f32 1.0, %v6508_v5  ;;  %v4211_v5 = vand.u32 2147483648, %v4136_v28 }
 0x7ca   : > { %v9319_v20 = vcvt.s32.f32 %v3968_v50 }
 0x7cb   : > { %6513 = vrcp.f32 %v4146_v32  ;;  %vm4355_vm13 = vweird.f32 %v4146_v32 }
 0x7cc   : > { %6515 = vpow2.f32 %v4814_v56  ;;  %v5138_v56 = vadd.f32 %v9341_v29, %v8854_v24 }
 0x7d5   : > { %v5275_v36 = vpop.permute.xlu0 %5274  ;;  %3410 = vmax.xlane.f32.xlu2 %v3409_v51  ;;  %v6510_v51 = vpop.eup %6509 }
 0x7d6   : > { %v5353_v30 = vsel %vm5322_vm14, %v4992_v44, %v5275_v36  ;;  %v5267_v11 = vpop.permute.xlu1 %5266  ;;  %v9323_v12 = vadd.f32 1.0, %v6510_v51  ;;  %v6512_v44 = vpop.eup %6511 }
 0x7d7   : > { %v9308_v39 = vsel %vm571_vm1, %v5353_v30, %v4633_v4  ;;  %v5349_v23 = vsel %vm5322_vm14, %v4988_v1, %v5267_v11  ;;  %v6514_v38 = vpop.eup %6513  ;;  %v4201_v8 = vmul.f32 %v6512_v44, %v4136_v28  ;;  %v9328_v36 = vpop.permute.xlu2 %4916  ;;  %vm4206_vm8 = vweird.f32 %v6512_v44 }
 0x7d8   : > { %v9315_v19 = vsel %vm571_vm1, %v5349_v23, %v4573_v34  ;;  %6517 = vrcp.f32 %v9323_v12  ;;  %v6516_v60 = vpop.eup %6515  ;;  %v4351_v1 = vmul.f32 %v6514_v38, %v4146_v32  ;;  %10419 = vst [vmem:[#allocation58_spill] sm:$0xff] %v9328_v36  ;;  %vm4356_vm10 = vweird.f32 %v6514_v38  ;;  %vm9346_vm12 = vmor %vm4205_vm11, %vm4206_vm8 }
 0x7d9   : > { %10417 = vst [vmem:[#allocation116_spill] sm:$0xff] %v9315_v19  ;;  %3720 = vmin.xlane.f32.xlu1 %v10418_v58  ;;  %v4202_v6 = vsub.f32 1.0, %v4201_v8  ;;  %6519 = vpow2.f32 %v6291_v0  ;;  %v4359_v0 = vand.u32 2147483647, %v4146_v32  ;;  %vm9355_vm15 = vmor %vm4355_vm13, %vm4356_vm10  ;;  %vm4415_vm6 = vweird.f32 %v9323_v12 }
 0x7da   : > { %v4352_v4 = vsub.f32 1.0, %v4351_v1  ;;  %v4361_v1 = vand.u32 2147483648, %v4146_v32  ;;  %6521 = vpow2.f32 %v6287_v27 }
 0x7db   : > { %v4203_v11 = vmul.f32 %v6512_v44, %v4202_v6  ;;  %vm4360_vm5 = vcmp.eq.f32.partialorder %v4359_v0, 8.507059e+37 }
 0x7dc   : > { %v4353_v34 = vmul.f32 %v6514_v38, %v4352_v4  ;;  %v3528_v4 = vcvt.f32.s32 %v10388_v54  ;;  %v6636_v54 = vld [vmem:[%s10085_s5 + $0x10] sm:$0xff]  ;;  %v4362_v27 = vor.u32 1.1754944e-38, %v4361_v1 }
 0x7dd   : > { %v4204_v58 = vadd.f32 %v6512_v44, %v4203_v11 }
 0x7de   : > { %v9326_v37 = vpop.eup %6517  ;;  %v4354_v51 = vadd.f32 %v6514_v38, %v4353_v34  ;;  %v3529_v11 = vshll.u32 %v3528_v4, 16 }
 0x7df   : > { %v4411_v30 = vmul.f32 %v9326_v37, %v9323_v12  ;;  %v9336_v50 = vpop.permute.xlu2 %5060  ;;  %v6520_v46 = vpop.eup %6519  ;;  %v4208_v24 = vsel %vm9346_vm12, %v6512_v44, %v4204_v58  ;;  %vm4416_vm3 = vweird.f32 %v9326_v37  ;;  %v10424_v44 = vld [vmem:[#allocation65_spill] sm:$0xff]  ;;  %v3738_v58 = vcvt.f32.s32 %v9110_v45 }
 0x7e0   : > { %v9361_v34 = vadd.f32 1.0, %v6520_v46  ;;  %vm9378_vm7 = vmor %vm4415_vm6, %vm4416_vm3  ;;  %v4421_v45 = vand.u32 2147483648, %v9323_v12 }
 0x7e1   : > { %3971 = vmin.xlane.f32.xlu1 %v9319_v20  ;;  %v4412_v23 = vsub.f32 1.0, %v4411_v30  ;;  %v4212_v30 = vor.u32 1.1754944e-38, %v4211_v5 }
 0x7e2   : > { %6523 = vrcp.f32 %v9361_v34 }
 0x7e3   : > { %v4413_v8 = vmul.f32 %v9326_v37, %v4412_v23  ;;  %v4964_v23 = vsub.f32 %v6636_v54, %v10424_v44  ;;  %v10430_v44 = vld [vmem:[#allocation144_spill] sm:$0xff] }
 0x7e5   : > { %v4414_v32 = vadd.f32 %v9326_v37, %v4413_v8  ;;  %v10426_v8 = vld [vmem:[#allocation71_spill] sm:$0xff] }
 0x7e7   : > { %v4418_v0 = vsel %vm9378_vm7, %v9326_v37, %v4414_v32  ;;  %v3772_v32 = vand.u32 65535, %v9133_v35 }
 0x7ed   : > { %4922 = vrot.lane.b32.xlu2 %v6516_v60, %s6661_s30 }
 0x7f5   : > { %5066 = vrot.lane.b32.xlu2 %v6516_v60, %s6660_s29  ;;  %v4209_v60 = vand.u32 2147483647, %v4136_v28  ;;  %v4358_v28 = vsel %vm9355_vm15, %v6514_v38, %v4354_v51  ;;  %v6522_v38 = vpop.eup %6521  ;;  %v6637_v51 = vld [vmem:[%s10085_s5 + $0x60] sm:$0xff]  ;;  %vm4670_vm15 = vweird.f32 %v9361_v34 }
 0x7f6   : > { %v4974_v46 = vsub.f32 %v6637_v51, %v10426_v8  ;;  %v4363_v19 = vsel %vm4360_vm5, %v4362_v27, %v4358_v28  ;;  %v10429_v28 = vld [vmem:[#allocation97_spill] sm:$0xff]  ;;  %v4978_v27 = vsub.f32 %v8910_v61, %v10430_v44  ;;  %v9392_v43 = vadd.f32 1.0, %v6522_v38 }
 0x7f7   : > { %vm4210_vm4 = vcmp.eq.f32.partialorder %v4209_v60, 8.507059e+37  ;;  %v5325_v54 = vsel %vm5322_vm14, %v4964_v23, %v10429_v28  ;;  %v4422_v60 = vor.u32 1.1754944e-38, %v4421_v45  ;;  %v6524_v45 = vpop.eup %6523 }
 0x7f8   : > { %v4213_v5 = vsel %vm4210_vm4, %v4212_v30, %v4208_v24  ;;  %v4419_v24 = vand.u32 2147483647, %v9323_v12  ;;  %v5339_v12 = vsel %vm5322_vm14, %v4978_v27, %v9272_v47  ;;  %6525 = vrcp.f32 %v9392_v43 }
 0x7f9   : > { %vm4671_vm12 = vweird.f32 %v6524_v45  ;;  %vm4610_vm7 = vweird.f32 %v9392_v43 }
 0x7fa   : > { %5278 = vrot.lane.b32.xlu1 %v5138_v56, %s6662_s13  ;;  %v10425_v56 = vld [vmem:[#allocation124_spill] sm:$0xff]  ;;  %vm4420_vm8 = vcmp.eq.f32.partialorder %v4419_v24, 8.507059e+37  ;;  %v4666_v24 = vmul.f32 %v6524_v45, %v9361_v34  ;;  %vm4672_vm3 = vmor %vm4670_vm15, %vm4671_vm12 }
 0x7fb   : > { %v3678_v6 = vcvt.f32.s32 %v10425_v56  ;;  %v3739_v56 = vshll.u32 %v3738_v58, 16  ;;  %v4423_v38 = vsel %vm4420_vm8, %v4422_v60, %v4418_v0 }
 0x7fc   : > { %v5375_v47 = vsel %vm571_vm1, %v5339_v12, %v4423_v38  ;;  %v10434_v38 = vld [vmem:[#allocation88_spill] sm:$0xff] }
 0x7fd   : > { %v3679_v48 = vshll.u32 %v3678_v6, 16  ;;  %v5361_v6 = vsel %vm571_vm1, %v5325_v54, %v4213_v5 }
 0x7ff   : > { %v3526_v1 = vpop.xlane.xlu2 %3525 }
 0x800   : > { %v3527_v30 = vcvt.f32.s32 %v3526_v1  ;;  %v3736_v4 = vpop.xlane.xlu0 %3735  ;;  %v10431_v1 = vld [vmem:[#allocation131_spill] sm:$0xff] }
 0x801   : > { %v3737_v51 = vcvt.f32.s32 %v3736_v4  ;;  %v3676_v8 = vpop.xlane.xlu1 %3675  ;;  %v5335_v23 = vsel %vm5322_vm14, %v4974_v46, %v10431_v1  ;;  %v3774_v46 = vcvt.s32.f32 %v3772_v32 }
 0x802   : > { %v3530_v36 = vadd.s32 %v3529_v11, %v3527_v30  ;;  %v3677_v26 = vcvt.f32.s32 %v3676_v8  ;;  %v3922_v11 = vand.u32 65535, %v9151_v17 }
 0x803   : > { %v3740_v37 = vadd.s32 %v3739_v56, %v3737_v51  ;;  %v6526_v56 = vpop.eup %6525  ;;  %v4981_v51 = vsub.f32 %v9191_v55, %v8707_v59  ;;  %v4674_v59 = vand.u32 2147483647, %v9361_v34 }
 0x804   : > { %v5144_v61 = vcvt.s32.f32 %v3530_v36  ;;  %v3680_v58 = vadd.s32 %v3679_v48, %v3677_v26  ;;  %v5371_v36 = vsel %vm571_vm1, %v5335_v23, %v4363_v19  ;;  %v3924_v44 = vcvt.s32.f32 %v3922_v11  ;;  %v10435_v11 = vld [vmem:[#allocation103_spill] sm:$0xff] }
 0x805   : > { %v5158_v4 = vcvt.s32.f32 %v3740_v37  ;;  %v4606_v8 = vmul.f32 %v6526_v56, %v9392_v43  ;;  %vm4675_vm5 = vcmp.eq.f32.partialorder %v4674_v59, 8.507059e+37  ;;  %vm4611_vm6 = vweird.f32 %v6526_v56 }
 0x806   : > { %v5398_v35 = vsel %vm5395_vm0, %v5361_v6, %v5144_v61  ;;  %v5154_v30 = vcvt.s32.f32 %v3680_v58  ;;  %v4676_v58 = vand.u32 2147483648, %v9361_v34  ;;  %v10433_v6 = vld [vmem:[#allocation112_spill] sm:$0xff]  ;;  %vm4612_vm8 = vmor %vm4610_vm7, %vm4611_vm6 }
 0x807   : > { %v5435_v48 = vsel %vm5432_vm2, %v5398_v35, 0.0  ;;  %v5412_v26 = vsel %vm5395_vm0, %v5375_v47, %v5158_v4  ;;  %v9407_v5 = vpop.xlane.xlu2 %3776  ;;  %v4607_v1 = vsub.f32 1.0, %v4606_v8  ;;  %vm3436_vm13 = vcmp.eq.f32.partialorder %v10434_v38, %v10433_v6  ;;  %v10436_v47 = vld [vmem:[#allocation73_spill] sm:$0xff] }
 0x808   : > { %5471 = vst.msk [vmem:[%s8668_s20 + $0x10] sm:$0xff] %vm3303_vm9, %v5435_v48  ;;  %v5449_v17 = vsel %vm5432_vm2, %v5412_v26, 0.0  ;;  %v5408_v0 = vsel %vm5395_vm0, %v5371_v36, %v5154_v30  ;;  %vm3778_vm10 = vcmp.eq.f32.partialorder %v9165_v7, %v9407_v5  ;;  %v4667_v7 = vsub.f32 1.0, %v4666_v24  ;;  %v9433_v32 = vpop.xlane.xlu0 %3986 }
 0x809   : > { %5485 = vst.msk [vmem:[%s8668_s20 + $0x80] sm:$0xff] %vm3303_vm9, %v5449_v17  ;;  %v5445_v19 = vsel %vm5432_vm2, %v5408_v0, 0.0  ;;  %v9419_v28 = vpop.xlane.xlu1 %3926  ;;  %v3779_v54 = vsel %vm3778_vm10, %v3774_v46, inf  ;;  %v4608_v55 = vmul.f32 %v6526_v56, %v4607_v1  ;;  %vm3568_vm4 = vcmp.eq.f32.partialorder %v10436_v47, %v10435_v11  ;;  %v10437_v1 = vld [vmem:[#allocation74_spill] sm:$0xff] }
 0x80a   : > { %5481 = vst.msk [vmem:[%s8668_s20 + $0x60] sm:$0xff] %vm3303_vm9, %v5445_v19  ;;  %vm3928_vm11 = vcmp.eq.f32.partialorder %v9170_v49, %v9419_v28  ;;  %3780 = vmin.xlane.f32.xlu0 %v3779_v54  ;;  %v4668_v37 = vmul.f32 %v6524_v45, %v4667_v7  ;;  %v10432_v49 = vld [vmem:[#allocation72_spill] sm:$0xff]  ;;  %v3472_v35 = vsel %vm3436_vm13, %v7944_v52, 8  ;;  %v4995_v30 = vsub.f32 %v9180_v14, %v8782_v25 }
 0x80b   : > { %v9425_v27 = vsel %vm3928_vm11, %v3924_v44, inf  ;;  %v3562_v61 = vand.u32 65535, %v10432_v49  ;;  %v4677_v36 = vor.u32 1.1754944e-38, %v4676_v58  ;;  %v4609_v46 = vadd.f32 %v6526_v56, %v4608_v55 }
 0x80c   : > { %v4669_v23 = vadd.f32 %v6524_v45, %v4668_v37  ;;  %v9449_v24 = vsel %vm3303_vm9, %v3472_v35, 2147483647  ;;  %v4614_v25 = vand.u32 2147483647, %v9392_v43  ;;  %v4991_v54 = vsub.f32 %v9202_v18, %v8677_v13 }
 0x80d   : > { %v3564_v48 = vcvt.s32.f32 %v3562_v61  ;;  %v4613_v14 = vsel %vm4612_vm8, %v6526_v56, %v4609_v46  ;;  %v3818_v7 = vshra.s32 %v9449_v24, 16  ;;  %v9471_v61 = vld [vmem:[%s10085_s5 + $0xb0] sm:$0xff]  ;;  %v6290_v55 = vmul.f32 -1.442695, %v9275_v3 }
 0x80e   : > { %v4673_v4 = vsel %vm4672_vm3, %v6524_v45, %v4669_v23  ;;  %v4616_v45 = vand.u32 2147483648, %v9392_v43  ;;  %vm4615_vm10 = vcmp.eq.f32.partialorder %v4614_v25, 8.507059e+37  ;;  %v6273_v23 = vmul.f32 -1.442695, %v10437_v1  ;;  %v10438_v43 = vld [vmem:[#allocation150_spill] sm:$0xff]  ;;  %v10440_v25 = vld [vmem:[#allocation81_spill] sm:$0xff] }
 0x80f   : > { %v5253_v60 = vpop.permute.xlu2 %5252  ;;  %v4678_v17 = vsel %vm4675_vm5, %v4677_v36, %v4673_v4  ;;  %v3569_v0 = vsel %vm3568_vm4, %v3564_v48, inf  ;;  %v9465_v49 = vcvt.s32.f32 %v3818_v7  ;;  %v5128_v58 = vadd.f32 %v9471_v61, %v8820_v63  ;;  %v10441_v1 = vld [vmem:[#allocation145_spill] sm:$0xff] }
 0x810   : > { %v9431_v12 = vsel %vm5322_vm14, %v4981_v51, %v5253_v60  ;;  %v4617_v44 = vor.u32 1.1754944e-38, %v4616_v45  ;;  %6527 = vpow2.f32 %v6273_v23  ;;  %v6639_v45 = vld [vmem:[%s10085_s5 + $0x78] sm:$0xff] }
 0x812   : > { %v4618_v8 = vsel %vm4615_vm10, %v4617_v44, %v4613_v14  ;;  %v4977_v14 = vsub.f32 %v6639_v45, %v10440_v25 }
 0x814   : > { %v5338_v23 = vsel %vm5322_vm14, %v4977_v14, %v10441_v1  ;;  %v10445_v14 = vld [vmem:[#allocation115_spill] sm:$0xff] }
 0x816   : > { %v6528_v13 = vpop.eup %6527 }
 0x817   : > { %v4149_v18 = vadd.f32 1.0, %v6528_v13  ;;  %v3967_v13 = vand.u32 65535, %v9312_v62 }
 0x819   : > { %6529 = vrcp.f32 %v4149_v18  ;;  %v4406_v46 = vand.u32 2147483648, %v4149_v18  ;;  %vm4400_vm13 = vweird.f32 %v4149_v18  ;;  %v4404_v3 = vand.u32 2147483647, %v4149_v18 }
 0x81a   : > { %6531 = vpow2.f32 %v6290_v55 }
 0x81b   : > { %v5281_v26 = vpop.permute.xlu0 %5280  ;;  %vm4405_vm3 = vcmp.eq.f32.partialorder %v4404_v3, 8.507059e+37  ;;  %v10443_v3 = vld [vmem:[#allocation126_spill] sm:$0xff] }
 0x81c   : > { %v5356_v34 = vsel %vm5322_vm14, %v4995_v30, %v5281_v26  ;;  %v10439_v30 = vld [vmem:[#allocation138_spill] sm:$0xff] }
 0x81d   : > { %v9452_v19 = vsel %vm571_vm1, %v5356_v34, %v4678_v17  ;;  %v3723_v36 = vcvt.f32.s32 %v10439_v30  ;;  %v6277_v30 = vmul.f32 -1.442695, %v10386_v57 }
 0x81e   : > { %3570 = vmin.xlane.f32.xlu2 %v3569_v0 }
 0x81f   : > { %v6530_v56 = vpop.eup %6529 }
 0x820   : > { %v4396_v59 = vmul.f32 %v6530_v56, %v4149_v18  ;;  %v6532_v48 = vpop.eup %6531  ;;  %vm4401_vm12 = vweird.f32 %v6530_v56 }
 0x821   : > { %v5273_v51 = vpop.permute.xlu1 %5272  ;;  %vm4402_vm15 = vmor %vm4400_vm13, %vm4401_vm12  ;;  %v4166_v44 = vadd.f32 1.0, %v6532_v48  ;;  %v10442_v48 = vld [vmem:[#allocation155_spill] sm:$0xff] }
 0x822   : > { %v5352_v60 = vsel %vm5322_vm14, %v4991_v54, %v5273_v51  ;;  %v4397_v4 = vsub.f32 1.0, %v4396_v59  ;;  %v3724_v54 = vshll.u32 %v3723_v36, 16 }
 0x823   : > { %v9461_v37 = vsel %vm571_vm1, %v5352_v60, %v4618_v8  ;;  %v4407_v60 = vor.u32 1.1754944e-38, %v4406_v46  ;;  %6533 = vrcp.f32 %v4166_v44  ;;  %vm4655_vm7 = vweird.f32 %v4166_v44 }
 0x824   : > { %3765 = vmin.xlane.f32.xlu1 %v10438_v43  ;;  %v4398_v47 = vmul.f32 %v6530_v56, %v4397_v4  ;;  %6535 = vpow2.f32 %v6277_v30 }
 0x826   : > { %3821 = vmin.xlane.f32.xlu2 %v9465_v49  ;;  %v4399_v26 = vadd.f32 %v6530_v56, %v4398_v47  ;;  %v3969_v47 = vcvt.s32.f32 %v3967_v13 }
 0x828   : > { %v4403_v51 = vsel %vm4402_vm15, %v6530_v56, %v4399_v26 }
 0x829   : > { %v4408_v18 = vsel %vm4405_vm3, %v4407_v60, %v4403_v51  ;;  %v6534_v36 = vpop.eup %6533  ;;  %v10446_v51 = vld [vmem:[#allocation68_spill] sm:$0xff] }
 0x82a   : > { %v5374_v59 = vsel %vm571_vm1, %v5338_v23, %v4408_v18  ;;  %v4651_v26 = vmul.f32 %v6534_v36, %v4166_v44  ;;  %v6536_v46 = vpop.eup %6535  ;;  %vm4656_vm6 = vweird.f32 %v6534_v36  ;;  %v6263_v60 = vmul.f32 -1.442695, %v10446_v51  ;;  %v10447_v23 = vld [vmem:[#allocation92_spill] sm:$0xff] }
 0x82b   : > { %v4153_v57 = vadd.f32 1.0, %v6536_v46  ;;  %vm4657_vm8 = vmor %vm4655_vm7, %vm4656_vm6 }
 0x82d   : > { %6537 = vrcp.f32 %v4153_v57  ;;  %vm4460_vm13 = vweird.f32 %v4153_v57 }
 0x82e   : > { %6539 = vpow2.f32 %v6263_v60 }
 0x833   : > { %v6538_v18 = vpop.eup %6537 }
 0x834   : > { %v4456_v30 = vmul.f32 %v6538_v18, %v4153_v57  ;;  %vm4461_vm12 = vweird.f32 %v6538_v18 }
 0x835   : > { %vm4462_vm15 = vmor %vm4460_vm13, %vm4461_vm12 }
 0x83e   : > { %5258 = vrot.lane.b32.xlu2 %v5128_v58, %s6662_s13 }
 0x848   : > { %v9477_v35 = vpop.xlane.xlu2 %3410 }
 0x849   : > { %vm3449_vm11 = vcmp.eq.f32.partialorder %v8741_v9, %v9477_v35 }
 0x84a   : > { %v3485_v63 = vsel %vm3449_vm11, %v7944_v52, 8  ;;  %vm3988_vm11 = vcmp.eq.f32.partialorder %v9167_v16, %v9433_v32  ;;  %v4464_v16 = vand.u32 2147483647, %v4153_v57 }
 0x84b   : > { %v9484_v17 = vsel %vm3303_vm9, %v3485_v63, 2147483647  ;;  %v4652_v63 = vsub.f32 1.0, %v4651_v26  ;;  %v6280_v26 = vmul.f32 -1.442695, %v10433_v6 }
 0x84c   : > { %v3721_v34 = vpop.xlane.xlu1 %3720  ;;  %v4013_v0 = vshra.s32 %v9484_v17, 16  ;;  %vm4465_vm3 = vcmp.eq.f32.partialorder %v4464_v16, 8.507059e+37 }
 0x84d   : > { %v3722_v7 = vcvt.f32.s32 %v3721_v34  ;;  %v10444_v34 = vld [vmem:[#allocation105_spill] sm:$0xff] }
 0x84e   : > { %v9491_v8 = vcvt.s32.f32 %v4013_v0  ;;  %vm3439_vm5 = vcmp.eq.f32.partialorder %v10444_v34, %v10443_v3  ;;  %v4653_v0 = vmul.f32 %v6534_v36, %v4652_v63 }
 0x84f   : > { %v3725_v43 = vadd.s32 %v3724_v54, %v3722_v7  ;;  %v3475_v45 = vsel %vm3439_vm5, %v7944_v52, 8  ;;  %v4661_v54 = vand.u32 2147483648, %v4166_v44  ;;  %v4659_v7 = vand.u32 2147483647, %v4166_v44 }
 0x850   : > { %4016 = vmin.xlane.f32.xlu1 %v9491_v8  ;;  %v4654_v25 = vadd.f32 %v6534_v36, %v4653_v0 }
 0x851   : > { %v5157_v58 = vcvt.s32.f32 %v3725_v43  ;;  %v4994_v43 = vsub.f32 %v9341_v29, %v10447_v23  ;;  %v4662_v13 = vor.u32 1.1754944e-38, %v4661_v54  ;;  %vm4660_vm10 = vcmp.eq.f32.partialorder %v4659_v7, 8.507059e+37 }
 0x852   : > { %v4658_v1 = vsel %vm4657_vm8, %v6534_v36, %v4654_v25  ;;  %v3982_v29 = vand.u32 65535, %v9140_v31  ;;  %v6540_v36 = vpop.eup %6539  ;;  %v3783_v31 = vcvt.f32.s32 %v9407_v5  ;;  %v4466_v54 = vand.u32 2147483648, %v4153_v57 }
 0x853   : > { %v5411_v56 = vsel %vm5395_vm0, %v5374_v59, %v5157_v58  ;;  %v4663_v59 = vsel %vm4660_vm10, %v4662_v13, %v4658_v1  ;;  %v9536_v46 = vadd.f32 1.0, %v6540_v36  ;;  %v9542_v1 = vpop.permute.xlu2 %4922 }
 0x854   : > { %v5448_v55 = vsel %vm5432_vm2, %v5411_v56, 0.0  ;;  %v9500_v4 = vpop.xlane.xlu1 %3971  ;;  %v3984_v63 = vcvt.s32.f32 %v3982_v29  ;;  %v3784_v7 = vshll.u32 %v3783_v31, 16  ;;  %v4467_v5 = vor.u32 1.1754944e-38, %v4466_v54  ;;  %v9577_v31 = vld [vmem:[%s10085_s5 + $0x118] sm:$0xff] }
 0x855   : > { %5484 = vst.msk [vmem:[%s8668_s20 + $0x78] sm:$0xff] %vm3303_vm9, %v5448_v55  ;;  %vm3973_vm4 = vcmp.eq.f32.partialorder %v9319_v20, %v9500_v4  ;;  %v9515_v20 = vsel %vm3303_vm9, %v3475_v45, 2147483647  ;;  %v10448_v55 = vld [vmem:[#allocation83_spill] sm:$0xff]  ;;  %v4256_v16 = vand.u32 2147483648, %v9536_v46  ;;  %vm4250_vm5 = vweird.f32 %v9536_v46 }
 0x856   : > { %v9507_v62 = vsel %vm3973_vm4, %v3969_v47, inf  ;;  %v6276_v47 = vmul.f32 -1.442695, %v10448_v55  ;;  %v3989_v45 = vsel %vm3988_vm11, %v3984_v63, inf  ;;  %v9554_v55 = vld [vmem:[%s10085_s5 + $0xc8] sm:$0xff] }
 0x858   : > { %3810 = vmin.xlane.f32.xlu1 %v10442_v48  ;;  %6541 = vpow2.f32 %v6276_v47  ;;  %v4457_v48 = vsub.f32 1.0, %v4456_v30  ;;  %v5131_v47 = vadd.f32 %v9554_v55, %v8959_v40 }
 0x859   : > { %6543 = vpow2.f32 %v6280_v26 }
 0x85a   : > { %v4458_v0 = vmul.f32 %v6538_v18, %v4457_v48  ;;  %6545 = vrcp.f32 %v9536_v46 }
 0x85b   : > { %v9567_v48 = vpop.permute.xlu2 %5066 }
 0x85e   : > { %v6542_v25 = vpop.eup %6541 }
 0x85f   : > { %v6544_v60 = vpop.eup %6543 }
 0x860   : > { %3855 = vmin.xlane.f32.xlu1 %v8961_v41  ;;  %v3863_v41 = vshra.s32 %v9515_v20, 16  ;;  %v6546_v23 = vpop.eup %6545  ;;  %v9545_v13 = vadd.f32 1.0, %v6544_v60  ;;  %v10450_v60 = vld [vmem:[#allocation75_spill] sm:$0xff] }
 0x861   : > { %v4246_v57 = vmul.f32 %v6546_v23, %v9536_v46  ;;  %vm4251_vm4 = vweird.f32 %v6546_v23 }
 0x862   : > { %vm4252_vm6 = vmor %vm4250_vm5, %vm4251_vm4 }
 0x863   : > { %v4247_v36 = vsub.f32 1.0, %v4246_v57  ;;  %v4257_v57 = vor.u32 1.1754944e-38, %v4256_v16  ;;  %v10453_v16 = vld [vmem:[#allocation90_spill] sm:$0xff] }
 0x865   : > { %v4248_v26 = vmul.f32 %v6546_v23, %v4247_v36 }
 0x867   : > { %3615 = vmin.xlane.f32.xlu2 %v10445_v14  ;;  %v9540_v14 = vadd.f32 1.0, %v6542_v25 }
 0x868   : > { %3900 = vmin.xlane.f32.xlu1 %v9098_v2  ;;  %v9524_v2 = vcvt.s32.f32 %v3863_v41 }
 0x869   : > { %6547 = vrcp.f32 %v9540_v14  ;;  %vm4445_vm10 = vweird.f32 %v9540_v14 }
 0x86a   : > { %6549 = vrcp.f32 %v9545_v13 }
 0x86c   : > { %v5279_v58 = vpop.permute.xlu1 %5278 }
 0x86d   : > { %v5355_v56 = vsel %vm5322_vm14, %v4994_v43, %v5279_v58 }
 0x86e   : > { %v9527_v44 = vsel %vm571_vm1, %v5355_v56, %v4663_v59 }
 0x86f   : > { %3866 = vmin.xlane.f32.xlu2 %v9524_v2  ;;  %v9559_v29 = vpop.eup %6547 }
 0x870   : > { %3945 = vmin.xlane.f32.xlu1 %v9270_v22  ;;  %v4459_v22 = vadd.f32 %v6538_v18, %v4458_v0  ;;  %v9569_v63 = vpop.eup %6549  ;;  %v3573_v0 = vcvt.f32.s32 %v10435_v11  ;;  %vm4446_vm8 = vweird.f32 %v9559_v29 }
 0x871   : > { %v4501_v25 = vmul.f32 %v9569_v63, %v9545_v13  ;;  %vm9605_vm11 = vmor %vm4445_vm10, %vm4446_vm8 }
 0x872   : > { %v4463_v41 = vsel %vm4462_vm15, %v6538_v18, %v4459_v22  ;;  %v10449_v22 = vld [vmem:[#allocation111_spill] sm:$0xff]  ;;  %vm4506_vm15 = vweird.f32 %v9569_v63 }
 0x873   : > { %v4468_v58 = vsel %vm4465_vm3, %v4467_v5, %v4463_v41  ;;  %v5141_v54 = vadd.f32 %v9577_v31, %v10449_v22  ;;  %v3574_v5 = vshll.u32 %v3573_v0, 16  ;;  %vm4505_vm3 = vweird.f32 %v9545_v13 }
 0x874   : > { %v5378_v56 = vsel %vm571_vm1, %v9431_v12, %v4468_v58  ;;  %v4441_v12 = vmul.f32 %v9559_v29, %v9540_v14  ;;  %vm4507_vm4 = vmor %vm4505_vm3, %vm4506_vm15 }
 0x876   : > { %v4442_v40 = vsub.f32 1.0, %v4441_v12  ;;  %v3817_v12 = vand.u32 65535, %v9449_v24 }
 0x878   : > { %3990 = vmin.xlane.f32.xlu1 %v3989_v45  ;;  %v4249_v45 = vadd.f32 %v6546_v23, %v4248_v26  ;;  %v4443_v11 = vmul.f32 %v9559_v29, %v4442_v40  ;;  %v4451_v40 = vand.u32 2147483648, %v9540_v14 }
 0x87a   : > { %v4253_v58 = vsel %vm4252_vm6, %v6546_v23, %v4249_v45  ;;  %v4444_v36 = vadd.f32 %v9559_v29, %v4443_v11  ;;  %v4449_v45 = vand.u32 2147483647, %v9540_v14 }
 0x87c   : > { %v4448_v14 = vsel %vm9605_vm11, %v9559_v29, %v4444_v36  ;;  %vm4450_vm13 = vcmp.eq.f32.partialorder %v4449_v45, 8.507059e+37  ;;  %v4509_v36 = vand.u32 2147483647, %v9545_v13 }
 0x87d   : > { %v3781_v6 = vpop.xlane.xlu0 %3780 }
 0x87e   : > { %v3782_v51 = vcvt.f32.s32 %v3781_v6  ;;  %v4254_v6 = vand.u32 2147483647, %v9536_v46  ;;  %vm4510_vm5 = vcmp.eq.f32.partialorder %v4509_v36, 8.507059e+37 }
 0x880   : > { %v3785_v43 = vadd.s32 %v3784_v7, %v3782_v51  ;;  %v6642_v51 = vld [vmem:[%s10085_s5 + $0x28] sm:$0xff]  ;;  %vm4255_vm7 = vcmp.eq.f32.partialorder %v4254_v6, 8.507059e+37 }
 0x881   : > { %v4967_v41 = vsub.f32 %v6642_v51, %v10450_v60  ;;  %v4258_v26 = vsel %vm4255_vm7, %v4257_v57, %v4253_v58  ;;  %v10456_v58 = vld [vmem:[#allocation154_spill] sm:$0xff] }
 0x882   : > { %v5161_v59 = vcvt.s32.f32 %v3785_v43 }
 0x884   : > { %v5415_v18 = vsel %vm5395_vm0, %v5378_v56, %v5161_v59  ;;  %v4502_v59 = vsub.f32 1.0, %v4501_v25  ;;  %v10451_v56 = vld [vmem:[#allocation107_spill] sm:$0xff] }
 0x885   : > { %v5452_v30 = vsel %vm5432_vm2, %v5415_v18, 0.0  ;;  %v5328_v46 = vsel %vm5322_vm14, %v4967_v41, %v10451_v56  ;;  %v10452_v18 = vld [vmem:[#allocation149_spill] sm:$0xff] }
 0x886   : > { %5488 = vst.msk [vmem:[%s8668_s20 + $0x98] sm:$0xff] %vm3303_vm9, %v5452_v30  ;;  %v5364_v23 = vsel %vm571_vm1, %v5328_v46, %v4258_v26  ;;  %v4503_v22 = vmul.f32 %v9569_v63, %v4502_v59 }
 0x887   : > { %5264 = vrot.lane.b32.xlu2 %v5131_v47, %s6662_s13  ;;  %v3768_v47 = vcvt.f32.s32 %v10452_v18 }
 0x888   : > { %v4504_v29 = vadd.f32 %v9569_v63, %v4503_v22 }
 0x889   : > { %v3769_v6 = vshll.u32 %v3768_v47, 16  ;;  %v4511_v47 = vand.u32 2147483648, %v9545_v13 }
 0x88a   : > { %v4508_v26 = vsel %vm4507_vm4, %v9569_v63, %v4504_v29  ;;  %v10462_v29 = vld [vmem:[#allocation79_spill] sm:$0xff] }
 0x891   : > { %v3571_v7 = vpop.xlane.xlu2 %3570  ;;  %5284 = vrot.lane.b32.xlu1 %v5141_v54, %s6662_s13  ;;  %v6643_v54 = vld [vmem:[%s10085_s5 + $0x90] sm:$0xff] }
 0x892   : > { %v3572_v43 = vcvt.f32.s32 %v3571_v7  ;;  %v4980_v24 = vsub.f32 %v6643_v54, %v10453_v16  ;;  %v10458_v54 = vld [vmem:[#allocation140_spill] sm:$0xff]  ;;  %v10459_v16 = vld [vmem:[#allocation121_spill] sm:$0xff] }
 0x893   : > { %vm3442_vm6 = vcmp.eq.f32.partialorder %v10459_v16, %v10458_v54 }
 0x894   : > { %v3575_v30 = vadd.s32 %v3574_v5, %v3572_v43  ;;  %v3819_v5 = vcvt.s32.f32 %v3817_v12  ;;  %v4452_v43 = vor.u32 1.1754944e-38, %v4451_v40  ;;  %v5341_v59 = vsel %vm5322_vm14, %v4980_v24, %v10456_v58  ;;  %v10457_v40 = vld [vmem:[#allocation55_spill] sm:$0xff] }
 0x895   : > { %v3478_v24 = vsel %vm3442_vm6, %v7944_v52, 8 }
 0x896   : > { %v5147_v0 = vcvt.s32.f32 %v3575_v30  ;;  %v4453_v46 = vsel %vm4450_vm13, %v4452_v43, %v4448_v14  ;;  %v9643_v63 = vsel %vm3303_vm9, %v3478_v24, 2147483647  ;;  %v4012_v43 = vand.u32 65535, %v9484_v17 }
 0x897   : > { %v3766_v25 = vpop.xlane.xlu1 %3765  ;;  %v5377_v30 = vsel %vm571_vm1, %v5341_v59, %v4453_v46  ;;  %v3813_v46 = vcvt.f32.s32 %v10462_v29  ;;  %v3903_v29 = vcvt.f32.s32 %v9088_v21 }
 0x898   : > { %v5401_v7 = vsel %vm5395_vm0, %v5364_v23, %v5147_v0  ;;  %v3767_v51 = vcvt.f32.s32 %v3766_v25  ;;  %v4984_v0 = vsub.f32 %v9471_v61, %v10457_v40  ;;  %v4512_v23 = vor.u32 1.1754944e-38, %v4511_v47  ;;  %v10460_v61 = vld [vmem:[#allocation129_spill] sm:$0xff]  ;;  %v10463_v40 = vld [vmem:[#allocation99_spill] sm:$0xff] }
 0x899   : > { %v5438_v60 = vsel %vm5432_vm2, %v5401_v7, 0.0  ;;  %v9614_v41 = vpop.xlane.xlu2 %3821  ;;  %v3908_v7 = vshra.s32 %v9643_v63, 16  ;;  %v4014_v59 = vcvt.s32.f32 %v4012_v43  ;;  %v3814_v36 = vshll.u32 %v3813_v46, 16 }
 0x89a   : > { %5474 = vst.msk [vmem:[%s8668_s20 + $0x28] sm:$0xff] %vm3303_vm9, %v5438_v60  ;;  %v3770_v57 = vadd.s32 %v3769_v6, %v3767_v51  ;;  %vm3823_vm12 = vcmp.eq.f32.partialorder %v9465_v49, %v9614_v41  ;;  %v4513_v25 = vsel %vm4510_vm5, %v4512_v23, %v4508_v26  ;;  %v10461_v6 = vld [vmem:[#allocation86_spill] sm:$0xff]  ;;  %v6283_v60 = vmul.f32 -1.442695, %v10443_v3 }
 0x89b   : > { %v3824_v56 = vsel %vm3823_vm12, %v3819_v5, inf  ;;  %v6266_v11 = vmul.f32 -1.442695, %v10461_v6  ;;  %v9648_v51 = vcvt.s32.f32 %v3908_v7  ;;  %v10465_v7 = vld [vmem:[#allocation114_spill] sm:$0xff] }
 0x89c   : > { %v5160_v18 = vcvt.s32.f32 %v3770_v57  ;;  %3825 = vmin.xlane.f32.xlu0 %v3824_v56 }
 0x89d   : > { %6551 = vpow2.f32 %v6266_v11 }
 0x89e   : > { %v5414_v49 = vsel %vm5395_vm0, %v5377_v30, %v5160_v18  ;;  %6553 = vpow2.f32 %v6283_v60 }
 0x89f   : > { %v5451_v12 = vsel %vm5432_vm2, %v5414_v49, 0.0  ;;  %v9666_v49 = vld [vmem:[%s10085_s5 + $0xe0] sm:$0xff] }
 0x8a0   : > { %5487 = vst.msk [vmem:[%s8668_s20 + $0x90] sm:$0xff] %vm3303_vm9, %v5451_v12 }
 0x8a1   : > { %v5259_v45 = vpop.permute.xlu2 %5258 }
 0x8a2   : > { %v5345_v22 = vsel %vm5322_vm14, %v4984_v0, %v5259_v45  ;;  %v3858_v0 = vcvt.f32.s32 %v10463_v40  ;;  %v10464_v45 = vld [vmem:[#allocation95_spill] sm:$0xff] }
 0x8a3   : > { %v9637_v13 = vsel %vm571_vm1, %v5345_v22, %v4513_v25  ;;  %v6552_v14 = vpop.eup %6551 }
 0x8a4   : > { %v4142_v5 = vadd.f32 1.0, %v6552_v14  ;;  %v6554_v56 = vpop.eup %6553  ;;  %v3859_v11 = vshll.u32 %v3858_v0, 16  ;;  %v3618_v14 = vcvt.f32.s32 %v10465_v7 }
 0x8a5   : > { %v9660_v47 = vadd.f32 1.0, %v6554_v56 }
 0x8a6   : > { %6555 = vrcp.f32 %v4142_v5  ;;  %vm4295_vm10 = vweird.f32 %v4142_v5 }
 0x8a7   : > { %6557 = vrcp.f32 %v9660_v47  ;;  %vm4550_vm3 = vweird.f32 %v9660_v47 }
 0x8ac   : > { %v6556_v18 = vpop.eup %6555 }
 0x8ad   : > { %v4291_v30 = vmul.f32 %v6556_v18, %v4142_v5  ;;  %vm4296_vm8 = vweird.f32 %v6556_v18 }
 0x8ae   : > { %vm9690_vm11 = vmor %vm4295_vm10, %vm4296_vm8 }
 0x8af   : > { %v4292_v26 = vsub.f32 1.0, %v4291_v30  ;;  %v6645_v30 = vld [vmem:[%s10085_s5 + $0x40] sm:$0xff] }
 0x8b0   : > { %3660 = vmin.xlane.f32.xlu2 %v10460_v61  ;;  %v9675_v61 = vpop.eup %6557 }
 0x8b1   : > { %v4293_v6 = vmul.f32 %v6556_v18, %v4292_v26  ;;  %v4546_v43 = vmul.f32 %v9675_v61, %v9660_v47  ;;  %v10467_v26 = vld [vmem:[#allocation108_spill] sm:$0xff]  ;;  %vm4551_vm15 = vweird.f32 %v9675_v61 }
 0x8b2   : > { %vm4552_vm4 = vmor %vm4550_vm3, %vm4551_vm15 }
 0x8b3   : > { %v4294_v56 = vadd.f32 %v6556_v18, %v4293_v6 }
 0x8b8   : > { %3911 = vmin.xlane.f32.xlu2 %v9648_v51 }
 0x8c3   : > { %v9653_v58 = vpop.xlane.xlu1 %4016 }
 0x8c4   : > { %vm4018_vm7 = vcmp.eq.f32.partialorder %v9491_v8, %v9653_v58  ;;  %v5134_v8 = vadd.f32 %v9666_v49, %v9096_v15 }
 0x8c5   : > { %v9657_v57 = vsel %vm4018_vm7, %v4014_v59, inf  ;;  %v6293_v59 = vmul.f32 -1.442695, %v9477_v35 }
 0x8c7   : > { %6559 = vpow2.f32 %v6293_v59 }
 0x8cb   : > { %v3811_v3 = vpop.xlane.xlu1 %3810 }
 0x8cc   : > { %v3812_v17 = vcvt.f32.s32 %v3811_v3  ;;  %v4301_v3 = vand.u32 2147483648, %v4142_v5 }
 0x8ce   : > { %v3815_v12 = vadd.s32 %v3814_v36, %v3812_v17  ;;  %v10466_v36 = vld [vmem:[#allocation80_spill] sm:$0xff]  ;;  %v4302_v6 = vor.u32 1.1754944e-38, %v4301_v3  ;;  %v6560_v3 = vpop.eup %6559 }
 0x8cf   : > { %v4970_v17 = vsub.f32 %v6645_v30, %v10466_v36 }
 0x8d0   : > { %v5163_v23 = vcvt.s32.f32 %v3815_v12  ;;  %5270 = vrot.lane.b32.xlu2 %v5134_v8, %s6662_s13  ;;  %v3619_v8 = vshll.u32 %v3618_v14, 16  ;;  %v4299_v12 = vand.u32 2147483647, %v4142_v5 }
 0x8d2   : > { %v5417_v25 = vsel %vm5395_vm0, %v10464_v45, %v5163_v23  ;;  %vm4300_vm12 = vcmp.eq.f32.partialorder %v4299_v12, 8.507059e+37 }
 0x8d3   : > { %v5454_v22 = vsel %vm5432_vm2, %v5417_v25, 0.0  ;;  %v3856_v24 = vpop.xlane.xlu1 %3855  ;;  %v4547_v25 = vsub.f32 1.0, %v4546_v43 }
 0x8d4   : > { %5490 = vst.msk [vmem:[%s8668_s20 + $0xa8] sm:$0xff] %vm3303_vm9, %v5454_v22  ;;  %v3857_v15 = vcvt.f32.s32 %v3856_v24  ;;  %v4298_v22 = vsel %vm9690_vm11, %v6556_v18, %v4294_v56  ;;  %v3904_v24 = vshll.u32 %v3903_v29, 16  ;;  %v3948_v56 = vcvt.f32.s32 %v9262_v33 }
 0x8d5   : > { %v4303_v59 = vsel %vm4300_vm12, %v4302_v6, %v4298_v22  ;;  %v4548_v43 = vmul.f32 %v9675_v61, %v4547_v25 }
 0x8d6   : > { %v3860_v60 = vadd.s32 %v3859_v11, %v3857_v15  ;;  %v10470_v11 = vld [vmem:[#allocation122_spill] sm:$0xff] }
 0x8d7   : > { %v5331_v15 = vsel %vm5322_vm14, %v4970_v17, %v10470_v11 }
 0x8d8   : > { %v5166_v46 = vcvt.s32.f32 %v3860_v60  ;;  %v3862_v60 = vand.u32 65535, %v9515_v20  ;;  %v5367_v18 = vsel %vm571_vm1, %v5331_v15, %v4303_v59 }
 0x8da   : > { %v5420_v40 = vsel %vm5395_vm0, %v10467_v26, %v5166_v46  ;;  %v3616_v35 = vpop.xlane.xlu2 %3615  ;;  %v3864_v20 = vcvt.s32.f32 %v3862_v60  ;;  %v4549_v26 = vadd.f32 %v9675_v61, %v4548_v43 }
 0x8db   : > { %v5457_v21 = vsel %vm5432_vm2, %v5420_v40, 0.0  ;;  %v3617_v23 = vcvt.f32.s32 %v3616_v35  ;;  %v3901_v45 = vpop.xlane.xlu1 %3900  ;;  %v3949_v40 = vshll.u32 %v3948_v56, 16  ;;  %v4169_v35 = vadd.f32 1.0, %v6560_v3  ;;  %v10473_v56 = vld [vmem:[#allocation136_spill] sm:$0xff] }
 0x8dc   : > { %5493 = vst.msk [vmem:[%s8668_s20 + $0xc0] sm:$0xff] %vm3303_vm9, %v5457_v21  ;;  %v3902_v5 = vcvt.f32.s32 %v3901_v45  ;;  %v4556_v21 = vand.u32 2147483648, %v9660_v47  ;;  %v4554_v45 = vand.u32 2147483647, %v9660_v47  ;;  %v4553_v22 = vsel %vm4552_vm4, %v9675_v61, %v4549_v26 }
 0x8dd   : > { %v3620_v7 = vadd.s32 %v3619_v8, %v3617_v23  ;;  %6561 = vrcp.f32 %v4169_v35  ;;  %vm4700_vm8 = vweird.f32 %v4169_v35 }
 0x8de   : > { %v3905_v14 = vadd.s32 %v3904_v24, %v3902_v5  ;;  %v10471_v24 = vld [vmem:[#allocation87_spill] sm:$0xff]  ;;  %v4557_v6 = vor.u32 1.1754944e-38, %v4556_v21  ;;  %vm4555_vm5 = vcmp.eq.f32.partialorder %v4554_v45, 8.507059e+37  ;;  %v4704_v21 = vand.u32 2147483647, %v4169_v35  ;;  %v10476_v45 = vld [vmem:[#allocation62_spill] sm:$0xff] }
 0x8df   : > { %v5150_v46 = vcvt.s32.f32 %v3620_v7  ;;  %v4987_v5 = vsub.f32 %v9554_v55, %v10471_v24 }
 0x8e0   : > { %v5169_v29 = vcvt.s32.f32 %v3905_v14  ;;  %v4558_v7 = vsel %vm4555_vm5, %v4557_v6, %v4553_v22  ;;  %vm4705_vm11 = vcmp.eq.f32.partialorder %v4704_v21, 8.507059e+37 }
 0x8e1   : > { %v5404_v30 = vsel %vm5395_vm0, %v5367_v18, %v5150_v46  ;;  %v10472_v18 = vld [vmem:[#allocation151_spill] sm:$0xff] }
 0x8e2   : > { %v5441_v36 = vsel %vm5432_vm2, %v5404_v30, 0.0  ;;  %v5423_v17 = vsel %vm5395_vm0, %v9162_v10, %v5169_v29  ;;  %v9709_v8 = vpop.xlane.xlu2 %3866  ;;  %vm3445_vm6 = vcmp.eq.f32.partialorder %v10473_v56, %v10472_v18 }
 0x8e3   : > { %5477 = vst.msk [vmem:[%s8668_s20 + $0x40] sm:$0xff] %vm3303_vm9, %v5441_v36  ;;  %v5460_v12 = vsel %vm5432_vm2, %v5423_v17, 0.0  ;;  %vm3868_vm13 = vcmp.eq.f32.partialorder %v9524_v2, %v9709_v8  ;;  %v3946_v33 = vpop.xlane.xlu1 %3945  ;;  %v3993_v2 = vcvt.f32.s32 %v9433_v32  ;;  %v6562_v59 = vpop.eup %6561  ;;  %v3481_v30 = vsel %vm3445_vm6, %v7944_v52, 8 }
 0x8e4   : > { %5496 = vst.msk [vmem:[%s8668_s20 + $0xd8] sm:$0xff] %vm3303_vm9, %v5460_v12  ;;  %v3947_v10 = vcvt.f32.s32 %v3946_v33  ;;  %v3869_v0 = vsel %vm3868_vm13, %v3864_v20, inf  ;;  %v9745_v17 = vsel %vm3303_vm9, %v3481_v30, 2147483647  ;;  %v10474_v20 = vld [vmem:[#allocation143_spill] sm:$0xff]  ;;  %v10475_v33 = vld [vmem:[#allocation104_spill] sm:$0xff]  ;;  %vm4701_vm7 = vweird.f32 %v6562_v59 }
 0x8e5   : > { %3870 = vmin.xlane.f32.xlu0 %v3869_v0  ;;  %v3994_v60 = vshll.u32 %v3993_v2, 16  ;;  %v6269_v26 = vmul.f32 -1.442695, %v10475_v33  ;;  %vm4702_vm10 = vmor %vm4700_vm8, %vm4701_vm7  ;;  %v4997_v2 = vsub.f32 %v9577_v31, %v10476_v45 }
 0x8e6   : > { %v3950_v23 = vadd.s32 %v3949_v40, %v3947_v10  ;;  %v3953_v40 = vshra.s32 %v9745_v17, 16 }
 0x8e7   : > { %6563 = vpow2.f32 %v6269_v26 }
 0x8e8   : > { %v5172_v25 = vcvt.s32.f32 %v3950_v23  ;;  %v9750_v0 = vcvt.s32.f32 %v3953_v40 }
 0x8ea   : > { %v5426_v11 = vsel %vm5395_vm0, %v9308_v39, %v5172_v25  ;;  %v5265_v15 = vpop.permute.xlu2 %5264  ;;  %v4696_v39 = vmul.f32 %v6562_v59, %v4169_v35 }
 0x8eb   : > { %v5463_v47 = vsel %vm5432_vm2, %v5426_v11, 0.0  ;;  %v5348_v14 = vsel %vm5322_vm14, %v4987_v5, %v5265_v15  ;;  %v3991_v32 = vpop.xlane.xlu1 %3990  ;;  %v6286_v15 = vmul.f32 -1.442695, %v10458_v54  ;;  %v9766_v54 = vld [vmem:[%s10085_s5 + $0xf8] sm:$0xff] }
 0x8ec   : > { %5499 = vst.msk [vmem:[%s8668_s20 + $0xf0] sm:$0xff] %vm3303_vm9, %v5463_v47  ;;  %v9734_v61 = vsel %vm571_vm1, %v5348_v14, %v4558_v7  ;;  %v3992_v55 = vcvt.f32.s32 %v3991_v32  ;;  %v4697_v36 = vsub.f32 1.0, %v4696_v39  ;;  %v3828_v47 = vcvt.f32.s32 %v9614_v41 }
 0x8ed   : > { %v6564_v6 = vpop.eup %6563  ;;  %6565 = vpow2.f32 %v6286_v15  ;;  %v5137_v41 = vadd.f32 %v9766_v54, %v9336_v50  ;;  %v6647_v50 = vld [vmem:[%s10085_s5 + $0x58] sm:$0xff]  ;;  %v3907_v15 = vand.u32 65535, %v9643_v63 }
 0x8ee   : > { %v3995_v46 = vadd.s32 %v3994_v60, %v3992_v55  ;;  %v4698_v12 = vmul.f32 %v6562_v59, %v4697_v36  ;;  %v3829_v31 = vshll.u32 %v3828_v47, 16 }
 0x8f0   : > { %v5175_v43 = vcvt.s32.f32 %v3995_v46  ;;  %v4699_v10 = vadd.f32 %v6562_v59, %v4698_v12 }
 0x8f2   : > { %v5429_v29 = vsel %vm5395_vm0, %v9452_v19, %v5175_v43  ;;  %v4706_v19 = vand.u32 2147483648, %v4169_v35  ;;  %v4703_v23 = vsel %vm4702_vm10, %v6562_v59, %v4699_v10  ;;  %v4145_v35 = vadd.f32 1.0, %v6564_v6 }
 0x8f3   : > { %v5466_v3 = vsel %vm5432_vm2, %v5429_v29, 0.0  ;;  %v6566_v32 = vpop.eup %6565 }
 0x8f4   : > { %5502 = vst.msk [vmem:[%s8668_s20 + $0x108] sm:$0xff] %vm3303_vm9, %v5466_v3  ;;  %v4707_v25 = vor.u32 1.1754944e-38, %v4706_v19  ;;  %6567 = vrcp.f32 %v4145_v35  ;;  %v4162_v59 = vadd.f32 1.0, %v6566_v32  ;;  %v4346_v26 = vand.u32 2147483648, %v4145_v35  ;;  %v10478_v19 = vld [vmem:[#allocation84_spill] sm:$0xff] }
 0x8f5   : > { %vm4340_vm13 = vweird.f32 %v4145_v35  ;;  %v4344_v40 = vand.u32 2147483647, %v4145_v35  ;;  %v4973_v21 = vsub.f32 %v6647_v50, %v10478_v19  ;;  %v6289_v50 = vmul.f32 -1.442695, %v10472_v18 }
 0x8f6   : > { %v4708_v24 = vsel %vm4705_vm11, %v4707_v25, %v4703_v23  ;;  %6569 = vrcp.f32 %v4162_v59  ;;  %v4601_v63 = vand.u32 2147483648, %v4162_v59  ;;  %vm4595_vm6 = vweird.f32 %v4162_v59 }
 0x8f7   : > { %vm4345_vm3 = vcmp.eq.f32.partialorder %v4344_v40, 8.507059e+37  ;;  %vm5685_vm11 = vcmask 105568  }
 0x8f9   : > { %3705 = vmin.xlane.f32.xlu2 %v10474_v20  ;;  %v10477_v20 = vld [vmem:[#allocation128_spill] sm:$0xff] }
 0x8fa   : > { %v6568_v60 = vpop.eup %6567 }
 0x8fb   : > { %v4336_v43 = vmul.f32 %v6568_v60, %v4145_v35  ;;  %vm4341_vm12 = vweird.f32 %v6568_v60 }
 0x8fc   : > { %v6570_v36 = vpop.eup %6569  ;;  %vm4342_vm15 = vmor %vm4340_vm13, %vm4341_vm12 }
 0x8fd   : > { %v4337_v3 = vsub.f32 1.0, %v4336_v43  ;;  %v4591_v33 = vmul.f32 %v6570_v36, %v4162_v59  ;;  %vm4596_vm5 = vweird.f32 %v6570_v36 }
 0x8fe   : > { %vm4597_vm7 = vmor %vm4595_vm6, %vm4596_vm5 }
 0x8ff   : > { %v4338_v30 = vmul.f32 %v6568_v60, %v4337_v3  ;;  %v4592_v25 = vsub.f32 1.0, %v4591_v33  ;;  %v4602_v3 = vor.u32 1.1754944e-38, %v4601_v63 }
 0x901   : > { %3956 = vmin.xlane.f32.xlu2 %v9750_v0  ;;  %v4339_v12 = vadd.f32 %v6568_v60, %v4338_v30 }
 0x903   : > { %v5285_v22 = vpop.permute.xlu1 %5284 }
 0x904   : > { %v5358_v5 = vsel %vm5322_vm14, %v4997_v2, %v5285_v22  ;;  %v4343_v2 = vsel %vm4342_vm15, %v6568_v60, %v4339_v12  ;;  %v4347_v22 = vor.u32 1.1754944e-38, %v4346_v26  ;;  %v3909_v60 = vcvt.s32.f32 %v3907_v15  ;;  %v10480_v12 = vld [vmem:[#allocation106_spill] sm:$0xff] }
 0x905   : > { %v9757_v11 = vsel %vm571_vm1, %v5358_v5, %v4708_v24  ;;  %v10479_v24 = vld [vmem:[#allocation134_spill] sm:$0xff]  ;;  %vm3448_vm10 = vcmp.eq.f32.partialorder %v8689_v42, %v10480_v12 }
 0x906   : > { %v5334_v5 = vsel %vm5322_vm14, %v4973_v21, %v10479_v24  ;;  %v4348_v35 = vsel %vm4345_vm3, %v4347_v22, %v4343_v2  ;;  %v3484_v33 = vsel %vm3448_vm10, %v7944_v52, 8  ;;  %v10483_v52 = vld [vmem:[#allocation60_spill] sm:$0xff]  ;;  %v3873_v21 = vcvt.f32.s32 %v9709_v8  ;;  %v10484_v22 = vld [vmem:[#allocation82_spill] sm:$0xff] }
 0x90f   : > { %v3826_v7 = vpop.xlane.xlu0 %3825 }
 0x910   : > { %v3827_v14 = vcvt.f32.s32 %v3826_v7  ;;  %v5370_v7 = vsel %vm571_vm1, %v5334_v5, %v4348_v35 }
 0x912   : > { %v3830_v55 = vadd.s32 %v3829_v31, %v3827_v14  ;;  %v4593_v31 = vmul.f32 %v6570_v36, %v4592_v25 }
 0x914   : > { %v5164_v46 = vcvt.s32.f32 %v3830_v55  ;;  %v4594_v43 = vadd.f32 %v6570_v36, %v4593_v31 }
 0x916   : > { %v5418_v39 = vsel %vm5395_vm0, %v9637_v13, %v5164_v46  ;;  %v3663_v13 = vcvt.f32.s32 %v10477_v20 }
 0x917   : > { %v5455_v29 = vsel %vm5432_vm2, %v5418_v39, 0.0  ;;  %v4599_v39 = vand.u32 2147483647, %v4162_v59  ;;  %v9801_v59 = vsel %vm3303_vm9, %v3484_v33, 2147483647 }
 0x918   : > { %5491 = vst.msk [vmem:[%s8668_s20 + $0xb0] sm:$0xff] %vm3303_vm9, %v5455_v29  ;;  %v3664_v23 = vshll.u32 %v3663_v13, 16  ;;  %v4990_v29 = vsub.f32 %v9666_v49, %v9068_v53  ;;  %v10482_v53 = vld [vmem:[#allocation119_spill] sm:$0xff]  ;;  %v3998_v26 = vshra.s32 %v9801_v59, 16 }
 0x919   : > { %5276 = vrot.lane.b32.xlu2 %v5137_v41, %s6662_s13  ;;  %v4598_v41 = vsel %vm4597_vm7, %v6570_v36, %v4594_v43  ;;  %vm4600_vm8 = vcmp.eq.f32.partialorder %v4599_v39, 8.507059e+37  ;;  %v10481_v36 = vld [vmem:[#allocation153_spill] sm:$0xff]  ;;  %v6272_v49 = vmul.f32 -1.442695, %v10482_v53  ;;  %v10490_v43 = vld [vmem:[#allocation12_spill] sm:$0xff] }
 0x91a   : > { %v4603_v20 = vsel %vm4600_vm8, %v4602_v3, %v4598_v41  ;;  %v9806_v40 = vcvt.s32.f32 %v3998_v26  ;;  %v10491_v41 = vld [vmem:[#allocation102_spill] sm:$0xff]  ;;  %v10493_v3 = vld [vmem:[#allocation29_spill] sm:$0xff] }
 0x91b   : > { %6571 = vpow2.f32 %v6272_v49  ;;  %v10494_v49 = vld [vmem:[#allocation10_spill] sm:$0xff]  ;;  %v10495_v26 = vld [vmem:[#allocation25_spill] sm:$0xff] }
 0x91c   : > { %6573 = vpow2.f32 %v6289_v50  ;;  %v10496_v50 = vld [vmem:[#allocation11_spill] sm:$0xff] }
 0x923   : > { %v3661_v10 = vpop.xlane.xlu2 %3660 }
 0x924   : > { %v3662_v45 = vcvt.f32.s32 %v3661_v10  ;;  %v6572_v10 = vpop.eup %6571 }
 0x925   : > { %v9810_v19 = vadd.f32 1.0, %v6572_v10  ;;  %v6574_v25 = vpop.eup %6573  ;;  %v5653_v10 = vmul.f32 %v10495_v26, %v10494_v49  ;;  %v10508_v26 = vld [vmem:[#allocation147_spill] sm:$0xff] }
 0x926   : > { %v3665_v6 = vadd.s32 %v3664_v23, %v3662_v45  ;;  %v3874_v45 = vshll.u32 %v3873_v21, 16 }
 0x927   : > { %6575 = vrcp.f32 %v9810_v19  ;;  %vm4385_vm13 = vweird.f32 %v9810_v19 }
 0x928   : > { %v5153_v47 = vcvt.s32.f32 %v3665_v6  ;;  %v9816_v6 = vadd.f32 1.0, %v6574_v25 }
 0x92a   : > { %v5407_v14 = vsel %vm5395_vm0, %v5370_v7, %v5153_v47  ;;  %v10485_v47 = vld [vmem:[#allocation6_spill] sm:$0xff]  ;;  %v10486_v7 = vld [vmem:[#allocation23_spill] sm:$0xff]  ;;  %6577 = vrcp.f32 %v9816_v6  ;;  %vm4640_vm6 = vweird.f32 %v9816_v6 }
 0x92b   : > { %v5444_v32 = vsel %vm5432_vm2, %v5407_v14, 0.0  ;;  %v9785_v55 = vpop.xlane.xlu2 %3911  ;;  %v5650_v31 = vmul.f32 %v10486_v7, %v10485_v47  ;;  %v10487_v14 = vld [vmem:[#allocation3_spill] sm:$0xff]  ;;  %v5693_v47 = vsel %vm5685_vm11, %v5653_v10, 0.0  ;;  %v4391_v7 = vand.u32 2147483648, %v9810_v19 }
 0x92c   : > { %5480 = vst.msk [vmem:[%s8668_s20 + $0x58] sm:$0xff] %vm3303_vm9, %v5444_v32  ;;  %vm3913_vm4 = vcmp.eq.f32.partialorder %v9648_v51, %v9785_v55  ;;  %v10488_v32 = vld [vmem:[#allocation28_spill] sm:$0xff] }
 0x92d   : > { %v3914_v46 = vsel %vm3913_vm4, %v3909_v60, inf  ;;  %v6576_v24 = vpop.eup %6575  ;;  %v5649_v60 = vmul.f32 %v10488_v32, %v10487_v14  ;;  %v4389_v14 = vand.u32 2147483647, %v9810_v19  ;;  %v4392_v49 = vor.u32 1.1754944e-38, %v4391_v7  ;;  %v10512_v7 = vld [vmem:[#allocation30_spill] sm:$0xff] }
 0x92e   : > { %3915 = vmin.xlane.f32.xlu0 %v3914_v46  ;;  %v4381_v15 = vmul.f32 %v6576_v24, %v9810_v19  ;;  %v10489_v46 = vld [vmem:[#allocation4_spill] sm:$0xff]  ;;  %vm4386_vm12 = vweird.f32 %v6576_v24 }
 0x92f   : > { %v5651_v63 = vmul.f32 %v10490_v43, %v10489_v46  ;;  %v10502_v46 = vld [vmem:[#allocation26_spill] sm:$0xff]  ;;  %vm9861_vm15 = vmor %vm4385_vm13, %vm4386_vm12  ;;  %vm4390_vm3 = vcmp.eq.f32.partialorder %v4389_v14, 8.507059e+37 }
 0x930   : > { %v4382_v39 = vsub.f32 1.0, %v4381_v15 }
 0x932   : > { %v4383_v33 = vmul.f32 %v6576_v24, %v4382_v39 }
 0x933   : > { %v5271_v30 = vpop.permute.xlu2 %5270 }
 0x934   : > { %v5351_v13 = vsel %vm5322_vm14, %v4990_v29, %v5271_v30  ;;  %v10492_v29 = vld [vmem:[#allocation5_spill] sm:$0xff]  ;;  %v4384_v15 = vadd.f32 %v6576_v24, %v4383_v33  ;;  %v10507_v33 = vld [vmem:[#allocation14_spill] sm:$0xff] }
 0x935   : > { %v9795_v51 = vsel %vm571_vm1, %v5351_v13, %v4603_v20  ;;  %v5652_v30 = vmul.f32 %v10493_v3, %v10492_v29  ;;  %v5686_v20 = vsel %vm5685_vm11, %v5649_v60, 0.0  ;;  %v5689_v13 = vsel %vm5685_vm11, %v5651_v63, 0.0  ;;  %v10501_v60 = vld [vmem:[#allocation9_spill] sm:$0xff]  ;;  %v6648_v63 = vld [vmem:[%s10085_s5 + $0x70] sm:$0xff] }
 0x936   : > { %v5656_v43 = vmul.f32 %v10502_v46, %v10501_v60  ;;  %v4388_v19 = vsel %vm9861_vm15, %v6576_v24, %v4384_v15 }
 0x937   : > { %v4393_v24 = vsel %vm4390_vm3, %v4392_v49, %v4388_v19  ;;  %v4646_v19 = vand.u32 2147483648, %v9816_v6 }
 0x942   : > { %3750 = vmin.xlane.f32.xlu2 %v10481_v36  ;;  %v9837_v36 = vpop.eup %6577 }
 0x943   : > { %vm4641_vm5 = vweird.f32 %v9837_v36 }
 0x944   : > { %vm4642_vm7 = vmor %vm4640_vm6, %vm4641_vm5 }
 0x94a   : > { %4001 = vmin.xlane.f32.xlu2 %v9806_v40 }
 0x952   : > { %3795 = vmin.xlane.f32.xlu2 %v10483_v52  ;;  %v10497_v52 = vld [vmem:[#allocation13_spill] sm:$0xff] }
 0x953   : > { %v5654_v21 = vmul.f32 %v10497_v52, %v10496_v50 }
 0x958   : > { %v3871_v23 = vpop.xlane.xlu0 %3870 }
 0x959   : > { %v3872_v2 = vcvt.f32.s32 %v3871_v23 }
 0x95a   : > { %3840 = vmin.xlane.f32.xlu2 %v10484_v22  ;;  %v10499_v22 = vld [vmem:[#allocation7_spill] sm:$0xff] }
 0x95b   : > { %v3875_v5 = vadd.s32 %v3874_v45, %v3872_v2  ;;  %v5691_v45 = vsel %vm5685_vm11, %v5652_v30, 0.0  ;;  %v10498_v2 = vld [vmem:[#allocation141_spill] sm:$0xff] }
 0x95c   : > { %v3708_v25 = vcvt.f32.s32 %v10498_v2  ;;  %v10510_v2 = vld [vmem:[#allocation36_spill] sm:$0xff] }
 0x95d   : > { %v5167_v18 = vcvt.s32.f32 %v3875_v5  ;;  %v10500_v5 = vld [vmem:[#allocation32_spill] sm:$0xff] }
 0x95f   : > { %v5421_v35 = vsel %vm5395_vm0, %v9734_v61, %v5167_v18  ;;  %v5687_v61 = vsel %vm5685_vm11, %v5650_v31, 0.0  ;;  %v5655_v18 = vmul.f32 %v10500_v5, %v10499_v22 }
 0x960   : > { %v5458_v8 = vsel %vm5432_vm2, %v5421_v35, 0.0  ;;  %v5688_v53 = vadd.f32 %v5687_v61, %v5686_v20  ;;  %v4636_v35 = vmul.f32 %v9837_v36, %v9816_v6 }
 0x961   : > { %5494 = vst.msk [vmem:[%s8668_s20 + $0xc8] sm:$0xff] %vm3303_vm9, %v5458_v8  ;;  %v5695_v8 = vsel %vm5685_vm11, %v5654_v21, 0.0  ;;  %v5697_v30 = vsel %vm5685_vm11, %v5655_v18, 0.0  ;;  %v3952_v21 = vand.u32 65535, %v9745_v17 }
 0x962   : > { %3885 = vmin.xlane.f32.xlu2 %v10491_v41  ;;  %v5690_v23 = vadd.f32 %v5689_v13, %v5688_v53  ;;  %v3709_v41 = vshll.u32 %v3708_v25, 16  ;;  %v4637_v20 = vsub.f32 1.0, %v4636_v35  ;;  %v10506_v13 = vld [vmem:[#allocation8_spill] sm:$0xff] }
 0x963   : > { %v5657_v53 = vmul.f32 %v10507_v33, %v10506_v13  ;;  %v3954_v60 = vcvt.s32.f32 %v3952_v21  ;;  %v4644_v13 = vand.u32 2147483647, %v9816_v6  ;;  %v10517_v33 = vld [vmem:[#allocation39_spill] sm:$0xff]  ;;  %v10520_v21 = vld [vmem:[#allocation16_spill] sm:$0xff]  ;;  %v4647_v6 = vor.u32 1.1754944e-38, %v4646_v19 }
 0x964   : > { %v5692_v31 = vadd.f32 %v5691_v45, %v5690_v23  ;;  %v5699_v23 = vsel %vm5685_vm11, %v5656_v43, 0.0  ;;  %v10509_v45 = vld [vmem:[#allocation2_spill] sm:$0xff]  ;;  %v4638_v15 = vmul.f32 %v9837_v36, %v4637_v20  ;;  %v10513_v43 = vld [vmem:[#allocation17_spill] sm:$0xff] }
 0x965   : > { %v5658_v25 = vmul.f32 %v10510_v2, %v10509_v45  ;;  %v5701_v35 = vsel %vm5685_vm11, %v5657_v53, 0.0  ;;  %v10518_v53 = vld [vmem:[#allocation33_spill] sm:$0xff]  ;;  %v10521_v45 = vld [vmem:[#allocation58_spill] sm:$0xff]  ;;  %vm4645_vm8 = vcmp.eq.f32.partialorder %v4644_v13, 8.507059e+37 }
 0x966   : > { %v5694_v3 = vadd.f32 %v5693_v47, %v5692_v31  ;;  %v10511_v47 = vld [vmem:[#allocation19_spill] sm:$0xff]  ;;  %v5662_v49 = vmul.f32 %v10518_v53, %v10517_v33  ;;  %v4993_v2 = vsub.f32 %v9766_v54, %v10521_v45  ;;  %v10525_v54 = vld [vmem:[#allocation37_spill] sm:$0xff] }
 0x967   : > { %v5659_v17 = vmul.f32 %v10512_v7, %v10511_v47  ;;  %v5703_v46 = vsel %vm5685_vm11, %v5658_v25, 0.0  ;;  %v10533_v33 = vld [vmem:[#allocation21_spill] sm:$0xff]  ;;  %v10536_v45 = vld [vmem:[#allocation43_spill] sm:$0xff] }
 0x968   : > { %v5696_v52 = vadd.f32 %v5695_v8, %v5694_v3  ;;  %v10516_v3 = vld [vmem:[#allocation40_spill] sm:$0xff] }
 0x969   : > { %v5705_v61 = vsel %vm5685_vm11, %v5659_v17, 0.0  ;;  %v10524_v17 = vld [vmem:[#allocation57_spill] sm:$0xff] }
 0x96a   : > { %3930 = vmin.xlane.f32.xlu2 %v9425_v27  ;;  %v10503_v27 = vld [vmem:[#allocation91_spill] sm:$0xff]  ;;  %v5698_v5 = vadd.f32 %v5697_v30, %v5696_v52 }
 0x96b   : > { %v4976_v39 = vsub.f32 %v6648_v63, %v10503_v27  ;;  %v10514_v63 = vld [vmem:[#allocation15_spill] sm:$0xff] }
 0x96c   : > { %v3706_v32 = vpop.xlane.xlu2 %3705  ;;  %v5700_v8 = vadd.f32 %v5699_v23, %v5698_v5  ;;  %v10519_v52 = vld [vmem:[#allocation35_spill] sm:$0xff]  ;;  %v10522_v5 = vld [vmem:[#allocation38_spill] sm:$0xff] }
 0x96d   : > { %v3707_v29 = vcvt.f32.s32 %v3706_v32  ;;  %v5337_v10 = vsel %vm5322_vm14, %v4976_v39, %v10508_v26  ;;  %v5663_v23 = vmul.f32 %v10520_v21, %v10519_v52 }
 0x96e   : > { %v5373_v18 = vsel %vm571_vm1, %v5337_v10, %v4393_v24  ;;  %v5702_v27 = vadd.f32 %v5701_v35, %v5700_v8 }
 0x96f   : > { %v3710_v50 = vadd.s32 %v3709_v41, %v3707_v29  ;;  %v4639_v41 = vadd.f32 %v9837_v36, %v4638_v15  ;;  %v10515_v29 = vld [vmem:[#allocation20_spill] sm:$0xff]  ;;  %v5713_v7 = vsel %vm5685_vm11, %v5663_v23, 0.0 }
 0x970   : > { %v5661_v30 = vmul.f32 %v10516_v3, %v10515_v29  ;;  %v5704_v20 = vadd.f32 %v5703_v46, %v5702_v27  ;;  %v10527_v46 = vld [vmem:[#allocation18_spill] sm:$0xff]  ;;  %v10528_v27 = vld [vmem:[#allocation56_spill] sm:$0xff] }
 0x971   : > { %v5156_v22 = vcvt.s32.f32 %v3710_v50  ;;  %v4643_v10 = vsel %vm4642_vm7, %v9837_v36, %v4639_v41  ;;  %v10530_v3 = vld [vmem:[#allocation70_spill] sm:$0xff] }
 0x972   : > { %3975 = vmin.xlane.f32.xlu2 %v9507_v62  ;;  %v5660_v62 = vmul.f32 %v10514_v63, %v10513_v43  ;;  %v5706_v26 = vadd.f32 %v5705_v61, %v5704_v20  ;;  %v5709_v50 = vsel %vm5685_vm11, %v5661_v30, 0.0  ;;  %v10531_v30 = vld [vmem:[#allocation41_spill] sm:$0xff] }
 0x973   : > { %v5410_v31 = vsel %vm5395_vm0, %v5373_v18, %v5156_v22  ;;  %v5711_v22 = vsel %vm5685_vm11, %v5662_v49, 0.0  ;;  %v10523_v18 = vld [vmem:[#allocation42_spill] sm:$0xff]  ;;  %v5668_v19 = vmul.f32 %v10531_v30, %v10530_v3 }
 0x974   : > { %v5447_v14 = vsel %vm5432_vm2, %v5410_v31, 0.0  ;;  %v9884_v32 = vpop.xlane.xlu2 %3956  ;;  %v5664_v15 = vmul.f32 %v10523_v18, %v10522_v5  ;;  %v5665_v31 = vmul.f32 %v10525_v54, %v10524_v17  ;;  %v10539_v18 = vld [vmem:[#allocation135_spill] sm:$0xff] }
 0x975   : > { %5483 = vst.msk [vmem:[%s8668_s20 + $0x70] sm:$0xff] %vm3303_vm9, %v5447_v14  ;;  %vm3958_vm4 = vcmp.eq.f32.partialorder %v9750_v0, %v9884_v32  ;;  %v5707_v0 = vsel %vm5685_vm11, %v5660_v62, 0.0 }
 0x976   : > { %v3959_v39 = vsel %vm3958_vm4, %v3954_v60, inf  ;;  %v5708_v25 = vadd.f32 %v5707_v0, %v5706_v26  ;;  %v5715_v14 = vsel %vm5685_vm11, %v5664_v15, 0.0  ;;  %v10526_v60 = vld [vmem:[#allocation61_spill] sm:$0xff]  ;;  %v5717_v62 = vsel %vm5685_vm11, %v5665_v31, 0.0  ;;  %v10532_v0 = vld [vmem:[#allocation76_spill] sm:$0xff] }
 0x977   : > { %3960 = vmin.xlane.f32.xlu0 %v3959_v39  ;;  %v5666_v43 = vmul.f32 %v10527_v46, %v10526_v60  ;;  %v10529_v39 = vld [vmem:[#allocation44_spill] sm:$0xff]  ;;  %v5669_v53 = vmul.f32 %v10533_v33, %v10532_v0  ;;  %v5723_v26 = vsel %vm5685_vm11, %v5668_v19, 0.0  ;;  %v6275_v15 = vmul.f32 -1.442695, %v10539_v18  ;;  %v10548_v33 = vld [vmem:[#allocation127_spill] sm:$0xff] }
 0x978   : > { %v5710_v35 = vadd.f32 %v5709_v50, %v5708_v25  ;;  %v5667_v41 = vmul.f32 %v10529_v39, %v10528_v27  ;;  %v10535_v50 = vld [vmem:[#allocation46_spill] sm:$0xff]  ;;  %v9949_v31 = vld [vmem:[%s10085_s5 + $0x110] sm:$0xff] }
 0x979   : > { %v5719_v29 = vsel %vm5685_vm11, %v5666_v43, 0.0  ;;  %v5725_v23 = vsel %vm5685_vm11, %v5669_v53, 0.0  ;;  %6579 = vpow2.f32 %v6275_v15  ;;  %v10549_v53 = vld [vmem:[#allocation27_spill] sm:$0xff]  ;;  %v10554_v15 = vld [vmem:[#allocation142_spill] sm:$0xff] }
 0x97a   : > { %4020 = vmin.xlane.f32.xlu2 %v9657_v57  ;;  %v4648_v57 = vsel %vm4645_vm8, %v4647_v6, %v4643_v10  ;;  %v5712_v8 = vadd.f32 %v5711_v22, %v5710_v35  ;;  %v5721_v13 = vsel %vm5685_vm11, %v5667_v41, 0.0  ;;  %v10534_v10 = vld [vmem:[#allocation67_spill] sm:$0xff]  ;;  %v10538_v22 = vld [vmem:[#allocation22_spill] sm:$0xff]  ;;  %v10540_v35 = vld [vmem:[#allocation85_spill] sm:$0xff] }
 0x97b   : > { %v5670_v52 = vmul.f32 %v10535_v50, %v10534_v10 }
 0x97c   : > { %v5277_v24 = vpop.permute.xlu2 %5276  ;;  %v5714_v63 = vadd.f32 %v5713_v7, %v5712_v8  ;;  %v10541_v7 = vld [vmem:[#allocation48_spill] sm:$0xff] }
 0x97d   : > { %v5354_v36 = vsel %vm5322_vm14, %v4993_v2, %v5277_v24  ;;  %v5671_v2 = vmul.f32 %v10536_v45, %v10434_v38  ;;  %v5727_v25 = vsel %vm5685_vm11, %v5670_v52, 0.0  ;;  %v10537_v24 = vld [vmem:[#allocation93_spill] sm:$0xff]  ;;  %v5673_v17 = vmul.f32 %v10541_v7, %v10540_v35 }
 0x97e   : > { %v9916_v47 = vsel %vm571_vm1, %v5354_v36, %v4648_v57  ;;  %v5716_v61 = vadd.f32 %v5715_v14, %v5714_v63  ;;  %v5672_v5 = vmul.f32 %v10538_v22, %v10537_v24  ;;  %v5140_v38 = vadd.f32 %v9949_v31, %v9567_v48  ;;  %v10542_v14 = vld [vmem:[#allocation45_spill] sm:$0xff] }
 0x97f   : > { %v5729_v36 = vsel %vm5685_vm11, %v5671_v2, 0.0  ;;  %v5674_v60 = vmul.f32 %v10542_v14, %v10444_v34  ;;  %v5733_v43 = vsel %vm5685_vm11, %v5673_v17, 0.0  ;;  %v10543_v63 = vld [vmem:[#allocation113_spill] sm:$0xff]  ;;  %v6580_v30 = vpop.eup %6579  ;;  %v10547_v34 = vld [vmem:[#allocation47_spill] sm:$0xff]  ;;  %v10556_v17 = vld [vmem:[#allocation132_spill] sm:$0xff] }
 0x980   : > { %v5718_v20 = vadd.f32 %v5717_v62, %v5716_v61  ;;  %v5731_v8 = vsel %vm5685_vm11, %v5672_v5, 0.0  ;;  %v10544_v62 = vld [vmem:[#allocation24_spill] sm:$0xff]  ;;  %v10545_v61 = vld [vmem:[#allocation101_spill] sm:$0xff]  ;;  %v9969_v10 = vadd.f32 1.0, %v6580_v30  ;;  %v3918_v5 = vcvt.f32.s32 %v9785_v55  ;;  %v10558_v55 = vld [vmem:[#allocation51_spill] sm:$0xff] }
 0x981   : > { %v5675_v27 = vmul.f32 %v10544_v62, %v10543_v63  ;;  %v5735_v41 = vsel %vm5685_vm11, %v5674_v60, 0.0  ;;  %v10550_v52 = vld [vmem:[#allocation117_spill] sm:$0xff] }
 0x982   : > { %v5720_v49 = vadd.f32 %v5719_v29, %v5718_v20  ;;  %v10546_v29 = vld [vmem:[#allocation50_spill] sm:$0xff]  ;;  %v5677_v20 = vmul.f32 %v10547_v34, %v10459_v16  ;;  %6581 = vrcp.f32 %v9969_v10  ;;  %v3919_v14 = vshll.u32 %v3918_v5, 16 }
 0x983   : > { %v5676_v48 = vmul.f32 %v10546_v29, %v10545_v61  ;;  %v5737_v19 = vsel %vm5685_vm11, %v5675_v27, 0.0 }
 0x984   : > { %v5722_v21 = vadd.f32 %v5721_v13, %v5720_v49  ;;  %v5678_v49 = vmul.f32 %v10549_v53, %v10548_v33  ;;  %v5741_v50 = vsel %vm5685_vm11, %v5677_v20, 0.0 }
 0x985   : > { %v5739_v0 = vsel %vm5685_vm11, %v5676_v48, 0.0 }
 0x986   : > { %v5724_v6 = vadd.f32 %v5723_v26, %v5722_v21  ;;  %v10551_v21 = vld [vmem:[#allocation52_spill] sm:$0xff]  ;;  %v5743_v2 = vsel %vm5685_vm11, %v5678_v49, 0.0 }
 0x988   : > { %v5726_v57 = vadd.f32 %v5725_v23, %v5724_v6  ;;  %v5679_v23 = vmul.f32 %v10551_v21, %v10550_v52  ;;  %v10552_v6 = vld [vmem:[#allocation49_spill] sm:$0xff]  ;;  %v6582_v63 = vpop.eup %6581 }
 0x989   : > { %v5680_v16 = vmul.f32 %v10552_v6, %v10473_v56  ;;  %vm4431_vm10 = vweird.f32 %v6582_v63 }
 0x98a   : > { %v5728_v54 = vadd.f32 %v5727_v25, %v5726_v57  ;;  %v10553_v25 = vld [vmem:[#allocation148_spill] sm:$0xff]  ;;  %v5745_v18 = vsel %vm5685_vm11, %v5679_v23, 0.0  ;;  %v10555_v57 = vld [vmem:[#allocation31_spill] sm:$0xff] }
 0x98b   : > { %v6278_v24 = vmul.f32 -1.442695, %v10553_v25  ;;  %v5747_v7 = vsel %vm5685_vm11, %v5680_v16, 0.0  ;;  %v6650_v16 = vld [vmem:[%s10085_s5 + $0x88] sm:$0xff]  ;;  %v10561_v25 = vld [vmem:[#allocation98_spill] sm:$0xff] }
 0x98c   : > { %v5730_v46 = vadd.f32 %v5729_v36, %v5728_v54  ;;  %v5681_v36 = vmul.f32 %v10555_v57, %v10554_v15  ;;  %v10557_v54 = vld [vmem:[#allocation54_spill] sm:$0xff] }
 0x98d   : > { %6583 = vpow2.f32 %v6278_v24  ;;  %v4979_v24 = vsub.f32 %v6650_v16, %v10561_v25 }
 0x98e   : > { %v5732_v39 = vadd.f32 %v5731_v8, %v5730_v46  ;;  %v5749_v46 = vsel %vm5685_vm11, %v5681_v36, 0.0 }
 0x990   : > { %v5734_v3 = vadd.f32 %v5733_v43, %v5732_v39  ;;  %v5683_v43 = vmul.f32 %v10558_v55, %v8689_v42 }
 0x992   : > { %5282 = vrot.lane.b32.xlu2 %v5140_v38, %s6662_s13  ;;  %v5736_v13 = vadd.f32 %v5735_v41, %v5734_v3  ;;  %v5682_v38 = vmul.f32 %v10557_v54, %v10556_v17  ;;  %v10559_v41 = vld [vmem:[#allocation34_spill] sm:$0xff]  ;;  %v5753_v30 = vsel %vm5685_vm11, %v5683_v43, 0.0 }
 0x993   : > { %v5684_v61 = vmul.f32 %v10559_v41, %v8741_v9  ;;  %v6584_v3 = vpop.eup %6583 }
 0x994   : > { %v5738_v26 = vadd.f32 %v5737_v19, %v5736_v13  ;;  %v5751_v39 = vsel %vm5685_vm11, %v5682_v38, 0.0  ;;  %v4426_v19 = vmul.f32 %v6582_v63, %v9969_v10  ;;  %v4154_v33 = vadd.f32 1.0, %v6584_v3 }
 0x995   : > { %v5755_v20 = vsel %vm5685_vm11, %v5684_v61, 0.0  ;;  %vm4430_vm11 = vweird.f32 %v9969_v10 }
 0x996   : > { %v5740_v45 = vadd.f32 %v5739_v0, %v5738_v26  ;;  %v4427_v9 = vsub.f32 1.0, %v4426_v19  ;;  %6585 = vrcp.f32 %v4154_v33  ;;  %vm4432_vm12 = vmor %vm4430_vm11, %vm4431_vm10  ;;  %vm4475_vm4 = vweird.f32 %v4154_v33 }
 0x998   : > { %v5742_v22 = vadd.f32 %v5741_v50, %v5740_v45  ;;  %v4428_v49 = vmul.f32 %v6582_v63, %v4427_v9  ;;  %v10560_v50 = vld [vmem:[#allocation152_spill] sm:$0xff] }
 0x999   : > { %v3753_v52 = vcvt.f32.s32 %v10560_v50  ;;  %v10564_v9 = vld [vmem:[#allocation120_spill] sm:$0xff] }
 0x99a   : > { %v5744_v35 = vadd.f32 %v5743_v2, %v5742_v22  ;;  %v4429_v21 = vadd.f32 %v6582_v63, %v4428_v49  ;;  %v4434_v2 = vand.u32 2147483647, %v9969_v10 }
 0x99b   : > { %v3754_v22 = vshll.u32 %v3753_v52, 16 }
 0x99c   : > { %v5746_v8 = vadd.f32 %v5745_v18, %v5744_v35  ;;  %v6586_v23 = vpop.eup %6585  ;;  %v4433_v18 = vsel %vm4432_vm12, %v6582_v63, %v4429_v21  ;;  %v10562_v35 = vld [vmem:[#allocation77_spill] sm:$0xff]  ;;  %vm4435_vm13 = vcmp.eq.f32.partialorder %v4434_v2, 8.507059e+37  ;;  %v10566_v2 = vld [vmem:[#allocation63_spill] sm:$0xff] }
 0x99d   : > { %v4471_v15 = vmul.f32 %v6586_v23, %v4154_v33  ;;  %vm4476_vm3 = vweird.f32 %v6586_v23 }
 0x99e   : > { %v5748_v62 = vadd.f32 %v5747_v7, %v5746_v8  ;;  %v5340_v7 = vsel %vm5322_vm14, %v4979_v24, %v10562_v35  ;;  %vm4477_vm5 = vmor %vm4475_vm4, %vm4476_vm3  ;;  %v10567_v24 = vld [vmem:[#allocation94_spill] sm:$0xff] }
 0x99f   : > { %v4472_v8 = vsub.f32 1.0, %v4471_v15 }
 0x9a0   : > { %v5750_v29 = vadd.f32 %v5749_v46, %v5748_v62 }
 0x9a1   : > { %v3916_v56 = vpop.xlane.xlu0 %3915  ;;  %v4473_v63 = vmul.f32 %v6586_v23, %v4472_v8 }
 0x9a2   : > { %v3917_v60 = vcvt.f32.s32 %v3916_v56  ;;  %v5752_v34 = vadd.f32 %v5751_v39, %v5750_v29  ;;  %v4481_v29 = vand.u32 2147483648, %v4154_v33 }
 0x9a3   : > { %v4474_v41 = vadd.f32 %v6586_v23, %v4473_v63 }
 0x9a4   : > { %v3920_v27 = vadd.s32 %v3919_v14, %v3917_v60  ;;  %v5754_v0 = vadd.f32 %v5753_v30, %v5752_v34 }
 0x9a5   : > { %v4478_v34 = vsel %vm4477_vm5, %v6586_v23, %v4474_v41 }
 0x9a6   : > { %v5170_v48 = vcvt.s32.f32 %v3920_v27  ;;  %v5756_v53 = vadd.f32 %v5755_v20, %v5754_v0  ;;  %v10563_v27 = vld [vmem:[#allocation78_spill] sm:$0xff] }
 0x9a7   : > { %v3798_v39 = vcvt.f32.s32 %v10563_v27 }
 0x9a8   : > { %v5424_v42 = vsel %vm5395_vm0, %v9795_v51, %v5170_v48  ;;  %v5757_v26 = vrot.slane %v5756_v53, 4  ;;  %v4436_v51 = vand.u32 2147483648, %v9969_v10  ;;  %v3997_v10 = vand.u32 65535, %v9801_v59 }
 0x9a9   : > { %v5461_v13 = vsel %vm5432_vm2, %v5424_v42, 0.0  ;;  %v4479_v48 = vand.u32 2147483647, %v4154_v33  ;;  %v3799_v30 = vshll.u32 %v3798_v39, 16 }
 0x9aa   : > { %5497 = vst.msk [vmem:[%s8668_s20 + $0xe0] sm:$0xff] %vm3303_vm9, %v5461_v13  ;;  %v5758_v45 = vadd.f32 %v5757_v26, %v5756_v53  ;;  %v4437_v36 = vor.u32 1.1754944e-38, %v4436_v51  ;;  %v3999_v43 = vcvt.s32.f32 %v3997_v10  ;;  %v6292_v13 = vmul.f32 -1.442695, %v10480_v12  ;;  %v10565_v26 = vld [vmem:[#allocation109_spill] sm:$0xff]  ;;  %v10568_v10 = vld [vmem:[#allocation116_spill] sm:$0xff] }
 0x9ab   : > { %vm4480_vm6 = vcmp.eq.f32.partialorder %v4479_v48, 8.507059e+37  ;;  %v3843_v53 = vcvt.f32.s32 %v10564_v9 }
 0x9ac   : > { %v5759_v57 = vrot.slane %v5758_v45, 2  ;;  %v4438_v54 = vsel %vm4435_vm13, %v4437_v36, %v4433_v18 }
 0x9ad   : > { %v5376_v56 = vsel %vm571_vm1, %v5340_v7, %v4438_v54  ;;  %v3844_v23 = vshll.u32 %v3843_v53, 16  ;;  %v3933_v7 = vcvt.f32.s32 %v9419_v28 }
 0x9ae   : > { %v5760_v14 = vadd.f32 %v5759_v57, %v5758_v45 }
 0x9af   : > { %v3934_v8 = vshll.u32 %v3933_v7, 16 }
 0x9b0   : > { %v5761_v62 = vrot.slane %v5760_v14, 1 }
 0x9b2   : > { %v5762_v61 = vadd.f32 %v5761_v62, %v5760_v14 }
 0x9b4   : > { %v5763_v42 = vmul.f32 0.00390625, %v5762_v61  ;;  %v3963_v61 = vcvt.f32.s32 %v9884_v32 }
 0x9b5   : > { %v3751_v6 = vpop.xlane.xlu2 %3750 }
 0x9b6   : > { %v3752_v5 = vcvt.f32.s32 %v3751_v6  ;;  %6587 = vtanh.f32 %v5763_v42  ;;  %v3888_v6 = vcvt.f32.s32 %v10566_v2 }
 0x9b7   : > { %6589 = vpow2.f32 %v6292_v13 }
 0x9b8   : > { %v3755_v17 = vadd.s32 %v3754_v22, %v3752_v5  ;;  %v3889_v57 = vshll.u32 %v3888_v6, 16 }
 0x9ba   : > { %v5159_v38 = vcvt.s32.f32 %v3755_v17 }
 0x9bc   : > { %v5413_v60 = vsel %vm5395_vm0, %v5376_v56, %v5159_v38  ;;  %v6588_v51 = vpop.eup %6587 }
 0x9bd   : > { %v5450_v46 = vsel %vm5432_vm2, %v5413_v60, 0.0  ;;  %v10014_v55 = vpop.xlane.xlu2 %4001  ;;  %v6590_v25 = vpop.eup %6589 }
 0x9be   : > { %5486 = vst.msk [vmem:[%s8668_s20 + $0x88] sm:$0xff] %vm3303_vm9, %v5450_v46  ;;  %vm4003_vm15 = vcmp.eq.f32.partialorder %v9806_v40, %v10014_v55  ;;  %v4482_v40 = vor.u32 1.1754944e-38, %v4481_v29  ;;  %v4168_v15 = vadd.f32 1.0, %v6590_v25 }
 0x9bf   : > { %v4004_v59 = vsel %vm4003_vm15, %v3999_v43, inf  ;;  %v3978_v43 = vcvt.f32.s32 %v9500_v4 }
 0x9c0   : > { %4005 = vmin.xlane.f32.xlu0 %v4004_v59  ;;  %v4483_v0 = vsel %vm4480_vm6, %v4482_v40, %v4478_v34  ;;  %6591 = vrcp.f32 %v4168_v15  ;;  %vm4685_vm8 = vweird.f32 %v4168_v15 }
 0x9c1   : > { %v5379_v50 = vsel %vm571_vm1, %v10565_v26, %v4483_v0  ;;  %v3979_v39 = vshll.u32 %v3978_v43, 16 }
 0x9c5   : > { %v3796_v3 = vpop.xlane.xlu2 %3795 }
 0x9c6   : > { %v3797_v19 = vcvt.f32.s32 %v3796_v3  ;;  %v6592_v60 = vpop.eup %6591  ;;  %v4023_v3 = vcvt.f32.s32 %v9653_v58 }
 0x9c7   : > { %v4681_v59 = vmul.f32 %v6592_v60, %v4168_v15  ;;  %vm4686_vm7 = vweird.f32 %v6592_v60 }
 0x9c8   : > { %v3800_v20 = vadd.s32 %v3799_v30, %v3797_v19  ;;  %v3964_v19 = vshll.u32 %v3963_v61, 16  ;;  %v4024_v0 = vshll.u32 %v4023_v3, 16  ;;  %vm4687_vm10 = vmor %vm4685_vm8, %vm4686_vm7 }
 0x9c9   : > { %v4682_v29 = vsub.f32 1.0, %v4681_v59 }
 0x9ca   : > { %v5162_v49 = vcvt.s32.f32 %v3800_v20 }
 0x9cb   : > { %v4683_v42 = vmul.f32 %v6592_v60, %v4682_v29 }
 0x9cc   : > { %v5416_v33 = vsel %vm5395_vm0, %v5379_v50, %v5162_v49  ;;  %v4691_v49 = vand.u32 2147483648, %v4168_v15 }
 0x9cd   : > { %v5453_v52 = vsel %vm5432_vm2, %v5416_v33, 0.0  ;;  %v3841_v21 = vpop.xlane.xlu2 %3840  ;;  %v4684_v53 = vadd.f32 %v6592_v60, %v4683_v42 }
 0x9ce   : > { %5489 = vst.msk [vmem:[%s8668_s20 + $0xa0] sm:$0xff] %vm3303_vm9, %v5453_v52  ;;  %v3842_v12 = vcvt.f32.s32 %v3841_v21  ;;  %v4996_v21 = vsub.f32 %v9949_v31, %v9542_v1 }
 0x9cf   : > { %v4688_v52 = vsel %vm4687_vm10, %v6592_v60, %v4684_v53 }
 0x9d0   : > { %v3845_v45 = vadd.s32 %v3844_v23, %v3842_v12  ;;  %v4692_v12 = vor.u32 1.1754944e-38, %v4691_v49 }
 0x9d2   : > { %v5165_v16 = vcvt.s32.f32 %v3845_v45 }
 0x9d4   : > { %v5419_v22 = vsel %vm5395_vm0, %v10567_v24, %v5165_v16  ;;  %5766 = vrot.lane.b32.xlu0 %v6588_v51, %s6663_s8  ;;  %v4008_v16 = vcvt.f32.s32 %v10014_v55 }
 0x9d5   : > { %v5456_v5 = vsel %vm5432_vm2, %v5419_v22, 0.0  ;;  %v3886_v18 = vpop.xlane.xlu2 %3885 }
 0x9d6   : > { %5492 = vst.msk [vmem:[%s8668_s20 + $0xb8] sm:$0xff] %vm3303_vm9, %v5456_v5  ;;  %v3887_v36 = vcvt.f32.s32 %v3886_v18  ;;  %v4009_v31 = vshll.u32 %v4008_v16, 16 }
 0x9d8   : > { %v3890_v35 = vadd.s32 %v3889_v57, %v3887_v36 }
 0x9da   : > { %v5168_v17 = vcvt.s32.f32 %v3890_v35 }
 0x9dc   : > { %v5422_v54 = vsel %vm5395_vm0, %v10568_v10, %v5168_v17 }
 0x9dd   : > { %v5459_v38 = vsel %vm5432_vm2, %v5422_v54, 0.0  ;;  %v3931_v56 = vpop.xlane.xlu2 %3930 }
 0x9de   : > { %5495 = vst.msk [vmem:[%s8668_s20 + $0xd0] sm:$0xff] %vm3303_vm9, %v5459_v38  ;;  %v3932_v14 = vcvt.f32.s32 %v3931_v56 }
 0x9e0   : > { %v3935_v46 = vadd.s32 %v3934_v8, %v3932_v14 }
 0x9e2   : > { %v5171_v63 = vcvt.s32.f32 %v3935_v46 }
 0x9e4   : > { %v5425_v28 = vsel %vm5395_vm0, %v9461_v37, %v5171_v63 }
 0x9e5   : > { %v5462_v62 = vsel %vm5432_vm2, %v5425_v28, 0.0  ;;  %v3976_v27 = vpop.xlane.xlu2 %3975 }
 0x9e6   : > { %5498 = vst.msk [vmem:[%s8668_s20 + $0xe8] sm:$0xff] %vm3303_vm9, %v5462_v62  ;;  %v3977_v41 = vcvt.f32.s32 %v3976_v27 }
 0x9e8   : > { %v3980_v48 = vadd.s32 %v3979_v39, %v3977_v41 }
 0x9ea   : > { %v5174_v4 = vcvt.s32.f32 %v3980_v48  ;;  %v3961_v30 = vpop.xlane.xlu0 %3960 }
 0x9eb   : > { %v3962_v34 = vcvt.f32.s32 %v3961_v30 }
 0x9ec   : > { %v5428_v37 = vsel %vm5395_vm0, %v9527_v44, %v5174_v4  ;;  %v4689_v44 = vand.u32 2147483647, %v4168_v15 }
 0x9ed   : > { %v5465_v40 = vsel %vm5432_vm2, %v5428_v37, 0.0  ;;  %v3965_v20 = vadd.s32 %v3964_v19, %v3962_v34  ;;  %v4021_v13 = vpop.xlane.xlu2 %4020 }
 0x9ee   : > { %5501 = vst.msk [vmem:[%s8668_s20 + $0x100] sm:$0xff] %vm3303_vm9, %v5465_v40  ;;  %v4022_v32 = vcvt.f32.s32 %v4021_v13  ;;  %vm4690_vm11 = vcmp.eq.f32.partialorder %v4689_v44, 8.507059e+37 }
 0x9ef   : > { %v5173_v9 = vcvt.s32.f32 %v3965_v20  ;;  %v4693_v51 = vsel %vm4690_vm11, %v4692_v12, %v4688_v52 }
 0x9f0   : > { %v4025_v58 = vadd.s32 %v4024_v0, %v4022_v32 }
 0x9f1   : > { %v5427_v26 = vsel %vm5395_vm0, %v9916_v47, %v5173_v9 }
 0x9f2   : > { %v5464_v50 = vsel %vm5432_vm2, %v5427_v26, 0.0  ;;  %v5177_v33 = vcvt.s32.f32 %v4025_v58 }
 0x9f3   : > { %5500 = vst.msk [vmem:[%s8668_s20 + $0xf8] sm:$0xff] %vm3303_vm9, %v5464_v50 }
 0x9f4   : > { %v5431_v23 = vsel %vm5395_vm0, %v9757_v11, %v5177_v33 }
 0x9f5   : > { %v5468_v45 = vsel %vm5432_vm2, %v5431_v23, 0.0  ;;  %v5283_v47 = vpop.permute.xlu2 %5282 }
 0x9f6   : > { %5504 = vst.msk [vmem:[%s8668_s20 + $0x118] sm:$0xff] %vm3303_vm9, %v5468_v45  ;;  %v5357_v2 = vsel %vm5322_vm14, %v4996_v21, %v5283_v47  ;;  %vm5769_vm14 = vcmask 0  }
 0x9f7   : > { %v5393_v6 = vsel %vm571_vm1, %v5357_v2, %v4693_v51 }
 0xa33   : > { %v4006_v1 = vpop.xlane.xlu0 %4005 }
 0xa34   : > { %v4007_v25 = vcvt.f32.s32 %v4006_v1 }
 0xa36   : > { %v4010_v11 = vadd.s32 %v4009_v31, %v4007_v25 }
 0xa38   : > { %v5176_v24 = vcvt.s32.f32 %v4010_v11 }
 0xa3a   : > { %v5430_v22 = vsel %vm5395_vm0, %v5393_v6, %v5176_v24 }
 0xa3b   : > { %v5467_v5 = vsel %vm5432_vm2, %v5430_v22, 0.0 }
 0xa3c   : > { %5503 = vst.msk [vmem:[%s8668_s20 + $0x110] sm:$0xff] %vm3303_vm9, %v5467_v5 }
 0xa46   : > { %v5767_v18 = vpop.permute.xlu0 %5766 }
 0xa47   : > { %5770 = vst.msk [vmem:[%s287_s12] sm:$0x1] %vm5769_vm14, %v5767_v18 }
 0xa48 PF: > { %s18_s24 = sadd.s32 1, %s6657_s24  }
 0xa49   : > { %p15_p4 = scmp.ge.s32.totalorder %s18_s24, 4  }
 0xa4b   :  { %17 = sbr.rel (!%p15_p4) target bundleno = 1 (0x1), region = 94 }

</bundles_post_ra>
